<compile_context>
chip_gen: v6e
topology: v6e:2x2x1
jax: 0.10.0
libtpu: 0.0.40
codegen_flags: <defaults>
</compile_context>

<pallas_src>
import math
import functools

import jax
import jax.numpy as jnp
from jax import lax
from jax.experimental import pallas as pl
from jax.experimental.pallas import tpu as pltpu


LANE = 128
SUBLANE = 8


def _round_up(x, m):
    return ((x + m - 1) // m) * m


def _pad2(a, rows, cols):
    return jnp.pad(a, ((0, rows - a.shape[0]), (0, cols - a.shape[1])))


# ----------------------------------------------------------------------------
# Pallas kernel: one DirectionalGNNLayerWithAngles layer (+ optional ReLU)
# ----------------------------------------------------------------------------
def _gnn_layer_kernel(x_ref, g_ref, d_ref, a_ref, wx_ref, wa_ref, lb_ref, b_ref,
                      o_ref, acc_ref, *scratch, use_angle, apply_tanh,
                      apply_relu, gather_first):
    k = pl.program_id(1)
    last_k = pl.num_programs(1) - 1
    hw_ref = None if gather_first else scratch[0]

    @pl.when(k == 0)
    def _init():
        acc_ref[...] = jnp.zeros_like(acc_ref)
        if not gather_first:
            # Linear-first reassociation: G @ (h @ Wx) == (G @ h) @ Wx (exact).
            hw_ref[...] = jnp.dot(x_ref[...], wx_ref[...],
                                  preferred_element_type=jnp.float32)

    # One-hot gather matrix stored in bf16 (0/1 exact); upcast for exact f32 math.
    g = g_ref[...].astype(jnp.float32)                                  # [tE, N]
    if gather_first:
        x_j = jnp.dot(g, x_ref[...], preferred_element_type=jnp.float32)
        msg = jnp.dot(x_j, wx_ref[...], preferred_element_type=jnp.float32)
    else:
        msg = jnp.dot(g, hw_ref[...], preferred_element_type=jnp.float32)

    if use_angle:
        # K=2 angle "matmul" on the VPU (broadcast mul-add); keeps the MXU free.
        msg = msg + (a_ref[:, 0:1] * wa_ref[0:1, :]
                     + a_ref[:, 1:2] * wa_ref[1:2, :]
                     + lb_ref[...])
    else:
        msg = msg + lb_ref[...]                             # lin bias, [1, C]
    if apply_tanh:                                          # skipped on final layer
        msg = jnp.tanh(msg)

    # Scatter-add to destination nodes: contract over the edge axis so the MXU
    # performs the transpose implicitly (no one_hot(dst).T materialized in HBM).
    acc_ref[...] += lax.dot_general(
        d_ref[...].astype(jnp.float32), msg,
        dimension_numbers=(((0,), (0,)), ((), ())),
        preferred_element_type=jnp.float32)

    @pl.when(k == last_k)
    def _finalize():
        out = acc_ref[...] + b_ref[...]                     # layer bias
        if apply_relu:                                      # inter-layer ReLU
            out = jnp.maximum(out, 0.0)
        o_ref[...] = out


def gnn_layer(h, gather_oh, dst_oh, angle_feats, w_x, w_a, lin_b, bias, *,
              tile_e, tile_n, use_angle, apply_tanh, apply_relu, gather_first):
    n_pad, cin_pad = h.shape
    e_pad = gather_oh.shape[0]
    cout_pad = w_x.shape[1]
    kn = n_pad // tile_n
    ke = e_pad // tile_e

    kernel = functools.partial(
        _gnn_layer_kernel, use_angle=use_angle, apply_tanh=apply_tanh,
        apply_relu=apply_relu, gather_first=gather_first)

    # Accumulator always; h @ Wx staging buffer only for the linear-first path.
    scratch_shapes = [pltpu.VMEM((tile_n, cout_pad), jnp.float32)]
    if not gather_first:
        scratch_shapes.append(pltpu.VMEM((n_pad, cout_pad), jnp.float32))

    # Explicit VMEM budget: double-buffered blocks + scratch + headroom,
    # capped at 32 MiB (safe default scoped limit on v5e/v6e/v7x).
    blk_bytes = (n_pad * cin_pad * 4            # h (full block, f32)
                 + tile_e * n_pad * 2           # gather tile (bf16)
                 + tile_e * tile_n * 2          # scatter tile (bf16)
                 + tile_e * LANE * 4            # angles (lane-padded tile)
                 + cin_pad * cout_pad * 4       # Wx
                 + 3 * SUBLANE * cout_pad * 4   # Wa, lin_b, bias (sublane-padded)
                 + tile_n * cout_pad * 4)       # output tile
    scratch_bytes = (tile_n + (0 if gather_first else n_pad)) * cout_pad * 4
    vmem_limit = int(min(2 * (2 * blk_bytes + scratch_bytes) + 8 * 1024 * 1024,
                         32 * 1024 * 1024))

    if gather_first:
        matmul_flops = 2 * kn * ke * tile_e * n_pad * cin_pad \
            + 2 * kn * ke * tile_e * cin_pad * cout_pad
    else:
        matmul_flops = 2 * kn * n_pad * cin_pad * cout_pad \
            + 2 * kn * ke * tile_e * n_pad * cout_pad
    flops = int(matmul_flops
                + 2 * kn * ke * tile_e * tile_n * cout_pad)   # scatter matmul
    transcendentals = int(kn * e_pad * cout_pad) if apply_tanh else 0
    bytes_accessed = int(h.size * 4 + kn * gather_oh.size * 2 + dst_oh.size * 2
                         + kn * angle_feats.size * 4 + w_x.size * 4
                         + n_pad * cout_pad * 4)

    return pl.pallas_call(
        kernel,
        out_shape=jax.ShapeDtypeStruct((n_pad, cout_pad), jnp.float32),
        grid_spec=pltpu.PrefetchScalarGridSpec(
            num_scalar_prefetch=0,
            grid=(kn, ke),                                    # edges (reduction) last
            in_specs=[
                pl.BlockSpec((n_pad, cin_pad), lambda i, k: (0, 0)),    # h (full)
                pl.BlockSpec((tile_e, n_pad), lambda i, k: (k, 0)),     # G tile
                pl.BlockSpec((tile_e, tile_n), lambda i, k: (k, i)),    # D tile
                pl.BlockSpec((tile_e, 2), lambda i, k: (k, 0)),         # angles
                pl.BlockSpec((cin_pad, cout_pad), lambda i, k: (0, 0)), # Wx
                pl.BlockSpec((2, cout_pad), lambda i, k: (0, 0)),       # Wa
                pl.BlockSpec((1, cout_pad), lambda i, k: (0, 0)),       # lin_b
                pl.BlockSpec((1, cout_pad), lambda i, k: (0, 0)),       # bias
            ],
            out_specs=pl.BlockSpec((tile_n, cout_pad), lambda i, k: (i, 0)),
            scratch_shapes=scratch_shapes,
        ),
        compiler_params=pltpu.CompilerParams(
            dimension_semantics=("parallel", "arbitrary"),
            vmem_limit_bytes=vmem_limit),
        cost_estimate=pl.CostEstimate(flops=flops, transcendentals=transcendentals,
                                      bytes_accessed=bytes_accessed),
    )(h, gather_oh, dst_oh, angle_feats, w_x, w_a, lin_b, bias)


# ----------------------------------------------------------------------------
# GridGNNWithAngles wrapper (padding / one-hot construction in plain JAX)
# ----------------------------------------------------------------------------
def init_params(key, in_channels, hidden_channels, out_channels, num_layers=2,
                use_angle=True):
    """Deterministic parameter init matching the module's shapes."""
    dims = [in_channels] + [hidden_channels] * (num_layers - 1) + [out_channels]
    params = []
    for li in range(num_layers):
        c_in, c_out = dims[li], dims[li + 1]
        in_feat = c_in + 2 if use_angle else c_in
        key, k1, k2 = jax.random.split(key, 3)
        bound = 1.0 / math.sqrt(in_feat)
        w = jax.random.uniform(k1, (in_feat, c_out), jnp.float32, -bound, bound)
        lin_b = jax.random.uniform(k2, (1, c_out), jnp.float32, -bound, bound)
        w_x = w[:c_in]
        # use_angle=False: keep a fixed-shape (2, c_out) placeholder; the kernel
        # statically skips the angle term so these values are never used.
        w_a = w[c_in:] if use_angle else jnp.zeros((2, c_out), jnp.float32)
        params.append(dict(w_x=w_x, w_a=w_a, lin_b=lin_b,
                           bias=jnp.zeros((1, c_out), jnp.float32)))
    return params


def grid_gnn_with_angles(params, x, edge_index, edge_attr, *, use_angle=True,
                         tile_e=512, tile_n=None, max_tile_n=1024):
    num_nodes, in_channels = x.shape
    num_edges = edge_index.shape[1]
    out_channels = params[-1]["w_x"].shape[1]

    # Adaptive node tile: one tile over the whole (lane-padded) node range when
    # it fits VMEM - avoids recomputing each edge tile's message per node tile.
    if tile_n is None:
        tile_n = min(max_tile_n, _round_up(num_nodes, LANE))
    # Edge tile: cap at the (sublane-padded) edge count for small graphs.
    tile_e = min(tile_e, _round_up(num_edges, SUBLANE))
    tile_e = _round_up(tile_e, SUBLANE)
    assert tile_n % LANE == 0 and tile_e % SUBLANE == 0

    n_pad = _round_up(num_nodes, tile_n)
    e_pad = _round_up(num_edges, tile_e)
    kn = n_pad // tile_n

    # Dense one-hot gather / dst matrices in bf16 (0/1 exact; halves HBM/VMEM).
    # Padded edges get index -1 -> all-zero rows -> contribute nothing.
    src = jnp.full((e_pad,), -1, jnp.int32).at[:num_edges].set(edge_index[0])
    dst = jnp.full((e_pad,), -1, jnp.int32).at[:num_edges].set(edge_index[1])
    gather_oh = jax.nn.one_hot(src, n_pad, dtype=jnp.bfloat16)   # [E, N]
    dst_oh = jax.nn.one_hot(dst, n_pad, dtype=jnp.bfloat16)      # [E, N] (no .T)

    if use_angle:
        angle_rad = edge_attr.astype(jnp.float32) * (math.pi / 180.0)
        a = jnp.stack([jnp.sin(angle_rad), jnp.cos(angle_rad)], axis=1)  # [E, 2]
        angle_feats = jnp.zeros((e_pad, 2), jnp.float32).at[:num_edges].set(a)
    else:
        angle_feats = jnp.zeros((e_pad, 2), jnp.float32)  # statically unused

    cin_pad0 = _round_up(in_channels, LANE)
    h = jnp.zeros((n_pad, cin_pad0), jnp.float32)
    h = h.at[:num_nodes, :in_channels].set(x.astype(jnp.float32))

    num_layers = len(params)
    for li, p in enumerate(params):
        c_in, c_out = p["w_x"].shape
        cin_p, cout_p = _round_up(c_in, LANE), _round_up(c_out, LANE)
        assert h.shape[1] == cin_p
        wx = _pad2(p["w_x"].astype(jnp.float32), cin_p, cout_p)
        wa = _pad2(p["w_a"].astype(jnp.float32), 2, cout_p)
        lb = _pad2(p["lin_b"].astype(jnp.float32), 1, cout_p)
        b = _pad2(p["bias"].astype(jnp.float32), 1, cout_p)
        final = li == num_layers - 1
        # Matmul association per layer: pick whichever order does fewer padded
        # flops (including the kn-fold recompute of h @ Wx for linear-first).
        cost_gather_first = kn * (e_pad * n_pad * cin_p + e_pad * cin_p * cout_p)
        cost_linear_first = kn * (n_pad * cin_p * cout_p + e_pad * n_pad * cout_p)
        h = gnn_layer(h, gather_oh, dst_oh, angle_feats, wx, wa, lb, b,
                      tile_e=tile_e, tile_n=tile_n, use_angle=use_angle,
                      apply_tanh=not final, apply_relu=not final,
                      gather_first=cost_gather_first < cost_linear_first)
    return h[:num_nodes, :out_channels]


# Pure-JAX reference (module order) for validation.
def grid_gnn_ref(params, x, edge_index, edge_attr):
    src, dst = edge_index[0], edge_index[1]
    num_nodes = x.shape[0]
    angle_rad = edge_attr * (math.pi / 180.0)
    a = jnp.stack([jnp.sin(angle_rad), jnp.cos(angle_rad)], axis=1)
    num_layers = len(params)
    h = x
    for li, p in enumerate(params):
        x_j = h[src]
        msg = x_j @ p["w_x"] + a @ p["w_a"] + p["lin_b"]
        if li != num_layers - 1:
            msg = jnp.tanh(msg)
        agg = jnp.zeros((num_nodes, msg.shape[1]), jnp.float32).at[dst].add(msg)
        h = agg + p["bias"]
        if li < num_layers - 1:
            h = jax.nn.relu(h)
    return h


# ----------------------------------------------------------------------------
# Grid graph with 8-directional edges (angles in degrees)
# ----------------------------------------------------------------------------
def build_grid_graph(rows, cols):
    dirs = [(-1, 0, 0.0), (-1, 1, 45.0), (0, 1, 90.0), (1, 1, 135.0),
            (1, 0, 180.0), (1, -1, 225.0), (0, -1, 270.0), (-1, -1, 315.0)]
    src, dst, ang = [], [], []
    for r in range(rows):
        for c in range(cols):
            node = r * cols + c
            for dr, dc, a in dirs:
                nr, nc = r + dr, c + dc
                if 0 <= nr < rows and 0 <= nc < cols:
                    src.append(nr * cols + nc)   # neighbor -> node
                    dst.append(node)
                    ang.append(a)
    edge_index = jnp.array([src, dst], dtype=jnp.int32)
    edge_attr = jnp.array(ang, dtype=jnp.float32)
    return edge_index, edge_attr


if __name__ == "__main__":
    key = jax.random.PRNGKey(0)
    in_channels, hidden_channels, out_channels = 4, 32, 8
    rows, cols = 16, 16                      # 256 nodes, 1860 directed edges
    num_nodes = rows * cols

    edge_index, edge_attr = build_grid_graph(rows, cols)
    k_x, k_p = jax.random.split(key)
    x = jax.random.normal(k_x, (num_nodes, in_channels), dtype=jnp.float32)
    params = init_params(k_p, in_channels, hidden_channels, out_channels,
                         num_layers=2, use_angle=True)

    fwd = jax.jit(functools.partial(grid_gnn_with_angles, use_angle=True))
    out = jax.block_until_ready(fwd(params, x, edge_index, edge_attr))

    ref = grid_gnn_ref(params, x, edge_index, edge_attr)
    assert out.shape == (num_nodes, out_channels)
    max_err = float(jnp.max(jnp.abs(out - ref)))
    assert jnp.allclose(out, ref, atol=1e-3, rtol=1e-3), \
        f"mismatch vs reference, max abs err = {max_err}"

    print("KERNEL_OK")
</pallas_src>

<mosaic_0001>
module attributes {stable_mosaic.version = 11 : i64} {
  func.func @_gnn_layer_kernel(%arg0: i32, %arg1: i32, %arg2: memref<256x128xf32, #tpu.memory_space<vmem>>, %arg3: memref<512x256xbf16, #tpu.memory_space<vmem>>, %arg4: memref<512x256xbf16, #tpu.memory_space<vmem>>, %arg5: memref<512x2xf32, #tpu.memory_space<vmem>>, %arg6: memref<128x128xf32, #tpu.memory_space<vmem>>, %arg7: memref<2x128xf32, #tpu.memory_space<vmem>>, %arg8: memref<1x128xf32, #tpu.memory_space<vmem>>, %arg9: memref<1x128xf32, #tpu.memory_space<vmem>>, %arg10: memref<256x128xf32, #tpu.memory_space<vmem>>, %arg11: memref<256x128xf32, #tpu.memory_space<vmem>>, %arg12: memref<256x128xf32, #tpu.memory_space<vmem>>) attributes {dimension_semantics = [#tpu.dimension_semantics<parallel>, #tpu.dimension_semantics<arbitrary>], iteration_bounds = array<i64: 1, 4>, scalar_prefetch = 0 : i64, scratch_operands = 2 : i64, tpu.core_type = #tpu.core_type<tc>, window_params = [{pipeline_mode = #tpu.pipeline_mode<synchronous>, transform_indices = @transform_0, window_bounds = array<i64: 256, 128>}, {transform_indices = @transform_1, window_bounds = array<i64: 512, 256>}, {transform_indices = @transform_2, window_bounds = array<i64: 512, 256>}, {transform_indices = @transform_3, window_bounds = array<i64: 512, 2>}, {pipeline_mode = #tpu.pipeline_mode<synchronous>, transform_indices = @transform_4, window_bounds = array<i64: 128, 128>}, {pipeline_mode = #tpu.pipeline_mode<synchronous>, transform_indices = @transform_5, window_bounds = array<i64: 2, 128>}, {pipeline_mode = #tpu.pipeline_mode<synchronous>, transform_indices = @transform_6, window_bounds = array<i64: 1, 128>}, {pipeline_mode = #tpu.pipeline_mode<synchronous>, transform_indices = @transform_7, window_bounds = array<i64: 1, 128>}, {transform_indices = @transform_8, window_bounds = array<i64: 256, 128>}]} {
    %c0_i32 = arith.constant 0 : i32
    %0 = arith.cmpi eq, %arg1, %c0_i32 : i32
    %1 = arith.extui %0 : i1 to i32
    %c0_i32_0 = arith.constant 0 : i32
    %2 = arith.cmpi ne, %1, %c0_i32_0 : i32
    scf.if %2 {
      %cst_21 = arith.constant 0.000000e+00 : f32
      %32 = vector.broadcast %cst_21 : f32 to vector<256x128xf32>
      %c0_22 = arith.constant 0 : index
      %c0_23 = arith.constant 0 : index
      %33 = vector.load %arg11[%c0_22, %c0_23] : memref<256x128xf32, #tpu.memory_space<vmem>>, vector<256x128xf32>
      tpu.vector_store %arg11[%c0_22, %c0_23], %32 {strides = array<i32>} : memref<256x128xf32, #tpu.memory_space<vmem>>, vector<256x128xf32>,
      %c0_24 = arith.constant 0 : index
      %c0_25 = arith.constant 0 : index
      %34 = vector.load %arg2[%c0_24, %c0_25] : memref<256x128xf32, #tpu.memory_space<vmem>>, vector<256x128xf32>
      %c0_26 = arith.constant 0 : index
      %c0_27 = arith.constant 0 : index
      %35 = vector.load %arg6[%c0_26, %c0_27] : memref<128x128xf32, #tpu.memory_space<vmem>>, vector<128x128xf32>
      %cst_28 = arith.constant dense<0.000000e+00> : vector<256x128xf32>
      %36 = tpu.matmul %34, %35, %cst_28 {dimension_numbers = #tpu.dot_dimension_numbers<[1], [0], [0], [1], [0, 0, 1, 1], [], []>} : vector<256x128xf32>, vector<128x128xf32>, vector<256x128xf32> -> vector<256x128xf32>
      %c0_29 = arith.constant 0 : index
      %c0_30 = arith.constant 0 : index
      %37 = vector.load %arg12[%c0_29, %c0_30] : memref<256x128xf32, #tpu.memory_space<vmem>>, vector<256x128xf32>
      tpu.vector_store %arg12[%c0_29, %c0_30], %36 {strides = array<i32>} : memref<256x128xf32, #tpu.memory_space<vmem>>, vector<256x128xf32>,
    } else {
    }
    %c0 = arith.constant 0 : index
    %c0_1 = arith.constant 0 : index
    %3 = vector.load %arg3[%c0, %c0_1] : memref<512x256xbf16, #tpu.memory_space<vmem>>, vector<512x256xbf16>
    %4 = arith.extf %3 : vector<512x256xbf16> to vector<512x256xf32>
    %c0_2 = arith.constant 0 : index
    %c0_3 = arith.constant 0 : index
    %5 = vector.load %arg12[%c0_2, %c0_3] : memref<256x128xf32, #tpu.memory_space<vmem>>, vector<256x128xf32>
    %cst = arith.constant dense<0.000000e+00> : vector<512x128xf32>
    %6 = tpu.matmul %4, %5, %cst {dimension_numbers = #tpu.dot_dimension_numbers<[1], [0], [0], [1], [0, 0, 1, 1], [], []>} : vector<512x256xf32>, vector<256x128xf32>, vector<512x128xf32> -> vector<512x128xf32>
    %c0_4 = arith.constant 0 : index
    %c0_5 = arith.constant 0 : index
    %7 = vector.load %arg5[%c0_4, %c0_5] : memref<512x2xf32, #tpu.memory_space<vmem>>, vector<512x1xf32>
    %c0_6 = arith.constant 0 : index
    %c0_7 = arith.constant 0 : index
    %8 = vector.load %arg7[%c0_6, %c0_7] : memref<2x128xf32, #tpu.memory_space<vmem>>, vector<1x128xf32>
    %9 = vector.broadcast %7 : vector<512x1xf32> to vector<512x128xf32>
    %10 = vector.broadcast %8 : vector<1x128xf32> to vector<512x128xf32>
    %11 = arith.mulf %9, %10 : vector<512x128xf32>
    %c0_8 = arith.constant 0 : index
    %c1 = arith.constant 1 : index
    %12 = vector.load %arg5[%c0_8, %c1] : memref<512x2xf32, #tpu.memory_space<vmem>>, vector<512x1xf32>
    %c1_9 = arith.constant 1 : index
    %c0_10 = arith.constant 0 : index
    %13 = vector.load %arg7[%c1_9, %c0_10] : memref<2x128xf32, #tpu.memory_space<vmem>>, vector<1x128xf32>
    %14 = vector.broadcast %12 : vector<512x1xf32> to vector<512x128xf32>
    %15 = vector.broadcast %13 : vector<1x128xf32> to vector<512x128xf32>
    %16 = arith.mulf %14, %15 : vector<512x128xf32>
    %17 = arith.addf %11, %16 : vector<512x128xf32>
    %c0_11 = arith.constant 0 : index
    %c0_12 = arith.constant 0 : index
    %18 = vector.load %arg8[%c0_11, %c0_12] : memref<1x128xf32, #tpu.memory_space<vmem>>, vector<1x128xf32>
    %19 = vector.broadcast %18 : vector<1x128xf32> to vector<512x128xf32>
    %20 = arith.addf %17, %19 : vector<512x128xf32>
    %21 = arith.addf %6, %20 : vector<512x128xf32>
    %22 = math.tanh %21 : vector<512x128xf32>
    %c0_13 = arith.constant 0 : index
    %c0_14 = arith.constant 0 : index
    %23 = vector.load %arg11[%c0_13, %c0_14] : memref<256x128xf32, #tpu.memory_space<vmem>>, vector<256x128xf32>
    %c0_15 = arith.constant 0 : index
    %c0_16 = arith.constant 0 : index
    %24 = vector.load %arg4[%c0_15, %c0_16] : memref<512x256xbf16, #tpu.memory_space<vmem>>, vector<512x256xbf16>
    %25 = arith.extf %24 : vector<512x256xbf16> to vector<512x256xf32>
    %cst_17 = arith.constant dense<0.000000e+00> : vector<256x128xf32>
    %26 = tpu.matmul %25, %22, %cst_17 {dimension_numbers = #tpu.dot_dimension_numbers<[0], [0], [1], [1], [0, 1, 1, 1], [], []>} : vector<512x256xf32>, vector<512x128xf32>, vector<256x128xf32> -> vector<256x128xf32>
    %27 = arith.addf %23, %26 : vector<256x128xf32>
    %c0_18 = arith.constant 0 : index
    %c0_19 = arith.constant 0 : index
    %28 = vector.load %arg11[%c0_18, %c0_19] : memref<256x128xf32, #tpu.memory_space<vmem>>, vector<256x128xf32>
    tpu.vector_store %arg11[%c0_18, %c0_19], %27 {strides = array<i32>} : memref<256x128xf32, #tpu.memory_space<vmem>>, vector<256x128xf32>,
    %c3_i32 = arith.constant 3 : i32
    %29 = arith.cmpi eq, %arg1, %c3_i32 : i32
    %30 = arith.extui %29 : i1 to i32
    %c0_i32_20 = arith.constant 0 : i32
    %31 = arith.cmpi ne, %30, %c0_i32_20 : i32
    scf.if %31 {
      %c0_21 = arith.constant 0 : index
      %c0_22 = arith.constant 0 : index
      %32 = vector.load %arg11[%c0_21, %c0_22] : memref<256x128xf32, #tpu.memory_space<vmem>>, vector<256x128xf32>
      %c0_23 = arith.constant 0 : index
      %c0_24 = arith.constant 0 : index
      %33 = vector.load %arg9[%c0_23, %c0_24] : memref<1x128xf32, #tpu.memory_space<vmem>>, vector<1x128xf32>
      %34 = vector.broadcast %33 : vector<1x128xf32> to vector<256x128xf32>
      %35 = arith.addf %32, %34 : vector<256x128xf32>
      %cst_25 = arith.constant 0.000000e+00 : f32
      %36 = vector.broadcast %cst_25 : f32 to vector<256x128xf32>
      %37 = arith.maximumf %35, %36 : vector<256x128xf32>
      %c0_26 = arith.constant 0 : index
      %c0_27 = arith.constant 0 : index
      %38 = vector.load %arg10[%c0_26, %c0_27] : memref<256x128xf32, #tpu.memory_space<vmem>>, vector<256x128xf32>
      tpu.vector_store %arg10[%c0_26, %c0_27], %37 {strides = array<i32>} : memref<256x128xf32, #tpu.memory_space<vmem>>, vector<256x128xf32>,
    } else {
    }
    return
  }
  func.func @transform_0(%arg0: i32, %arg1: i32) -> (i32, i32) {
    %c0_i32 = arith.constant 0 : i32
    %c0_i32_0 = arith.constant 0 : i32
    %c0_i32_1 = arith.constant 0 : i32
    return %c0_i32, %c0_i32_0 : i32, i32
  }
  func.func @transform_1(%arg0: i32, %arg1: i32) -> (i32, i32) {
    %c0_i32 = arith.constant 0 : i32
    %c0_i32_0 = arith.constant 0 : i32
    return %arg1, %c0_i32 : i32, i32
  }
  func.func @transform_2(%arg0: i32, %arg1: i32) -> (i32, i32) {
    %c0_i32 = arith.constant 0 : i32
    return %arg1, %arg0 : i32, i32
  }
  func.func @transform_3(%arg0: i32, %arg1: i32) -> (i32, i32) {
    %c0_i32 = arith.constant 0 : i32
    %c0_i32_0 = arith.constant 0 : i32
    return %arg1, %c0_i32 : i32, i32
  }
  func.func @transform_4(%arg0: i32, %arg1: i32) -> (i32, i32) {
    %c0_i32 = arith.constant 0 : i32
    %c0_i32_0 = arith.constant 0 : i32
    %c0_i32_1 = arith.constant 0 : i32
    return %c0_i32, %c0_i32_0 : i32, i32
  }
  func.func @transform_5(%arg0: i32, %arg1: i32) -> (i32, i32) {
    %c0_i32 = arith.constant 0 : i32
    %c0_i32_0 = arith.constant 0 : i32
    %c0_i32_1 = arith.constant 0 : i32
    return %c0_i32, %c0_i32_0 : i32, i32
  }
  func.func @transform_6(%arg0: i32, %arg1: i32) -> (i32, i32) {
    %c0_i32 = arith.constant 0 : i32
    %c0_i32_0 = arith.constant 0 : i32
    %c0_i32_1 = arith.constant 0 : i32
    return %c0_i32, %c0_i32_0 : i32, i32
  }
  func.func @transform_7(%arg0: i32, %arg1: i32) -> (i32, i32) {
    %c0_i32 = arith.constant 0 : i32
    %c0_i32_0 = arith.constant 0 : i32
    %c0_i32_1 = arith.constant 0 : i32
    return %c0_i32, %c0_i32_0 : i32, i32
  }
  func.func @transform_8(%arg0: i32, %arg1: i32) -> (i32, i32) {
    %c0_i32 = arith.constant 0 : i32
    %c0_i32_0 = arith.constant 0 : i32
    return %arg0, %c0_i32 : i32, i32
  }
}

module attributes {stable_mosaic.version = 11 : i64} {
  func.func @_gnn_layer_kernel(%arg0: i32, %arg1: i32, %arg2: memref<256x128xf32, #tpu.memory_space<vmem>>, %arg3: memref<512x256xbf16, #tpu.memory_space<vmem>>, %arg4: memref<512x256xbf16, #tpu.memory_space<vmem>>, %arg5: memref<512x2xf32, #tpu.memory_space<vmem>>, %arg6: memref<128x128xf32, #tpu.memory_space<vmem>>, %arg7: memref<2x128xf32, #tpu.memory_space<vmem>>, %arg8: memref<1x128xf32, #tpu.memory_space<vmem>>, %arg9: memref<1x128xf32, #tpu.memory_space<vmem>>, %arg10: memref<256x128xf32, #tpu.memory_space<vmem>>, %arg11: memref<256x128xf32, #tpu.memory_space<vmem>>, %arg12: memref<256x128xf32, #tpu.memory_space<vmem>>) attributes {dimension_semantics = [#tpu.dimension_semantics<parallel>, #tpu.dimension_semantics<arbitrary>], iteration_bounds = array<i64: 1, 4>, scalar_prefetch = 0 : i64, scratch_operands = 2 : i64, tpu.core_type = #tpu.core_type<tc>, window_params = [{pipeline_mode = #tpu.pipeline_mode<synchronous>, transform_indices = @transform_0, window_bounds = array<i64: 256, 128>}, {transform_indices = @transform_1, window_bounds = array<i64: 512, 256>}, {transform_indices = @transform_2, window_bounds = array<i64: 512, 256>}, {transform_indices = @transform_3, window_bounds = array<i64: 512, 2>}, {pipeline_mode = #tpu.pipeline_mode<synchronous>, transform_indices = @transform_4, window_bounds = array<i64: 128, 128>}, {pipeline_mode = #tpu.pipeline_mode<synchronous>, transform_indices = @transform_5, window_bounds = array<i64: 2, 128>}, {pipeline_mode = #tpu.pipeline_mode<synchronous>, transform_indices = @transform_6, window_bounds = array<i64: 1, 128>}, {pipeline_mode = #tpu.pipeline_mode<synchronous>, transform_indices = @transform_7, window_bounds = array<i64: 1, 128>}, {transform_indices = @transform_8, window_bounds = array<i64: 256, 128>}]} {
    %c0_i32 = arith.constant 0 : i32
    %0 = arith.cmpi eq, %arg1, %c0_i32 : i32
    %1 = arith.extui %0 : i1 to i32
    %c0_i32_0 = arith.constant 0 : i32
    %2 = arith.cmpi ne, %1, %c0_i32_0 : i32
    scf.if %2 {
      %cst_21 = arith.constant 0.000000e+00 : f32
      %31 = vector.broadcast %cst_21 : f32 to vector<256x128xf32>
      %c0_22 = arith.constant 0 : index
      %c0_23 = arith.constant 0 : index
      %32 = vector.load %arg11[%c0_22, %c0_23] : memref<256x128xf32, #tpu.memory_space<vmem>>, vector<256x128xf32>
      tpu.vector_store %arg11[%c0_22, %c0_23], %31 {strides = array<i32>} : memref<256x128xf32, #tpu.memory_space<vmem>>, vector<256x128xf32>,
      %c0_24 = arith.constant 0 : index
      %c0_25 = arith.constant 0 : index
      %33 = vector.load %arg2[%c0_24, %c0_25] : memref<256x128xf32, #tpu.memory_space<vmem>>, vector<256x128xf32>
      %c0_26 = arith.constant 0 : index
      %c0_27 = arith.constant 0 : index
      %34 = vector.load %arg6[%c0_26, %c0_27] : memref<128x128xf32, #tpu.memory_space<vmem>>, vector<128x128xf32>
      %cst_28 = arith.constant dense<0.000000e+00> : vector<256x128xf32>
      %35 = tpu.matmul %33, %34, %cst_28 {dimension_numbers = #tpu.dot_dimension_numbers<[1], [0], [0], [1], [0, 0, 1, 1], [], []>} : vector<256x128xf32>, vector<128x128xf32>, vector<256x128xf32> -> vector<256x128xf32>
      %c0_29 = arith.constant 0 : index
      %c0_30 = arith.constant 0 : index
      %36 = vector.load %arg12[%c0_29, %c0_30] : memref<256x128xf32, #tpu.memory_space<vmem>>, vector<256x128xf32>
      tpu.vector_store %arg12[%c0_29, %c0_30], %35 {strides = array<i32>} : memref<256x128xf32, #tpu.memory_space<vmem>>, vector<256x128xf32>,
    } else {
    }
    %c0 = arith.constant 0 : index
    %c0_1 = arith.constant 0 : index
    %3 = vector.load %arg3[%c0, %c0_1] : memref<512x256xbf16, #tpu.memory_space<vmem>>, vector<512x256xbf16>
    %4 = arith.extf %3 : vector<512x256xbf16> to vector<512x256xf32>
    %c0_2 = arith.constant 0 : index
    %c0_3 = arith.constant 0 : index
    %5 = vector.load %arg12[%c0_2, %c0_3] : memref<256x128xf32, #tpu.memory_space<vmem>>, vector<256x128xf32>
    %cst = arith.constant dense<0.000000e+00> : vector<512x128xf32>
    %6 = tpu.matmul %4, %5, %cst {dimension_numbers = #tpu.dot_dimension_numbers<[1], [0], [0], [1], [0, 0, 1, 1], [], []>} : vector<512x256xf32>, vector<256x128xf32>, vector<512x128xf32> -> vector<512x128xf32>
    %c0_4 = arith.constant 0 : index
    %c0_5 = arith.constant 0 : index
    %7 = vector.load %arg5[%c0_4, %c0_5] : memref<512x2xf32, #tpu.memory_space<vmem>>, vector<512x1xf32>
    %c0_6 = arith.constant 0 : index
    %c0_7 = arith.constant 0 : index
    %8 = vector.load %arg7[%c0_6, %c0_7] : memref<2x128xf32, #tpu.memory_space<vmem>>, vector<1x128xf32>
    %9 = vector.broadcast %7 : vector<512x1xf32> to vector<512x128xf32>
    %10 = vector.broadcast %8 : vector<1x128xf32> to vector<512x128xf32>
    %11 = arith.mulf %9, %10 : vector<512x128xf32>
    %c0_8 = arith.constant 0 : index
    %c1 = arith.constant 1 : index
    %12 = vector.load %arg5[%c0_8, %c1] : memref<512x2xf32, #tpu.memory_space<vmem>>, vector<512x1xf32>
    %c1_9 = arith.constant 1 : index
    %c0_10 = arith.constant 0 : index
    %13 = vector.load %arg7[%c1_9, %c0_10] : memref<2x128xf32, #tpu.memory_space<vmem>>, vector<1x128xf32>
    %14 = vector.broadcast %12 : vector<512x1xf32> to vector<512x128xf32>
    %15 = vector.broadcast %13 : vector<1x128xf32> to vector<512x128xf32>
    %16 = arith.mulf %14, %15 : vector<512x128xf32>
    %17 = arith.addf %11, %16 : vector<512x128xf32>
    %c0_11 = arith.constant 0 : index
    %c0_12 = arith.constant 0 : index
    %18 = vector.load %arg8[%c0_11, %c0_12] : memref<1x128xf32, #tpu.memory_space<vmem>>, vector<1x128xf32>
    %19 = vector.broadcast %18 : vector<1x128xf32> to vector<512x128xf32>
    %20 = arith.addf %17, %19 : vector<512x128xf32>
    %21 = arith.addf %6, %20 : vector<512x128xf32>
    %c0_13 = arith.constant 0 : index
    %c0_14 = arith.constant 0 : index
    %22 = vector.load %arg11[%c0_13, %c0_14] : memref<256x128xf32, #tpu.memory_space<vmem>>, vector<256x128xf32>
    %c0_15 = arith.constant 0 : index
    %c0_16 = arith.constant 0 : index
    %23 = vector.load %arg4[%c0_15, %c0_16] : memref<512x256xbf16, #tpu.memory_space<vmem>>, vector<512x256xbf16>
    %24 = arith.extf %23 : vector<512x256xbf16> to vector<512x256xf32>
    %cst_17 = arith.constant dense<0.000000e+00> : vector<256x128xf32>
    %25 = tpu.matmul %24, %21, %cst_17 {dimension_numbers = #tpu.dot_dimension_numbers<[0], [0], [1], [1], [0, 1, 1, 1], [], []>} : vector<512x256xf32>, vector<512x128xf32>, vector<256x128xf32> -> vector<256x128xf32>
    %26 = arith.addf %22, %25 : vector<256x128xf32>
    %c0_18 = arith.constant 0 : index
    %c0_19 = arith.constant 0 : index
    %27 = vector.load %arg11[%c0_18, %c0_19] : memref<256x128xf32, #tpu.memory_space<vmem>>, vector<256x128xf32>
    tpu.vector_store %arg11[%c0_18, %c0_19], %26 {strides = array<i32>} : memref<256x128xf32, #tpu.memory_space<vmem>>, vector<256x128xf32>,
    %c3_i32 = arith.constant 3 : i32
    %28 = arith.cmpi eq, %arg1, %c3_i32 : i32
    %29 = arith.extui %28 : i1 to i32
    %c0_i32_20 = arith.constant 0 : i32
    %30 = arith.cmpi ne, %29, %c0_i32_20 : i32
    scf.if %30 {
      %c0_21 = arith.constant 0 : index
      %c0_22 = arith.constant 0 : index
      %31 = vector.load %arg11[%c0_21, %c0_22] : memref<256x128xf32, #tpu.memory_space<vmem>>, vector<256x128xf32>
      %c0_23 = arith.constant 0 : index
      %c0_24 = arith.constant 0 : index
      %32 = vector.load %arg9[%c0_23, %c0_24] : memref<1x128xf32, #tpu.memory_space<vmem>>, vector<1x128xf32>
      %33 = vector.broadcast %32 : vector<1x128xf32> to vector<256x128xf32>
      %34 = arith.addf %31, %33 : vector<256x128xf32>
      %c0_25 = arith.constant 0 : index
      %c0_26 = arith.constant 0 : index
      %35 = vector.load %arg10[%c0_25, %c0_26] : memref<256x128xf32, #tpu.memory_space<vmem>>, vector<256x128xf32>
      tpu.vector_store %arg10[%c0_25, %c0_26], %34 {strides = array<i32>} : memref<256x128xf32, #tpu.memory_space<vmem>>, vector<256x128xf32>,
    } else {
    }
    return
  }
  func.func @transform_0(%arg0: i32, %arg1: i32) -> (i32, i32) {
    %c0_i32 = arith.constant 0 : i32
    %c0_i32_0 = arith.constant 0 : i32
    %c0_i32_1 = arith.constant 0 : i32
    return %c0_i32, %c0_i32_0 : i32, i32
  }
  func.func @transform_1(%arg0: i32, %arg1: i32) -> (i32, i32) {
    %c0_i32 = arith.constant 0 : i32
    %c0_i32_0 = arith.constant 0 : i32
    return %arg1, %c0_i32 : i32, i32
  }
  func.func @transform_2(%arg0: i32, %arg1: i32) -> (i32, i32) {
    %c0_i32 = arith.constant 0 : i32
    return %arg1, %arg0 : i32, i32
  }
  func.func @transform_3(%arg0: i32, %arg1: i32) -> (i32, i32) {
    %c0_i32 = arith.constant 0 : i32
    %c0_i32_0 = arith.constant 0 : i32
    return %arg1, %c0_i32 : i32, i32
  }
  func.func @transform_4(%arg0: i32, %arg1: i32) -> (i32, i32) {
    %c0_i32 = arith.constant 0 : i32
    %c0_i32_0 = arith.constant 0 : i32
    %c0_i32_1 = arith.constant 0 : i32
    return %c0_i32, %c0_i32_0 : i32, i32
  }
  func.func @transform_5(%arg0: i32, %arg1: i32) -> (i32, i32) {
    %c0_i32 = arith.constant 0 : i32
    %c0_i32_0 = arith.constant 0 : i32
    %c0_i32_1 = arith.constant 0 : i32
    return %c0_i32, %c0_i32_0 : i32, i32
  }
  func.func @transform_6(%arg0: i32, %arg1: i32) -> (i32, i32) {
    %c0_i32 = arith.constant 0 : i32
    %c0_i32_0 = arith.constant 0 : i32
    %c0_i32_1 = arith.constant 0 : i32
    return %c0_i32, %c0_i32_0 : i32, i32
  }
  func.func @transform_7(%arg0: i32, %arg1: i32) -> (i32, i32) {
    %c0_i32 = arith.constant 0 : i32
    %c0_i32_0 = arith.constant 0 : i32
    %c0_i32_1 = arith.constant 0 : i32
    return %c0_i32, %c0_i32_0 : i32, i32
  }
  func.func @transform_8(%arg0: i32, %arg1: i32) -> (i32, i32) {
    %c0_i32 = arith.constant 0 : i32
    %c0_i32_0 = arith.constant 0 : i32
    return %arg0, %c0_i32 : i32, i32
  }
}

</mosaic_0001>

<bundles_post_ra>
// kernel: grid_gnn_with_angles.3
= control target key start
LH: loop header
LB: loop body
LE: loop exit
PB: predicated region body
PF: predicated region fallthrough
CT: control target
= control target key end

     0   :  { %s4205_s27 = smov 0   ;;  %s4207_s28 = smov 0   ;;  %s6239_s0 = inlined_call_operand.vmem [shape: f32[256,128], index: 0, kind: input, shape index: {}]   ;;  %s6240_s1 = inlined_call_operand.vmem [shape: bf16[2048,256], index: 1, kind: input, shape index: {}]   ;;  %s6241_s2 = inlined_call_operand.vmem [shape: bf16[2048,256], index: 2, kind: input, shape index: {}]   ;;  %s6242_s3 = inlined_call_operand.vmem [shape: f32[2048,2], index: 3, kind: input, shape index: {}]   ;;  %s6243_s4 = inlined_call_operand.vmem [shape: f32[128,128], index: 4, kind: input, shape index: {}]   ;;  %s6244_s5 = inlined_call_operand.vmem [shape: f32[2,128], index: 5, kind: input, shape index: {}]   ;;  %s6245_s6 = inlined_call_operand.vmem [shape: f32[1,128], index: 6, kind: input, shape index: {}]   ;;  %s6246_s7 = inlined_call_operand.vmem [shape: f32[1,128], index: 7, kind: input, shape index: {}]   ;;  %s6247_s8 = inlined_call_operand.vmem [shape: f32[256,128], index: 8, kind: output, shape index: {}]  }
   0x1   :  { %s4209_s29 = smov 0  }
   0x2 LB: > { %s27_s30 = sadd.s32 1, %s4150_s28  ;;  %p3446_p0 = scmp.ge.s32.totalorder %s4154_s29, 1  ;;  %s4154_s29 = sphi %s4209_s29, %s18_s29   ;;  %s4150_s28 = sphi %s4207_s28, %s6488_s28   ;;  %s4146_s27 = sphi %s4205_s27, %s6487_s27  }
   0x3   : > { %p28_p1 = scmp.ge.s32.totalorder %s27_s30, 4  ;;  %p306_p2 = scmp.lt.s32.totalorder %s4154_s29, 5 }
   0x5   : > { %s6490_s30 = smov (%p28_p1, %s27_s30), 0  ;;  %p307_p3 = pnand %p3446_p0, %p306_p2 }
   0x7   : > { %310 = sbr.rel (%p307_p3) target bundleno = 1164 (0x48c), region = 52 }
   0xc   : > { %s3447_s9 = sshll.u32 %s4146_s27, 6  ;;  %p3455_p5 = scmp.ne.s32.totalorder %s4146_s27, 0 }
   0xd   : > { %p357_p4 = scmp.lt.s32.totalorder %s3447_s9, 255 }
   0xe   : > { %390 = sbr.rel (%p3455_p5) target bundleno = 277 (0x115), region = 56 }
   0xf   : > { %s6492_s9 = smov (!%p357_p4, %s3447_s9), 255 }
  0x10   : > { %s3465_s10 = sshll.u32 %s6492_s9, 3 }
  0x11   : > { %s4229_s13 = scalar_lea.vmem %s6240_s1, %s3465_s10  ;;  %s4234_s16 = scalar_lea.vmem %s6241_s2, %s3465_s10 }
  0x12   : > { %s4239_s19 = scalar_lea.vmem %s6242_s3, %s3465_s10 }
  0x13   : > { %v470_v0 = vld [vmem:[%s6243_s4 + $0x78] sm:$0xff]  ;;  %v469_v1 = vld [vmem:[%s6243_s4 + $0x70] sm:$0xff]  ;;  %v4156_v2 = vmov 0.0   ;;  %v468_v3 = vld [vmem:[%s6243_s4 + $0x68] sm:$0xff] }
  0x14   : > { %391 = vst [vmem:[#allocation2 + $0xb0] sm:$0xff] %v4156_v2  ;;  %392 = vst [vmem:[#allocation2] sm:$0xff] %v4156_v2  ;;  %3515 = vmatprep.subr.mxu0 %v470_v0  ;;  %3595 = vmatprep.subr.mxu1 %v470_v0  ;;  %v467_v4 = vld [vmem:[%s6243_s4 + $0x60] sm:$0xff]  ;;  %v466_v5 = vld [vmem:[%s6243_s4 + $0x58] sm:$0xff] }
  0x15   : > { %393 = vst [vmem:[#allocation2 + $0xd8] sm:$0xff] %v4156_v2  ;;  %394 = vst [vmem:[#allocation2 + $0x18] sm:$0xff] %v4156_v2  ;;  %3516 = vmatpush3.msra.mxu0 %v470_v0  ;;  %3611 = vmatpush3.msra.mxu1 %v470_v0  ;;  %v465_v6 = vld [vmem:[%s6243_s4 + $0x50] sm:$0xff]  ;;  %v464_v7 = vld [vmem:[%s6243_s4 + $0x48] sm:$0xff] }
  0x16   : > { %395 = vst [vmem:[#allocation2 + $0x50] sm:$0xff] %v4156_v2  ;;  %396 = vst [vmem:[#allocation2 + $0x68] sm:$0xff] %v4156_v2  ;;  %3517 = vmatprep.subr.mxu0 %v469_v1  ;;  %3596 = vmatprep.subr.mxu1 %v469_v1  ;;  %v463_v8 = vld [vmem:[%s6243_s4 + $0x40] sm:$0xff]  ;;  %v462_v9 = vld [vmem:[%s6243_s4 + $0x38] sm:$0xff] }
  0x17   : > { %397 = vst [vmem:[#allocation2 + $0x30] sm:$0xff] %v4156_v2  ;;  %398 = vst [vmem:[#allocation2 + $0x48] sm:$0xff] %v4156_v2  ;;  %3518 = vmatpush3.msra.mxu0 %v469_v1  ;;  %3612 = vmatpush3.msra.mxu1 %v469_v1  ;;  %v461_v10 = vld [vmem:[%s6243_s4 + $0x30] sm:$0xff]  ;;  %v460_v11 = vld [vmem:[%s6243_s4 + $0x28] sm:$0xff] }
  0x18   : > { %399 = vst [vmem:[#allocation2 + $0x80] sm:$0xff] %v4156_v2  ;;  %400 = vst [vmem:[#allocation2 + $0x88] sm:$0xff] %v4156_v2  ;;  %3519 = vmatprep.subr.mxu0 %v468_v3  ;;  %3597 = vmatprep.subr.mxu1 %v468_v3  ;;  %v459_v12 = vld [vmem:[%s6243_s4 + $0x20] sm:$0xff]  ;;  %v458_v13 = vld [vmem:[%s6243_s4 + $0x18] sm:$0xff] }
  0x19   : > { %401 = vst [vmem:[#allocation2 + $0xe8] sm:$0xff] %v4156_v2  ;;  %402 = vst [vmem:[#allocation2 + $0xb8] sm:$0xff] %v4156_v2  ;;  %3520 = vmatpush3.msra.mxu0 %v468_v3  ;;  %3613 = vmatpush3.msra.mxu1 %v468_v3  ;;  %v457_v14 = vld [vmem:[%s6243_s4 + $0x10] sm:$0xff]  ;;  %v456_v15 = vld [vmem:[%s6243_s4 + $0x8] sm:$0xff] }
  0x1a   : > { %403 = vst [vmem:[#allocation2 + $0x60] sm:$0xff] %v4156_v2  ;;  %404 = vst [vmem:[#allocation2 + $0xf0] sm:$0xff] %v4156_v2  ;;  %3521 = vmatprep.subr.mxu0 %v467_v4  ;;  %3598 = vmatprep.subr.mxu1 %v467_v4  ;;  %v455_v16 = vld [vmem:[%s6243_s4] sm:$0xff]  ;;  %v424_v19 = vld [vmem:[%s6239_s0 + $0x8] sm:$0xff] }
  0x1b   : > { %405 = vst [vmem:[#allocation2 + $0x8] sm:$0xff] %v4156_v2  ;;  %406 = vst [vmem:[#allocation2 + $0x78] sm:$0xff] %v4156_v2  ;;  %3522 = vmatpush3.msra.mxu0 %v467_v4  ;;  %3614 = vmatpush3.msra.mxu1 %v467_v4  ;;  %v423_v17 = vld [vmem:[%s6239_s0] sm:$0xff]  ;;  %v440_v20 = vld [vmem:[%s6239_s0 + $0x88] sm:$0xff] }
  0x1c   : > { %407 = vst [vmem:[#allocation2 + $0x38] sm:$0xff] %v4156_v2  ;;  %408 = vst [vmem:[#allocation2 + $0x58] sm:$0xff] %v4156_v2  ;;  %3523 = vmatprep.subr.mxu0 %v466_v5  ;;  %3599 = vmatprep.subr.mxu1 %v466_v5  ;;  %v439_v18 = vld [vmem:[%s6239_s0 + $0x80] sm:$0xff]  ;;  %v425_v21 = vld [vmem:[%s6239_s0 + $0x10] sm:$0xff] }
  0x1d   : > { %409 = vst [vmem:[#allocation2 + $0x40] sm:$0xff] %v4156_v2  ;;  %410 = vst [vmem:[#allocation2 + $0xc8] sm:$0xff] %v4156_v2  ;;  %3524 = vmatpush3.msra.mxu0 %v466_v5  ;;  %3615 = vmatpush3.msra.mxu1 %v466_v5  ;;  %v441_v22 = vld [vmem:[%s6239_s0 + $0x90] sm:$0xff]  ;;  %v426_v23 = vld [vmem:[%s6239_s0 + $0x18] sm:$0xff] }
  0x1e   : > { %411 = vst [vmem:[#allocation2 + $0xe0] sm:$0xff] %v4156_v2  ;;  %412 = vst [vmem:[#allocation2 + $0x90] sm:$0xff] %v4156_v2  ;;  %3525 = vmatprep.subr.mxu0 %v465_v6  ;;  %3600 = vmatprep.subr.mxu1 %v465_v6  ;;  %v442_v24 = vld [vmem:[%s6239_s0 + $0x98] sm:$0xff]  ;;  %v427_v25 = vld [vmem:[%s6239_s0 + $0x20] sm:$0xff] }
  0x1f   : > { %413 = vst [vmem:[#allocation2 + $0x70] sm:$0xff] %v4156_v2  ;;  %414 = vst [vmem:[#allocation2 + $0xc0] sm:$0xff] %v4156_v2  ;;  %3526 = vmatpush3.msra.mxu0 %v465_v6  ;;  %3616 = vmatpush3.msra.mxu1 %v465_v6  ;;  %v443_v26 = vld [vmem:[%s6239_s0 + $0xa0] sm:$0xff]  ;;  %v428_v27 = vld [vmem:[%s6239_s0 + $0x28] sm:$0xff] }
  0x20   : > { %415 = vst [vmem:[#allocation2 + $0xa8] sm:$0xff] %v4156_v2  ;;  %416 = vst [vmem:[#allocation2 + $0xd0] sm:$0xff] %v4156_v2  ;;  %3527 = vmatprep.subr.mxu0 %v464_v7  ;;  %3601 = vmatprep.subr.mxu1 %v464_v7  ;;  %v444_v28 = vld [vmem:[%s6239_s0 + $0xa8] sm:$0xff]  ;;  %v429_v29 = vld [vmem:[%s6239_s0 + $0x30] sm:$0xff] }
  0x21   : > { %417 = vst [vmem:[#allocation2 + $0x10] sm:$0xff] %v4156_v2  ;;  %418 = vst [vmem:[#allocation2 + $0x28] sm:$0xff] %v4156_v2  ;;  %3528 = vmatpush3.msra.mxu0 %v464_v7  ;;  %3617 = vmatpush3.msra.mxu1 %v464_v7  ;;  %v445_v30 = vld [vmem:[%s6239_s0 + $0xb0] sm:$0xff]  ;;  %v430_v31 = vld [vmem:[%s6239_s0 + $0x38] sm:$0xff] }
  0x22   : > { %419 = vst [vmem:[#allocation2 + $0xa0] sm:$0xff] %v4156_v2  ;;  %420 = vst [vmem:[#allocation2 + $0xf8] sm:$0xff] %v4156_v2  ;;  %3529 = vmatprep.subr.mxu0 %v463_v8  ;;  %3602 = vmatprep.subr.mxu1 %v463_v8  ;;  %v446_v32 = vld [vmem:[%s6239_s0 + $0xb8] sm:$0xff]  ;;  %v431_v33 = vld [vmem:[%s6239_s0 + $0x40] sm:$0xff] }
  0x23   : > { %421 = vst [vmem:[#allocation2 + $0x20] sm:$0xff] %v4156_v2  ;;  %422 = vst [vmem:[#allocation2 + $0x98] sm:$0xff] %v4156_v2  ;;  %3530 = vmatpush3.msra.mxu0 %v463_v8  ;;  %3618 = vmatpush3.msra.mxu1 %v463_v8  ;;  %v447_v34 = vld [vmem:[%s6239_s0 + $0xc0] sm:$0xff]  ;;  %v432_v35 = vld [vmem:[%s6239_s0 + $0x48] sm:$0xff] }
  0x24   : > { %3531 = vmatprep.subr.mxu0 %v462_v9  ;;  %3603 = vmatprep.subr.mxu1 %v462_v9  ;;  %v448_v36 = vld [vmem:[%s6239_s0 + $0xc8] sm:$0xff]  ;;  %v433_v37 = vld [vmem:[%s6239_s0 + $0x50] sm:$0xff]  ;;  %v434_v39 = vld [vmem:[%s6239_s0 + $0x58] sm:$0xff] }
  0x25   : > { %3532 = vmatpush3.msra.mxu0 %v462_v9  ;;  %3619 = vmatpush3.msra.mxu1 %v462_v9  ;;  %v449_v38 = vld [vmem:[%s6239_s0 + $0xd0] sm:$0xff]  ;;  %v450_v40 = vld [vmem:[%s6239_s0 + $0xd8] sm:$0xff]  ;;  %v435_v41 = vld [vmem:[%s6239_s0 + $0x60] sm:$0xff] }
  0x26   : > { %3533 = vmatprep.subr.mxu0 %v461_v10  ;;  %3604 = vmatprep.subr.mxu1 %v461_v10  ;;  %v451_v42 = vld [vmem:[%s6239_s0 + $0xe0] sm:$0xff]  ;;  %v436_v43 = vld [vmem:[%s6239_s0 + $0x68] sm:$0xff]  ;;  %v437_v45 = vld [vmem:[%s6239_s0 + $0x70] sm:$0xff] }
  0x27   : > { %3534 = vmatpush3.msra.mxu0 %v461_v10  ;;  %3620 = vmatpush3.msra.mxu1 %v461_v10  ;;  %v452_v44 = vld [vmem:[%s6239_s0 + $0xe8] sm:$0xff]  ;;  %v453_v46 = vld [vmem:[%s6239_s0 + $0xf0] sm:$0xff]  ;;  %v438_v47 = vld [vmem:[%s6239_s0 + $0x78] sm:$0xff] }
  0x28   : > { %3535 = vmatprep.subr.mxu0 %v460_v11  ;;  %3605 = vmatprep.subr.mxu1 %v460_v11  ;;  %v454_v48 = vld [vmem:[%s6239_s0 + $0xf8] sm:$0xff] }
  0x29   : > { %3536 = vmatpush3.msra.mxu0 %v460_v11  ;;  %3621 = vmatpush3.msra.mxu1 %v460_v11 }
  0x2a   : > { %3537 = vmatprep.subr.mxu0 %v459_v12  ;;  %3606 = vmatprep.subr.mxu1 %v459_v12 }
  0x2b   : > { %3538 = vmatpush3.msra.mxu0 %v459_v12  ;;  %3622 = vmatpush3.msra.mxu1 %v459_v12 }
  0x2c   : > { %3539 = vmatprep.subr.mxu0 %v458_v13  ;;  %3607 = vmatprep.subr.mxu1 %v458_v13 }
  0x2d   : > { %3540 = vmatpush3.msra.mxu0 %v458_v13  ;;  %3623 = vmatpush3.msra.mxu1 %v458_v13 }
  0x2e   : > { %3541 = vmatprep.subr.mxu0 %v457_v14  ;;  %3608 = vmatprep.subr.mxu1 %v457_v14 }
  0x2f   : > { %3542 = vmatpush3.msra.mxu0 %v457_v14  ;;  %3624 = vmatpush3.msra.mxu1 %v457_v14 }
  0x30   : > { %3543 = vmatprep.subr.mxu0 %v456_v15  ;;  %3609 = vmatprep.subr.mxu1 %v456_v15 }
  0x31   : > { %3544 = vmatpush3.msra.mxu0 %v456_v15  ;;  %3625 = vmatpush3.msra.mxu1 %v456_v15 }
  0x32   : > { %3545 = vmatprep.subr.mxu0 %v455_v16  ;;  %3610 = vmatprep.subr.mxu1 %v455_v16 }
  0x33   : > { %3546 = vmatpush3.msra.mxu0 %v455_v16  ;;  %3626 = vmatpush3.msra.mxu1 %v455_v16 }
  0x34   : > { %3547 = vmatprep.mubr.f32.mxu0 %v423_v17  ;;  %3571 = vmatprep.mubr.f32.mxu1 %v439_v18 }
  0x35   : > { %3548 = vmatmul.mubr.f32.vlgmr.msra.gmra.mxu0 %v424_v19  ;;  %3572 = vmatmul.mubr.f32.vlgmr.msra.gmra.mxu1 %v440_v20 }
  0x36   : > { %3550 = vmatprep.mubr.f32.mxu0 %v425_v21  ;;  %3574 = vmatprep.mubr.f32.mxu1 %v441_v22 }
  0x39   : > { %3551 = vmatmul.mubr.f32.gmra.mxu0 %v426_v23  ;;  %3575 = vmatmul.mubr.f32.gmra.mxu1 %v442_v24 }
  0x3a   : > { %3553 = vmatprep.mubr.f32.mxu0 %v427_v25  ;;  %3577 = vmatprep.mubr.f32.mxu1 %v443_v26 }
  0x3d   : > { %3554 = vmatmul.mubr.f32.gmra.mxu0 %v428_v27  ;;  %3578 = vmatmul.mubr.f32.gmra.mxu1 %v444_v28 }
  0x3e   : > { %3556 = vmatprep.mubr.f32.mxu0 %v429_v29  ;;  %3580 = vmatprep.mubr.f32.mxu1 %v445_v30 }
  0x41   : > { %3557 = vmatmul.mubr.f32.gmra.mxu0 %v430_v31  ;;  %3581 = vmatmul.mubr.f32.gmra.mxu1 %v446_v32 }
  0x42   : > { %3559 = vmatprep.mubr.f32.mxu0 %v431_v33  ;;  %3583 = vmatprep.mubr.f32.mxu1 %v447_v34 }
  0x45   : > { %3560 = vmatmul.mubr.f32.gmra.mxu0 %v432_v35  ;;  %3584 = vmatmul.mubr.f32.gmra.mxu1 %v448_v36 }
  0x46   : > { %3562 = vmatprep.mubr.f32.mxu0 %v433_v37  ;;  %3586 = vmatprep.mubr.f32.mxu1 %v449_v38 }
  0x49   : > { %3563 = vmatmul.mubr.f32.gmra.mxu0 %v434_v39  ;;  %3587 = vmatmul.mubr.f32.gmra.mxu1 %v450_v40 }
  0x4a   : > { %3565 = vmatprep.mubr.f32.mxu0 %v435_v41  ;;  %3589 = vmatprep.mubr.f32.mxu1 %v451_v42 }
  0x4d   : > { %3566 = vmatmul.mubr.f32.gmra.mxu0 %v436_v43  ;;  %3590 = vmatmul.mubr.f32.gmra.mxu1 %v452_v44 }
  0x4e   : > { %3568 = vmatprep.mubr.f32.mxu0 %v437_v45  ;;  %3592 = vmatprep.mubr.f32.mxu1 %v453_v46 }
  0x51   : > { %3569 = vmatmul.mubr.f32.gmra.mxu0 %v438_v47  ;;  %3593 = vmatmul.mubr.f32.gmra.mxu1 %v454_v48 }
  0xf5   : > { %v3549_v49 = vpop.f32.mrf.mxu0  ;;  %v3573_v50 = vpop.f32.mrf.mxu1 }
  0xf6   : > { %697 = vst [vmem:[#allocation3 + $0xc8] sm:$0xff] %v3549_v49  ;;  %713 = vst [vmem:[#allocation3 + $0x70] sm:$0xff] %v3573_v50 }
  0xf7   : > { %v537_v51 = vpop.f32.mrf.mxu0  ;;  %v617_v52 = vpop.f32.mrf.mxu1 }
  0xf8   : > { %696 = vst [vmem:[#allocation3 + $0x80] sm:$0xff] %v537_v51  ;;  %712 = vst [vmem:[#allocation3 + $0x10] sm:$0xff] %v617_v52 }
  0xf9   : > { %v3552_v53 = vpop.f32.mrf.mxu0  ;;  %v3576_v54 = vpop.f32.mrf.mxu1 }
  0xfa   : > { %699 = vst [vmem:[#allocation3 + $0x78] sm:$0xff] %v3552_v53  ;;  %715 = vst [vmem:[#allocation3 + $0xa0] sm:$0xff] %v3576_v54 }
  0xfb   : > { %v547_v55 = vpop.f32.mrf.mxu0  ;;  %v627_v56 = vpop.f32.mrf.mxu1 }
  0xfc   : > { %698 = vst [vmem:[#allocation3 + $0xe8] sm:$0xff] %v547_v55  ;;  %714 = vst [vmem:[#allocation3 + $0x50] sm:$0xff] %v627_v56 }
  0xfd   : > { %v3555_v57 = vpop.f32.mrf.mxu0  ;;  %v3579_v58 = vpop.f32.mrf.mxu1 }
  0xfe   : > { %701 = vst [vmem:[#allocation3 + $0x90] sm:$0xff] %v3555_v57  ;;  %717 = vst [vmem:[#allocation3 + $0x30] sm:$0xff] %v3579_v58 }
  0xff   : > { %v557_v59 = vpop.f32.mrf.mxu0  ;;  %v637_v60 = vpop.f32.mrf.mxu1 }
 0x100   : > { %700 = vst [vmem:[#allocation3 + $0x8] sm:$0xff] %v557_v59  ;;  %716 = vst [vmem:[#allocation3 + $0xd8] sm:$0xff] %v637_v60 }
 0x101   : > { %v3558_v61 = vpop.f32.mrf.mxu0  ;;  %v3582_v62 = vpop.f32.mrf.mxu1 }
 0x102   : > { %703 = vst [vmem:[#allocation3 + $0xa8] sm:$0xff] %v3558_v61  ;;  %719 = vst [vmem:[#allocation3 + $0xf0] sm:$0xff] %v3582_v62 }
 0x103   : > { %v567_v63 = vpop.f32.mrf.mxu0  ;;  %v647_v0 = vpop.f32.mrf.mxu1 }
 0x104   : > { %702 = vst [vmem:[#allocation3 + $0x58] sm:$0xff] %v567_v63  ;;  %718 = vst [vmem:[#allocation3 + $0x20] sm:$0xff] %v647_v0 }
 0x105   : > { %v3561_v1 = vpop.f32.mrf.mxu0  ;;  %v3585_v2 = vpop.f32.mrf.mxu1 }
 0x106   : > { %705 = vst [vmem:[#allocation3 + $0xb0] sm:$0xff] %v3561_v1  ;;  %721 = vst [vmem:[#allocation3 + $0x48] sm:$0xff] %v3585_v2 }
 0x107   : > { %v577_v3 = vpop.f32.mrf.mxu0  ;;  %v657_v4 = vpop.f32.mrf.mxu1 }
 0x108   : > { %704 = vst [vmem:[#allocation3 + $0xd0] sm:$0xff] %v577_v3  ;;  %720 = vst [vmem:[#allocation3 + $0x88] sm:$0xff] %v657_v4 }
 0x109   : > { %v3564_v5 = vpop.f32.mrf.mxu0  ;;  %v3588_v6 = vpop.f32.mrf.mxu1 }
 0x10a   : > { %707 = vst [vmem:[#allocation3 + $0x40] sm:$0xff] %v3564_v5  ;;  %723 = vst [vmem:[#allocation3 + $0xc0] sm:$0xff] %v3588_v6 }
 0x10b   : > { %v587_v7 = vpop.f32.mrf.mxu0  ;;  %v667_v8 = vpop.f32.mrf.mxu1 }
 0x10c   : > { %706 = vst [vmem:[#allocation3 + $0x38] sm:$0xff] %v587_v7  ;;  %722 = vst [vmem:[#allocation3 + $0xf8] sm:$0xff] %v667_v8 }
 0x10d   : > { %v3567_v9 = vpop.f32.mrf.mxu0  ;;  %v3591_v10 = vpop.f32.mrf.mxu1 }
 0x10e   : > { %709 = vst [vmem:[#allocation3 + $0x60] sm:$0xff] %v3567_v9  ;;  %725 = vst [vmem:[#allocation3] sm:$0xff] %v3591_v10 }
 0x10f   : > { %v597_v11 = vpop.f32.mrf.mxu0  ;;  %v677_v12 = vpop.f32.mrf.mxu1 }
 0x110   : > { %708 = vst [vmem:[#allocation3 + $0xe0] sm:$0xff] %v597_v11  ;;  %724 = vst [vmem:[#allocation3 + $0xb8] sm:$0xff] %v677_v12 }
 0x111   : > { %v3570_v13 = vpop.f32.mrf.mxu0  ;;  %v3594_v14 = vpop.f32.mrf.mxu1 }
 0x112   : > { %711 = vst [vmem:[#allocation3 + $0x68] sm:$0xff] %v3570_v13  ;;  %727 = vst [vmem:[#allocation3 + $0x98] sm:$0xff] %v3594_v14 }
 0x113   : > { %v607_v15 = vpop.f32.mrf.mxu0  ;;  %v687_v16 = vpop.f32.mrf.mxu1 }
 0x114   : > { %710 = vst [vmem:[#allocation3 + $0x18] sm:$0xff] %v607_v15  ;;  %726 = vst [vmem:[#allocation3 + $0x28] sm:$0xff] %v687_v16 }
 0x115 PF: > { %v4387_v17 = vld [vmem:[%s4239_s19 + $0x78] sm:$0xff]  ;;  %v6248_v19 = vmov 0.0   ;;  %v6250_v20 = vmov 1   ;;  %v2282_v22 = vld [vmem:[%s4234_s16] sm:$0xff]  ;;  %v4395_v28 = vld [vmem:[%s4234_s16 + $0x8] sm:$0xff]  ;;  %p3459_p6 = scmp.ne.s32.totalorder %s4146_s27, 3 }
 0x116   : > { %1865 = vmatprep.subr.mxu0 %v6248_v19  ;;  %3655 = vset.pattern.permute.xlu0 %v6250_v20  ;;  %v2298_v23 = vld [vmem:[%s4234_s16 + $0x80] sm:$0xff]  ;;  %v2347_v24 = vunpack.c.h.bf16 %v2282_v22  ;;  %v2346_v27 = vunpack.c.l.bf16 %v2282_v22  ;;  %v4402_v30 = vld [vmem:[%s4234_s16 + $0x88] sm:$0xff]  ;;  %v2348_v31 = vunpack.c.l.bf16 %v4395_v28  ;;  %v4410_v36 = vld [vmem:[%s4234_s16 + $0x10] sm:$0xff] }
 0x117   : > { %1467 = vperm.xlu0 %3655, %v4387_v17   ;;  %v2378_v25 = vunpack.c.l.bf16 %v2298_v23  ;;  %v2379_v26 = vunpack.c.h.bf16 %v2298_v23  ;;  %v4399_v29 = vld [vmem:[%s4239_s19 + $0x60] sm:$0xff]  ;;  %2730 = vmatprep.subr.mxu1 %v6248_v19  ;;  %v2380_v35 = vunpack.c.l.bf16 %v4402_v30  ;;  %v4413_v37 = vld [vmem:[%s4234_s16 + $0x90] sm:$0xff]  ;;  %v2350_v40 = vunpack.c.l.bf16 %v4410_v36  ;;  %v4420_v42 = vld [vmem:[%s4234_s16 + $0x18] sm:$0xff] }
 0x118   : > { %v933_v34 = vld [vmem:[#allocation3 + $0x60] sm:$0xff]  ;;  %v2382_v41 = vunpack.c.l.bf16 %v4413_v37  ;;  %v4423_v43 = vld [vmem:[%s4234_s16 + $0x98] sm:$0xff]  ;;  %v4427_v44 = vld [vmem:[%s4239_s19 + $0x50] sm:$0xff]  ;;  %v2352_v48 = vunpack.c.l.bf16 %v4420_v42 }
 0x119   : > { %v935_v18 = vld [vmem:[#allocation3 + $0x68] sm:$0xff]  ;;  %v4406_v32 = vpack.i.bf16 %v2347_v24, %v2379_v26  ;;  %v3656_v33 = vpack.i.bf16 %v2346_v27, %v2378_v25  ;;  %v932_v38 = vld [vmem:[#allocation3 + $0xe0] sm:$0xff]  ;;  %v3658_v39 = vpack.i.bf16 %v2348_v31, %v2380_v35  ;;  %v930_v46 = vld [vmem:[#allocation3 + $0x38] sm:$0xff]  ;;  %v2384_v49 = vunpack.c.l.bf16 %v4423_v43 }
 0x11a   : > { %1866 = vmatpush1.msra.mxu0 %v935_v18  ;;  %v931_v45 = vld [vmem:[#allocation3 + $0x40] sm:$0xff]  ;;  %v3660_v47 = vpack.i.bf16 %v2350_v40, %v2382_v41  ;;  %v929_v53 = vld [vmem:[#allocation3 + $0xb0] sm:$0xff]  ;;  %v4448_v58 = vld [vmem:[%s4234_s16 + $0x28] sm:$0xff] }
 0x11b   : > { %v934_v21 = vld [vmem:[#allocation3 + $0x18] sm:$0xff]  ;;  %1867 = vmatprep.subr.mxu0 %v6248_v19  ;;  %6295 = vst [vmem:[#allocation4_spill] sm:$0xff] %v4406_v32  ;;  %3657 = vxpose.xlu1.b32.start [1/16] %v3656_v33, 128  ;;  %v4434_v50 = vld [vmem:[%s4234_s16 + $0x20] sm:$0xff]  ;;  %v928_v54 = vld [vmem:[#allocation3 + $0xd0] sm:$0xff]  ;;  %v3662_v55 = vpack.i.bf16 %v2352_v48, %v2384_v49  ;;  %v2356_v0 = vunpack.c.l.bf16 %v4448_v58  ;;  %v6253_v32 = vmov 0  }
 0x11c   : > { %1868 = vmatpush1.msra.mxu0 %v934_v21  ;;  %1455 = vperm.xlu0 %3655, %v4399_v29   ;;  %v4437_v51 = vld [vmem:[%s4234_s16 + $0xa0] sm:$0xff]  ;;  %v2354_v56 = vunpack.c.l.bf16 %v4434_v50  ;;  %v4451_v59 = vld [vmem:[%s4234_s16 + $0xa8] sm:$0xff]  ;;  %v4455_v60 = vld [vmem:[%s4239_s19 + $0x30] sm:$0xff] }
 0x11d   : > { %1869 = vmatprep.subr.mxu0 %v6248_v19  ;;  %v4441_v52 = vld [vmem:[%s4239_s19 + $0x40] sm:$0xff]  ;;  %v2386_v57 = vunpack.c.l.bf16 %v4437_v51  ;;  %v927_v61 = vld [vmem:[#allocation3 + $0xa8] sm:$0xff]  ;;  %v926_v62 = vld [vmem:[#allocation3 + $0x58] sm:$0xff]  ;;  %v2388_v1 = vunpack.c.l.bf16 %v4451_v59 }
 0x11e   : > { %1870 = vmatpush1.msra.mxu0 %v933_v34  ;;  %v4462_v2 = vld [vmem:[%s4234_s16 + $0x30] sm:$0xff]  ;;  %v4469_v4 = vld [vmem:[%s4239_s19 + $0x20] sm:$0xff]  ;;  %v924_v6 = vld [vmem:[#allocation3 + $0x8] sm:$0xff] }
 0x11f   : > { %1871 = vmatprep.subr.mxu0 %v6248_v19  ;;  %3659 = vxpose.xlu1.b32.cont [2/16] %v3658_v39, 128  ;;  %v3664_v63 = vpack.i.bf16 %v2354_v56, %v2386_v57  ;;  %v4465_v3 = vld [vmem:[%s4234_s16 + $0xb0] sm:$0xff]  ;;  %v3666_v7 = vpack.i.bf16 %v2356_v0, %v2388_v1  ;;  %v2358_v8 = vunpack.c.l.bf16 %v4462_v2  ;;  %v4476_v10 = vld [vmem:[%s4234_s16 + $0x38] sm:$0xff]  ;;  %v922_v14 = vld [vmem:[#allocation3 + $0xe8] sm:$0xff] }
 0x120   : > { %1872 = vmatpush1.msra.mxu0 %v932_v38  ;;  %1447 = vperm.xlu0 %3655, %v4427_v44   ;;  %v925_v5 = vld [vmem:[#allocation3 + $0x90] sm:$0xff]  ;;  %v2390_v9 = vunpack.c.l.bf16 %v4465_v3  ;;  %v4479_v11 = vld [vmem:[%s4234_s16 + $0xb8] sm:$0xff]  ;;  %v2360_v16 = vunpack.c.l.bf16 %v4476_v10  ;;  %v4489_v21 = vld [vmem:[%s4229_s13] sm:$0xff] }
 0x121   : > { %1873 = vmatprep.subr.mxu0 %v6248_v19  ;;  %v4483_v12 = vld [vmem:[%s4239_s19 + $0x10] sm:$0xff]  ;;  %v923_v13 = vld [vmem:[#allocation3 + $0x78] sm:$0xff]  ;;  %v2392_v18 = vunpack.c.l.bf16 %v4479_v11  ;;  %v4493_v22 = vld [vmem:[%s4234_s16 + $0x40] sm:$0xff]  ;;  %v793_v24 = vunpack.c.h.bf16 %v4489_v21 }
 0x122   : > { %1874 = vmatpush1.msra.mxu0 %v931_v45  ;;  %v3668_v15 = vpack.i.bf16 %v2358_v8, %v2390_v9  ;;  %v4496_v23 = vld [vmem:[%s4234_s16 + $0xc0] sm:$0xff]  ;;  %v921_v26 = vld [vmem:[#allocation3 + $0xc8] sm:$0xff]  ;;  %v2362_v33 = vunpack.c.l.bf16 %v4493_v22  ;;  %v4515_v39 = vld [vmem:[%s4239_s19 + $0xf0] sm:$0xff] }
 0x123   : > { %1875 = vmatprep.subr.mxu0 %v6248_v19  ;;  %3661 = vxpose.xlu1.b32.cont [3/16] %v3660_v47, 128  ;;  %v4501_v25 = vld [vmem:[%s4239_s19] sm:$0xff]  ;;  %v3670_v31 = vpack.i.bf16 %v2360_v16, %v2392_v18  ;;  %v2394_v34 = vunpack.c.l.bf16 %v4496_v23  ;;  %v4508_v35 = vld [vmem:[%s4234_s16 + $0x48] sm:$0xff]  ;;  %v951_v40 = vld [vmem:[#allocation3 + $0x98] sm:$0xff] }
 0x124   : > { %1876 = vmatpush1.msra.mxu0 %v930_v46  ;;  %1439 = vperm.xlu0 %3655, %v4441_v52   ;;  %v920_v27 = vld [vmem:[#allocation3 + $0x80] sm:$0xff]  ;;  %v4511_v38 = vld [vmem:[%s4234_s16 + $0xc8] sm:$0xff]  ;;  %v2364_v46 = vunpack.c.l.bf16 %v4508_v35  ;;  %v4522_v48 = vld [vmem:[%s4234_s16 + $0x50] sm:$0xff] }
 0x125   : > { %1877 = vmatprep.subr.mxu0 %v6248_v19  ;;  %1929 = vmatprep.mubr.f32.mxu0 %v793_v24  ;;  %v950_v41 = vld [vmem:[#allocation3 + $0x28] sm:$0xff]  ;;  %v3672_v45 = vpack.i.bf16 %v2362_v33, %v2394_v34  ;;  %v2396_v47 = vunpack.c.l.bf16 %v4511_v38  ;;  %v4525_v49 = vld [vmem:[%s4234_s16 + $0xd0] sm:$0xff]  ;;  %v2366_v57 = vunpack.c.l.bf16 %v4522_v48  ;;  %v947_v1 = vld [vmem:[#allocation3 + $0xc0] sm:$0xff] }
 0x126   : > { %1878 = vmatpush1.msra.mxu0 %v929_v53  ;;  %v4529_v53 = vld [vmem:[%s4239_s19 + $0xe0] sm:$0xff]  ;;  %v4543_v0 = vld [vmem:[%s4239_s19 + $0xd0] sm:$0xff]  ;;  %v944_v16 = vld [vmem:[#allocation3 + $0x88] sm:$0xff] }
 0x127   : > { %1879 = vmatprep.subr.mxu0 %v6248_v19  ;;  %3663 = vxpose.xlu1.b32.cont [4/16] %v3662_v55, 128  ;;  %v948_v55 = vld [vmem:[#allocation3 + $0xb8] sm:$0xff]  ;;  %v3674_v56 = vpack.i.bf16 %v2364_v46, %v2396_v47  ;;  %v4550_v9 = vld [vmem:[%s4234_s16 + $0x60] sm:$0xff]  ;;  %v4571_v33 = vld [vmem:[%s4239_s19 + $0xb0] sm:$0xff] }
 0x128   : > { %1880 = vmatpush1.msra.mxu0 %v928_v54  ;;  %1431 = vperm.xlu0 %3655, %v4455_v60   ;;  %v949_v54 = vld [vmem:[#allocation3] sm:$0xff]  ;;  %v2370_v24 = vunpack.c.l.bf16 %v4550_v9  ;;  %v943_v34 = vld [vmem:[#allocation3 + $0xf0] sm:$0xff] }
 0x129   : > { %1881 = vmatprep.subr.mxu0 %v6248_v19  ;;  %v4578_v47 = vld [vmem:[%s4234_s16 + $0x70] sm:$0xff]  ;;  %v4650_v20 = vld [vmem:[%s4239_s19 + $0x140] sm:$0xff] }
 0x12a   : > { %1882 = vmatpush1.msra.mxu0 %v927_v61  ;;  %v2398_v61 = vunpack.c.l.bf16 %v4525_v49  ;;  %6301 = vst [vmem:[#allocation10_spill] sm:$0xff] %v4650_v20 }
 0x12b   : > { %1883 = vmatprep.subr.mxu0 %v6248_v19  ;;  %3665 = vxpose.xlu1.b32.cont [5/16] %v3664_v63, 128  ;;  %v4539_v63 = vld [vmem:[%s4234_s16 + $0xd8] sm:$0xff] }
 0x12c   : > { %1884 = vmatpush1.msra.mxu0 %v926_v62  ;;  %1423 = vperm.xlu0 %3655, %v4469_v4   ;;  %v4536_v62 = vld [vmem:[%s4234_s16 + $0x58] sm:$0xff]  ;;  %v2400_v8 = vunpack.c.l.bf16 %v4539_v63 }
 0x12d   : > { %1885 = vmatprep.subr.mxu0 %v6248_v19 }
 0x12e   : > { %1886 = vmatpush1.msra.mxu0 %v925_v5  ;;  %v946_v5 = vld [vmem:[#allocation3 + $0xf8] sm:$0xff] }
 0x12f   : > { %1887 = vmatprep.subr.mxu0 %v6248_v19  ;;  %3667 = vxpose.xlu1.b32.cont [6/16] %v3666_v7, 128  ;;  %v2368_v7 = vunpack.c.l.bf16 %v4536_v62 }
 0x130   : > { %1888 = vmatpush1.msra.mxu0 %v924_v6  ;;  %1415 = vperm.xlu0 %3655, %v4483_v12   ;;  %v3676_v6 = vpack.i.bf16 %v2366_v57, %v2398_v61  ;;  %v940_v57 = vld [vmem:[#allocation3 + $0xd8] sm:$0xff] }
 0x131   : > { %1889 = vmatprep.subr.mxu0 %v6248_v19  ;;  %v3678_v18 = vpack.i.bf16 %v2368_v7, %v2400_v8  ;;  %v4595_v7 = vld [vmem:[%s4234_s16 + $0xf8] sm:$0xff]  ;;  %v4599_v8 = vld [vmem:[%s4239_s19 + $0x90] sm:$0xff] }
 0x132   : > { %1890 = vmatpush1.msra.mxu0 %v923_v13  ;;  %v4553_v13 = vld [vmem:[%s4234_s16 + $0xe0] sm:$0xff]  ;;  %6297 = vst [vmem:[#allocation6_spill] sm:$0xff] %v4595_v7 }
 0x133   : > { %1891 = vmatprep.subr.mxu0 %v6248_v19  ;;  %3669 = vxpose.xlu1.b32.cont [7/16] %v3668_v15, 128  ;;  %v945_v15 = vld [vmem:[#allocation3 + $0x48] sm:$0xff] }
 0x134   : > { %1892 = vmatpush1.msra.mxu0 %v922_v14  ;;  %1407 = vperm.xlu0 %3655, %v4501_v25   ;;  %v4557_v14 = vld [vmem:[%s4239_s19 + $0xc0] sm:$0xff] }
 0x135   : > { %1893 = vmatprep.subr.mxu0 %v6248_v19 }
 0x136   : > { %1894 = vmatpush1.msra.mxu0 %v921_v26  ;;  %v2402_v26 = vunpack.c.l.bf16 %v4553_v13 }
 0x137   : > { %1895 = vmatprep.subr.mxu0 %v6248_v19  ;;  %3671 = vxpose.xlu1.b32.cont [8/16] %v3670_v31, 128  ;;  %v4567_v31 = vld [vmem:[%s4234_s16 + $0xe8] sm:$0xff] }
 0x138   : > { %1896 = vmatpush1.msra.mxu0 %v920_v27  ;;  %1527 = vperm.xlu0 %3655, %v4515_v39   ;;  %v4564_v27 = vld [vmem:[%s4234_s16 + $0x68] sm:$0xff]  ;;  %v2404_v46 = vunpack.c.l.bf16 %v4567_v31 }
 0x139   : > { %1897 = vmatprep.subr.mxu0 %v6248_v19 }
 0x13a   : > { %1898 = vmatpush2.msra.mxu0 %v951_v40  ;;  %v942_v40 = vld [vmem:[#allocation3 + $0x20] sm:$0xff] }
 0x13b   : > { %1899 = vmatprep.subr.mxu0 %v6248_v19  ;;  %3673 = vxpose.xlu1.b32.cont [9/16] %v3672_v45, 128  ;;  %v2372_v45 = vunpack.c.l.bf16 %v4564_v27 }
 0x13c   : > { %1900 = vmatpush2.msra.mxu0 %v950_v41  ;;  %1519 = vperm.xlu0 %3655, %v4529_v53   ;;  %v3680_v41 = vpack.i.bf16 %v2370_v24, %v2402_v26  ;;  %v2408_v26 = vunpack.c.l.bf16 %v4595_v7 }
 0x13d   : > { %1901 = vmatprep.subr.mxu0 %v6248_v19  ;;  %v3682_v61 = vpack.i.bf16 %v2372_v45, %v2404_v46  ;;  %v936_v45 = vld [vmem:[#allocation3 + $0x10] sm:$0xff]  ;;  %v792_v46 = vunpack.c.l.bf16 %v4489_v21 }
 0x13e   : > { %1902 = vmatpush2.msra.mxu0 %v949_v54  ;;  %v4581_v54 = vld [vmem:[%s4234_s16 + $0xf0] sm:$0xff] }
 0x13f   : > { %1903 = vmatprep.subr.mxu0 %v6248_v19  ;;  %3675 = vxpose.xlu1.b32.cont [10/16] %v3674_v56, 128  ;;  %v941_v56 = vld [vmem:[#allocation3 + $0x30] sm:$0xff] }
 0x140   : > { %1904 = vmatpush2.msra.mxu0 %v948_v55  ;;  %1511 = vperm.xlu0 %3655, %v4543_v0   ;;  %v4585_v55 = vld [vmem:[%s4239_s19 + $0xa0] sm:$0xff] }
 0x141   : > { %1905 = vmatprep.subr.mxu0 %v6248_v19 }
 0x142   : > { %1906 = vmatpush2.msra.mxu0 %v947_v1  ;;  %v2374_v1 = vunpack.c.l.bf16 %v4578_v47 }
 0x143   : > { %1907 = vmatprep.subr.mxu0 %v6248_v19  ;;  %3677 = vxpose.xlu1.b32.cont [11/16] %v3676_v6, 128  ;;  %v4592_v6 = vld [vmem:[%s4234_s16 + $0x78] sm:$0xff] }
 0x144   : > { %1908 = vmatpush2.msra.mxu0 %v946_v5  ;;  %1503 = vperm.xlu0 %3655, %v4557_v14   ;;  %v2406_v5 = vunpack.c.l.bf16 %v4581_v54  ;;  %6296 = vst [vmem:[#allocation5_spill] sm:$0xff] %v4592_v6  ;;  %v2376_v24 = vunpack.c.l.bf16 %v4592_v6 }
 0x145   : > { %1909 = vmatprep.subr.mxu0 %v6248_v19 }
 0x146   : > { %1910 = vmatpush2.msra.mxu0 %v945_v15  ;;  %v939_v15 = vld [vmem:[#allocation3 + $0xa0] sm:$0xff] }
 0x147   : > { %1911 = vmatprep.subr.mxu0 %v6248_v19  ;;  %3679 = vxpose.xlu1.b32.cont [12/16] %v3678_v18, 128  ;;  %v3684_v18 = vpack.i.bf16 %v2374_v1, %v2406_v5  ;;  %v730_v1 = vld [vmem:[%s4229_s13 + $0x10] sm:$0xff] }
 0x148   : > { %1912 = vmatpush2.msra.mxu0 %v944_v16  ;;  %1495 = vperm.xlu0 %3655, %v4571_v33   ;;  %v938_v16 = vld [vmem:[#allocation3 + $0x50] sm:$0xff]  ;;  %v797_v21 = vunpack.c.h.bf16 %v730_v1 }
 0x149   : > { %1913 = vmatprep.subr.mxu0 %v6248_v19 }
 0x14a   : > { %1914 = vmatpush2.msra.mxu0 %v943_v34  ;;  %v4607_v34 = vld [vmem:[%s4239_s19 + $0x80] sm:$0xff] }
 0x14b   : > { %1915 = vmatprep.subr.mxu0 %v6248_v19  ;;  %3681 = vxpose.xlu1.b32.cont [13/16] %v3680_v41, 128  ;;  %v729_v41 = vld [vmem:[%s4229_s13 + $0x8] sm:$0xff] }
 0x14c   : > { %1916 = vmatpush2.msra.mxu0 %v942_v40  ;;  %1487 = vperm.xlu0 %3655, %v4585_v55   ;;  %v937_v40 = vld [vmem:[#allocation3 + $0x70] sm:$0xff]  ;;  %v794_v5 = vunpack.c.l.bf16 %v729_v41 }
 0x14d   : > { %1917 = vmatprep.subr.mxu0 %v6248_v19 }
 0x14e   : > { %1918 = vmatpush2.msra.mxu0 %v941_v56  ;;  %v3686_v56 = vpack.i.bf16 %v2376_v24, %v2408_v26  ;;  %v4625_v26 = vld [vmem:[%s4239_s19 + $0x168] sm:$0xff] }
 0x14f   : > { %1919 = vmatprep.subr.mxu0 %v6248_v19  ;;  %3683 = vxpose.xlu1.b32.cont [14/16] %v3682_v61, 128  ;;  %v4615_v61 = vld [vmem:[%s4239_s19 + $0x178] sm:$0xff] }
 0x150   : > { %1920 = vmatpush2.msra.mxu0 %v940_v57  ;;  %1479 = vperm.xlu0 %3655, %v4599_v8   ;;  %v795_v57 = vunpack.c.h.bf16 %v729_v41 }
 0x151   : > { %1921 = vmatprep.subr.mxu0 %v6248_v19 }
 0x152   : > { %1922 = vmatpush2.msra.mxu0 %v939_v15  ;;  %v4620_v15 = vld [vmem:[%s4239_s19 + $0x170] sm:$0xff] }
 0x153   : > { %1923 = vmatprep.subr.mxu0 %v6248_v19  ;;  %3685 = vxpose.xlu1.b32.cont [15/16] %v3684_v18, 128  ;;  %6298 = vst [vmem:[#allocation7_spill] sm:$0xff] %v4620_v15  ;;  %v796_v18 = vunpack.c.l.bf16 %v730_v1 }
 0x154   : > { %1924 = vmatpush2.msra.mxu0 %v938_v16  ;;  %1471 = vperm.xlu0 %3655, %v4607_v34   ;;  %v731_v16 = vld [vmem:[%s4229_s13 + $0x18] sm:$0xff] }
 0x155   : > { %1925 = vmatprep.subr.mxu0 %v6248_v19  ;;  %v799_v24 = vunpack.c.h.bf16 %v731_v16  ;;  %v798_v41 = vunpack.c.l.bf16 %v731_v16 }
 0x156   : > { %1926 = vmatpush2.msra.mxu0 %v937_v40  ;;  %v732_v40 = vld [vmem:[%s4229_s13 + $0x20] sm:$0xff] }
 0x157   : > { %1927 = vmatprep.subr.mxu0 %v6248_v19  ;;  %3687 = vxpose.xlu1.b32.end [16/16] %v3686_v56, 128  ;;  %v733_v56 = vld [vmem:[%s4229_s13 + $0x28] sm:$0xff] }
 0x158   : > { %1928 = vmatpush2.msra.mxu0 %v936_v45  ;;  %1595 = vperm.xlu0 %3655, %v4615_v61   ;;  %v801_v45 = vunpack.c.h.bf16 %v732_v40  ;;  %v803_v1 = vunpack.c.h.bf16 %v733_v56  ;;  %v802_v16 = vunpack.c.l.bf16 %v733_v56  ;;  %v4645_v19 = vld [vmem:[%s4239_s19 + $0x148] sm:$0xff] }
 0x159   : > { %1930 = vmatmul.mubr.f32.vlgmr.msra.gmra.mxu0 %v792_v46  ;;  %v4630_v46 = vld [vmem:[%s4239_s19 + $0x160] sm:$0xff] }
 0x15a   : > { %1934 = vmatprep.mubr.f32.mxu0 %v795_v57  ;;  %6299 = vst [vmem:[#allocation8_spill] sm:$0xff] %v4630_v46  ;;  %v800_v57 = vunpack.c.l.bf16 %v732_v40  ;;  %v735_v40 = vld [vmem:[%s4229_s13 + $0x38] sm:$0xff] }
 0x15b   : > { %v806_v56 = vunpack.c.l.bf16 %v735_v40 }
 0x15c   : > { %1591 = vperm.xlu0 %3655, %v4620_v15   ;;  %v739_v15 = vld [vmem:[%s4229_s13 + $0x58] sm:$0xff] }
 0x15d   : > { %1935 = vmatmul.mubr.f32.gmra.mxu0 %v794_v5  ;;  %v4635_v5 = vld [vmem:[%s4239_s19 + $0x158] sm:$0xff] }
 0x15e   : > { %1939 = vmatprep.mubr.f32.mxu0 %v797_v21  ;;  %v734_v21 = vld [vmem:[%s4229_s13 + $0x30] sm:$0xff] }
 0x160   : > { %1587 = vperm.xlu0 %3655, %v4625_v26  }
 0x161   : > { %1940 = vmatmul.mubr.f32.gmra.mxu0 %v796_v18  ;;  %v805_v18 = vunpack.c.h.bf16 %v734_v21 }
 0x162   : > { %1944 = vmatprep.mubr.f32.mxu0 %v799_v24  ;;  %v4640_v24 = vld [vmem:[%s4239_s19 + $0x150] sm:$0xff] }
 0x163   : > { %6300 = vst [vmem:[#allocation9_spill] sm:$0xff] %v4640_v24 }
 0x164   : > { %1583 = vperm.xlu0 %3655, %v4630_v46   ;;  %v4679_v46 = vld [vmem:[%s4239_s19 + $0x38] sm:$0xff] }
 0x165   : > { %1945 = vmatmul.mubr.f32.gmra.mxu0 %v798_v41  ;;  %v804_v41 = vunpack.c.l.bf16 %v734_v21  ;;  %6305 = vst [vmem:[#allocation14_spill] sm:$0xff] %v4679_v46 }
 0x166   : > { %1949 = vmatprep.mubr.f32.mxu0 %v801_v45  ;;  %v807_v45 = vunpack.c.h.bf16 %v735_v40  ;;  %v4656_v40 = vld [vmem:[%s4239_s19 + $0x138] sm:$0xff] }
 0x168   : > { %1579 = vperm.xlu0 %3655, %v4635_v5  }
 0x169   : > { %1950 = vmatmul.mubr.f32.gmra.mxu0 %v800_v57  ;;  %v736_v57 = vld [vmem:[%s4229_s13 + $0x40] sm:$0xff] }
 0x16a   : > { %1954 = vmatprep.mubr.f32.mxu0 %v803_v1  ;;  %v809_v1 = vunpack.c.h.bf16 %v736_v57  ;;  %v808_v21 = vunpack.c.l.bf16 %v736_v57 }
 0x16c   : > { %1575 = vperm.xlu0 %3655, %v4640_v24   ;;  %v4683_v24 = vld [vmem:[%s4239_s19 + $0x120] sm:$0xff] }
 0x16d   : > { %1955 = vmatmul.mubr.f32.gmra.mxu0 %v802_v16  ;;  %v737_v16 = vld [vmem:[%s4229_s13 + $0x48] sm:$0xff]  ;;  %6306 = vst [vmem:[#allocation15_spill] sm:$0xff] %v4683_v24 }
 0x16e   : > { %1959 = vmatprep.mubr.f32.mxu0 %v805_v18  ;;  %v811_v18 = vunpack.c.h.bf16 %v737_v16  ;;  %v810_v57 = vunpack.c.l.bf16 %v737_v16  ;;  %v815_v16 = vunpack.c.h.bf16 %v739_v15 }
 0x170   : > { %1571 = vperm.xlu0 %3655, %v4645_v19  }
 0x171   : > { %1960 = vmatmul.mubr.f32.gmra.mxu0 %v804_v41  ;;  %v738_v41 = vld [vmem:[%s4229_s13 + $0x50] sm:$0xff] }
 0x172   : > { %1964 = vmatprep.mubr.f32.mxu0 %v807_v45  ;;  %v4661_v45 = vld [vmem:[%s4239_s19 + $0x18] sm:$0xff] }
 0x173   : > { %6302 = vst [vmem:[#allocation11_spill] sm:$0xff] %v4661_v45 }
 0x174   : > { %1567 = vperm.xlu0 %3655, %v4650_v20   ;;  %v4692_v20 = vld [vmem:[%s4239_s19 + $0x118] sm:$0xff] }
 0x175   : > { %1965 = vmatmul.mubr.f32.gmra.mxu0 %v806_v56  ;;  %3768 = vset.pattern.permute.xlu1 %v6253_v32  ;;  %v813_v56 = vunpack.c.h.bf16 %v738_v41  ;;  %v4674_v32 = vld [vmem:[%s4239_s19 + $0x128] sm:$0xff] }
 0x176   : > { %1969 = vmatprep.mubr.f32.mxu0 %v809_v1  ;;  %1029 = vperm.xlu1 %3768, %v4483_v12   ;;  %v4665_v1 = vld [vmem:[%s4239_s19 + $0x130] sm:$0xff]  ;;  %v4670_v12 = vld [vmem:[%s4239_s19 + $0x28] sm:$0xff] }
 0x177   : > { %6303 = vst [vmem:[#allocation12_spill] sm:$0xff] %v4665_v1  ;;  %6304 = vst [vmem:[#allocation13_spill] sm:$0xff] %v4670_v12 }
 0x178   : > { %1563 = vperm.xlu0 %3655, %v4656_v40  }
 0x179   : > { %1970 = vmatmul.mubr.f32.gmra.mxu0 %v808_v21  ;;  %v812_v21 = vunpack.c.l.bf16 %v738_v41 }
 0x17a   : > { %1974 = vmatprep.mubr.f32.mxu0 %v811_v18  ;;  %1034 = vperm.xlu1 %3768, %v4661_v45   ;;  %v740_v18 = vld [vmem:[%s4229_s13 + $0x60] sm:$0xff]  ;;  %v4688_v45 = vld [vmem:[%s4239_s19 + $0x48] sm:$0xff] }
 0x17b   : > { %v817_v41 = vunpack.c.h.bf16 %v740_v18  ;;  %6307 = vst [vmem:[#allocation16_spill] sm:$0xff] %v4688_v45 }
 0x17c   : > { %1559 = vperm.xlu0 %3655, %v4665_v1   ;;  %v4701_v1 = vld [vmem:[%s4239_s19 + $0x110] sm:$0xff] }
 0x17d   : > { %1975 = vmatmul.mubr.f32.gmra.mxu0 %v810_v57  ;;  %v814_v57 = vunpack.c.l.bf16 %v739_v15  ;;  %6309 = vst [vmem:[#allocation18_spill] sm:$0xff] %v4701_v1 }
 0x17e   : > { %1979 = vmatprep.mubr.f32.mxu0 %v813_v56  ;;  %1044 = vperm.xlu1 %3768, %v4670_v12   ;;  %v741_v56 = vld [vmem:[%s4229_s13 + $0x68] sm:$0xff]  ;;  %v4697_v12 = vld [vmem:[%s4239_s19 + $0x58] sm:$0xff] }
 0x17f   : > { %v819_v15 = vunpack.c.h.bf16 %v741_v56  ;;  %6308 = vst [vmem:[#allocation17_spill] sm:$0xff] %v4697_v12 }
 0x180   : > { %1555 = vperm.xlu0 %3655, %v4674_v32  }
 0x181   : > { %1980 = vmatmul.mubr.f32.gmra.mxu0 %v812_v21  ;;  %v816_v21 = vunpack.c.l.bf16 %v740_v18 }
 0x182   : > { %1984 = vmatprep.mubr.f32.mxu0 %v815_v16  ;;  %1054 = vperm.xlu1 %3768, %v4679_v46   ;;  %v742_v16 = vld [vmem:[%s4229_s13 + $0x70] sm:$0xff]  ;;  %v743_v46 = vld [vmem:[%s4229_s13 + $0x78] sm:$0xff] }
 0x183   : > { %v821_v18 = vunpack.c.h.bf16 %v742_v16 }
 0x184   : > { %1551 = vperm.xlu0 %3655, %v4683_v24   ;;  %v820_v24 = vunpack.c.l.bf16 %v742_v16  ;;  %v4716_v16 = vld [vmem:[%s4239_s19 + $0x100] sm:$0xff] }
 0x185   : > { %1985 = vmatmul.mubr.f32.gmra.mxu0 %v814_v57  ;;  %v818_v57 = vunpack.c.l.bf16 %v741_v56  ;;  %v823_v56 = vunpack.c.h.bf16 %v743_v46  ;;  %6310 = vst [vmem:[#allocation19_spill] sm:$0xff] %v4716_v16 }
 0x186   : > { %1989 = vmatprep.mubr.f32.mxu0 %v817_v41  ;;  %1064 = vperm.xlu1 %3768, %v4688_v45   ;;  %v4706_v41 = vld [vmem:[%s4239_s19 + $0x68] sm:$0xff]  ;;  %v822_v45 = vunpack.c.l.bf16 %v743_v46 }
 0x188   : > { %1547 = vperm.xlu0 %3655, %v4692_v20  }
 0x189   : > { %1990 = vmatmul.mubr.f32.gmra.mxu0 %v816_v21  ;;  %v4710_v21 = vld [vmem:[%s4239_s19 + $0x108] sm:$0xff] }
 0x18a   : > { %1994 = vmatprep.mubr.f32.mxu0 %v819_v15  ;;  %1074 = vperm.xlu1 %3768, %v4697_v12   ;;  %v744_v15 = vld [vmem:[%s4229_s13 + $0x80] sm:$0xff]  ;;  %v4723_v12 = vld [vmem:[%s4239_s19 + $0x88] sm:$0xff] }
 0x18b   : > { %6312 = vst [vmem:[#allocation21_spill] sm:$0xff] %v4723_v12  ;;  %v824_v7 = vunpack.c.l.bf16 %v744_v15 }
 0x18c   : > { %1543 = vperm.xlu0 %3655, %v4701_v1   ;;  %v745_v1 = vld [vmem:[%s4229_s13 + $0x88] sm:$0xff] }
 0x18d   : > { %1995 = vmatmul.mubr.f32.gmra.mxu0 %v818_v57  ;;  %v825_v57 = vunpack.c.h.bf16 %v744_v15  ;;  %v827_v46 = vunpack.c.h.bf16 %v745_v1 }
 0x18e   : > { %1999 = vmatprep.mubr.f32.mxu0 %v821_v18  ;;  %1084 = vperm.xlu1 %3768, %v4706_v41  }
 0x190   : > { %1539 = vperm.xlu0 %3655, %v4710_v21  }
 0x191   : > { %2000 = vmatmul.mubr.f32.gmra.mxu0 %v820_v24  ;;  %v4727_v24 = vld [vmem:[%s4239_s19 + $0x1f8] sm:$0xff] }
 0x192   : > { %2004 = vmatprep.mubr.f32.mxu0 %v823_v56  ;;  %1094 = vperm.xlu1 %3768, %v4387_v17   ;;  %v4720_v18 = vpop.permute.xlu0 %1467  ;;  %6313 = vst [vmem:[#allocation22_spill] sm:$0xff] %v4727_v24  ;;  %v746_v56 = vld [vmem:[%s4229_s13 + $0x90] sm:$0xff]  ;;  %v4734_v17 = vld [vmem:[%s4239_s19 + $0x98] sm:$0xff] }
 0x193   : > { %6311 = vst [vmem:[#allocation20_spill] sm:$0xff] %v4720_v18  ;;  %6315 = vst [vmem:[#allocation24_spill] sm:$0xff] %v4734_v17  ;;  %v829_v15 = vunpack.c.h.bf16 %v746_v56 }
 0x194   : > { %1535 = vperm.xlu0 %3655, %v4716_v16   ;;  %v4741_v16 = vld [vmem:[%s4239_s19 + $0x1f0] sm:$0xff] }
 0x195   : > { %2005 = vmatmul.mubr.f32.gmra.mxu0 %v822_v45  ;;  %v826_v45 = vunpack.c.l.bf16 %v745_v1  ;;  %6317 = vst [vmem:[#allocation26_spill] sm:$0xff] %v4741_v16  ;;  %v4748_v1 = vld [vmem:[%s4239_s19 + $0xa8] sm:$0xff] }
 0x196   : > { %2009 = vmatprep.mubr.f32.mxu0 %v825_v57  ;;  %1104 = vperm.xlu1 %3768, %v4723_v12   ;;  %v747_v12 = vld [vmem:[%s4229_s13 + $0x98] sm:$0xff]  ;;  %6319 = vst [vmem:[#allocation28_spill] sm:$0xff] %v4748_v1 }
 0x197   : > { %v4731_v6 = vpop.permute.xlu0 %1455  ;;  %v4736_v18 = vpop.trf.xlu1 }
 0x198   : > { %6314 = vst [vmem:[#allocation23_spill] sm:$0xff] %v4731_v6  ;;  %6316 = vst [vmem:[#allocation25_spill] sm:$0xff] %v4736_v18  ;;  %1659 = vperm.xlu0 %3655, %v4727_v24   ;;  %v3689_v57 = vunpack.i.l.bf16 %v4736_v18  ;;  %v828_v6 = vunpack.c.l.bf16 %v746_v56  ;;  %v748_v18 = vld [vmem:[%s4229_s13 + $0xa0] sm:$0xff]  ;;  %v6324_v56 = vmov 0  }
 0x199   : > { %2010 = vmatmul.mubr.f32.gmra.mxu0 %v824_v7 }
 0x19a   : > { %2014 = vmatprep.mubr.f32.mxu0 %v827_v46  ;;  %1114 = vperm.xlu1 %3768, %v4734_v17   ;;  %v831_v46 = vunpack.c.h.bf16 %v747_v12 }
 0x19b   : > { %2794 = vmatprep.mubr.f32.mxu1 %v3689_v57  ;;  %v4745_v7 = vpop.permute.xlu0 %1447  ;;  %v4750_v24 = vpop.trf.xlu1  ;;  %v4758_v57 = vld [vmem:[%s4239_s19 + $0xb8] sm:$0xff] }
 0x19c   : > { %6318 = vst [vmem:[#allocation27_spill] sm:$0xff] %v4745_v7  ;;  %6320 = vst [vmem:[#allocation29_spill] sm:$0xff] %v4750_v24  ;;  %1655 = vperm.xlu0 %3655, %v4741_v16   ;;  %v833_v24 = vunpack.c.h.bf16 %v748_v18  ;;  %v751_v16 = vld [vmem:[%s4229_s13 + $0xb8] sm:$0xff] }
 0x19d   : > { %2015 = vmatmul.mubr.f32.gmra.mxu0 %v826_v45  ;;  %6322 = vst [vmem:[#allocation31_spill] sm:$0xff] %v4758_v57  ;;  %v830_v45 = vunpack.c.l.bf16 %v747_v12  ;;  %v832_v12 = vunpack.c.l.bf16 %v748_v18 }
 0x19e   : > { %2019 = vmatprep.mubr.f32.mxu0 %v829_v15  ;;  %1124 = vperm.xlu1 %3768, %v4748_v1   ;;  %v749_v15 = vld [vmem:[%s4229_s13 + $0xa8] sm:$0xff] }
 0x19f   : > { %v4755_v17 = vpop.permute.xlu0 %1439  ;;  %v4760_v7 = vpop.trf.xlu1  ;;  %v4767_v1 = vld [vmem:[%s4239_s19 + $0x8] sm:$0xff] }
 0x1a0   : > { %6321 = vst [vmem:[#allocation30_spill] sm:$0xff] %v4755_v17  ;;  %6323 = vst [vmem:[#allocation32_spill] sm:$0xff] %v4760_v7  ;;  %3770 = vset.pattern.permute.xlu0 %v6324_v56 }
 0x1a1   : > { %2020 = vmatmul.mubr.f32.gmra.mxu0 %v828_v6  ;;  %1019 = vperm.xlu0 %3770, %v4501_v25   ;;  %v4772_v6 = vld [vmem:[%s4239_s19 + $0xc8] sm:$0xff]  ;;  %v750_v25 = vld [vmem:[%s4229_s13 + $0xb0] sm:$0xff] }
 0x1a2   : > { %2024 = vmatprep.mubr.f32.mxu0 %v831_v46  ;;  %1134 = vperm.xlu1 %3768, %v4758_v57   ;;  %6326 = vst [vmem:[#allocation34_spill] sm:$0xff] %v4772_v6  ;;  %v835_v46 = vunpack.c.h.bf16 %v749_v15  ;;  %v4782_v57 = vld [vmem:[%s4239_s19 + $0xd8] sm:$0xff]  ;;  %v837_v18 = vunpack.c.h.bf16 %v750_v25 }
 0x1a3   : > { %v4769_v17 = vpop.permute.xlu0 %1431  ;;  %v4774_v7 = vpop.trf.xlu1 }
 0x1a4   : > { %6325 = vst [vmem:[#allocation33_spill] sm:$0xff] %v4769_v17  ;;  %6327 = vst [vmem:[#allocation35_spill] sm:$0xff] %v4774_v7  ;;  %v2381_v7 = vunpack.c.h.bf16 %v4402_v30 }
 0x1a5   : > { %2025 = vmatmul.mubr.f32.gmra.mxu0 %v830_v45  ;;  %1024 = vperm.xlu0 %3770, %v4767_v1   ;;  %v834_v45 = vunpack.c.l.bf16 %v749_v15  ;;  %v836_v15 = vunpack.c.l.bf16 %v750_v25  ;;  %v4808_v25 = vld [vmem:[%s4239_s19 + $0xf8] sm:$0xff] }
 0x1a6   : > { %2029 = vmatprep.mubr.f32.mxu0 %v833_v24  ;;  %1144 = vperm.xlu1 %3768, %v4772_v6   ;;  %v2349_v24 = vunpack.c.h.bf16 %v4395_v28  ;;  %v752_v28 = vld [vmem:[%s4229_s13 + $0xc0] sm:$0xff]  ;;  %v2383_v6 = vunpack.c.h.bf16 %v4413_v37  ;;  %v2385_v37 = vunpack.c.h.bf16 %v4423_v43  ;;  %v2387_v43 = vunpack.c.h.bf16 %v4437_v51 }
 0x1a7   : > { %v4779_v56 = vpop.permute.xlu0 %1423  ;;  %v4784_v17 = vpop.trf.xlu1  ;;  %v2389_v51 = vunpack.c.h.bf16 %v4451_v59  ;;  %v2359_v59 = vunpack.c.h.bf16 %v4462_v2  ;;  %v2361_v2 = vunpack.c.h.bf16 %v4476_v10  ;;  %v2363_v10 = vunpack.c.h.bf16 %v4493_v22 }
 0x1a8   : > { %6328 = vst [vmem:[#allocation36_spill] sm:$0xff] %v4779_v56  ;;  %6329 = vst [vmem:[#allocation37_spill] sm:$0xff] %v4784_v17  ;;  %v4800_v30 = vpack.i.bf16 %v2349_v24, %v2381_v7  ;;  %v753_v7 = vld [vmem:[%s4229_s13 + $0xc8] sm:$0xff]  ;;  %v2365_v22 = vunpack.c.h.bf16 %v4508_v35  ;;  %v2367_v35 = vunpack.c.h.bf16 %v4522_v48  ;;  %v2369_v48 = vunpack.c.h.bf16 %v4536_v62 }
 0x1a9   : > { %2030 = vmatmul.mubr.f32.gmra.mxu0 %v832_v12  ;;  %1039 = vperm.xlu0 %3770, %v4469_v4   ;;  %v4794_v12 = vld [vmem:[%s4239_s19 + $0xe8] sm:$0xff]  ;;  %v2351_v4 = vunpack.c.h.bf16 %v4410_v36  ;;  %v2353_v36 = vunpack.c.h.bf16 %v4420_v42  ;;  %v2355_v42 = vunpack.c.h.bf16 %v4434_v50  ;;  %v2357_v50 = vunpack.c.h.bf16 %v4448_v58  ;;  %v756_v58 = vld [vmem:[%s4229_s13 + $0xe0] sm:$0xff] }
 0x1aa   : > { %2034 = vmatprep.mubr.f32.mxu0 %v835_v46  ;;  %1154 = vperm.xlu1 %3768, %v4782_v57   ;;  %v839_v46 = vunpack.c.h.bf16 %v751_v16  ;;  %v2371_v62 = vunpack.c.h.bf16 %v4550_v9  ;;  %v6348_v9 = vmov 1  }
 0x1ab   : > { %v4791_v56 = vpop.permute.xlu0 %1415  ;;  %v4796_v17 = vpop.trf.xlu1  ;;  %v4817_v24 = vpack.i.bf16 %v2351_v4, %v2383_v6  ;;  %v4828_v6 = vpack.i.bf16 %v2353_v36, %v2385_v37  ;;  %v4842_v36 = vpack.i.bf16 %v2355_v42, %v2387_v43 }
 0x1ac   : > { %6330 = vst [vmem:[#allocation38_spill] sm:$0xff] %v4796_v17  ;;  %v838_v17 = vunpack.c.l.bf16 %v751_v16  ;;  %v840_v16 = vunpack.c.l.bf16 %v752_v28 }
 0x1ad   : > { %2035 = vmatmul.mubr.f32.gmra.mxu0 %v834_v45  ;;  %1049 = vperm.xlu0 %3770, %v4455_v60   ;;  %v841_v60 = vunpack.c.h.bf16 %v752_v28 }
 0x1ae   : > { %2039 = vmatprep.mubr.f32.mxu0 %v837_v18  ;;  %1164 = vperm.xlu1 %3768, %v4794_v12  }
 0x1af   : > { %v4805_v45 = vpop.permute.xlu0 %1407  ;;  %v4810_v18 = vpop.trf.xlu1 }
 0x1b0   : > { %6331 = vst [vmem:[#allocation39_spill] sm:$0xff] %v4805_v45  ;;  %6332 = vst [vmem:[#allocation40_spill] sm:$0xff] %v4810_v18 }
 0x1b1   : > { %2040 = vmatmul.mubr.f32.gmra.mxu0 %v836_v15  ;;  %1059 = vperm.xlu0 %3770, %v4441_v52   ;;  %v754_v52 = vld [vmem:[%s4229_s13 + $0xd0] sm:$0xff] }
 0x1b2   : > { %2044 = vmatprep.mubr.f32.mxu0 %v839_v46  ;;  %1174 = vperm.xlu1 %3768, %v4808_v25   ;;  %v843_v46 = vunpack.c.h.bf16 %v753_v7 }
 0x1b3   : > { %v4819_v15 = vpop.permute.xlu0 %1527  ;;  %v4821_v45 = vpop.trf.xlu1 }
 0x1b4   : > { %6333 = vst [vmem:[#allocation41_spill] sm:$0xff] %v4819_v15  ;;  %6334 = vst [vmem:[#allocation42_spill] sm:$0xff] %v4821_v45 }
 0x1b5   : > { %2045 = vmatmul.mubr.f32.gmra.mxu0 %v838_v17  ;;  %1069 = vperm.xlu0 %3770, %v4427_v44   ;;  %v842_v17 = vunpack.c.l.bf16 %v753_v7  ;;  %v755_v44 = vld [vmem:[%s4229_s13 + $0xd8] sm:$0xff]  ;;  %v844_v7 = vunpack.c.l.bf16 %v754_v52 }
 0x1b6   : > { %2049 = vmatprep.mubr.f32.mxu0 %v841_v60  ;;  %1184 = vperm.xlu1 %3768, %v4710_v21   ;;  %v845_v60 = vunpack.c.h.bf16 %v754_v52  ;;  %v4840_v21 = vld [vmem:[%s4239_s19 + $0x70] sm:$0xff]  ;;  %v846_v52 = vunpack.c.l.bf16 %v755_v44 }
 0x1b7   : > { %v4830_v4 = vpop.permute.xlu0 %1519  ;;  %v4832_v28 = vpop.trf.xlu1 }
 0x1b8   : > { %6335 = vst [vmem:[#allocation43_spill] sm:$0xff] %v4830_v4  ;;  %6336 = vst [vmem:[#allocation44_spill] sm:$0xff] %v4832_v28 }
 0x1b9   : > { %2050 = vmatmul.mubr.f32.gmra.mxu0 %v840_v16  ;;  %1079 = vperm.xlu0 %3770, %v4399_v29   ;;  %v847_v29 = vunpack.c.h.bf16 %v755_v44  ;;  %v848_v44 = vunpack.c.l.bf16 %v756_v58 }
 0x1ba   : > { %2054 = vmatprep.mubr.f32.mxu0 %v843_v46  ;;  %1194 = vperm.xlu1 %3768, %v4692_v20   ;;  %v2391_v20 = vunpack.c.h.bf16 %v4465_v3  ;;  %v4853_v46 = vpack.i.bf16 %v2357_v50, %v2389_v51  ;;  %v2393_v3 = vunpack.c.h.bf16 %v4479_v11  ;;  %v2395_v11 = vunpack.c.h.bf16 %v4496_v23 }
 0x1bb   : > { %v4844_v37 = vpop.permute.xlu0 %1511  ;;  %v4846_v16 = vpop.trf.xlu1  ;;  %v2397_v23 = vunpack.c.h.bf16 %v4511_v38  ;;  %v2399_v38 = vunpack.c.h.bf16 %v4525_v49  ;;  %v2401_v49 = vunpack.c.h.bf16 %v4539_v63  ;;  %v2403_v63 = vunpack.c.h.bf16 %v4553_v13 }
 0x1bc   : > { %6337 = vst [vmem:[#allocation45_spill] sm:$0xff] %v4844_v37  ;;  %6338 = vst [vmem:[#allocation46_spill] sm:$0xff] %v4846_v16  ;;  %v6382_v37 = vmov 0  }
 0x1bd   : > { %2055 = vmatmul.mubr.f32.gmra.mxu0 %v842_v17  ;;  %1089 = vperm.xlu0 %3770, %v4840_v21   ;;  %v849_v17 = vunpack.c.h.bf16 %v756_v58  ;;  %v4928_v13 = vpack.i.bf16 %v2371_v62, %v2403_v63 }
 0x1be   : > { %2059 = vmatprep.mubr.f32.mxu0 %v845_v60  ;;  %1204 = vperm.xlu1 %3768, %v4674_v32   ;;  %v757_v60 = vld [vmem:[%s4229_s13 + $0xe8] sm:$0xff]  ;;  %v4864_v32 = vpack.i.bf16 %v2359_v59, %v2391_v20 }
 0x1bf   : > { %v4855_v42 = vpop.permute.xlu0 %1503  ;;  %v4857_v43 = vpop.trf.xlu1  ;;  %v850_v58 = vunpack.c.l.bf16 %v757_v60 }
 0x1c0   : > { %6339 = vst [vmem:[#allocation47_spill] sm:$0xff] %v4855_v42  ;;  %6340 = vst [vmem:[#allocation48_spill] sm:$0xff] %v4857_v43 }
 0x1c1   : > { %2060 = vmatmul.mubr.f32.gmra.mxu0 %v844_v7  ;;  %1099 = vperm.xlu0 %3770, %v4607_v34   ;;  %v851_v7 = vunpack.c.h.bf16 %v757_v60  ;;  %v758_v34 = vld [vmem:[%s4229_s13 + $0xf0] sm:$0xff] }
 0x1c2   : > { %2064 = vmatprep.mubr.f32.mxu0 %v847_v29  ;;  %1214 = vperm.xlu1 %3768, %v4656_v40   ;;  %v4875_v40 = vpack.i.bf16 %v2361_v2, %v2393_v3  ;;  %v853_v20 = vunpack.c.h.bf16 %v758_v34 }
 0x1c3   : > { %v4866_v50 = vpop.permute.xlu0 %1495  ;;  %v4868_v51 = vpop.trf.xlu1 }
 0x1c4   : > { %6341 = vst [vmem:[#allocation49_spill] sm:$0xff] %v4866_v50  ;;  %6342 = vst [vmem:[#allocation50_spill] sm:$0xff] %v4868_v51  ;;  %v6370_v51 = vld [vmem:[#allocation31_spill] sm:$0xff]  ;;  %v6376_v50 = vld [vmem:[#allocation21_spill] sm:$0xff] }
 0x1c5   : > { %2065 = vmatmul.mubr.f32.gmra.mxu0 %v846_v52  ;;  %1109 = vperm.xlu0 %3770, %v4599_v8   ;;  %v759_v8 = vld [vmem:[%s4229_s13 + $0xf8] sm:$0xff] }
 0x1c6   : > { %2069 = vmatprep.mubr.f32.mxu0 %v849_v17  ;;  %1224 = vperm.xlu1 %3768, %v4645_v19   ;;  %v4886_v19 = vpack.i.bf16 %v2363_v10, %v2395_v11  ;;  %v852_v17 = vunpack.c.l.bf16 %v758_v34  ;;  %v855_v2 = vunpack.c.h.bf16 %v759_v8  ;;  %v1001_v11 = vld [vmem:[%s4239_s19 + $0x188] sm:$0xff] }
 0x1c7   : > { %v4877_v29 = vpop.permute.xlu0 %1487  ;;  %v4879_v59 = vpop.trf.xlu1 }
 0x1c8   : > { %6343 = vst [vmem:[#allocation51_spill] sm:$0xff] %v4879_v59 }
 0x1c9   : > { %2070 = vmatmul.mubr.f32.gmra.mxu0 %v848_v44  ;;  %1119 = vperm.xlu0 %3770, %v4585_v55   ;;  %v760_v55 = vld [vmem:[%s4229_s13 + $0x100] sm:$0xff]  ;;  %v854_v44 = vunpack.c.l.bf16 %v759_v8 }
 0x1ca   : > { %2074 = vmatprep.mubr.f32.mxu0 %v851_v7  ;;  %1234 = vperm.xlu1 %3768, %v4635_v5   ;;  %v4897_v5 = vpack.i.bf16 %v2365_v22, %v2397_v23  ;;  %v857_v34 = vunpack.c.h.bf16 %v760_v55 }
 0x1cb   : > { %v4888_v52 = vpop.permute.xlu0 %1479  ;;  %v4890_v60 = vpop.trf.xlu1 }
 0x1cc   : > { %6344 = vst [vmem:[#allocation52_spill] sm:$0xff] %v4890_v60 }
 0x1cd   : > { %2075 = vmatmul.mubr.f32.gmra.mxu0 %v850_v58  ;;  %1129 = vperm.xlu0 %3770, %v4571_v33   ;;  %v761_v33 = vld [vmem:[%s4229_s13 + $0x108] sm:$0xff]  ;;  %v856_v58 = vunpack.c.l.bf16 %v760_v55  ;;  %v2405_v55 = vunpack.c.h.bf16 %v4567_v31  ;;  %v2407_v31 = vunpack.c.h.bf16 %v4581_v54 }
 0x1ce   : > { %2079 = vmatprep.mubr.f32.mxu0 %v853_v20  ;;  %1244 = vperm.xlu1 %3768, %v4625_v26   ;;  %v4908_v26 = vpack.i.bf16 %v2367_v35, %v2399_v38  ;;  %v859_v8 = vunpack.c.h.bf16 %v761_v33  ;;  %v858_v23 = vunpack.c.l.bf16 %v761_v33  ;;  %v6353_v54 = vld [vmem:[#allocation17_spill] sm:$0xff] }
 0x1cf   : > { %v4899_v3 = vpop.permute.xlu0 %1471  ;;  %v4901_v7 = vpop.trf.xlu1 }
 0x1d0   : > { %6345 = vst [vmem:[#allocation53_spill] sm:$0xff] %v4901_v7 }
 0x1d1   : > { %2080 = vmatmul.mubr.f32.gmra.mxu0 %v852_v17  ;;  %1139 = vperm.xlu0 %3770, %v4557_v14   ;;  %v762_v14 = vld [vmem:[%s4229_s13 + $0x110] sm:$0xff] }
 0x1d2   : > { %2084 = vmatprep.mubr.f32.mxu0 %v855_v2  ;;  %1254 = vperm.xlu1 %3768, %v4615_v61   ;;  %v4919_v61 = vpack.i.bf16 %v2369_v48, %v2401_v49  ;;  %v861_v17 = vunpack.c.h.bf16 %v762_v14  ;;  %v763_v2 = vld [vmem:[%s4229_s13 + $0x118] sm:$0xff]  ;;  %v860_v38 = vunpack.c.l.bf16 %v762_v14 }
 0x1d3   : > { %v4910_v10 = vpop.permute.xlu0 %1595  ;;  %v4913_v20 = vpop.trf.xlu1  ;;  %v6350_v49 = vld [vmem:[#allocation19_spill] sm:$0xff] }
 0x1d4   : > { %6346 = vst [vmem:[#allocation54_spill] sm:$0xff] %v4913_v20 }
 0x1d5   : > { %2085 = vmatmul.mubr.f32.gmra.mxu0 %v854_v44  ;;  %1149 = vperm.xlu0 %3770, %v4543_v0   ;;  %v2373_v0 = vunpack.c.h.bf16 %v4564_v27  ;;  %v863_v44 = vunpack.c.h.bf16 %v763_v2  ;;  %v2375_v27 = vunpack.c.h.bf16 %v4578_v47 }
 0x1d6   : > { %2089 = vmatprep.mubr.f32.mxu0 %v857_v34  ;;  %1264 = vperm.xlu1 %3768, %v1001_v11   ;;  %v765_v11 = vld [vmem:[%s4229_s13 + $0x128] sm:$0xff] }
 0x1d7   : > { %v4921_v22 = vpop.permute.xlu0 %1591  ;;  %v4937_v34 = vpack.i.bf16 %v2373_v0, %v2405_v55  ;;  %v4946_v14 = vpack.i.bf16 %v2375_v27, %v2407_v31  ;;  %v867_v63 = vunpack.c.h.bf16 %v765_v11  ;;  %v6355_v0 = vld [vmem:[#allocation16_spill] sm:$0xff]  ;;  %v6356_v27 = vld [vmem:[#allocation15_spill] sm:$0xff] }
 0x1d8   : > { %6347 = vst [vmem:[#allocation55_spill] sm:$0xff] %v4921_v22  ;;  %v767_v31 = vld [vmem:[%s4229_s13 + $0x138] sm:$0xff]  ;;  %v777_v22 = vld [vmem:[%s4229_s13 + $0x188] sm:$0xff] }
 0x1d9   : > { %2090 = vmatmul.mubr.f32.gmra.mxu0 %v856_v58  ;;  %1159 = vperm.xlu0 %3770, %v4529_v53   ;;  %v764_v53 = vld [vmem:[%s4229_s13 + $0x120] sm:$0xff]  ;;  %v891_v45 = vunpack.c.h.bf16 %v777_v22 }
 0x1da   : > { %2094 = vmatprep.mubr.f32.mxu0 %v859_v8  ;;  %3769 = vset.pattern.permute.xlu1 %v6348_v9  ;;  %v865_v48 = vunpack.c.h.bf16 %v764_v53  ;;  %v6352_v8 = vld [vmem:[#allocation6_spill] sm:$0xff]  ;;  %v864_v62 = vunpack.c.l.bf16 %v764_v53 }
 0x1db   : > { %1463 = vperm.xlu1 %3769, %v4840_v21   ;;  %v4931_v35 = vpop.permute.xlu0 %1587  ;;  %v862_v21 = vunpack.c.l.bf16 %v763_v2  ;;  %v2409_v47 = vunpack.c.h.bf16 %v6352_v8  ;;  %v6357_v53 = vld [vmem:[#allocation14_spill] sm:$0xff]  ;;  %v6359_v8 = vld [vmem:[#allocation13_spill] sm:$0xff] }
 0x1dd   : > { %2095 = vmatmul.mubr.f32.gmra.mxu0 %v858_v23  ;;  %1169 = vperm.xlu0 %3770, %v4515_v39   ;;  %v6351_v39 = vld [vmem:[#allocation5_spill] sm:$0xff]  ;;  %v6354_v23 = vld [vmem:[#allocation18_spill] sm:$0xff] }
 0x1de   : > { %2099 = vmatprep.mubr.f32.mxu0 %v861_v17  ;;  %v2377_v58 = vunpack.c.h.bf16 %v6351_v39  ;;  %v766_v17 = vld [vmem:[%s4229_s13 + $0x130] sm:$0xff]  ;;  %v6358_v39 = vld [vmem:[#allocation12_spill] sm:$0xff] }
 0x1df   : > { %1459 = vperm.xlu1 %3769, %v4706_v41   ;;  %v4940_v33 = vpop.permute.xlu0 %1583 }
 0x1e0   : > { %6349 = vst [vmem:[#allocation56_spill] sm:$0xff] %v4940_v33  ;;  %v4953_v2 = vpack.i.bf16 %v2377_v58, %v2409_v47  ;;  %v768_v58 = vld [vmem:[%s4229_s13 + $0x140] sm:$0xff]  ;;  %v870_v47 = vunpack.c.l.bf16 %v767_v31 }
 0x1e1   : > { %2100 = vmatmul.mubr.f32.gmra.mxu0 %v860_v38  ;;  %1179 = vperm.xlu0 %3770, %v6350_v49   ;;  %v866_v38 = vunpack.c.l.bf16 %v765_v11  ;;  %v871_v49 = vunpack.c.h.bf16 %v767_v31  ;;  %v770_v31 = vld [vmem:[%s4229_s13 + $0x150] sm:$0xff] }
 0x1e2   : > { %2104 = vmatprep.mubr.f32.mxu0 %v863_v44  ;;  %v869_v44 = vunpack.c.h.bf16 %v766_v17 }
 0x1e3   : > { %1451 = vperm.xlu1 %3769, %v6353_v54   ;;  %v4949_v41 = vpop.permute.xlu0 %1579  ;;  %v873_v54 = vunpack.c.h.bf16 %v768_v58 }
 0x1e5   : > { %2105 = vmatmul.mubr.f32.gmra.mxu0 %v862_v21  ;;  %1189 = vperm.xlu0 %3770, %v6354_v23   ;;  %v769_v23 = vld [vmem:[%s4229_s13 + $0x148] sm:$0xff] }
 0x1e6   : > { %2109 = vmatprep.mubr.f32.mxu0 %v865_v48  ;;  %v868_v48 = vunpack.c.l.bf16 %v766_v17  ;;  %v6361_v17 = vld [vmem:[#allocation11_spill] sm:$0xff] }
 0x1e7   : > { %1443 = vperm.xlu1 %3769, %v6355_v0   ;;  %v4956_v55 = vpop.permute.xlu0 %1575 }
 0x1e9   : > { %2110 = vmatmul.mubr.f32.gmra.mxu0 %v864_v62  ;;  %1199 = vperm.xlu0 %3770, %v6356_v27  }
 0x1ea   : > { %2114 = vmatprep.mubr.f32.mxu0 %v867_v63  ;;  %v6360_v63 = vld [vmem:[#allocation10_spill] sm:$0xff] }
 0x1eb   : > { %1435 = vperm.xlu1 %3769, %v6357_v53   ;;  %v4961_v21 = vpop.permute.xlu0 %1571  ;;  %v6362_v53 = vld [vmem:[#allocation9_spill] sm:$0xff] }
 0x1ed   : > { %2115 = vmatmul.mubr.f32.gmra.mxu0 %v866_v38  ;;  %1209 = vperm.xlu0 %3770, %v6358_v39   ;;  %v872_v38 = vunpack.c.l.bf16 %v768_v58  ;;  %v877_v39 = vunpack.c.h.bf16 %v770_v31  ;;  %v6363_v58 = vld [vmem:[#allocation8_spill] sm:$0xff] }
 0x1ee   : > { %2119 = vmatprep.mubr.f32.mxu0 %v869_v44  ;;  %v875_v44 = vunpack.c.h.bf16 %v769_v23 }
 0x1ef   : > { %1427 = vperm.xlu1 %3769, %v6359_v8   ;;  %v4966_v11 = vpop.permute.xlu0 %1567 }
 0x1f1   : > { %2120 = vmatmul.mubr.f32.gmra.mxu0 %v868_v48  ;;  %v4968_v62 = vpop.permute.xlu1 %1029  ;;  %1219 = vperm.xlu0 %3770, %v6360_v63  }
 0x1f2   : > { %2124 = vmatprep.mubr.f32.mxu0 %v871_v49  ;;  %v874_v49 = vunpack.c.l.bf16 %v769_v23  ;;  %v772_v23 = vld [vmem:[%s4229_s13 + $0x160] sm:$0xff] }
 0x1f3   : > { %1419 = vperm.xlu1 %3769, %v6361_v17   ;;  %v4973_v0 = vpop.permute.xlu0 %1563 }
 0x1f5   : > { %2125 = vmatmul.mubr.f32.gmra.mxu0 %v870_v47  ;;  %v4975_v27 = vpop.permute.xlu1 %1034  ;;  %1229 = vperm.xlu0 %3770, %v6362_v53   ;;  %v771_v47 = vld [vmem:[%s4229_s13 + $0x158] sm:$0xff] }
 0x1f6   : > { %2129 = vmatprep.mubr.f32.mxu0 %v873_v54  ;;  %v879_v63 = vunpack.c.h.bf16 %v771_v47 }
 0x1f7   : > { %1411 = vperm.xlu1 %3769, %v4767_v1   ;;  %v4980_v48 = vpop.permute.xlu0 %1559  ;;  %v876_v1 = vunpack.c.l.bf16 %v770_v31  ;;  %v773_v31 = vld [vmem:[%s4229_s13 + $0x168] sm:$0xff] }
 0x1f9   : > { %2130 = vmatmul.mubr.f32.gmra.mxu0 %v872_v38  ;;  %v4982_v8 = vpop.permute.xlu1 %1044  ;;  %1239 = vperm.xlu0 %3770, %v6363_v58   ;;  %v6364_v38 = vld [vmem:[#allocation7_spill] sm:$0xff] }
 0x1fa   : > { %2134 = vmatprep.mubr.f32.mxu0 %v875_v44  ;;  %v4994_v44 = vld [vmem:[%s4239_s19 + $0x180] sm:$0xff] }
 0x1fb   : > { %1531 = vperm.xlu1 %3769, %v4808_v25   ;;  %v4987_v54 = vpop.permute.xlu0 %1555  ;;  %6365 = vst [vmem:[#allocation19_spill] sm:$0xff] %v4994_v44  ;;  %v878_v25 = vunpack.c.l.bf16 %v771_v47  ;;  %v6366_v47 = vld [vmem:[#allocation22_spill] sm:$0xff] }
 0x1fd   : > { %2135 = vmatmul.mubr.f32.gmra.mxu0 %v874_v49  ;;  %v4989_v17 = vpop.permute.xlu1 %1054  ;;  %1249 = vperm.xlu0 %3770, %v6364_v38   ;;  %v881_v49 = vunpack.c.h.bf16 %v772_v23  ;;  %v883_v38 = vunpack.c.h.bf16 %v773_v31 }
 0x1fe   : > { %2139 = vmatprep.mubr.f32.mxu0 %v877_v39 }
 0x1ff   : > { %1523 = vperm.xlu1 %3769, %v4794_v12   ;;  %v4997_v53 = vpop.permute.xlu0 %1551  ;;  %v880_v12 = vunpack.c.l.bf16 %v772_v23  ;;  %v775_v23 = vld [vmem:[%s4229_s13 + $0x178] sm:$0xff] }
 0x200   : > { %v887_v43 = vunpack.c.h.bf16 %v775_v23 }
 0x201   : > { %2140 = vmatmul.mubr.f32.gmra.mxu0 %v876_v1  ;;  %v4999_v58 = vpop.permute.xlu1 %1064  ;;  %1259 = vperm.xlu0 %3770, %v4994_v44   ;;  %v774_v1 = vld [vmem:[%s4229_s13 + $0x170] sm:$0xff] }
 0x202   : > { %2144 = vmatprep.mubr.f32.mxu0 %v879_v63  ;;  %v6367_v63 = vld [vmem:[#allocation34_spill] sm:$0xff]  ;;  %v885_v60 = vunpack.c.h.bf16 %v774_v1 }
 0x203   : > { %1515 = vperm.xlu1 %3769, %v4782_v57   ;;  %v5004_v39 = vpop.permute.xlu0 %1547  ;;  %v882_v57 = vunpack.c.l.bf16 %v773_v31  ;;  %v776_v31 = vld [vmem:[%s4229_s13 + $0x180] sm:$0xff]  ;;  %v782_v44 = vld [vmem:[%s4229_s13 + $0x1b0] sm:$0xff] }
 0x205   : > { %2145 = vmatmul.mubr.f32.gmra.mxu0 %v878_v25  ;;  %v5006_v20 = vpop.permute.xlu1 %1074  ;;  %1334 = vperm.xlu0 %3770, %v6366_v47   ;;  %v6369_v25 = vld [vmem:[#allocation26_spill] sm:$0xff] }
 0x206   : > { %2149 = vmatprep.mubr.f32.mxu0 %v881_v49  ;;  %v1013_v49 = vld [vmem:[%s4239_s19 + $0x1e8] sm:$0xff] }
 0x207   : > { %1507 = vperm.xlu1 %3769, %v6367_v63   ;;  %v5011_v7 = vpop.permute.xlu0 %1543  ;;  %v884_v63 = vunpack.c.l.bf16 %v774_v1  ;;  %v888_v1 = vunpack.c.l.bf16 %v776_v31 }
 0x208   : > { %6368 = vst [vmem:[#allocation5_spill] sm:$0xff] %v5011_v7  ;;  %v1012_v7 = vld [vmem:[%s4239_s19 + $0x1e0] sm:$0xff] }
 0x209   : > { %2150 = vmatmul.mubr.f32.gmra.mxu0 %v880_v12  ;;  %v5013_v59 = vpop.permute.xlu1 %1084  ;;  %1329 = vperm.xlu0 %3770, %v6369_v25   ;;  %v886_v25 = vunpack.c.l.bf16 %v775_v23 }
 0x20a   : > { %2154 = vmatprep.mubr.f32.mxu0 %v883_v38  ;;  %v6371_v38 = vld [vmem:[#allocation28_spill] sm:$0xff] }
 0x20b   : > { %1499 = vperm.xlu1 %3769, %v6370_v51   ;;  %v5019_v47 = vpop.permute.xlu0 %1539  ;;  %v889_v51 = vunpack.c.h.bf16 %v776_v31 }
 0x20d   : > { %2155 = vmatmul.mubr.f32.gmra.mxu0 %v882_v57  ;;  %v5021_v12 = vpop.permute.xlu1 %1094  ;;  %1324 = vperm.xlu0 %3770, %v1013_v49   ;;  %v6373_v57 = vld [vmem:[#allocation24_spill] sm:$0xff] }
 0x20e   : > { %2159 = vmatprep.mubr.f32.mxu0 %v885_v60 }
 0x20f   : > { %1491 = vperm.xlu1 %3769, %v6371_v38   ;;  %v5025_v16 = vpop.permute.xlu0 %1535  ;;  %v778_v38 = vld [vmem:[%s4229_s13 + $0x190] sm:$0xff] }
 0x211   : > { %2160 = vmatmul.mubr.f32.gmra.mxu0 %v884_v63  ;;  %v5027_v28 = vpop.permute.xlu1 %1104  ;;  %v890_v63 = vunpack.c.l.bf16 %v777_v22 }
 0x212   : > { %2164 = vmatprep.mubr.f32.mxu0 %v887_v43  ;;  %6372 = vst [vmem:[#allocation6_spill] sm:$0xff] %v5027_v28 }
 0x213   : > { %1483 = vperm.xlu1 %3769, %v6373_v57   ;;  %v5031_v60 = vpop.permute.xlu0 %1659  ;;  %v893_v57 = vunpack.c.h.bf16 %v778_v38 }
 0x214   : > { %6374 = vst [vmem:[#allocation17_spill] sm:$0xff] %v5031_v60 }
 0x215   : > { %2165 = vmatmul.mubr.f32.gmra.mxu0 %v886_v25  ;;  %v5033_v18 = vpop.permute.xlu1 %1114  ;;  %v779_v25 = vld [vmem:[%s4229_s13 + $0x198] sm:$0xff] }
 0x216   : > { %2169 = vmatprep.mubr.f32.mxu0 %v889_v51  ;;  %6375 = vst [vmem:[#allocation18_spill] sm:$0xff] %v5033_v18  ;;  %v892_v18 = vunpack.c.l.bf16 %v778_v38  ;;  %v895_v42 = vunpack.c.h.bf16 %v779_v25 }
 0x217   : > { %1475 = vperm.xlu1 %3769, %v6376_v50   ;;  %v5037_v23 = vpop.permute.xlu0 %1655 }
 0x218   : > { %6377 = vst [vmem:[#allocation16_spill] sm:$0xff] %v5037_v23 }
 0x219   : > { %v5039_v43 = vpop.f32.mrf.mxu0  ;;  %2170 = vmatmul.mubr.f32.gmra.mxu0 %v888_v1  ;;  %v5041_v28 = vpop.permute.xlu1 %1124 }
 0x21a   : > { %6378 = vst [vmem:[#allocation15_spill] sm:$0xff] %v5039_v43  ;;  %2174 = vmatprep.mubr.f32.mxu0 %v891_v45  ;;  %6379 = vst [vmem:[#allocation14_spill] sm:$0xff] %v5041_v28  ;;  %v780_v45 = vld [vmem:[%s4229_s13 + $0x1a0] sm:$0xff] }
 0x21b   : > { %v1933_v31 = vpop.f32.mrf.mxu0  ;;  %1651 = vperm.xlu1 %3769, %v1013_v49   ;;  %v894_v49 = vunpack.c.l.bf16 %v779_v25  ;;  %v897_v38 = vunpack.c.h.bf16 %v780_v45  ;;  %v896_v4 = vunpack.c.l.bf16 %v780_v45  ;;  %v901_v45 = vunpack.c.h.bf16 %v782_v44 }
 0x21c   : > { %v5046_v50 = vpop.permute.xlu0 %1019 }
 0x21d   : > { %v5044_v51 = vpop.f32.mrf.mxu0  ;;  %2175 = vmatmul.mubr.f32.gmra.mxu0 %v890_v63  ;;  %v5048_v1 = vpop.permute.xlu1 %1134 }
 0x21e   : > { %6380 = vst [vmem:[#allocation12_spill] sm:$0xff] %v5044_v51  ;;  %2179 = vmatprep.mubr.f32.mxu0 %v893_v57  ;;  %6381 = vst [vmem:[#allocation13_spill] sm:$0xff] %v5048_v1  ;;  %v781_v1 = vld [vmem:[%s4229_s13 + $0x1a8] sm:$0xff] }
 0x21f   : > { %v1938_v22 = vpop.f32.mrf.mxu0  ;;  %3883 = vset.pattern.permute.xlu1 %v6382_v37  ;;  %v898_v23 = vunpack.c.l.bf16 %v781_v1 }
 0x220   : > { %1319 = vperm.xlu1 %3883, %v1012_v7   ;;  %v5055_v31 = vpop.permute.xlu0 %1024 }
 0x221   : > { %v5053_v28 = vpop.f32.mrf.mxu0  ;;  %2180 = vmatmul.mubr.f32.gmra.mxu0 %v892_v18  ;;  %6384 = vst [vmem:[#allocation11_spill] sm:$0xff] %v5055_v31  ;;  %v5057_v63 = vpop.permute.xlu1 %1144  ;;  %v899_v18 = vunpack.c.h.bf16 %v781_v1  ;;  %v900_v1 = vunpack.c.l.bf16 %v782_v44  ;;  %v5094_v44 = vld [vmem:[%s6244_s5 + $0x1] ss:$0 sm:$0xff] }
 0x222   : > { %6383 = vst [vmem:[#allocation10_spill] sm:$0xff] %v5053_v28  ;;  %2184 = vmatprep.mubr.f32.mxu0 %v895_v42  ;;  %6385 = vst [vmem:[#allocation9_spill] sm:$0xff] %v5057_v63  ;;  %v785_v28 = vld [vmem:[%s4229_s13 + $0x1c8] sm:$0xff] }
 0x223   : > { %v1943_v57 = vpop.f32.mrf.mxu0 }
 0x224   : > { %3884 = vset.pattern.permute.xlu1 %v6348_v9  ;;  %v5063_v15 = vpop.permute.xlu0 %1039  ;;  %v1011_v57 = vld [vmem:[%s4239_s19 + $0x1d8] sm:$0xff] }
 0x225   : > { %v5060_v22 = vpop.f32.mrf.mxu0  ;;  %2185 = vmatmul.mubr.f32.gmra.mxu0 %v894_v49  ;;  %v5065_v25 = vpop.permute.xlu1 %1154  ;;  %1647 = vperm.xlu1 %3884, %v1012_v7   ;;  %v6390_v7 = vld [vmem:[#allocation4_spill] sm:$0xff] }
 0x226   : > { %6386 = vst [vmem:[#allocation8_spill] sm:$0xff] %v5060_v22  ;;  %2189 = vmatprep.mubr.f32.mxu0 %v897_v38  ;;  %6387 = vst [vmem:[#allocation7_spill] sm:$0xff] %v5065_v25  ;;  %v783_v25 = vld [vmem:[%s4229_s13 + $0x1b8] sm:$0xff] }
 0x227   : > { %v1948_v42 = vpop.f32.mrf.mxu0  ;;  %v903_v51 = vunpack.c.h.bf16 %v783_v25 }
 0x228   : > { %v5071_v60 = vpop.permute.xlu0 %1049 }
 0x229   : > { %v5068_v63 = vpop.f32.mrf.mxu0  ;;  %2190 = vmatmul.mubr.f32.gmra.mxu0 %v896_v4  ;;  %v5073_v49 = vpop.permute.xlu1 %1164  ;;  %3885 = vset.pattern.permute.xlu1 %v6382_v37 }
 0x22a   : > { %6388 = vst [vmem:[#allocation22_spill] sm:$0xff] %v5068_v63  ;;  %2194 = vmatprep.mubr.f32.mxu0 %v899_v18  ;;  %6389 = vst [vmem:[#allocation34_spill] sm:$0xff] %v5073_v49  ;;  %1314 = vperm.xlu1 %3885, %v1011_v57   ;;  %v784_v49 = vld [vmem:[%s4229_s13 + $0x1c0] sm:$0xff] }
 0x22b   : > { %v1953_v38 = vpop.f32.mrf.mxu0  ;;  %3772 = vxpose.xlu0.b32.start [1/16] %v6390_v7, 128  ;;  %v902_v7 = vunpack.c.l.bf16 %v783_v25 }
 0x22c   : > { %v5080_v4 = vpop.permute.xlu0 %1059 }
 0x22d   : > { %v5078_v42 = vpop.f32.mrf.mxu0  ;;  %2195 = vmatmul.mubr.f32.gmra.mxu0 %v898_v23  ;;  %v5082_v43 = vpop.permute.xlu1 %1174 }
 0x22e   : > { %6391 = vst [vmem:[#allocation26_spill] sm:$0xff] %v5078_v42  ;;  %2199 = vmatprep.mubr.f32.mxu0 %v901_v45  ;;  %6392 = vst [vmem:[#allocation31_spill] sm:$0xff] %v5082_v43  ;;  %3886 = vset.pattern.permute.xlu1 %v6348_v9  ;;  %v5099_v45 = vld [vmem:[%s6244_s5] ss:$0 sm:$0xff]  ;;  %v905_v43 = vunpack.c.h.bf16 %v784_v49 }
 0x22f   : > { %v1958_v18 = vpop.f32.mrf.mxu0  ;;  %1643 = vperm.xlu1 %3886, %v1011_v57   ;;  %3774 = vxpose.xlu0.b32.cont [2/16] %v4800_v30, 128  ;;  %v1010_v30 = vld [vmem:[%s4239_s19 + $0x1d0] sm:$0xff] }
 0x230   : > { %v5089_v23 = vpop.permute.xlu0 %1069 }
 0x231   : > { %v5087_v38 = vpop.f32.mrf.mxu0  ;;  %2200 = vmatmul.mubr.f32.gmra.mxu0 %v900_v1  ;;  %v1185_v18 = vpop.permute.xlu1 %1184  ;;  %v1699_v1 = vmul.f32 %v5094_v44, %v5019_v47  ;;  %v907_v47 = vunpack.c.h.bf16 %v785_v28 }
 0x232   : > { %2204 = vmatprep.mubr.f32.mxu0 %v903_v51  ;;  %v1374_v25 = vmul.f32 %v5099_v45, %v1185_v18  ;;  %v1701_v18 = vmul.f32 %v5094_v44, %v5004_v39 }
 0x233   : > { %v1963_v57 = vpop.f32.mrf.mxu0  ;;  %3887 = vset.pattern.permute.xlu1 %v6382_v37  ;;  %3776 = vxpose.xlu0.b32.cont [3/16] %v4817_v24, 128  ;;  %v786_v24 = vld [vmem:[%s4229_s13 + $0x1d0] sm:$0xff] }
 0x234   : > { %v5110_v33 = vadd.f32 %v1699_v1, %v1374_v25  ;;  %1309 = vperm.xlu1 %3887, %v1010_v30   ;;  %v5112_v51 = vpop.permute.xlu0 %1079  ;;  %v904_v57 = vunpack.c.l.bf16 %v784_v49  ;;  %v1703_v25 = vmul.f32 %v5094_v44, %v4987_v54 }
 0x235   : > { %v5108_v22 = vpop.f32.mrf.mxu0  ;;  %2205 = vmatmul.mubr.f32.gmra.mxu0 %v902_v7  ;;  %v1195_v63 = vpop.permute.xlu1 %1194 }
 0x236   : > { %6393 = vst [vmem:[#allocation28_spill] sm:$0xff] %v5110_v33  ;;  %2209 = vmatprep.mubr.f32.mxu0 %v905_v43  ;;  %v1376_v42 = vmul.f32 %v5099_v45, %v1195_v63  ;;  %v906_v43 = vunpack.c.l.bf16 %v785_v28  ;;  %v909_v63 = vunpack.c.h.bf16 %v786_v24  ;;  %v787_v33 = vld [vmem:[%s4229_s13 + $0x1d8] sm:$0xff] }
 0x237   : > { %v1968_v31 = vpop.f32.mrf.mxu0  ;;  %3778 = vxpose.xlu0.b32.cont [4/16] %v4828_v6, 128 }
 0x238   : > { %v5121_v7 = vadd.f32 %v1701_v18, %v1376_v42  ;;  %3888 = vset.pattern.permute.xlu1 %v6348_v9  ;;  %v5124_v31 = vpop.permute.xlu0 %1089 }
 0x239   : > { %v5119_v1 = vpop.f32.mrf.mxu0  ;;  %2210 = vmatmul.mubr.f32.gmra.mxu0 %v904_v57  ;;  %v1205_v49 = vpop.permute.xlu1 %1204  ;;  %1639 = vperm.xlu1 %3888, %v1010_v30   ;;  %v1009_v57 = vld [vmem:[%s4239_s19 + $0x1c8] sm:$0xff]  ;;  %v908_v30 = vunpack.c.l.bf16 %v786_v24 }
 0x23a   : > { %6394 = vst [vmem:[#allocation24_spill] sm:$0xff] %v5121_v7  ;;  %2214 = vmatprep.mubr.f32.mxu0 %v907_v47  ;;  %v1378_v6 = vmul.f32 %v5099_v45, %v1205_v49  ;;  %v1682_v47 = vmul.f32 %v5094_v44, %v4899_v3  ;;  %v1705_v7 = vmul.f32 %v5094_v44, %v4973_v0 }
 0x23b   : > { %v1973_v39 = vpop.f32.mrf.mxu0  ;;  %3780 = vxpose.xlu0.b32.cont [5/16] %v4842_v36, 128  ;;  %v911_v36 = vunpack.c.h.bf16 %v787_v33 }
 0x23c   : > { %v5134_v18 = vadd.f32 %v1703_v25, %v1378_v6  ;;  %v1100_v28 = vpop.permute.xlu0 %1099 }
 0x23d   : > { %v5131_v42 = vpop.f32.mrf.mxu0  ;;  %2215 = vmatmul.mubr.f32.gmra.mxu0 %v906_v43  ;;  %v1357_v39 = vmul.f32 %v5099_v45, %v1100_v28  ;;  %v1215_v54 = vpop.permute.xlu1 %1214  ;;  %3889 = vset.pattern.permute.xlu1 %v6382_v37  ;;  %v788_v43 = vld [vmem:[%s4229_s13 + $0x1e0] sm:$0xff] }
 0x23e   : > { %6395 = vst [vmem:[#allocation21_spill] sm:$0xff] %v5134_v18  ;;  %2219 = vmatprep.mubr.f32.mxu0 %v909_v63  ;;  %v1380_v25 = vmul.f32 %v5099_v45, %v1215_v54  ;;  %1304 = vperm.xlu1 %3889, %v1009_v57   ;;  %v910_v63 = vunpack.c.l.bf16 %v787_v33 }
 0x23f   : > { %v1978_v49 = vpop.f32.mrf.mxu0  ;;  %v5144_v6 = vadd.f32 %v1682_v47, %v1357_v39  ;;  %3782 = vxpose.xlu0.b32.cont [6/16] %v4853_v46, 128  ;;  %v913_v47 = vunpack.c.h.bf16 %v788_v43  ;;  %v1707_v39 = vmul.f32 %v5094_v44, %v4961_v21  ;;  %v1686_v21 = vmul.f32 %v5094_v44, %v4877_v29 }
 0x240   : > { %v5149_v24 = vadd.f32 %v1705_v7, %v1380_v25  ;;  %v1110_v28 = vpop.permute.xlu0 %1109  ;;  %v1684_v49 = vmul.f32 %v5094_v44, %v4888_v52  ;;  %v789_v7 = vld [vmem:[%s4229_s13 + $0x1e8] sm:$0xff] }
 0x241   : > { %v5147_v3 = vpop.f32.mrf.mxu0  ;;  %2220 = vmatmul.mubr.f32.gmra.mxu0 %v908_v30  ;;  %v1359_v0 = vmul.f32 %v5099_v45, %v1110_v28  ;;  %v1225_v54 = vpop.permute.xlu1 %1224 }
 0x242   : > { %6396 = vst [vmem:[#allocation4_spill] sm:$0xff] %v5149_v24  ;;  %2224 = vmatprep.mubr.f32.mxu0 %v911_v36  ;;  %v1382_v46 = vmul.f32 %v5099_v45, %v1225_v54  ;;  %3890 = vset.pattern.permute.xlu1 %v6348_v9  ;;  %v912_v36 = vunpack.c.l.bf16 %v788_v43 }
 0x243   : > { %v1983_v18 = vpop.f32.mrf.mxu0  ;;  %v5159_v30 = vadd.f32 %v1684_v49, %v1359_v0  ;;  %1635 = vperm.xlu1 %3890, %v1009_v57   ;;  %3784 = vxpose.xlu0.b32.cont [7/16] %v4864_v32, 128  ;;  %v1008_v49 = vld [vmem:[%s4239_s19 + $0x1c0] sm:$0xff]  ;;  %v915_v57 = vunpack.c.h.bf16 %v789_v7  ;;  %v1709_v32 = vmul.f32 %v5094_v44, %v4949_v41 }
 0x244   : > { %v5164_v33 = vadd.f32 %v1707_v39, %v1382_v46  ;;  %v1120_v18 = vpop.permute.xlu0 %1119  ;;  %v790_v39 = vld [vmem:[%s4229_s13 + $0x1f0] sm:$0xff] }
 0x245   : > { %v5162_v52 = vpop.f32.mrf.mxu0  ;;  %2225 = vmatmul.mubr.f32.gmra.mxu0 %v910_v63  ;;  %v1361_v25 = vmul.f32 %v5099_v45, %v1120_v18  ;;  %v1235_v28 = vpop.permute.xlu1 %1234 }
 0x246   : > { %6397 = vst [vmem:[#allocation57_spill] sm:$0xff] %v5164_v33  ;;  %2229 = vmatprep.mubr.f32.mxu0 %v913_v47  ;;  %v1384_v0 = vmul.f32 %v5099_v45, %v1235_v28  ;;  %v914_v47 = vunpack.c.l.bf16 %v789_v7  ;;  %v917_v28 = vunpack.c.h.bf16 %v790_v39 }
 0x247   : > { %v1988_v54 = vpop.f32.mrf.mxu0  ;;  %v5174_v46 = vadd.f32 %v1686_v21, %v1361_v25  ;;  %3891 = vset.pattern.permute.xlu1 %v6382_v37  ;;  %3786 = vxpose.xlu0.b32.cont [8/16] %v4875_v40, 128  ;;  %v1711_v21 = vmul.f32 %v5094_v44, %v4931_v35  ;;  %v1356_v25 = vmul.f32 %v5099_v45, %v5021_v12 }
 0x248   : > { %v5180_v43 = vadd.f32 %v1709_v32, %v1384_v0  ;;  %1299 = vperm.xlu1 %3891, %v1008_v49   ;;  %v5182_v63 = vpop.permute.xlu0 %1129  ;;  %v791_v54 = vld [vmem:[%s4229_s13 + $0x1f8] sm:$0xff]  ;;  %v6399_v32 = vld [vmem:[#allocation20_spill] sm:$0xff] }
 0x249   : > { %v5178_v29 = vpop.f32.mrf.mxu0  ;;  %2230 = vmatmul.mubr.f32.gmra.mxu0 %v912_v36  ;;  %v1245_v41 = vpop.permute.xlu1 %1244  ;;  %v1681_v7 = vmul.f32 %v5094_v44, %v6399_v32 }
 0x24a   : > { %6398 = vst [vmem:[#allocation58_spill] sm:$0xff] %v5180_v43  ;;  %2234 = vmatprep.mubr.f32.mxu0 %v915_v57  ;;  %v1386_v40 = vmul.f32 %v5099_v45, %v1245_v41  ;;  %v916_v57 = vunpack.c.l.bf16 %v790_v39  ;;  %v918_v39 = vunpack.c.l.bf16 %v791_v54 }
 0x24b   : > { %v1993_v18 = vpop.f32.mrf.mxu0  ;;  %3788 = vxpose.xlu0.b32.cont [9/16] %v4886_v19, 128  ;;  %v1713_v19 = vmul.f32 %v5094_v44, %v4910_v10  ;;  %v1745_v24 = vadd.f32 %v1681_v7, %v1356_v25 }
 0x24c   : > { %v5195_v0 = vadd.f32 %v1711_v21, %v1386_v40  ;;  %3892 = vset.pattern.permute.xlu1 %v6348_v9  ;;  %v5198_v35 = vpop.permute.xlu0 %1139  ;;  %v919_v18 = vunpack.c.h.bf16 %v791_v54 }
 0x24d   : > { %v5191_v36 = vpop.f32.mrf.mxu0  ;;  %2235 = vmatmul.mubr.f32.gmra.mxu0 %v914_v47  ;;  %v1255_v12 = vpop.permute.xlu1 %1254  ;;  %1631 = vperm.xlu1 %3892, %v1008_v49   ;;  %v1007_v47 = vld [vmem:[%s4239_s19 + $0x1b8] sm:$0xff]  ;;  %v5212_v49 = vld [vmem:[%s6245_s6] ss:$0 sm:$0xff] }
 0x24e   : > { %6400 = vst [vmem:[#allocation20_spill] sm:$0xff] %v5195_v0  ;;  %2239 = vmatprep.mubr.f32.mxu0 %v917_v28  ;;  %v1388_v32 = vmul.f32 %v5099_v45, %v1255_v12 }
 0x24f   : > { %v1998_v41 = vpop.f32.mrf.mxu0  ;;  %3790 = vxpose.xlu0.b32.cont [10/16] %v4897_v5, 128  ;;  %v1816_v5 = vadd.f32 %v5212_v49, %v1745_v24 }
 0x250   : > { %v5205_v40 = vadd.f32 %v1713_v19, %v1388_v32  ;;  %v5207_v33 = vpop.permute.xlu0 %1149  ;;  %v1817_v41 = vadd.f32 %v5212_v49, %v5144_v6 }
 0x251   : > { %v2001_v21 = vpop.f32.mrf.mxu0  ;;  %2240 = vmatmul.mubr.f32.gmra.mxu0 %v916_v57  ;;  %v5214_v28 = vpop.permute.xlu1 %1264  ;;  %3893 = vset.pattern.permute.xlu1 %v6382_v37 }
 0x252   : > { %6401 = vst [vmem:[#allocation59_spill] sm:$0xff] %v5214_v28  ;;  %2244 = vmatprep.mubr.f32.mxu0 %v919_v18  ;;  %1294 = vperm.xlu1 %3893, %v1007_v47   ;;  %v1355_v18 = vmul.f32 %v5099_v45, %v5124_v31 }
 0x253   : > { %v2003_v10 = vpop.f32.mrf.mxu0  ;;  %3792 = vxpose.xlu0.b32.cont [11/16] %v4908_v26, 128 }
 0x254   : > { %v5219_v54 = vpop.permute.xlu0 %1159  ;;  %v1353_v10 = vmul.f32 %v5099_v45, %v5112_v51  ;;  %v1698_v51 = vmul.f32 %v5094_v44, %v5025_v16  ;;  %v1819_v16 = vadd.f32 %v5212_v49, %v5159_v30  ;;  %v6405_v30 = vld [vmem:[#allocation30_spill] sm:$0xff] }
 0x255   : > { %v2006_v25 = vpop.f32.mrf.mxu0  ;;  %2245 = vmatmul.mubr.f32.gmra.mxu0 %v918_v39  ;;  %v6402_v39 = vmov 0.0  }
 0x256   : > { %v2007_v7 = vadd.f32 %v2006_v25, %v1816_v5  ;;  %v1464_v12 = vpop.permute.xlu1 %1463  ;;  %3894 = vset.pattern.permute.xlu1 %v6348_v9  ;;  %v1006_v25 = vld [vmem:[%s4239_s19 + $0x1b0] sm:$0xff] }
 0x257   : > { %v2008_v57 = vpop.f32.mrf.mxu0  ;;  %v1680_v24 = vmul.f32 %v5094_v44, %v1464_v12  ;;  %1627 = vperm.xlu1 %3894, %v1007_v47   ;;  %3794 = vxpose.xlu0.b32.cont [12/16] %v4919_v61, 128  ;;  %v1354_v61 = vmul.f32 %v5099_v45, %v5013_v59 }
 0x258   : > { %2731 = vmatpush1.msra.mxu1 %v2007_v7  ;;  %v5230_v32 = vpop.permute.xlu0 %1169  ;;  %v6403_v7 = vld [vmem:[#allocation23_spill] sm:$0xff] }
 0x259   : > { %v2011_v26 = vpop.f32.mrf.mxu0  ;;  %2732 = vmatprep.subr.mxu1 %v6402_v39  ;;  %v1744_v5 = vadd.f32 %v1680_v24, %v1355_v18  ;;  %v1678_v31 = vmul.f32 %v5094_v44, %v6403_v7  ;;  %v1351_v18 = vmul.f32 %v5099_v45, %v5089_v23 }
 0x25a   : > { %v5228_v19 = vadd.f32 %v2011_v26, %v1817_v41  ;;  %v1460_v57 = vpop.permute.xlu1 %1459 }
 0x25b   : > { %v2013_v6 = vpop.f32.mrf.mxu0  ;;  %v1815_v47 = vadd.f32 %v5212_v49, %v1744_v5  ;;  %v1679_v12 = vmul.f32 %v5094_v44, %v1460_v57  ;;  %3895 = vset.pattern.permute.xlu1 %v6382_v37  ;;  %3796 = vxpose.xlu0.b32.cont [13/16] %v4928_v13, 128  ;;  %v1742_v26 = vadd.f32 %v1678_v31, %v1353_v10  ;;  %v6404_v57 = vld [vmem:[#allocation27_spill] sm:$0xff] }
 0x25c   : > { %1289 = vperm.xlu1 %3895, %v1006_v25   ;;  %v1180_v24 = vpop.permute.xlu0 %1179  ;;  %v1676_v28 = vmul.f32 %v5094_v44, %v6404_v57  ;;  %v1352_v13 = vmul.f32 %v5099_v45, %v5006_v20  ;;  %v1005_v57 = vld [vmem:[%s4239_s19 + $0x1a8] sm:$0xff] }
 0x25d   : > { %v5244_v41 = vpop.f32.mrf.mxu0  ;;  %v1743_v59 = vadd.f32 %v1679_v12, %v1354_v61  ;;  %v1373_v5 = vmul.f32 %v5099_v45, %v1180_v24  ;;  %v2002_v7 = vadd.f32 %v2001_v21, %v1815_v47  ;;  %v1349_v21 = vmul.f32 %v5099_v45, %v5080_v4 }
 0x25e   : > { %v1452_v43 = vpop.permute.xlu1 %1451  ;;  %v1740_v61 = vadd.f32 %v1676_v28, %v1351_v18  ;;  %v1674_v12 = vmul.f32 %v5094_v44, %v6405_v30  ;;  %v6406_v28 = vld [vmem:[#allocation33_spill] sm:$0xff]  ;;  %v1348_v24 = vmul.f32 %v5099_v45, %v4989_v17  ;;  %v1702_v17 = vmul.f32 %v5094_v44, %v4997_v53 }
 0x25f   : > { %v2018_v6 = vpop.f32.mrf.mxu0  ;;  %v1814_v23 = vadd.f32 %v5212_v49, %v1743_v59  ;;  %v5258_v0 = vadd.f32 %v1698_v51, %v1373_v5  ;;  %v1677_v10 = vmul.f32 %v5094_v44, %v1452_v43  ;;  %3798 = vxpose.xlu0.b32.cont [14/16] %v4937_v34, 128  ;;  %2733 = vmatpush1.msra.mxu1 %v2002_v7 }
 0x260   : > { %3896 = vset.pattern.permute.xlu1 %v6348_v9  ;;  %v5267_v20 = vpop.permute.xlu0 %1189  ;;  %2734 = vmatprep.subr.mxu1 %v6402_v39  ;;  %v1813_v43 = vadd.f32 %v5212_v49, %v1742_v26  ;;  %v1672_v18 = vmul.f32 %v5094_v44, %v6406_v28  ;;  %v1350_v59 = vmul.f32 %v5099_v45, %v4999_v58 }
 0x261   : > { %v2021_v31 = vpop.f32.mrf.mxu0  ;;  %v1741_v34 = vadd.f32 %v1677_v10, %v1352_v13  ;;  %1623 = vperm.xlu1 %3896, %v1006_v25   ;;  %v1997_v4 = vadd.f32 %v5191_v36, %v1814_v23  ;;  %v1347_v5 = vmul.f32 %v5099_v45, %v5071_v60  ;;  %v1345_v58 = vmul.f32 %v5099_v45, %v5063_v15 }
 0x262   : > { %v5264_v47 = vadd.f32 %v2021_v31, %v1819_v16  ;;  %v1444_v6 = vpop.permute.xlu1 %1443  ;;  %v1992_v26 = vadd.f32 %v5178_v29, %v1813_v43  ;;  %v1738_v60 = vadd.f32 %v1674_v12, %v1349_v21  ;;  %v1811_v13 = vadd.f32 %v5212_v49, %v1740_v61 }
 0x263   : > { %v2023_v51 = vpop.f32.mrf.mxu0  ;;  %v1812_v25 = vadd.f32 %v5212_v49, %v1741_v34  ;;  %v1675_v7 = vmul.f32 %v5094_v44, %v1444_v6  ;;  %3800 = vxpose.xlu0.b32.cont [15/16] %v4946_v14, 128  ;;  %2735 = vmatpush1.msra.mxu1 %v1997_v4  ;;  %v1736_v31 = vadd.f32 %v1672_v18, %v1347_v5 }
 0x264   : > { %v1200_v29 = vpop.permute.xlu0 %1199  ;;  %2736 = vmatprep.subr.mxu1 %v6402_v39  ;;  %v1982_v53 = vadd.f32 %v5147_v3, %v1811_v13  ;;  %v1821_v15 = vadd.f32 %v5212_v49, %v5174_v46  ;;  %v1704_v34 = vmul.f32 %v5094_v44, %v4980_v48  ;;  %v1809_v51 = vadd.f32 %v5212_v49, %v1738_v60 }
 0x265   : > { %v5286_v36 = vpop.f32.mrf.mxu0  ;;  %v1739_v16 = vadd.f32 %v1675_v7, %v1350_v59  ;;  %v1377_v23 = vmul.f32 %v5099_v45, %v1200_v29  ;;  %3897 = vset.pattern.permute.xlu1 %v6382_v37  ;;  %2737 = vmatpush1.msra.mxu1 %v1992_v26  ;;  %v1987_v10 = vadd.f32 %v5162_v52, %v1812_v25  ;;  %v6407_v52 = vld [vmem:[#allocation36_spill] sm:$0xff] }
 0x266   : > { %v1436_v30 = vpop.permute.xlu1 %1435  ;;  %1284 = vperm.xlu1 %3897, %v1005_v57   ;;  %2738 = vmatprep.subr.mxu1 %v6402_v39  ;;  %v1670_v3 = vmul.f32 %v5094_v44, %v6407_v52  ;;  %v1346_v28 = vmul.f32 %v5099_v45, %v4982_v8  ;;  %v1807_v48 = vadd.f32 %v5212_v49, %v1736_v31 }
 0x267   : > { %v2028_v14 = vpop.f32.mrf.mxu0  ;;  %v1810_v21 = vadd.f32 %v5212_v49, %v1739_v16  ;;  %v5303_v61 = vadd.f32 %v1702_v17, %v1377_v23  ;;  %v1673_v12 = vmul.f32 %v5094_v44, %v1436_v30  ;;  %3802 = vxpose.xlu0.b32.end [16/16] %v4953_v2, 128  ;;  %2739 = vmatpush1.msra.mxu1 %v1987_v10  ;;  %v5339_v23 = vld [vmem:[%s4239_s19 + $0x1a0] sm:$0xff] }
 0x268   : > { %v1210_v46 = vpop.permute.xlu0 %1209  ;;  %2740 = vmatprep.subr.mxu1 %v6402_v39  ;;  %v1734_v6 = vadd.f32 %v1670_v3, %v1345_v58  ;;  %v1972_v26 = vadd.f32 %v5119_v1, %v1809_v51  ;;  %v1706_v1 = vmul.f32 %v5094_v44, %v4966_v11  ;;  %v1343_v60 = vmul.f32 %v5099_v45, %v4968_v62  ;;  %v6409_v3 = vld [vmem:[#allocation26_spill] sm:$0xff]  ;;  %v1003_v51 = vld [vmem:[%s4239_s19 + $0x198] sm:$0xff] }
 0x269   : > { %v2031_v43 = vpop.f32.mrf.mxu0  ;;  %v1737_v18 = vadd.f32 %v1673_v12, %v1348_v24  ;;  %v1379_v2 = vmul.f32 %v5099_v45, %v1210_v46  ;;  %2741 = vmatpush1.msra.mxu1 %v1982_v53  ;;  %v1977_v5 = vadd.f32 %v5131_v42, %v1810_v21  ;;  %v1668_v42 = vmul.f32 %v5094_v44, %v4791_v56 }
 0x26a   : > { %v5312_v4 = vadd.f32 %v2031_v43, %v1821_v15  ;;  %v1428_v25 = vpop.permute.xlu1 %1427  ;;  %3898 = vset.pattern.permute.xlu1 %v6348_v9  ;;  %2742 = vmatprep.subr.mxu1 %v6402_v39  ;;  %v1344_v56 = vmul.f32 %v5099_v45, %v4975_v27  ;;  %v1341_v11 = vmul.f32 %v5099_v45, %v5046_v50  ;;  %v6408_v50 = vld [vmem:[#allocation39_spill] sm:$0xff] }
 0x26b   : > { %v2033_v59 = vpop.f32.mrf.mxu0  ;;  %v1808_v7 = vadd.f32 %v5212_v49, %v1737_v18  ;;  %v5324_v8 = vadd.f32 %v1704_v34, %v1379_v2  ;;  %v1671_v24 = vmul.f32 %v5094_v44, %v1428_v25  ;;  %1619 = vperm.xlu1 %3898, %v1005_v57   ;;  %2743 = vmatpush1.msra.mxu1 %v1977_v5  ;;  %v6412_v25 = vld [vmem:[#allocation56_spill] sm:$0xff] }
 0x26c   : > { %v1220_v58 = vpop.permute.xlu0 %1219  ;;  %2744 = vmatprep.subr.mxu1 %v6402_v39  ;;  %v1805_v14 = vadd.f32 %v5212_v49, %v1734_v6  ;;  %v1962_v10 = vadd.f32 %v5087_v38, %v1807_v48  ;;  %v1666_v30 = vmul.f32 %v5094_v44, %v6408_v50  ;;  %v1708_v38 = vmul.f32 %v5094_v44, %v4956_v55  ;;  %v6411_v55 = vld [vmem:[#allocation22_spill] sm:$0xff]  ;;  %v6415_v50 = vld [vmem:[#allocation12_spill] sm:$0xff] }
 0x26d   : > { %v5327_v17 = vpop.f32.mrf.mxu0  ;;  %v1735_v13 = vadd.f32 %v1671_v24, %v1346_v28  ;;  %v1381_v29 = vmul.f32 %v5099_v45, %v1220_v58  ;;  %2745 = vmatpush1.msra.mxu1 %v1972_v26  ;;  %v1967_v57 = vadd.f32 %v5108_v22, %v1808_v7  ;;  %v1732_v21 = vadd.f32 %v1668_v42, %v1343_v60  ;;  %v6410_v28 = vld [vmem:[#allocation11_spill] sm:$0xff] }
 0x26e   : > { %v1420_v62 = vpop.permute.xlu1 %1419  ;;  %2746 = vmatprep.subr.mxu1 %v6402_v39  ;;  %v1730_v46 = vadd.f32 %v1666_v30, %v1341_v11  ;;  %v1342_v18 = vmul.f32 %v5099_v45, %v6410_v28  ;;  %v1952_v59 = vadd.f32 %v6411_v55, %v1805_v14  ;;  %v1710_v7 = vmul.f32 %v5094_v44, %v6412_v25  ;;  %v6417_v28 = vld [vmem:[#allocation17_spill] sm:$0xff]  ;;  %v6419_v25 = vld [vmem:[#allocation16_spill] sm:$0xff] }
 0x26f   : > { %v2038_v16 = vpop.f32.mrf.mxu0  ;;  %v1806_v31 = vadd.f32 %v5212_v49, %v1735_v13  ;;  %v5349_v53 = vadd.f32 %v1706_v1, %v1381_v29  ;;  %v1669_v22 = vmul.f32 %v5094_v44, %v1420_v62  ;;  %3899 = vset.pattern.permute.xlu1 %v6382_v37  ;;  %2747 = vmatpush1.msra.mxu1 %v1967_v57  ;;  %v6413_v13 = vld [vmem:[#allocation8_spill] sm:$0xff] }
 0x270   : > { %1279 = vperm.xlu1 %3899, %v5339_v23   ;;  %v1230_v15 = vpop.permute.xlu0 %1229  ;;  %2748 = vmatprep.subr.mxu1 %v6402_v39  ;;  %v1803_v42 = vadd.f32 %v5212_v49, %v1732_v21  ;;  %v1801_v57 = vadd.f32 %v5212_v49, %v1730_v46  ;;  %v6416_v21 = vld [vmem:[#allocation15_spill] sm:$0xff] }
 0x271   : > { %v5353_v27 = vpop.f32.mrf.mxu0  ;;  %v1733_v12 = vadd.f32 %v1669_v22, %v1344_v56  ;;  %v1383_v43 = vmul.f32 %v5099_v45, %v1230_v15  ;;  %2749 = vmatpush1.msra.mxu1 %v1962_v10  ;;  %v1957_v34 = vadd.f32 %v6409_v3, %v1806_v31  ;;  %v6414_v56 = vld [vmem:[#allocation10_spill] sm:$0xff] }
 0x272   : > { %v1412_v2 = vpop.permute.xlu1 %1411  ;;  %2750 = vmatprep.subr.mxu1 %v6402_v39  ;;  %v1942_v11 = vadd.f32 %v6414_v56, %v1803_v42 }
 0x273   : > { %v2043_v52 = vpop.f32.mrf.mxu0  ;;  %v1804_v5 = vadd.f32 %v5212_v49, %v1733_v12  ;;  %v5369_v6 = vadd.f32 %v1708_v38, %v1383_v43  ;;  %v1667_v48 = vmul.f32 %v5094_v44, %v1412_v2  ;;  %2751 = vmatpush1.msra.mxu1 %v1957_v34  ;;  %v1932_v12 = vadd.f32 %v6416_v21, %v1801_v57  ;;  %v1002_v43 = vld [vmem:[%s4239_s19 + $0x190] sm:$0xff] }
 0x274   : > { %1274 = vperm.xlu1 %3899, %v1003_v51   ;;  %v1240_v24 = vpop.permute.xlu0 %1239  ;;  %2752 = vmatprep.subr.mxu1 %v6402_v39 }
 0x275   : > { %v5372_v26 = vpop.f32.mrf.mxu0  ;;  %v1731_v1 = vadd.f32 %v1667_v48, %v1342_v18  ;;  %v1385_v58 = vmul.f32 %v5099_v45, %v1240_v24  ;;  %2753 = vmatpush1.msra.mxu1 %v1952_v59  ;;  %v1947_v29 = vadd.f32 %v6413_v13, %v1804_v5  ;;  %v1729_v18 = vmul.f32 %v5094_v44, %v6417_v28 }
 0x276   : > { %v1532_v16 = vpop.permute.xlu1 %1531  ;;  %2754 = vmatprep.subr.mxu1 %v6402_v39 }
 0x277   : > { %v2048_v60 = vpop.f32.mrf.mxu0  ;;  %v1802_v14 = vadd.f32 %v5212_v49, %v1731_v1  ;;  %v5384_v10 = vadd.f32 %v1710_v7, %v1385_v58  ;;  %2755 = vmatpush1.msra.mxu1 %v1947_v29  ;;  %v1728_v7 = vmul.f32 %v5094_v44, %v6419_v25  ;;  %v1697_v57 = vmul.f32 %v5094_v44, %v1532_v16 }
 0x278   : > { %3901 = vset.pattern.permute.xlu1 %v6348_v9  ;;  %v5389_v31 = vpop.permute.xlu0 %1249  ;;  %2756 = vmatprep.subr.mxu1 %v6402_v39  ;;  %v4128_v60 = vld [vmem:[%s4239_s19 + $0x188] sm:$0xff]  ;;  %v1369_v16 = vmul.f32 %v5099_v45, %v5219_v54 }
 0x279   : > { %v5386_v62 = vpop.f32.mrf.mxu0  ;;  %1611 = vperm.xlu1 %3901, %v1003_v51   ;;  %2757 = vmatpush1.msra.mxu1 %v1942_v11  ;;  %v1937_v30 = vadd.f32 %v6415_v50, %v1802_v14  ;;  %v6421_v11 = vld [vmem:[#allocation19_spill] sm:$0xff] }
 0x27a   : > { %v1524_v38 = vpop.permute.xlu1 %1523  ;;  %2758 = vmatprep.subr.mxu1 %v6402_v39 }
 0x27b   : > { %v2053_v22 = vpop.f32.mrf.mxu0  ;;  %2759 = vmatpush1.msra.mxu1 %v1937_v30  ;;  %v1371_v30 = vmul.f32 %v5099_v45, %v5230_v32  ;;  %v6425_v32 = vld [vmem:[#allocation43_spill] sm:$0xff] }
 0x27c   : > { %v5398_v52 = vpop.permute.xlu0 %1259  ;;  %2760 = vmatprep.subr.mxu1 %v6402_v39  ;;  %v6422_v22 = vld [vmem:[#allocation31_spill] sm:$0xff] }
 0x27d   : > { %v5394_v15 = vpop.f32.mrf.mxu0  ;;  %3902 = vset.pattern.permute.xlu1 %v6382_v37  ;;  %2761 = vmatpush1.msra.mxu1 %v1932_v12  ;;  %v1372_v50 = vmul.f32 %v5099_v45, %v6422_v22  ;;  %v6423_v12 = vld [vmem:[#allocation41_spill] sm:$0xff] }
 0x27e   : > { %1269 = vperm.xlu1 %3902, %v1002_v43   ;;  %v1516_v34 = vpop.permute.xlu1 %1515  ;;  %2762 = vmatprep.subr.mxu1 %v6402_v39 }
 0x27f   : > { %v2058_v3 = vpop.f32.mrf.mxu0 }
 0x280   : > { %v1335_v46 = vpop.permute.xlu0 %1334  ;;  %v1761_v3 = vadd.f32 %v1697_v57, %v1372_v50  ;;  %v6427_v57 = vld [vmem:[#allocation45_spill] sm:$0xff] }
 0x281   : > { %v5403_v51 = vpop.f32.mrf.mxu0  ;;  %v1404_v2 = vmul.f32 %v5099_v45, %v1335_v46  ;;  %v1695_v46 = vmul.f32 %v5094_v44, %v1524_v38 }
 0x282   : > { %3903 = vset.pattern.permute.xlu1 %v6348_v9  ;;  %v1508_v59 = vpop.permute.xlu1 %1507 }
 0x283   : > { %v2063_v55 = vpop.f32.mrf.mxu0  ;;  %v5409_v37 = vadd.f32 %v1729_v18, %v1404_v2  ;;  %1607 = vperm.xlu1 %3903, %v1002_v43   ;;  %v1696_v43 = vmul.f32 %v5094_v44, %v6423_v12  ;;  %v1693_v18 = vmul.f32 %v5094_v44, %v1516_v34 }
 0x284   : > { %v1330_v48 = vpop.permute.xlu0 %1329  ;;  %v6424_v55 = vld [vmem:[#allocation34_spill] sm:$0xff] }
 0x285   : > { %6418 = vst [vmem:[#allocation23_spill] sm:$0xff] %v5409_v37  ;;  %v5411_v5 = vpop.f32.mrf.mxu0  ;;  %v1403_v24 = vmul.f32 %v5099_v45, %v1330_v48  ;;  %v1370_v48 = vmul.f32 %v5099_v45, %v6424_v55  ;;  %v1760_v25 = vadd.f32 %v1696_v43, %v1371_v30  ;;  %v1691_v30 = vmul.f32 %v5094_v44, %v1508_v59  ;;  %v6428_v43 = vld [vmem:[#allocation5_spill] sm:$0xff]  ;;  %v6461_v37 = vld [vmem:[#allocation20_spill] sm:$0xff] }
 0x286   : > { %v1500_v1 = vpop.permute.xlu1 %1499 }
 0x287   : > { %v2068_v42 = vpop.f32.mrf.mxu0  ;;  %v5416_v58 = vadd.f32 %v1728_v7, %v1403_v24  ;;  %1603 = vperm.xlu1 %3903, %v4128_v60   ;;  %v1694_v7 = vmul.f32 %v5094_v44, %v6425_v32  ;;  %v6426_v24 = vld [vmem:[#allocation7_spill] sm:$0xff]  ;;  %v1759_v34 = vadd.f32 %v1695_v46, %v1370_v48  ;;  %v1831_v12 = vadd.f32 %v5212_v49, %v1760_v25  ;;  %v6429_v46 = vld [vmem:[#allocation9_spill] sm:$0xff] }
 0x288   : > { %v1368_v38 = vmul.f32 %v5099_v45, %v6426_v24  ;;  %v1367_v42 = vmul.f32 %v5099_v45, %v5207_v33  ;;  %v1366_v55 = vmul.f32 %v5099_v45, %v6429_v46  ;;  %v1833_v25 = vadd.f32 %v5212_v49, %v5258_v0 }
 0x289   : > { %6420 = vst [vmem:[#allocation27_spill] sm:$0xff] %v5416_v58  ;;  %v5419_v13 = vpop.f32.mrf.mxu0  ;;  %v1830_v59 = vadd.f32 %v5212_v49, %v1759_v34  ;;  %v1689_v34 = vmul.f32 %v5094_v44, %v1500_v1  ;;  %v6433_v1 = vld [vmem:[#allocation28_spill] sm:$0xff] }
 0x28a   : > { %v5422_v56 = vpop.permute.xlu1 %1491  ;;  %v1757_v22 = vadd.f32 %v1693_v18, %v1368_v38 }
 0x28b   : > { %v2073_v29 = vpop.f32.mrf.mxu0  ;;  %1599 = vperm.xlu1 %3903, %v6421_v11   ;;  %v1758_v11 = vadd.f32 %v1694_v7, %v1369_v16  ;;  %v1375_v16 = vmul.f32 %v5099_v45, %v5267_v20  ;;  %v1755_v20 = vadd.f32 %v1691_v30, %v1366_v55  ;;  %v1687_v46 = vmul.f32 %v5094_v44, %v5422_v56 }
 0x28c   : > { %v1832_v29 = vadd.f32 %v5212_v49, %v1761_v3  ;;  %v1365_v3 = vmul.f32 %v5099_v45, %v5198_v35  ;;  %v1828_v24 = vadd.f32 %v5212_v49, %v1757_v22  ;;  %v6432_v22 = vld [vmem:[#allocation13_spill] sm:$0xff] }
 0x28d   : > { %v2076_v14 = vpop.f32.mrf.mxu0  ;;  %v1829_v38 = vadd.f32 %v5212_v49, %v1758_v11 }
 0x28e   : > { %v5432_v28 = vpop.permute.xlu1 %1483 }
 0x28f   : > { %v2078_v21 = vpop.f32.mrf.mxu0  ;;  %v2072_v30 = vadd.f32 %v5419_v13, %v1829_v38  ;;  %v1826_v13 = vadd.f32 %v5212_v49, %v1755_v20 }
 0x290   : > { %3900 = vset.pattern.permute.xlu0 %v6348_v9  ;;  %v1692_v9 = vmul.f32 %v5094_v44, %v6427_v57  ;;  %v1325_v21 = vpop.permute.xlu0 %1324  ;;  %v6430_v57 = vld [vmem:[#allocation47_spill] sm:$0xff] }
 0x291   : > { %v2081_v2 = vpop.f32.mrf.mxu0  ;;  %1615 = vperm.xlu0 %3900, %v5339_v23   ;;  %v1700_v23 = vmul.f32 %v5094_v44, %v6428_v43  ;;  %v1690_v0 = vmul.f32 %v5094_v44, %v6430_v57 }
 0x292   : > { %v5447_v60 = vpop.permute.xlu1 %1475  ;;  %v1756_v48 = vadd.f32 %v1692_v9, %v1367_v42  ;;  %v2082_v18 = vadd.f32 %v2081_v2, %v1831_v12  ;;  %v2077_v2 = vadd.f32 %v2076_v14, %v1830_v59  ;;  %v1834_v14 = vadd.f32 %v5212_v49, %v6433_v1 }
 0x293   : > { %v2083_v54 = vpop.f32.mrf.mxu0  ;;  %v1363_v12 = vmul.f32 %v5099_v45, %v5182_v63  ;;  %v6434_v63 = vld [vmem:[#allocation49_spill] sm:$0xff]  ;;  %v1683_v1 = vmul.f32 %v5094_v44, %v5447_v60  ;;  %v2330_v60 = vld [vmem:[%s4234_s16 + $0x180] sm:$0xff] }
 0x294   : > { %v1402_v54 = vmul.f32 %v5099_v45, %v1325_v21  ;;  %v1764_v21 = vadd.f32 %v1700_v23, %v1375_v16  ;;  %v1827_v43 = vadd.f32 %v5212_v49, %v1756_v48  ;;  %v2067_v23 = vadd.f32 %v5411_v5, %v1828_v24  ;;  %v6435_v48 = vld [vmem:[#allocation14_spill] sm:$0xff] }
 0x295   : > { %v2086_v50 = vpop.f32.mrf.mxu0  ;;  %v1685_v24 = vmul.f32 %v5094_v44, %v5432_v28 }
 0x296   : > { %v2087_v33 = vadd.f32 %v2086_v50, %v1832_v29  ;;  %v1652_v7 = vpop.permute.xlu1 %1651  ;;  %v1364_v50 = vmul.f32 %v5099_v45, %v6432_v22 }
 0x297   : > { %v2088_v32 = vpop.f32.mrf.mxu0  ;;  %v1727_v35 = vmul.f32 %v5094_v44, %v1652_v7  ;;  %v2062_v7 = vadd.f32 %v5403_v51, %v1827_v43  ;;  %v2057_v51 = vadd.f32 %v5394_v15, %v1826_v13  ;;  %v6439_v43 = vld [vmem:[#allocation6_spill] sm:$0xff]  ;;  %v1837_v13 = vadd.f32 %v5212_v49, %v5303_v61 }
 0x298   : > { %2763 = vmatpush2.msra.mxu1 %v2087_v33  ;;  %v1754_v33 = vadd.f32 %v1690_v0, %v1365_v3  ;;  %v1753_v16 = vadd.f32 %v1689_v34, %v1364_v50  ;;  %v1688_v3 = vmul.f32 %v5094_v44, %v6434_v63  ;;  %v6436_v34 = vld [vmem:[#allocation18_spill] sm:$0xff]  ;;  %v2314_v44 = vld [vmem:[%s4234_s16 + $0x100] sm:$0xff] }
 0x299   : > { %v2091_v42 = vpop.f32.mrf.mxu0  ;;  %2764 = vmatprep.subr.mxu1 %v6402_v39  ;;  %v5475_v9 = vadd.f32 %v1727_v35, %v1402_v54 }
 0x29a   : > { %v5471_v29 = vadd.f32 %v2091_v42, %v1833_v25  ;;  %2765 = vmatpush2.msra.mxu1 %v2082_v18  ;;  %v1362_v18 = vmul.f32 %v5099_v45, %v6435_v48  ;;  %v1835_v25 = vadd.f32 %v5212_v49, %v1764_v21  ;;  %v1752_v38 = vadd.f32 %v1688_v3, %v1363_v12 }
 0x29b   : > { %6431 = vst [vmem:[#allocation30_spill] sm:$0xff] %v5475_v9  ;;  %v2093_v11 = vpop.f32.mrf.mxu0  ;;  %2766 = vmatprep.subr.mxu1 %v6402_v39  ;;  %v5489_v32 = vpop.permute.xlu1 %1319  ;;  %v1825_v35 = vadd.f32 %v5212_v49, %v1754_v33  ;;  %v1824_v42 = vadd.f32 %v5212_v49, %v1753_v16  ;;  %v2443_v3 = vunpack.c.h.bf16 %v2330_v60 }
 0x29c   : > { %2767 = vmatpush2.msra.mxu1 %v2077_v2  ;;  %v1751_v5 = vadd.f32 %v1687_v46, %v1362_v18  ;;  %v1360_v2 = vmul.f32 %v5099_v45, %v6436_v34  ;;  %v6437_v11 = vld [vmem:[#allocation24_spill] sm:$0xff]  ;;  %v1358_v46 = vmul.f32 %v5099_v45, %v6439_v43  ;;  %v2411_v45 = vunpack.c.h.bf16 %v2314_v44 }
 0x29d   : > { %v2096_v55 = vpop.f32.mrf.mxu0  ;;  %2768 = vmatprep.subr.mxu1 %v6402_v39  ;;  %v2052_v28 = vadd.f32 %v5386_v62, %v1825_v35  ;;  %v1836_v22 = vadd.f32 %v5212_v49, %v6437_v11  ;;  %v2047_v62 = vadd.f32 %v5372_v26, %v1824_v42  ;;  %v2410_v18 = vunpack.c.l.bf16 %v2314_v44  ;;  %v6442_v44 = vld [vmem:[#allocation29_spill] sm:$0xff] }
 0x29e   : > { %v5493_v59 = vadd.f32 %v2096_v55, %v1834_v14  ;;  %2769 = vmatpush2.msra.mxu1 %v2072_v30  ;;  %v1822_v50 = vadd.f32 %v5212_v49, %v1751_v5  ;;  %v1749_v21 = vadd.f32 %v1685_v24, %v1360_v2  ;;  %v1823_v30 = vadd.f32 %v5212_v49, %v1752_v38  ;;  %v2316_v2 = vld [vmem:[%s4234_s16 + $0x110] sm:$0xff] }
 0x29f   : > { %v2098_v56 = vpop.f32.mrf.mxu0  ;;  %2770 = vmatprep.subr.mxu1 %v6402_v39  ;;  %v2442_v38 = vunpack.c.l.bf16 %v2330_v60  ;;  %v4016_v24 = vpack.i.bf16 %v2411_v45, %v2443_v3  ;;  %v3694_v60 = vunpack.i.l.bf16 %v6442_v44 }
 0x2a0   : > { %2771 = vmatpush2.msra.mxu1 %v2067_v23  ;;  %v5513_v0 = vpop.permute.xlu1 %1647  ;;  %v2042_v55 = vadd.f32 %v5353_v27, %v1823_v30  ;;  %v1820_v23 = vadd.f32 %v5212_v49, %v1749_v21  ;;  %v2037_v16 = vadd.f32 %v5327_v17, %v1822_v50  ;;  %v1747_v27 = vadd.f32 %v1683_v1, %v1358_v46  ;;  %v6441_v46 = vld [vmem:[#allocation25_spill] sm:$0xff] }
 0x2a1   : > { %v2101_v54 = vpop.f32.mrf.mxu0  ;;  %2772 = vmatprep.subr.mxu1 %v6402_v39  ;;  %v3904_v50 = vpack.i.bf16 %v2410_v18, %v2442_v38  ;;  %v2334_v18 = vld [vmem:[%s4234_s16 + $0x1a0] sm:$0xff] }
 0x2a2   : > { %v5507_v20 = vadd.f32 %v2101_v54, %v1835_v25  ;;  %2773 = vmatpush2.msra.mxu1 %v2062_v7  ;;  %v2315_v7 = vld [vmem:[%s4234_s16 + $0x108] sm:$0xff]  ;;  %v1818_v42 = vadd.f32 %v5212_v49, %v1747_v27 }
 0x2a3   : > { %v2103_v57 = vpop.f32.mrf.mxu0  ;;  %2774 = vmatprep.subr.mxu1 %v6402_v39  ;;  %v2331_v25 = vld [vmem:[%s4234_s16 + $0x188] sm:$0xff]  ;;  %v2413_v54 = vunpack.c.h.bf16 %v2315_v7  ;;  %v2412_v21 = vunpack.c.l.bf16 %v2315_v7 }
 0x2a4   : > { %2775 = vmatpush2.msra.mxu1 %v2057_v51  ;;  %v2445_v35 = vunpack.c.h.bf16 %v2331_v25  ;;  %v2027_v51 = vadd.f32 %v5286_v36, %v1820_v23  ;;  %v2332_v57 = vld [vmem:[%s4234_s16 + $0x190] sm:$0xff]  ;;  %v2017_v36 = vadd.f32 %v5244_v41, %v1818_v42 }
 0x2a5   : > { %v2106_v15 = vpop.f32.mrf.mxu0  ;;  %2776 = vmatprep.subr.mxu1 %v6402_v39  ;;  %v5527_v33 = vpop.permute.xlu1 %1314 }
 0x2a6   : > { %v5523_v14 = vadd.f32 %v2106_v15, %v1836_v22  ;;  %2777 = vmatpush2.msra.mxu1 %v2052_v28  ;;  %6438 = vst [vmem:[#allocation33_spill] sm:$0xff] %v5527_v33  ;;  %v4018_v49 = vpack.i.bf16 %v2413_v54, %v2445_v35  ;;  %v2415_v22 = vunpack.c.h.bf16 %v2316_v2  ;;  %v2444_v15 = vunpack.c.l.bf16 %v2331_v25  ;;  %v6444_v54 = vld [vmem:[#allocation32_spill] sm:$0xff] }
 0x2a7   : > { %v2108_v12 = vpop.f32.mrf.mxu0  ;;  %2778 = vmatprep.subr.mxu1 %v6402_v39  ;;  %v5539_v63 = vpop.trf.xlu0  ;;  %v3699_v35 = vunpack.i.l.bf16 %v6444_v54 }
 0x2a8   : > { %2779 = vmatpush2.msra.mxu1 %v2047_v62  ;;  %v2317_v62 = vld [vmem:[%s4234_s16 + $0x118] sm:$0xff]  ;;  %v3906_v23 = vpack.i.bf16 %v2412_v21, %v2444_v15 }
 0x2a9   : > { %v2111_v26 = vpop.f32.mrf.mxu0  ;;  %2780 = vmatprep.subr.mxu1 %v6402_v39  ;;  %v2333_v12 = vld [vmem:[%s4234_s16 + $0x198] sm:$0xff] }
 0x2aa   : > { %v5541_v48 = vadd.f32 %v2111_v26, %v1837_v13  ;;  %2781 = vmatpush2.msra.mxu1 %v2042_v55  ;;  %v5544_v56 = vpop.permute.xlu1 %1643  ;;  %v3692_v55 = vunpack.i.h.bf16 %v6441_v46  ;;  %v2449_v13 = vunpack.c.h.bf16 %v2333_v12  ;;  %v2414_v26 = vunpack.c.l.bf16 %v2316_v2 }
 0x2ab   : > { %v2113_v61 = vpop.f32.mrf.mxu0  ;;  %2782 = vmatprep.subr.mxu1 %v6402_v39  ;;  %v5551_v5 = vpop.trf.xlu0 }
 0x2ac   : > { %2783 = vmatpush2.msra.mxu1 %v2037_v16  ;;  %v2446_v16 = vunpack.c.l.bf16 %v2332_v57  ;;  %v2318_v61 = vld [vmem:[%s4234_s16 + $0x120] sm:$0xff] }
 0x2ad   : > { %v5548_v17 = vpop.f32.mrf.mxu0  ;;  %2784 = vmatprep.subr.mxu1 %v6402_v39  ;;  %v2419_v38 = vunpack.c.h.bf16 %v2318_v61 }
 0x2ae   : > { %2785 = vmatpush2.msra.mxu1 %v5312_v4  ;;  %v2447_v4 = vunpack.c.h.bf16 %v2332_v57  ;;  %v3908_v42 = vpack.i.bf16 %v2414_v26, %v2446_v16 }
 0x2af   : > { %v2118_v34 = vpop.f32.mrf.mxu0  ;;  %2786 = vmatprep.subr.mxu1 %v6402_v39  ;;  %v5562_v11 = vpop.permute.xlu1 %1309  ;;  %4017 = vxpose.xlu0.b32.start [1/16] %v4016_v24, 128  ;;  %v2451_v24 = vunpack.c.h.bf16 %v2334_v18 }
 0x2b0   : > { %2787 = vmatpush2.msra.mxu1 %v2027_v51  ;;  %6440 = vst [vmem:[#allocation36_spill] sm:$0xff] %v5562_v11  ;;  %v5566_v30 = vpop.trf.xlu0  ;;  %v4020_v41 = vpack.i.bf16 %v2415_v22, %v2447_v4  ;;  %v2416_v51 = vunpack.c.l.bf16 %v2317_v62  ;;  %v2448_v34 = vunpack.c.l.bf16 %v2333_v12  ;;  %v2319_v22 = vld [vmem:[%s4234_s16 + $0x128] sm:$0xff] }
 0x2b1   : > { %v5559_v28 = vpop.f32.mrf.mxu0  ;;  %2788 = vmatprep.subr.mxu1 %v6402_v39  ;;  %v2335_v4 = vld [vmem:[%s4234_s16 + $0x1a8] sm:$0xff]  ;;  %v4024_v21 = vpack.i.bf16 %v2419_v38, %v2451_v24  ;;  %v2421_v15 = vunpack.c.h.bf16 %v2319_v22  ;;  %v2420_v24 = vunpack.c.l.bf16 %v2319_v22 }
 0x2b2   : > { %2789 = vmatpush2.msra.mxu1 %v5264_v47  ;;  %v2417_v47 = vunpack.c.h.bf16 %v2317_v62  ;;  %v6446_v62 = vld [vmem:[#allocation35_spill] sm:$0xff]  ;;  %v3910_v46 = vpack.i.bf16 %v2416_v51, %v2448_v34 }
 0x2b3   : > { %v2123_v1 = vpop.f32.mrf.mxu0  ;;  %2790 = vmatprep.subr.mxu1 %v6402_v39  ;;  %4019 = vxpose.xlu0.b32.cont [2/16] %v4018_v49, 128  ;;  %v3704_v12 = vunpack.i.l.bf16 %v6446_v62  ;;  %v3707_v26 = vunpack.i.h.bf16 %v6446_v62  ;;  %v2321_v51 = vld [vmem:[%s4234_s16 + $0x138] sm:$0xff] }
 0x2b4   : > { %2791 = vmatpush2.msra.mxu1 %v2017_v36  ;;  %3905 = vxpose.xlu1.b32.start [1/16] %v3904_v50, 128  ;;  %v5577_v45 = vpop.trf.xlu0  ;;  %v5579_v27 = vpop.permute.xlu1 %1639  ;;  %v4022_v25 = vpack.i.bf16 %v2417_v47, %v2449_v13  ;;  %v3702_v50 = vunpack.i.h.bf16 %v6444_v54  ;;  %v2453_v1 = vunpack.c.h.bf16 %v2335_v4  ;;  %v2452_v54 = vunpack.c.l.bf16 %v2335_v4  ;;  %v2337_v34 = vld [vmem:[%s4234_s16 + $0x1b8] sm:$0xff]  ;;  %v6450_v4 = vld [vmem:[#allocation38_spill] sm:$0xff] }
 0x2b5   : > { %v5571_v43 = vpop.f32.mrf.mxu0  ;;  %2792 = vmatprep.subr.mxu1 %v6402_v39  ;;  %6443 = vst [vmem:[#allocation39_spill] sm:$0xff] %v5579_v27  ;;  %v2457_v22 = vunpack.c.h.bf16 %v2337_v34  ;;  %v3714_v62 = vunpack.i.l.bf16 %v6450_v4 }
 0x2b6   : > { %2793 = vmatpush2.msra.mxu1 %v5228_v19  ;;  %v3697_v19 = vunpack.i.h.bf16 %v6442_v44  ;;  %v2320_v44 = vld [vmem:[%s4234_s16 + $0x130] sm:$0xff] }
 0x2b7   : > { %v2128_v3 = vpop.f32.mrf.mxu0  ;;  %2795 = vmatmul.mubr.f32.vlgmr.msra.gmra.mxu1 %v3692_v55  ;;  %2955 = vmatprep.subr.mxu1 %v6402_v39  ;;  %v2418_v55 = vunpack.c.l.bf16 %v2318_v61 }
 0x2b8   : > { %2799 = vmatprep.mubr.f32.mxu1 %v3694_v60  ;;  %4021 = vxpose.xlu0.b32.cont [3/16] %v4020_v41, 128  ;;  %v5588_v2 = vpop.trf.xlu0  ;;  %v2450_v41 = vunpack.c.l.bf16 %v2334_v18  ;;  %v2336_v60 = vld [vmem:[%s4234_s16 + $0x1b0] sm:$0xff]  ;;  %v4026_v3 = vpack.i.bf16 %v2421_v15, %v2453_v1  ;;  %v6448_v18 = vld [vmem:[#allocation37_spill] sm:$0xff]  ;;  %v2425_v1 = vunpack.c.h.bf16 %v2321_v51 }
 0x2b9   : > { %v5584_v7 = vpop.f32.mrf.mxu0  ;;  %3907 = vxpose.xlu1.b32.cont [2/16] %v3906_v23, 128  ;;  %v5590_v49 = vpop.permute.xlu1 %1304  ;;  %v2455_v61 = vunpack.c.h.bf16 %v2336_v60 }
 0x2ba   : > { %6445 = vst [vmem:[#allocation26_spill] sm:$0xff] %v5590_v49  ;;  %v3912_v38 = vpack.i.bf16 %v2418_v55, %v2450_v41  ;;  %v2454_v55 = vunpack.c.l.bf16 %v2336_v60 }
 0x2bb   : > { %v2133_v57 = vpop.f32.mrf.mxu0  ;;  %2800 = vmatmul.mubr.f32.gmra.mxu1 %v3697_v19  ;;  %v2423_v19 = vunpack.c.h.bf16 %v2320_v44 }
 0x2bc   : > { %2804 = vmatprep.mubr.f32.mxu1 %v3699_v35  ;;  %4023 = vxpose.xlu0.b32.cont [4/16] %v4022_v25, 128  ;;  %v5598_v47 = vpop.trf.xlu0  ;;  %v3709_v25 = vunpack.i.l.bf16 %v6448_v18 }
 0x2bd   : > { %v5594_v36 = vpop.f32.mrf.mxu0  ;;  %3909 = vxpose.xlu1.b32.cont [3/16] %v3908_v42, 128  ;;  %v4028_v15 = vpack.i.bf16 %v2423_v19, %v2455_v61  ;;  %v4030_v19 = vpack.i.bf16 %v2425_v1, %v2457_v22  ;;  %v6453_v22 = vld [vmem:[#allocation42_spill] sm:$0xff] }
 0x2be   : > { %v5605_v16 = vpop.permute.xlu1 %1635 }
 0x2bf   : > { %v2138_v13 = vpop.f32.mrf.mxu0  ;;  %2805 = vmatmul.mubr.f32.gmra.mxu1 %v3702_v50  ;;  %6447 = vst [vmem:[#allocation11_spill] sm:$0xff] %v5605_v16  ;;  %v3712_v50 = vunpack.i.h.bf16 %v6448_v18  ;;  %v2338_v18 = vld [vmem:[%s4234_s16 + $0x1c0] sm:$0xff] }
 0x2c0   : > { %2809 = vmatprep.mubr.f32.mxu1 %v3704_v12  ;;  %4025 = vxpose.xlu0.b32.cont [5/16] %v4024_v21, 128  ;;  %v5608_v35 = vpop.trf.xlu0  ;;  %v3914_v12 = vpack.i.bf16 %v2420_v24, %v2452_v54  ;;  %v2424_v54 = vunpack.c.l.bf16 %v2321_v51  ;;  %v6457_v16 = vld [vmem:[#allocation44_spill] sm:$0xff] }
 0x2c1   : > { %v5602_v23 = vpop.f32.mrf.mxu0  ;;  %3911 = vxpose.xlu1.b32.cont [4/16] %v3910_v46, 128  ;;  %v2422_v46 = vunpack.c.l.bf16 %v2320_v44  ;;  %v6451_v44 = vld [vmem:[#allocation40_spill] sm:$0xff]  ;;  %v3729_v27 = vunpack.i.l.bf16 %v6457_v16 }
 0x2c2   : > { %v3719_v60 = vunpack.i.l.bf16 %v6451_v44 }
 0x2c3   : > { %v2143_v42 = vpop.f32.mrf.mxu0  ;;  %2810 = vmatmul.mubr.f32.gmra.mxu1 %v3707_v26  ;;  %v5615_v21 = vpop.permute.xlu1 %1299  ;;  %v2322_v26 = vld [vmem:[%s4234_s16 + $0x140] sm:$0xff]  ;;  %v3916_v24 = vpack.i.bf16 %v2422_v46, %v2454_v55 }
 0x2c4   : > { %2814 = vmatprep.mubr.f32.mxu1 %v3709_v25  ;;  %6449 = vst [vmem:[#allocation22_spill] sm:$0xff] %v5615_v21  ;;  %4027 = vxpose.xlu0.b32.cont [6/16] %v4026_v3, 128  ;;  %v5618_v41 = vpop.trf.xlu0  ;;  %v3717_v3 = vunpack.i.h.bf16 %v6450_v4  ;;  %v2427_v61 = vunpack.c.h.bf16 %v2322_v26  ;;  %v2456_v42 = vunpack.c.l.bf16 %v2337_v34  ;;  %v3722_v4 = vunpack.i.h.bf16 %v6451_v44  ;;  %v2339_v21 = vld [vmem:[%s4234_s16 + $0x1c8] sm:$0xff]  ;;  %v5639_v34 = vld [vmem:[%s6244_s5] ss:$0 sm:$0xff] }
 0x2c5   : > { %v5612_v57 = vpop.f32.mrf.mxu0  ;;  %3913 = vxpose.xlu1.b32.cont [5/16] %v3912_v38, 128  ;;  %v2459_v38 = vunpack.c.h.bf16 %v2338_v18  ;;  %v2461_v51 = vunpack.c.h.bf16 %v2339_v21  ;;  %v1387_v55 = vmul.f32 %v5639_v34, %v5389_v31  ;;  %v2426_v44 = vunpack.c.l.bf16 %v2322_v26  ;;  %v2324_v26 = vld [vmem:[%s4234_s16 + $0x150] sm:$0xff] }
 0x2c6   : > { %v3727_v31 = vunpack.i.h.bf16 %v6453_v22 }
 0x2c7   : > { %v2148_v13 = vpop.f32.mrf.mxu0  ;;  %2815 = vmatmul.mubr.f32.gmra.mxu1 %v3712_v50  ;;  %v4032_v49 = vpack.i.bf16 %v2427_v61, %v2459_v38  ;;  %v5650_v38 = vld [vmem:[%s6244_s5 + $0x1] ss:$0 sm:$0xff] }
 0x2c8   : > { %2819 = vmatprep.mubr.f32.mxu1 %v3714_v62  ;;  %4029 = vxpose.xlu0.b32.cont [7/16] %v4028_v15, 128  ;;  %v5626_v50 = vpop.trf.xlu0  ;;  %v5628_v13 = vpop.permute.xlu1 %1631  ;;  %v2323_v15 = vld [vmem:[%s4234_s16 + $0x148] sm:$0xff] }
 0x2c9   : > { %v5622_v25 = vpop.f32.mrf.mxu0  ;;  %3915 = vxpose.xlu1.b32.cont [6/16] %v3914_v12, 128  ;;  %6452 = vst [vmem:[#allocation56_spill] sm:$0xff] %v5628_v13  ;;  %v3724_v12 = vunpack.i.l.bf16 %v6453_v22  ;;  %v2429_v46 = vunpack.c.h.bf16 %v2323_v15  ;;  %v6456_v13 = vld [vmem:[#allocation55_spill] sm:$0xff] }
 0x2ca   : > { %v1712_v9 = vmul.f32 %v5650_v38, %v6456_v13 }
 0x2cb   : > { %v2153_v62 = vpop.f32.mrf.mxu0  ;;  %2820 = vmatmul.mubr.f32.gmra.mxu1 %v3717_v3  ;;  %v3918_v3 = vpack.i.bf16 %v2424_v54, %v2456_v42  ;;  %v2460_v42 = vunpack.c.l.bf16 %v2339_v21  ;;  %v5663_v21 = vld [vmem:[%s6245_s6] ss:$0 sm:$0xff] }
 0x2cc   : > { %2824 = vmatprep.mubr.f32.mxu1 %v3719_v60  ;;  %4031 = vxpose.xlu0.b32.cont [8/16] %v4030_v19, 128  ;;  %v2458_v60 = vunpack.c.l.bf16 %v2338_v18  ;;  %v5643_v62 = vpop.trf.xlu0  ;;  %v2340_v18 = vld [vmem:[%s4234_s16 + $0x1d0] sm:$0xff]  ;;  %v1776_v11 = vadd.f32 %v1712_v9, %v1387_v55 }
 0x2cd   : > { %v5633_v1 = vpop.f32.mrf.mxu0  ;;  %3917 = vxpose.xlu1.b32.cont [7/16] %v3916_v24, 128  ;;  %6454 = vst [vmem:[#allocation8_spill] sm:$0xff] %v5643_v62  ;;  %v5645_v61 = vpop.permute.xlu1 %1294  ;;  %v2428_v24 = vunpack.c.l.bf16 %v2323_v15  ;;  %v3732_v15 = vunpack.i.h.bf16 %v6457_v16  ;;  %v6459_v9 = vld [vmem:[#allocation46_spill] sm:$0xff]  ;;  %v2462_v16 = vunpack.c.l.bf16 %v2340_v18 }
 0x2ce   : > { %6455 = vst [vmem:[#allocation10_spill] sm:$0xff] %v5645_v61  ;;  %v2463_v61 = vunpack.c.h.bf16 %v2340_v18  ;;  %v3920_v33 = vpack.i.bf16 %v2426_v44, %v2458_v60  ;;  %v3734_v22 = vunpack.i.l.bf16 %v6459_v9 }
 0x2cf   : > { %v2158_v19 = vpop.f32.mrf.mxu0  ;;  %2825 = vmatmul.mubr.f32.gmra.mxu1 %v3722_v4  ;;  %v4034_v4 = vpack.i.bf16 %v2429_v46, %v2461_v51  ;;  %v2325_v46 = vld [vmem:[%s4234_s16 + $0x158] sm:$0xff]  ;;  %v3922_v44 = vpack.i.bf16 %v2428_v24, %v2460_v42 }
 0x2d0   : > { %2829 = vmatprep.mubr.f32.mxu1 %v3724_v12  ;;  %4033 = vxpose.xlu0.b32.cont [9/16] %v4032_v49, 128  ;;  %v2431_v19 = vunpack.c.h.bf16 %v2324_v26  ;;  %v5658_v13 = vpop.trf.xlu0  ;;  %v1848_v49 = vadd.f32 %v5663_v21, %v5205_v40  ;;  %v2341_v51 = vld [vmem:[%s4234_s16 + $0x1d8] sm:$0xff]  ;;  %v2433_v60 = vunpack.c.h.bf16 %v2325_v46  ;;  %v2430_v40 = vunpack.c.l.bf16 %v2324_v26 }
 0x2d1   : > { %v2161_v54 = vpop.f32.mrf.mxu0  ;;  %3919 = vxpose.xlu1.b32.cont [8/16] %v3918_v3, 128  ;;  %6458 = vst [vmem:[#allocation12_spill] sm:$0xff] %v5658_v13  ;;  %v2432_v42 = vunpack.c.l.bf16 %v2325_v46 }
 0x2d2   : > { %v5671_v3 = vpop.permute.xlu1 %1627 }
 0x2d3   : > { %v2163_v12 = vpop.f32.mrf.mxu0  ;;  %2830 = vmatmul.mubr.f32.gmra.mxu1 %v3727_v31  ;;  %6460 = vst [vmem:[#allocation15_spill] sm:$0xff] %v5671_v3  ;;  %v2465_v31 = vunpack.c.h.bf16 %v2341_v51  ;;  %v1846_v3 = vadd.f32 %v5663_v21, %v6461_v37 }
 0x2d4   : > { %2834 = vmatprep.mubr.f32.mxu1 %v3729_v27  ;;  %4035 = vxpose.xlu0.b32.cont [10/16] %v4034_v4, 128  ;;  %v4036_v27 = vpack.i.bf16 %v2431_v19, %v2463_v61  ;;  %v1847_v12 = vadd.f32 %v5663_v21, %v1776_v11  ;;  %v5674_v62 = vpop.trf.xlu0  ;;  %v3737_v61 = vunpack.i.h.bf16 %v6459_v9  ;;  %v5680_v4 = vld [vmem:[%s4234_s16 + $0x160] sm:$0xff]  ;;  %v1845_v19 = vadd.f32 %v5663_v21, %v5384_v10 }
 0x2d5   : > { %v2166_v55 = vpop.f32.mrf.mxu0  ;;  %3921 = vxpose.xlu1.b32.cont [9/16] %v3920_v33, 128  ;;  %v5683_v11 = vld [vmem:[%s4234_s16 + $0x1e0] sm:$0xff]  ;;  %v4038_v18 = vpack.i.bf16 %v2433_v60, %v2465_v31  ;;  %v2435_v37 = vunpack.c.h.bf16 %v5680_v4  ;;  %v3924_v9 = vpack.i.bf16 %v2430_v40, %v2462_v16  ;;  %v2343_v60 = vld [vmem:[%s4234_s16 + $0x1e8] sm:$0xff] }
 0x2d6   : > { %v2167_v13 = vadd.f32 %v2166_v55, %v1848_v49  ;;  %v2162_v24 = vadd.f32 %v2161_v54, %v1847_v12  ;;  %v2467_v54 = vunpack.c.h.bf16 %v5683_v11  ;;  %v6462_v49 = vld [vmem:[#allocation48_spill] sm:$0xff]  ;;  %v2152_v10 = vadd.f32 %v5622_v25, %v1845_v19 }
 0x2d7   : > { %v2168_v58 = vpop.f32.mrf.mxu0  ;;  %2835 = vmatmul.mubr.f32.gmra.mxu1 %v3732_v15  ;;  %v5688_v26 = vpop.permute.xlu1 %1289  ;;  %v3739_v15 = vunpack.i.l.bf16 %v6462_v49  ;;  %v1843_v25 = vadd.f32 %v5663_v21, %v5369_v6  ;;  %v2434_v19 = vunpack.c.l.bf16 %v5680_v4 }
 0x2d8   : > { %2839 = vmatprep.mubr.f32.mxu1 %v3734_v22  ;;  %2956 = vmatpush1.msra.mxu1 %v2167_v13  ;;  %v2464_v58 = vunpack.c.l.bf16 %v2341_v51  ;;  %v2157_v13 = vadd.f32 %v5633_v1, %v1846_v3  ;;  %v5696_v22 = vpop.trf.xlu0  ;;  %v6463_v51 = vld [vmem:[#allocation58_spill] sm:$0xff]  ;;  %v3742_v1 = vunpack.i.h.bf16 %v6462_v49  ;;  %v4040_v40 = vpack.i.bf16 %v2435_v37, %v2467_v54 }
 0x2d9   : > { %v5685_v33 = vpop.f32.mrf.mxu0  ;;  %2957 = vmatprep.subr.mxu1 %v6402_v39  ;;  %4037 = vxpose.xlu0.b32.cont [11/16] %v4036_v27, 128  ;;  %v1844_v55 = vadd.f32 %v5663_v21, %v6463_v51  ;;  %v6464_v3 = vld [vmem:[#allocation50_spill] sm:$0xff]  ;;  %v2327_v27 = vld [vmem:[%s4234_s16 + $0x168] sm:$0xff] }
 0x2da   : > { %2958 = vmatpush1.msra.mxu1 %v2162_v24  ;;  %3923 = vxpose.xlu1.b32.cont [10/16] %v3922_v44, 128  ;;  %v3744_v44 = vunpack.i.l.bf16 %v6464_v3  ;;  %v3926_v12 = vpack.i.bf16 %v2432_v42, %v2464_v58  ;;  %v2437_v16 = vunpack.c.h.bf16 %v2327_v27  ;;  %v2469_v24 = vunpack.c.h.bf16 %v2343_v60  ;;  %v2328_v54 = vld [vmem:[%s4234_s16 + $0x170] sm:$0xff] }
 0x2db   : > { %v2173_v46 = vpop.f32.mrf.mxu0  ;;  %2840 = vmatmul.mubr.f32.gmra.mxu1 %v3737_v61  ;;  %2959 = vmatprep.subr.mxu1 %v6402_v39  ;;  %v2147_v61 = vadd.f32 %v5612_v57, %v1844_v55  ;;  %v2142_v57 = vadd.f32 %v5602_v23, %v1843_v25  ;;  %v3747_v37 = vunpack.i.h.bf16 %v6464_v3  ;;  %v2436_v4 = vunpack.c.l.bf16 %v2327_v27 }
 0x2dc   : > { %2844 = vmatprep.mubr.f32.mxu1 %v3739_v15  ;;  %2960 = vmatpush1.msra.mxu1 %v2157_v13  ;;  %v2466_v13 = vunpack.c.l.bf16 %v5683_v11  ;;  %v5714_v49 = vpop.trf.xlu0  ;;  %v5717_v58 = vpop.permute.xlu1 %1623  ;;  %v2344_v11 = vld [vmem:[%s4234_s16 + $0x1f0] sm:$0xff]  ;;  %v4042_v46 = vpack.i.bf16 %v2437_v16, %v2469_v24  ;;  %v2439_v51 = vunpack.c.h.bf16 %v2328_v54  ;;  %v6468_v16 = vld [vmem:[#allocation52_spill] sm:$0xff] }
 0x2dd   : > { %v5706_v31 = vpop.f32.mrf.mxu0  ;;  %2961 = vmatprep.subr.mxu1 %v6402_v39  ;;  %4039 = vxpose.xlu0.b32.cont [12/16] %v4038_v18, 128  ;;  %v6465_v18 = vld [vmem:[#allocation57_spill] sm:$0xff]  ;;  %v2471_v55 = vunpack.c.h.bf16 %v2344_v11  ;;  %v3754_v24 = vunpack.i.l.bf16 %v6468_v16 }
 0x2de   : > { %2962 = vmatpush1.msra.mxu1 %v2152_v10  ;;  %3925 = vxpose.xlu1.b32.cont [11/16] %v3924_v9, 128  ;;  %v1842_v6 = vadd.f32 %v5663_v21, %v6465_v18  ;;  %v2468_v9 = vunpack.c.l.bf16 %v2343_v60  ;;  %v1841_v10 = vadd.f32 %v5663_v21, %v5349_v53 }
 0x2df   : > { %v2178_v42 = vpop.f32.mrf.mxu0  ;;  %2845 = vmatmul.mubr.f32.gmra.mxu1 %v3742_v1  ;;  %2963 = vmatprep.subr.mxu1 %v6402_v39  ;;  %v6466_v1 = vld [vmem:[#allocation51_spill] sm:$0xff]  ;;  %v4044_v18 = vpack.i.bf16 %v2439_v51, %v2471_v55 }
 0x2e0   : > { %2849 = vmatprep.mubr.f32.mxu1 %v3744_v44  ;;  %2964 = vmatpush1.msra.mxu1 %v2147_v61  ;;  %v2137_v23 = vadd.f32 %v5594_v36, %v1842_v6  ;;  %v3749_v3 = vunpack.i.l.bf16 %v6466_v1  ;;  %v3928_v44 = vpack.i.bf16 %v2434_v19, %v2466_v13  ;;  %v5732_v27 = vpop.trf.xlu0  ;;  %v2132_v36 = vadd.f32 %v5584_v7, %v1841_v10  ;;  %v2329_v61 = vld [vmem:[%s4234_s16 + $0x178] sm:$0xff] }
 0x2e1   : > { %v5725_v15 = vpop.f32.mrf.mxu0  ;;  %2965 = vmatprep.subr.mxu1 %v6402_v39  ;;  %4041 = vxpose.xlu0.b32.cont [13/16] %v4040_v40, 128  ;;  %v5735_v60 = vpop.permute.xlu1 %1284  ;;  %v6467_v40 = vld [vmem:[#allocation4_spill] sm:$0xff]  ;;  %v2345_v19 = vld [vmem:[%s4234_s16 + $0x1f8] sm:$0xff]  ;;  %v3930_v42 = vpack.i.bf16 %v2436_v4, %v2468_v9  ;;  %v2441_v6 = vunpack.c.h.bf16 %v2329_v61  ;;  %v1839_v7 = vadd.f32 %v5663_v21, %v5324_v8  ;;  %v2438_v10 = vunpack.c.l.bf16 %v2328_v54  ;;  %v6469_v4 = vld [vmem:[#allocation21_spill] sm:$0xff] }
 0x2e2   : > { %2966 = vmatpush1.msra.mxu1 %v2142_v57  ;;  %3927 = vxpose.xlu1.b32.cont [12/16] %v3926_v12, 128  ;;  %v1840_v53 = vadd.f32 %v5663_v21, %v6467_v40  ;;  %v3752_v12 = vunpack.i.h.bf16 %v6466_v1  ;;  %v2473_v57 = vunpack.c.h.bf16 %v2345_v19  ;;  %v1838_v9 = vadd.f32 %v5663_v21, %v6469_v4  ;;  %v6470_v54 = vld [vmem:[#allocation53_spill] sm:$0xff] }
 0x2e3   : > { %v2183_v25 = vpop.f32.mrf.mxu0  ;;  %2850 = vmatmul.mubr.f32.gmra.mxu1 %v3747_v37  ;;  %2967 = vmatprep.subr.mxu1 %v6402_v39  ;;  %v2472_v40 = vunpack.c.l.bf16 %v2345_v19 }
 0x2e4   : > { %2854 = vmatprep.mubr.f32.mxu1 %v3749_v3  ;;  %2968 = vmatpush1.msra.mxu1 %v2137_v23  ;;  %v2127_v37 = vadd.f32 %v5571_v43, %v1840_v53  ;;  %v2470_v23 = vunpack.c.l.bf16 %v2344_v11  ;;  %v5750_v1 = vpop.trf.xlu0  ;;  %v3757_v43 = vunpack.i.h.bf16 %v6468_v16  ;;  %v3759_v11 = vunpack.i.l.bf16 %v6470_v54 }
 0x2e5   : > { %v5744_v13 = vpop.f32.mrf.mxu0  ;;  %2969 = vmatprep.subr.mxu1 %v6402_v39  ;;  %4043 = vxpose.xlu0.b32.cont [14/16] %v4042_v46, 128  ;;  %v2122_v46 = vadd.f32 %v5559_v28, %v1839_v7  ;;  %v4046_v55 = vpack.i.bf16 %v2441_v6, %v2473_v57  ;;  %v2440_v28 = vunpack.c.l.bf16 %v2329_v61  ;;  %v3762_v16 = vunpack.i.h.bf16 %v6470_v54 }
 0x2e6   : > { %2970 = vmatpush1.msra.mxu1 %v2132_v36  ;;  %3929 = vxpose.xlu1.b32.cont [13/16] %v3928_v44, 128  ;;  %v5756_v51 = vpop.permute.xlu1 %1619  ;;  %v2117_v44 = vadd.f32 %v5548_v17, %v1838_v9  ;;  %v3932_v25 = vpack.i.bf16 %v2438_v10, %v2470_v23  ;;  %v6471_v17 = vld [vmem:[#allocation54_spill] sm:$0xff] }
 0x2e7   : > { %v2188_v3 = vpop.f32.mrf.mxu0  ;;  %2855 = vmatmul.mubr.f32.gmra.mxu1 %v3752_v12  ;;  %2971 = vmatprep.subr.mxu1 %v6402_v39  ;;  %v3934_v61 = vpack.i.bf16 %v2440_v28, %v2472_v40 }
 0x2e8   : > { %2859 = vmatprep.mubr.f32.mxu1 %v3754_v24  ;;  %2972 = vmatpush1.msra.mxu1 %v2127_v37  ;;  %v3764_v24 = vunpack.i.l.bf16 %v6471_v17  ;;  %v3814_v3 = vunpack.i.l.bf16 %v5566_v30 }
 0x2e9   : > { %v5758_v8 = vpop.f32.mrf.mxu0  ;;  %2973 = vmatprep.subr.mxu1 %v6402_v39  ;;  %4045 = vxpose.xlu0.b32.cont [15/16] %v4044_v18, 128  ;;  %v3767_v18 = vunpack.i.h.bf16 %v6471_v17  ;;  %v3829_v17 = vunpack.i.l.bf16 %v5598_v47 }
 0x2ea   : > { %2974 = vmatpush1.msra.mxu1 %v2122_v46  ;;  %3931 = vxpose.xlu1.b32.cont [14/16] %v3930_v42, 128  ;;  %v3819_v46 = vunpack.i.l.bf16 %v5577_v45 }
 0x2eb   : > { %v2193_v53 = vpop.f32.mrf.mxu0  ;;  %2860 = vmatmul.mubr.f32.gmra.mxu1 %v3757_v43  ;;  %2975 = vmatprep.subr.mxu1 %v6402_v39  ;;  %v5768_v12 = vpop.permute.xlu1 %1279 }
 0x2ec   : > { %2864 = vmatprep.mubr.f32.mxu1 %v3759_v11  ;;  %2976 = vmatpush1.msra.mxu1 %v2117_v44  ;;  %v3827_v53 = vunpack.i.h.bf16 %v5588_v2 }
 0x2ed   : > { %v5765_v36 = vpop.f32.mrf.mxu0  ;;  %2977 = vmatprep.subr.mxu1 %v6402_v39  ;;  %4047 = vxpose.xlu0.b32.end [16/16] %v4046_v55, 128  ;;  %v3824_v55 = vunpack.i.l.bf16 %v5588_v2  ;;  %v3834_v2 = vunpack.i.l.bf16 %v5608_v35 }
 0x2ee   : > { %2978 = vmatpush1.msra.mxu1 %v5541_v48  ;;  %3933 = vxpose.xlu1.b32.cont [15/16] %v3932_v25, 128  ;;  %v3804_v48 = vunpack.i.l.bf16 %v5539_v63 }
 0x2ef   : > { %v2198_v19 = vpop.f32.mrf.mxu0  ;;  %2865 = vmatmul.mubr.f32.gmra.mxu1 %v3762_v16  ;;  %2979 = vmatprep.subr.mxu1 %v6402_v39  ;;  %v5776_v42 = vpop.permute.xlu1 %1274 }
 0x2f0   : > { %2869 = vmatprep.mubr.f32.mxu1 %v3764_v24  ;;  %2980 = vmatpush1.msra.mxu1 %v5523_v14  ;;  %v3807_v14 = vunpack.i.h.bf16 %v5539_v63  ;;  %v1389_v19 = vmul.f32 %v5639_v34, %v5398_v52  ;;  %v3837_v52 = vunpack.i.h.bf16 %v5608_v35  ;;  %v1401_v35 = vmul.f32 %v5639_v34, %v5489_v32 }
 0x2f1   : > { %2981 = vmatprep.subr.mxu1 %v6402_v39  ;;  %v5779_v6 = vpop.f32.mrf.mxu0 }
 0x2f2   : > { %2982 = vmatpush1.msra.mxu1 %v5507_v20  ;;  %3935 = vxpose.xlu1.b32.end [16/16] %v3934_v61, 128  ;;  %v3809_v20 = vunpack.i.l.bf16 %v5551_v5 }
 0x2f3   : > { %2870 = vmatmul.mubr.f32.gmra.mxu1 %v3767_v18  ;;  %2983 = vmatprep.subr.mxu1 %v6402_v39  ;;  %v2203_v57 = vpop.f32.mrf.mxu0 }
 0x2f4   : > { %2984 = vmatpush1.msra.mxu1 %v5493_v59  ;;  %2874 = vmatprep.mubr.f32.mxu1 %v3804_v48  ;;  %v5791_v37 = vpop.permute.xlu1 %1611  ;;  %v3812_v59 = vunpack.i.h.bf16 %v5551_v5  ;;  %v3822_v5 = vunpack.i.h.bf16 %v5577_v45  ;;  %v3832_v57 = vunpack.i.h.bf16 %v5598_v47 }
 0x2f5   : > { %2985 = vmatprep.subr.mxu1 %v6402_v39  ;;  %v5787_v7 = vpop.f32.mrf.mxu0 }
 0x2f6   : > { %2986 = vmatpush1.msra.mxu1 %v5471_v29  ;;  %v3817_v29 = vunpack.i.h.bf16 %v5566_v30  ;;  %v6472_v30 = vld [vmem:[#allocation59_spill] sm:$0xff] }
 0x2f7   : > { %2875 = vmatmul.mubr.f32.gmra.mxu1 %v3807_v14  ;;  %2987 = vmatprep.subr.mxu1 %v6402_v39  ;;  %v2208_v10 = vpop.f32.mrf.mxu0  ;;  %v1390_v28 = vmul.f32 %v5639_v34, %v6472_v30 }
 0x2f8   : > { %2879 = vmatprep.mubr.f32.mxu1 %v3809_v20 }
 0x2f9   : > { %v5795_v23 = vpop.f32.mrf.mxu0  ;;  %v5798_v63 = vpop.permute.xlu1 %1269 }
 0x2fb   : > { %2880 = vmatmul.mubr.f32.gmra.mxu1 %v3812_v59  ;;  %v2213_v4 = vpop.f32.mrf.mxu0 }
 0x2fc   : > { %2884 = vmatprep.mubr.f32.mxu1 %v3814_v3 }
 0x2fd   : > { %v5801_v9 = vpop.f32.mrf.mxu0 }
 0x2fe   : > { %v5804_v54 = vpop.permute.xlu1 %1607 }
 0x2ff   : > { %2885 = vmatmul.mubr.f32.gmra.mxu1 %v3817_v29  ;;  %v2218_v43 = vpop.f32.mrf.mxu0  ;;  %v3839_v29 = vunpack.i.l.bf16 %v5618_v41 }
 0x300   : > { %2889 = vmatprep.mubr.f32.mxu1 %v3819_v46 }
 0x301   : > { %v5807_v11 = vpop.f32.mrf.mxu0 }
 0x302   : > { %v1604_v25 = vpop.permute.xlu1 %1603 }
 0x303   : > { %2890 = vmatmul.mubr.f32.gmra.mxu1 %v3822_v5  ;;  %v2223_v44 = vpop.f32.mrf.mxu0  ;;  %v1715_v40 = vmul.f32 %v5650_v38, %v1604_v25  ;;  %v3844_v5 = vunpack.i.l.bf16 %v5626_v50  ;;  %v6473_v25 = vld [vmem:[#allocation23_spill] sm:$0xff] }
 0x304   : > { %2894 = vmatprep.mubr.f32.mxu1 %v3824_v55  ;;  %v1726_v55 = vmul.f32 %v5650_v38, %v5513_v0  ;;  %v1864_v30 = vadd.f32 %v5663_v21, %v6473_v25  ;;  %v6483_v25 = vld [vmem:[#allocation12_spill] sm:$0xff] }
 0x305   : > { %v5814_v16 = vpop.f32.mrf.mxu0  ;;  %v1779_v45 = vadd.f32 %v1715_v40, %v1390_v28  ;;  %v6474_v28 = vld [vmem:[#allocation27_spill] sm:$0xff] }
 0x306   : > { %v1600_v61 = vpop.permute.xlu1 %1599  ;;  %v1863_v40 = vadd.f32 %v5663_v21, %v6474_v28 }
 0x307   : > { %2895 = vmatmul.mubr.f32.gmra.mxu1 %v3827_v53  ;;  %v2228_v24 = vpop.f32.mrf.mxu0  ;;  %v1850_v18 = vadd.f32 %v5663_v21, %v1779_v45  ;;  %v1714_v48 = vmul.f32 %v5650_v38, %v1600_v61  ;;  %v1790_v45 = vadd.f32 %v1726_v55, %v1401_v35 }
 0x308   : > { %2899 = vmatprep.mubr.f32.mxu1 %v3829_v17  ;;  %v6475_v17 = vld [vmem:[#allocation8_spill] sm:$0xff]  ;;  %v6476_v24 = vld [vmem:[#allocation33_spill] sm:$0xff] }
 0x309   : > { %v2231_v14 = vpop.f32.mrf.mxu0  ;;  %v5824_v20 = vadd.f32 %v5706_v31, %v1850_v18  ;;  %v1778_v10 = vadd.f32 %v1714_v48, %v1389_v19  ;;  %v3842_v31 = vunpack.i.h.bf16 %v5618_v41  ;;  %v3847_v41 = vunpack.i.h.bf16 %v5626_v50  ;;  %v6477_v19 = vld [vmem:[#allocation39_spill] sm:$0xff] }
 0x30a   : > { %v3849_v0 = vunpack.i.l.bf16 %v6475_v17  ;;  %v1400_v61 = vmul.f32 %v5639_v34, %v6476_v24  ;;  %v1724_v32 = vmul.f32 %v5650_v38, %v6477_v19  ;;  %v3852_v55 = vunpack.i.h.bf16 %v6475_v17 }
 0x30b   : > { %2900 = vmatmul.mubr.f32.gmra.mxu1 %v3832_v57  ;;  %v2233_v59 = vpop.f32.mrf.mxu0  ;;  %v1849_v3 = vadd.f32 %v5663_v21, %v1778_v10  ;;  %v1861_v35 = vadd.f32 %v5663_v21, %v1790_v45 }
 0x30c   : > { %2904 = vmatprep.mubr.f32.mxu1 %v3834_v2  ;;  %v6479_v2 = vld [vmem:[#allocation36_spill] sm:$0xff]  ;;  %v6480_v59 = vld [vmem:[#allocation30_spill] sm:$0xff]  ;;  %v1616_v19 = vpop.permute.xlu0 %1615 }
 0x30d   : > { %v2236_v4 = vpop.f32.mrf.mxu0  ;;  %v5830_v46 = vadd.f32 %v5685_v33, %v1849_v3  ;;  %v1725_v33 = vmul.f32 %v5650_v38, %v5544_v56  ;;  %v6478_v56 = vld [vmem:[#allocation11_spill] sm:$0xff]  ;;  %v1399_v10 = vmul.f32 %v5639_v34, %v6479_v2  ;;  %v1862_v3 = vadd.f32 %v5663_v21, %v6480_v59 }
 0x30e   : > { %v1723_v48 = vmul.f32 %v5650_v38, %v6478_v56  ;;  %v2232_v17 = vadd.f32 %v2231_v14, %v1861_v35  ;;  %v1394_v2 = vmul.f32 %v5639_v34, %v5735_v60  ;;  %v1717_v60 = vmul.f32 %v5650_v38, %v5791_v37 }
 0x30f   : > { %2905 = vmatmul.mubr.f32.gmra.mxu1 %v3837_v52  ;;  %v2238_v47 = vpop.f32.mrf.mxu0  ;;  %v1789_v50 = vadd.f32 %v1725_v33, %v1400_v61  ;;  %v2237_v33 = vadd.f32 %v2236_v4, %v1862_v3  ;;  %v6486_v4 = vld [vmem:[#allocation10_spill] sm:$0xff]  ;;  %v1720_v61 = vmul.f32 %v5650_v38, %v5717_v58  ;;  %v3864_v3 = vunpack.i.l.bf16 %v5696_v22 }
 0x310   : > { %2909 = vmatprep.mubr.f32.mxu1 %v3839_v29  ;;  %v6481_v29 = vld [vmem:[#allocation26_spill] sm:$0xff]  ;;  %v1396_v24 = vmul.f32 %v5639_v34, %v6486_v4 }
 0x311   : > { %v2241_v43 = vpop.f32.mrf.mxu0  ;;  %v1398_v47 = vmul.f32 %v5639_v34, %v6481_v29  ;;  %v1393_v29 = vmul.f32 %v5639_v34, %v5768_v12 }
 0x312   : > { %v2242_v52 = vadd.f32 %v2241_v43, %v1863_v40  ;;  %v6484_v43 = vld [vmem:[#allocation22_spill] sm:$0xff]  ;;  %v6485_v40 = vld [vmem:[#allocation15_spill] sm:$0xff] }
 0x313   : > { %2910 = vmatmul.mubr.f32.gmra.mxu1 %v3842_v31  ;;  %v2243_v44 = vpop.f32.mrf.mxu0  ;;  %v6482_v31 = vld [vmem:[#allocation56_spill] sm:$0xff]  ;;  %v1397_v28 = vmul.f32 %v5639_v34, %v6484_v43 }
 0x314   : > { %2914 = vmatprep.mubr.f32.mxu1 %v3844_v5  ;;  %v1722_v5 = vmul.f32 %v5650_v38, %v6482_v31  ;;  %v1788_v44 = vadd.f32 %v1724_v32, %v1399_v10  ;;  %v3857_v32 = vunpack.i.h.bf16 %v6483_v25  ;;  %v1718_v10 = vmul.f32 %v5650_v38, %v1616_v19 }
 0x315   : > { %v2246_v53 = vpop.f32.mrf.mxu0 }
 0x316   : > { %v2247_v18 = vadd.f32 %v2246_v53, %v1864_v30  ;;  %v3854_v30 = vunpack.i.l.bf16 %v6483_v25  ;;  %v1721_v53 = vmul.f32 %v5650_v38, %v6485_v40  ;;  %v1786_v45 = vadd.f32 %v1722_v5, %v1397_v28 }
 0x317   : > { %2915 = vmatmul.mubr.f32.gmra.mxu1 %v3847_v41  ;;  %v2248_v57 = vpop.f32.mrf.mxu0  ;;  %v1787_v41 = vadd.f32 %v1723_v48, %v1398_v47  ;;  %v1859_v56 = vadd.f32 %v5663_v21, %v1788_v44  ;;  %v3859_v48 = vunpack.i.l.bf16 %v5674_v62  ;;  %v1392_v47 = vmul.f32 %v5639_v34, %v5776_v42 }
 0x318   : > { %2919 = vmatprep.mubr.f32.mxu1 %v3849_v0  ;;  %2988 = vmatpush2.msra.mxu1 %v2247_v18  ;;  %v1860_v0 = vadd.f32 %v5663_v21, %v1789_v50  ;;  %v1719_v18 = vmul.f32 %v5650_v38, %v5756_v51  ;;  %v1785_v57 = vadd.f32 %v1721_v53, %v1396_v24  ;;  %v3869_v42 = vunpack.i.l.bf16 %v5714_v49 }
 0x319   : > { %2989 = vmatprep.subr.mxu1 %v6402_v39  ;;  %v1395_v50 = vmul.f32 %v5639_v34, %v5688_v26  ;;  %v1858_v58 = vadd.f32 %v5663_v21, %v1787_v41  ;;  %v2222_v51 = vadd.f32 %v5807_v11, %v1859_v56  ;;  %v1857_v59 = vadd.f32 %v5663_v21, %v1786_v45 }
 0x31a   : > { %2990 = vmatpush2.msra.mxu1 %v2242_v52  ;;  %v2227_v14 = vadd.f32 %v5814_v16, %v1860_v0  ;;  %v3862_v26 = vunpack.i.h.bf16 %v5674_v62  ;;  %v1783_v52 = vadd.f32 %v1719_v18, %v1394_v2  ;;  %v1856_v31 = vadd.f32 %v5663_v21, %v1785_v57 }
 0x31b   : > { %2920 = vmatmul.mubr.f32.gmra.mxu1 %v3852_v55  ;;  %2991 = vmatprep.subr.mxu1 %v6402_v39  ;;  %v1784_v16 = vadd.f32 %v1720_v61, %v1395_v50  ;;  %v2217_v11 = vadd.f32 %v5801_v9, %v1858_v58  ;;  %v2212_v62 = vadd.f32 %v5795_v23, %v1857_v59  ;;  %v3867_v9 = vunpack.i.h.bf16 %v5696_v22 }
 0x31c   : > { %2992 = vmatpush2.msra.mxu1 %v2237_v33  ;;  %2924 = vmatprep.mubr.f32.mxu1 %v3854_v30  ;;  %v1716_v5 = vmul.f32 %v5650_v38, %v5804_v54  ;;  %v1782_v12 = vadd.f32 %v1718_v10, %v1393_v29  ;;  %v1854_v55 = vadd.f32 %v5663_v21, %v1783_v52  ;;  %v3872_v22 = vunpack.i.h.bf16 %v5714_v49 }
 0x31d   : > { %2993 = vmatprep.subr.mxu1 %v6402_v39  ;;  %v1855_v37 = vadd.f32 %v5663_v21, %v1784_v16  ;;  %v2207_v44 = vadd.f32 %v5787_v7, %v1856_v31  ;;  %v1781_v35 = vadd.f32 %v1717_v60, %v1392_v47  ;;  %v1391_v23 = vmul.f32 %v5639_v34, %v5798_v63 }
 0x31e   : > { %2994 = vmatpush2.msra.mxu1 %v2232_v17  ;;  %v1853_v33 = vadd.f32 %v5663_v21, %v1782_v12  ;;  %v2197_v7 = vadd.f32 %v5765_v36, %v1854_v55  ;;  %v3874_v34 = vunpack.i.l.bf16 %v5732_v27  ;;  %v3877_v49 = vunpack.i.h.bf16 %v5732_v27 }
 0x31f   : > { %2925 = vmatmul.mubr.f32.gmra.mxu1 %v3857_v32  ;;  %2995 = vmatprep.subr.mxu1 %v6402_v39  ;;  %v2202_v38 = vadd.f32 %v5779_v6, %v1855_v37  ;;  %v1780_v54 = vadd.f32 %v1716_v5, %v1391_v23  ;;  %v1852_v25 = vadd.f32 %v5663_v21, %v1781_v35  ;;  %v3879_v41 = vunpack.i.l.bf16 %v5750_v1 }
 0x320   : > { %2996 = vmatpush2.msra.mxu1 %v2227_v14  ;;  %2929 = vmatprep.mubr.f32.mxu1 %v3859_v48  ;;  %v2192_v63 = vadd.f32 %v5758_v8, %v1853_v33  ;;  %v3882_v28 = vunpack.i.h.bf16 %v5750_v1 }
 0x321   : > { %2997 = vmatprep.subr.mxu1 %v6402_v39  ;;  %v1851_v6 = vadd.f32 %v5663_v21, %v1780_v54  ;;  %v2187_v36 = vadd.f32 %v5744_v13, %v1852_v25 }
 0x322   : > { %2998 = vmatpush2.msra.mxu1 %v2222_v51 }
 0x323   : > { %2930 = vmatmul.mubr.f32.gmra.mxu1 %v3862_v26  ;;  %2999 = vmatprep.subr.mxu1 %v6402_v39  ;;  %v2182_v21 = vadd.f32 %v5725_v15, %v1851_v6 }
 0x324   : > { %3000 = vmatpush2.msra.mxu1 %v2217_v11  ;;  %2934 = vmatprep.mubr.f32.mxu1 %v3864_v3 }
 0x325   : > { %3001 = vmatprep.subr.mxu1 %v6402_v39 }
 0x326   : > { %3002 = vmatpush2.msra.mxu1 %v2212_v62 }
 0x327   : > { %2935 = vmatmul.mubr.f32.gmra.mxu1 %v3867_v9  ;;  %3003 = vmatprep.subr.mxu1 %v6402_v39 }
 0x328   : > { %3004 = vmatpush2.msra.mxu1 %v2207_v44  ;;  %2939 = vmatprep.mubr.f32.mxu1 %v3869_v42 }
 0x329   : > { %3005 = vmatprep.subr.mxu1 %v6402_v39 }
 0x32a   : > { %3006 = vmatpush2.msra.mxu1 %v2202_v38 }
 0x32b   : > { %2940 = vmatmul.mubr.f32.gmra.mxu1 %v3872_v22  ;;  %3007 = vmatprep.subr.mxu1 %v6402_v39 }
 0x32c   : > { %3008 = vmatpush2.msra.mxu1 %v2197_v7  ;;  %2944 = vmatprep.mubr.f32.mxu1 %v3874_v34 }
 0x32d   : > { %v5924_v30 = vpop.trf.xlu0  ;;  %3009 = vmatprep.subr.mxu1 %v6402_v39 }
 0x32e   : > { %3010 = vmatpush2.msra.mxu1 %v2192_v63 }
 0x32f   : > { %2945 = vmatmul.mubr.f32.gmra.mxu1 %v3877_v49  ;;  %3011 = vmatprep.subr.mxu1 %v6402_v39 }
 0x330   : > { %3012 = vmatpush2.msra.mxu1 %v2187_v36  ;;  %2949 = vmatprep.mubr.f32.mxu1 %v3879_v41 }
 0x331   : > { %v5932_v8 = vpop.trf.xlu0  ;;  %3013 = vmatprep.subr.mxu1 %v6402_v39 }
 0x332   : > { %v3936_v43 = vpop.trf.xlu1  ;;  %3014 = vmatpush2.msra.mxu1 %v2182_v21 }
 0x333   : > { %v3937_v27 = vunpack.i.l.bf16 %v3936_v43  ;;  %v3940_v13 = vunpack.i.h.bf16 %v3936_v43  ;;  %2950 = vmatmul.mubr.f32.gmra.mxu1 %v3882_v28  ;;  %3015 = vmatprep.subr.mxu1 %v6402_v39  ;;  %v4049_v28 = vunpack.i.l.bf16 %v5924_v30 }
 0x334   : > { %3016 = vmatpush2.msra.mxu1 %v5824_v20 }
 0x335   : > { %3019 = vmatprep.mubr.f32.mxu1 %v3937_v27  ;;  %v5938_v40 = vpop.trf.xlu0  ;;  %3017 = vmatprep.subr.mxu1 %v6402_v39  ;;  %v4052_v27 = vunpack.i.h.bf16 %v5924_v30 }
 0x336   : > { %v3941_v15 = vpop.trf.xlu1  ;;  %3018 = vmatpush2.msra.mxu1 %v5830_v46 }
 0x337   : > { %v3942_v53 = vunpack.i.l.bf16 %v3941_v15  ;;  %3020 = vmatmul.mubr.f32.vlgmr.msra.gmra.mxu1 %v3940_v13  ;;  %v3945_v0 = vunpack.i.h.bf16 %v3941_v15  ;;  %v4054_v13 = vunpack.i.l.bf16 %v5932_v8 }
 0x339   : > { %3024 = vmatprep.mubr.f32.mxu1 %v3942_v53  ;;  %v5942_v1 = vpop.trf.xlu0  ;;  %v4057_v53 = vunpack.i.h.bf16 %v5932_v8 }
 0x33a   : > { %v3946_v17 = vpop.trf.xlu1  ;;  %v4064_v30 = vunpack.i.l.bf16 %v5942_v1 }
 0x33b   : > { %v3947_v45 = vunpack.i.l.bf16 %v3946_v17  ;;  %3025 = vmatmul.mubr.f32.gmra.mxu1 %v3945_v0  ;;  %v3950_v4 = vunpack.i.h.bf16 %v3946_v17  ;;  %v4059_v17 = vunpack.i.l.bf16 %v5938_v40 }
 0x33d   : > { %3029 = vmatprep.mubr.f32.mxu1 %v3947_v45  ;;  %v5944_v20 = vpop.trf.xlu0 }
 0x33e   : > { %v3951_v24 = vpop.trf.xlu1  ;;  %v4069_v8 = vunpack.i.l.bf16 %v5944_v20 }
 0x33f   : > { %v3952_v61 = vunpack.i.l.bf16 %v3951_v24  ;;  %3030 = vmatmul.mubr.f32.gmra.mxu1 %v3950_v4  ;;  %v3955_v39 = vunpack.i.h.bf16 %v3951_v24  ;;  %v4062_v4 = vunpack.i.h.bf16 %v5938_v40 }
 0x341   : > { %3034 = vmatprep.mubr.f32.mxu1 %v3952_v61  ;;  %v5946_v19 = vpop.trf.xlu0 }
 0x342   : > { %v3956_v46 = vpop.trf.xlu1  ;;  %v4074_v40 = vunpack.i.l.bf16 %v5946_v19 }
 0x343   : > { %v3957_v32 = vunpack.i.l.bf16 %v3956_v46  ;;  %3035 = vmatmul.mubr.f32.gmra.mxu1 %v3955_v39  ;;  %v3960_v18 = vunpack.i.h.bf16 %v3956_v46  ;;  %v4067_v39 = vunpack.i.h.bf16 %v5942_v1 }
 0x345   : > { %3039 = vmatprep.mubr.f32.mxu1 %v3957_v32  ;;  %v5948_v56 = vpop.trf.xlu0 }
 0x346   : > { %v3961_v14 = vpop.trf.xlu1  ;;  %v4079_v1 = vunpack.i.l.bf16 %v5948_v56 }
 0x347   : > { %v3962_v48 = vunpack.i.l.bf16 %v3961_v14  ;;  %3040 = vmatmul.mubr.f32.gmra.mxu1 %v3960_v18  ;;  %v3965_v57 = vunpack.i.h.bf16 %v3961_v14  ;;  %v4072_v18 = vunpack.i.h.bf16 %v5944_v20 }
 0x349   : > { %3044 = vmatprep.mubr.f32.mxu1 %v3962_v48  ;;  %v5950_v50 = vpop.trf.xlu0 }
 0x34a   : > { %v3966_v58 = vpop.trf.xlu1  ;;  %v4084_v20 = vunpack.i.l.bf16 %v5950_v50 }
 0x34b   : > { %v3967_v2 = vunpack.i.l.bf16 %v3966_v58  ;;  %3045 = vmatmul.mubr.f32.gmra.mxu1 %v3965_v57  ;;  %v3970_v51 = vunpack.i.h.bf16 %v3966_v58  ;;  %v4077_v57 = vunpack.i.h.bf16 %v5946_v19 }
 0x34d   : > { %3049 = vmatprep.mubr.f32.mxu1 %v3967_v2  ;;  %v5952_v10 = vpop.trf.xlu0 }
 0x34e   : > { %v3971_v16 = vpop.trf.xlu1  ;;  %v4089_v19 = vunpack.i.l.bf16 %v5952_v10 }
 0x34f   : > { %v3972_v59 = vunpack.i.l.bf16 %v3971_v16  ;;  %3050 = vmatmul.mubr.f32.gmra.mxu1 %v3970_v51  ;;  %v3975_v26 = vunpack.i.h.bf16 %v3971_v16  ;;  %v4082_v51 = vunpack.i.h.bf16 %v5948_v56 }
 0x351   : > { %3054 = vmatprep.mubr.f32.mxu1 %v3972_v59  ;;  %v5954_v3 = vpop.trf.xlu0 }
 0x352   : > { %v3976_v52 = vpop.trf.xlu1  ;;  %v4094_v56 = vunpack.i.l.bf16 %v5954_v3 }
 0x353   : > { %v3977_v29 = vunpack.i.l.bf16 %v3976_v52  ;;  %3055 = vmatmul.mubr.f32.gmra.mxu1 %v3975_v26  ;;  %v3980_v60 = vunpack.i.h.bf16 %v3976_v52  ;;  %v4087_v26 = vunpack.i.h.bf16 %v5950_v50 }
 0x355   : > { %3059 = vmatprep.mubr.f32.mxu1 %v3977_v29  ;;  %v5956_v11 = vpop.trf.xlu0 }
 0x356   : > { %v3981_v47 = vpop.trf.xlu1  ;;  %v4099_v50 = vunpack.i.l.bf16 %v5956_v11 }
 0x357   : > { %v3982_v31 = vunpack.i.l.bf16 %v3981_v47  ;;  %3060 = vmatmul.mubr.f32.gmra.mxu1 %v3980_v60  ;;  %v3985_v62 = vunpack.i.h.bf16 %v3981_v47  ;;  %v4092_v60 = vunpack.i.h.bf16 %v5952_v10 }
 0x359   : > { %3064 = vmatprep.mubr.f32.mxu1 %v3982_v31  ;;  %v5958_v5 = vpop.trf.xlu0 }
 0x35a   : > { %v3986_v12 = vpop.trf.xlu1 }
 0x35b   : > { %v3987_v37 = vunpack.i.l.bf16 %v3986_v12  ;;  %3065 = vmatmul.mubr.f32.gmra.mxu1 %v3985_v62  ;;  %v3990_v9 = vunpack.i.h.bf16 %v3986_v12  ;;  %v4097_v62 = vunpack.i.h.bf16 %v5954_v3 }
 0x35d   : > { %3069 = vmatprep.mubr.f32.mxu1 %v3987_v37  ;;  %v5960_v42 = vpop.trf.xlu0 }
 0x35e   : > { %v3991_v55 = vpop.trf.xlu1 }
 0x35f   : > { %v3992_v44 = vunpack.i.l.bf16 %v3991_v55  ;;  %3070 = vmatmul.mubr.f32.gmra.mxu1 %v3990_v9  ;;  %v3995_v35 = vunpack.i.h.bf16 %v3991_v55  ;;  %v4102_v9 = vunpack.i.h.bf16 %v5956_v11  ;;  %v4104_v55 = vunpack.i.l.bf16 %v5958_v5 }
 0x361   : > { %3074 = vmatprep.mubr.f32.mxu1 %v3992_v44  ;;  %v5962_v23 = vpop.trf.xlu0 }
 0x362   : > { %v3996_v38 = vpop.trf.xlu1 }
 0x363   : > { %v3997_v54 = vunpack.i.l.bf16 %v3996_v38  ;;  %3075 = vmatmul.mubr.f32.gmra.mxu1 %v3995_v35  ;;  %v4000_v33 = vunpack.i.h.bf16 %v3996_v38  ;;  %v4107_v35 = vunpack.i.h.bf16 %v5958_v5  ;;  %v4109_v38 = vunpack.i.l.bf16 %v5960_v42 }
 0x365   : > { %3079 = vmatprep.mubr.f32.mxu1 %v3997_v54  ;;  %v5964_v22 = vpop.trf.xlu0 }
 0x366   : > { %v4001_v7 = vpop.trf.xlu1 }
 0x367   : > { %v4002_v25 = vunpack.i.l.bf16 %v4001_v7  ;;  %3080 = vmatmul.mubr.f32.gmra.mxu1 %v4000_v33  ;;  %v4005_v34 = vunpack.i.h.bf16 %v4001_v7  ;;  %v4112_v33 = vunpack.i.h.bf16 %v5960_v42  ;;  %v4114_v7 = vunpack.i.l.bf16 %v5962_v23 }
 0x369   : > { %3084 = vmatprep.mubr.f32.mxu1 %v4002_v25  ;;  %v5966_v6 = vpop.trf.xlu0 }
 0x36a   : > { %v4006_v63 = vpop.trf.xlu1 }
 0x36b   : > { %v4007_v49 = vunpack.i.l.bf16 %v4006_v63  ;;  %3085 = vmatmul.mubr.f32.gmra.mxu1 %v4005_v34  ;;  %v4010_v36 = vunpack.i.h.bf16 %v4006_v63  ;;  %v4117_v34 = vunpack.i.h.bf16 %v5962_v23  ;;  %v4119_v63 = vunpack.i.l.bf16 %v5964_v22 }
 0x36d   : > { %3089 = vmatprep.mubr.f32.mxu1 %v4007_v49 }
 0x36e   : > { %v4011_v41 = vpop.trf.xlu1 }
 0x36f   : > { %v4012_v21 = vunpack.i.l.bf16 %v4011_v41  ;;  %v4015_v43 = vunpack.i.h.bf16 %v4011_v41  ;;  %3090 = vmatmul.mubr.f32.gmra.mxu1 %v4010_v36  ;;  %v4122_v36 = vunpack.i.h.bf16 %v5964_v22  ;;  %v4124_v41 = vunpack.i.l.bf16 %v5966_v6 }
 0x371   : > { %3094 = vmatprep.mubr.f32.mxu1 %v4012_v21 }
 0x373   : > { %3095 = vmatmul.mubr.f32.gmra.mxu1 %v4015_v43  ;;  %v4127_v43 = vunpack.i.h.bf16 %v5966_v6 }
 0x374   : > { %3099 = vmatprep.mubr.f32.mxu1 %v4049_v28 }
 0x377   : > { %v5971_v15 = vpop.f32.mrf.mxu1  ;;  %3100 = vmatmul.mubr.f32.gmra.mxu1 %v4052_v27 }
 0x378   : > { %3104 = vmatprep.mubr.f32.mxu1 %v4054_v13 }
 0x379   : > { %v2798_v0 = vpop.f32.mrf.mxu1 }
 0x37b   : > { %v5975_v45 = vpop.f32.mrf.mxu1  ;;  %3105 = vmatmul.mubr.f32.gmra.mxu1 %v4057_v53 }
 0x37c   : > { %3109 = vmatprep.mubr.f32.mxu1 %v4059_v17 }
 0x37d   : > { %v2803_v24 = vpop.f32.mrf.mxu1 }
 0x37f   : > { %v5979_v61 = vpop.f32.mrf.mxu1  ;;  %3110 = vmatmul.mubr.f32.gmra.mxu1 %v4062_v4 }
 0x380   : > { %3114 = vmatprep.mubr.f32.mxu1 %v4064_v30 }
 0x381   : > { %v2808_v46 = vpop.f32.mrf.mxu1 }
 0x383   : > { %v5983_v32 = vpop.f32.mrf.mxu1  ;;  %3115 = vmatmul.mubr.f32.gmra.mxu1 %v4067_v39 }
 0x384   : > { %3119 = vmatprep.mubr.f32.mxu1 %v4069_v8 }
 0x385   : > { %v2813_v14 = vpop.f32.mrf.mxu1 }
 0x387   : > { %v5987_v48 = vpop.f32.mrf.mxu1  ;;  %3120 = vmatmul.mubr.f32.gmra.mxu1 %v4072_v18 }
 0x388   : > { %3124 = vmatprep.mubr.f32.mxu1 %v4074_v40 }
 0x389   : > { %v2818_v58 = vpop.f32.mrf.mxu1 }
 0x38b   : > { %v5991_v2 = vpop.f32.mrf.mxu1  ;;  %3125 = vmatmul.mubr.f32.gmra.mxu1 %v4077_v57 }
 0x38c   : > { %3129 = vmatprep.mubr.f32.mxu1 %v4079_v1 }
 0x38d   : > { %v2823_v16 = vpop.f32.mrf.mxu1 }
 0x38f   : > { %v5995_v59 = vpop.f32.mrf.mxu1  ;;  %3130 = vmatmul.mubr.f32.gmra.mxu1 %v4082_v51 }
 0x390   : > { %3134 = vmatprep.mubr.f32.mxu1 %v4084_v20 }
 0x391   : > { %v2828_v52 = vpop.f32.mrf.mxu1 }
 0x393   : > { %v5999_v29 = vpop.f32.mrf.mxu1  ;;  %3135 = vmatmul.mubr.f32.gmra.mxu1 %v4087_v26 }
 0x394   : > { %3139 = vmatprep.mubr.f32.mxu1 %v4089_v19 }
 0x395   : > { %v2833_v47 = vpop.f32.mrf.mxu1 }
 0x397   : > { %v6003_v31 = vpop.f32.mrf.mxu1  ;;  %3140 = vmatmul.mubr.f32.gmra.mxu1 %v4092_v60 }
 0x398   : > { %3144 = vmatprep.mubr.f32.mxu1 %v4094_v56 }
 0x399   : > { %v2838_v12 = vpop.f32.mrf.mxu1 }
 0x39b   : > { %v6007_v37 = vpop.f32.mrf.mxu1  ;;  %3145 = vmatmul.mubr.f32.gmra.mxu1 %v4097_v62 }
 0x39c   : > { %3149 = vmatprep.mubr.f32.mxu1 %v4099_v50 }
 0x39d   : > { %v2843_v10 = vpop.f32.mrf.mxu1 }
 0x39f   : > { %v6011_v44 = vpop.f32.mrf.mxu1  ;;  %3150 = vmatmul.mubr.f32.gmra.mxu1 %v4102_v9 }
 0x3a0   : > { %3154 = vmatprep.mubr.f32.mxu1 %v4104_v55  ;;  %v2250_v55 = vld [vmem:[#allocation2 + $0xb0] sm:$0xff] }
 0x3a1   : > { %v2848_v3 = vpop.f32.mrf.mxu1 }
 0x3a3   : > { %v6015_v54 = vpop.f32.mrf.mxu1  ;;  %3155 = vmatmul.mubr.f32.gmra.mxu1 %v4107_v35 }
 0x3a4   : > { %3159 = vmatprep.mubr.f32.mxu1 %v4109_v38 }
 0x3a5   : > { %v2853_v11 = vpop.f32.mrf.mxu1 }
 0x3a6   : > { %v2251_v11 = vld [vmem:[#allocation2] sm:$0xff] }
 0x3a7   : > { %v6019_v25 = vpop.f32.mrf.mxu1  ;;  %3160 = vmatmul.mubr.f32.gmra.mxu1 %v4112_v33 }
 0x3a8   : > { %3164 = vmatprep.mubr.f32.mxu1 %v4114_v7 }
 0x3a9   : > { %v2858_v5 = vpop.f32.mrf.mxu1 }
 0x3ab   : > { %v6023_v49 = vpop.f32.mrf.mxu1  ;;  %3165 = vmatmul.mubr.f32.gmra.mxu1 %v4117_v34 }
 0x3ac   : > { %3169 = vmatprep.mubr.f32.mxu1 %v4119_v63 }
 0x3ad   : > { %v2863_v42 = vpop.f32.mrf.mxu1 }
 0x3af   : > { %v6027_v21 = vpop.f32.mrf.mxu1  ;;  %3170 = vmatmul.mubr.f32.gmra.mxu1 %v4122_v36  ;;  %v2252_v36 = vld [vmem:[#allocation2 + $0xd8] sm:$0xff] }
 0x3b0   : > { %3174 = vmatprep.mubr.f32.mxu1 %v4124_v41 }
 0x3b1   : > { %v2868_v23 = vpop.f32.mrf.mxu1 }
 0x3b3   : > { %v6030_v28 = vpop.f32.mrf.mxu1  ;;  %3175 = vmatmul.mubr.f32.gmra.mxu1 %v4127_v43 }
 0x3b5   : > { %v2873_v27 = vpop.f32.mrf.mxu1 }
 0x3b6   : > { %v2253_v27 = vld [vmem:[#allocation2 + $0x18] sm:$0xff] }
 0x3b7   : > { %v6032_v13 = vpop.f32.mrf.mxu1 }
 0x3b9   : > { %v2878_v53 = vpop.f32.mrf.mxu1 }
 0x3bb   : > { %v6034_v22 = vpop.f32.mrf.mxu1 }
 0x3bd   : > { %v2883_v0 = vpop.f32.mrf.mxu1 }
 0x3bf   : > { %v6036_v17 = vpop.f32.mrf.mxu1 }
 0x3c1   : > { %v2888_v4 = vpop.f32.mrf.mxu1 }
 0x3c3   : > { %v6038_v24 = vpop.f32.mrf.mxu1 }
 0x3c5   : > { %v2893_v30 = vpop.f32.mrf.mxu1 }
 0x3c6   : > { %v2254_v30 = vld [vmem:[#allocation2 + $0x50] sm:$0xff] }
 0x3c7   : > { %v6040_v6 = vpop.f32.mrf.mxu1 }
 0x3c9   : > { %v2898_v39 = vpop.f32.mrf.mxu1 }
 0x3cb   : > { %v6042_v46 = vpop.f32.mrf.mxu1 }
 0x3cd   : > { %v2903_v8 = vpop.f32.mrf.mxu1 }
 0x3cf   : > { %v6044_v18 = vpop.f32.mrf.mxu1 }
 0x3d1   : > { %v2908_v14 = vpop.f32.mrf.mxu1 }
 0x3d3   : > { %v6046_v40 = vpop.f32.mrf.mxu1 }
 0x3d5   : > { %v2913_v57 = vpop.f32.mrf.mxu1 }
 0x3d6   : > { %v2255_v57 = vld [vmem:[#allocation2 + $0x68] sm:$0xff] }
 0x3d7   : > { %v6048_v58 = vpop.f32.mrf.mxu1 }
 0x3d9   : > { %v2918_v1 = vpop.f32.mrf.mxu1 }
 0x3db   : > { %v6050_v51 = vpop.f32.mrf.mxu1 }
 0x3dd   : > { %v2923_v16 = vpop.f32.mrf.mxu1 }
 0x3df   : > { %v6052_v20 = vpop.f32.mrf.mxu1 }
 0x3e1   : > { %v2928_v26 = vpop.f32.mrf.mxu1 }
 0x3e3   : > { %v6054_v52 = vpop.f32.mrf.mxu1 }
 0x3e5   : > { %v2933_v19 = vpop.f32.mrf.mxu1 }
 0x3e6   : > { %v2256_v19 = vld [vmem:[#allocation2 + $0x30] sm:$0xff] }
 0x3e7   : > { %v6056_v60 = vpop.f32.mrf.mxu1 }
 0x3e9   : > { %v2938_v47 = vpop.f32.mrf.mxu1 }
 0x3eb   : > { %v6058_v56 = vpop.f32.mrf.mxu1 }
 0x3ed   : > { %v2943_v62 = vpop.f32.mrf.mxu1 }
 0x3ef   : > { %v6060_v12 = vpop.f32.mrf.mxu1 }
 0x3f1   : > { %v2948_v50 = vpop.f32.mrf.mxu1 }
 0x3f3   : > { %v6062_v9 = vpop.f32.mrf.mxu1 }
 0x3f5   : > { %v2953_v10 = vpop.f32.mrf.mxu1 }
 0x3f6   : > { %v2257_v10 = vld [vmem:[#allocation2 + $0x48] sm:$0xff] }
 0x3f7   : > { %v3021_v35 = vpop.f32.mrf.mxu1 }
 0x3f8   : > { %v3022_v3 = vadd.f32 %v3021_v35, %v5971_v15 }
 0x3f9   : > { %v3023_v38 = vpop.f32.mrf.mxu1 }
 0x3fa   : > { %v3180_v33 = vadd.f32 %v3022_v3, %v2250_v55  ;;  %v2258_v38 = vld [vmem:[#allocation2 + $0x80] sm:$0xff] }
 0x3fb   : > { %v3026_v7 = vpop.f32.mrf.mxu1 }
 0x3fc   : > { %3212 = vst [vmem:[#allocation2 + $0xb0] sm:$0xff] %v3180_v33  ;;  %v3027_v34 = vadd.f32 %v3026_v7, %v5975_v45 }
 0x3fd   : > { %v3028_v5 = vpop.f32.mrf.mxu1 }
 0x3fe   : > { %v3181_v63 = vadd.f32 %v3027_v34, %v2251_v11  ;;  %v2259_v34 = vld [vmem:[#allocation2 + $0x88] sm:$0xff] }
 0x3ff   : > { %v3031_v42 = vpop.f32.mrf.mxu1 }
 0x400   : > { %3213 = vst [vmem:[#allocation2] sm:$0xff] %v3181_v63  ;;  %v3032_v41 = vadd.f32 %v3031_v42, %v5979_v61  ;;  %v2260_v42 = vld [vmem:[#allocation2 + $0xe8] sm:$0xff] }
 0x401   : > { %v3033_v43 = vpop.f32.mrf.mxu1 }
 0x402   : > { %v3182_v23 = vadd.f32 %v3032_v41, %v2252_v36 }
 0x403   : > { %v3036_v53 = vpop.f32.mrf.mxu1 }
 0x404   : > { %3214 = vst [vmem:[#allocation2 + $0xd8] sm:$0xff] %v3182_v23  ;;  %v3037_v15 = vadd.f32 %v3036_v53, %v5983_v32 }
 0x405   : > { %v3038_v0 = vpop.f32.mrf.mxu1 }
 0x406   : > { %v3183_v4 = vadd.f32 %v3037_v15, %v2253_v27  ;;  %v2261_v27 = vld [vmem:[#allocation2 + $0xb8] sm:$0xff] }
 0x407   : > { %v3041_v39 = vpop.f32.mrf.mxu1 }
 0x408   : > { %3215 = vst [vmem:[#allocation2 + $0x18] sm:$0xff] %v3183_v4  ;;  %v3042_v45 = vadd.f32 %v3041_v39, %v5987_v48  ;;  %v2262_v4 = vld [vmem:[#allocation2 + $0x60] sm:$0xff] }
 0x409   : > { %v3043_v8 = vpop.f32.mrf.mxu1 }
 0x40a   : > { %v3184_v14 = vadd.f32 %v3042_v45, %v2254_v30  ;;  %v2263_v8 = vld [vmem:[#allocation2 + $0xf0] sm:$0xff] }
 0x40b   : > { %v3046_v1 = vpop.f32.mrf.mxu1 }
 0x40c   : > { %3216 = vst [vmem:[#allocation2 + $0x50] sm:$0xff] %v3184_v14  ;;  %v3047_v61 = vadd.f32 %v3046_v1, %v5991_v2 }
 0x40d   : > { %v3048_v16 = vpop.f32.mrf.mxu1 }
 0x40e   : > { %v3185_v26 = vadd.f32 %v3047_v61, %v2255_v57  ;;  %v2264_v61 = vld [vmem:[#allocation2 + $0x8] sm:$0xff] }
 0x40f   : > { %v3051_v47 = vpop.f32.mrf.mxu1 }
 0x410   : > { %3217 = vst [vmem:[#allocation2 + $0x68] sm:$0xff] %v3185_v26  ;;  %v3052_v32 = vadd.f32 %v3051_v47, %v5995_v59  ;;  %v2265_v47 = vld [vmem:[#allocation2 + $0x78] sm:$0xff] }
 0x411   : > { %v3053_v62 = vpop.f32.mrf.mxu1 }
 0x412   : > { %v3186_v50 = vadd.f32 %v3052_v32, %v2256_v19 }
 0x413   : > { %v3056_v55 = vpop.f32.mrf.mxu1 }
 0x414   : > { %3218 = vst [vmem:[#allocation2 + $0x30] sm:$0xff] %v3186_v50  ;;  %v3057_v48 = vadd.f32 %v3056_v55, %v5999_v29 }
 0x415   : > { %v3058_v35 = vpop.f32.mrf.mxu1 }
 0x416   : > { %v3187_v3 = vadd.f32 %v3057_v48, %v2257_v10  ;;  %v2266_v10 = vld [vmem:[#allocation2 + $0x38] sm:$0xff] }
 0x417   : > { %v3061_v33 = vpop.f32.mrf.mxu1 }
 0x418   : > { %3219 = vst [vmem:[#allocation2 + $0x48] sm:$0xff] %v3187_v3  ;;  %v3062_v2 = vadd.f32 %v3061_v33, %v6003_v31  ;;  %v2267_v3 = vld [vmem:[#allocation2 + $0x58] sm:$0xff] }
 0x419   : > { %v3063_v11 = vpop.f32.mrf.mxu1 }
 0x41a   : > { %v3188_v7 = vadd.f32 %v3062_v2, %v2258_v38  ;;  %v2268_v11 = vld [vmem:[#allocation2 + $0x40] sm:$0xff] }
 0x41b   : > { %v3066_v5 = vpop.f32.mrf.mxu1 }
 0x41c   : > { %3220 = vst [vmem:[#allocation2 + $0x80] sm:$0xff] %v3188_v7  ;;  %v3067_v59 = vadd.f32 %v3066_v5, %v6007_v37 }
 0x41d   : > { %v3068_v63 = vpop.f32.mrf.mxu1 }
 0x41e   : > { %v3189_v36 = vadd.f32 %v3067_v59, %v2259_v34  ;;  %v2269_v59 = vld [vmem:[#allocation2 + $0xc8] sm:$0xff] }
 0x41f   : > { %v3071_v41 = vpop.f32.mrf.mxu1 }
 0x420   : > { %3221 = vst [vmem:[#allocation2 + $0x88] sm:$0xff] %v3189_v36  ;;  %v3072_v29 = vadd.f32 %v3071_v41, %v6011_v44  ;;  %v2270_v41 = vld [vmem:[#allocation2 + $0xe0] sm:$0xff] }
 0x421   : > { %v3073_v43 = vpop.f32.mrf.mxu1 }
 0x422   : > { %v3190_v23 = vadd.f32 %v3072_v29, %v2260_v42 }
 0x423   : > { %v3076_v53 = vpop.f32.mrf.mxu1 }
 0x424   : > { %3222 = vst [vmem:[#allocation2 + $0xe8] sm:$0xff] %v3190_v23  ;;  %v3077_v31 = vadd.f32 %v3076_v53, %v6015_v54 }
 0x425   : > { %v3078_v15 = vpop.f32.mrf.mxu1 }
 0x426   : > { %v3191_v0 = vadd.f32 %v3077_v31, %v2261_v27  ;;  %v2271_v27 = vld [vmem:[#allocation2 + $0x90] sm:$0xff] }
 0x427   : > { %v3081_v30 = vpop.f32.mrf.mxu1 }
 0x428   : > { %3223 = vst [vmem:[#allocation2 + $0xb8] sm:$0xff] %v3191_v0  ;;  %v3082_v37 = vadd.f32 %v3081_v30, %v6019_v25  ;;  %v2272_v0 = vld [vmem:[#allocation2 + $0x70] sm:$0xff] }
 0x429   : > { %v3083_v39 = vpop.f32.mrf.mxu1 }
 0x42a   : > { %v3192_v45 = vadd.f32 %v3082_v37, %v2262_v4  ;;  %v2273_v39 = vld [vmem:[#allocation2 + $0xc0] sm:$0xff] }
 0x42b   : > { %v3086_v14 = vpop.f32.mrf.mxu1 }
 0x42c   : > { %3224 = vst [vmem:[#allocation2 + $0x60] sm:$0xff] %v3192_v45  ;;  %v3087_v44 = vadd.f32 %v3086_v14, %v6023_v49 }
 0x42d   : > { %v3088_v57 = vpop.f32.mrf.mxu1 }
 0x42e   : > { %v3193_v1 = vadd.f32 %v3087_v44, %v2263_v8  ;;  %v2274_v44 = vld [vmem:[#allocation2 + $0xa8] sm:$0xff] }
 0x42f   : > { %v3091_v16 = vpop.f32.mrf.mxu1 }
 0x430   : > { %3225 = vst [vmem:[#allocation2 + $0xf0] sm:$0xff] %v3193_v1  ;;  %v3092_v54 = vadd.f32 %v3091_v16, %v6027_v21  ;;  %v2275_v16 = vld [vmem:[#allocation2 + $0xd0] sm:$0xff] }
 0x431   : > { %v3093_v26 = vpop.f32.mrf.mxu1 }
 0x432   : > { %v3194_v19 = vadd.f32 %v3092_v54, %v2264_v61 }
 0x433   : > { %v3096_v32 = vpop.f32.mrf.mxu1 }
 0x434   : > { %3226 = vst [vmem:[#allocation2 + $0x8] sm:$0xff] %v3194_v19  ;;  %v3097_v25 = vadd.f32 %v3096_v32, %v6030_v28 }
 0x435   : > { %v3098_v62 = vpop.f32.mrf.mxu1 }
 0x436   : > { %v3195_v50 = vadd.f32 %v3097_v25, %v2265_v47  ;;  %v2276_v47 = vld [vmem:[#allocation2 + $0x10] sm:$0xff] }
 0x437   : > { %v3101_v55 = vpop.f32.mrf.mxu1 }
 0x438   : > { %3227 = vst [vmem:[#allocation2 + $0x78] sm:$0xff] %v3195_v50  ;;  %v3102_v49 = vadd.f32 %v3101_v55, %v6032_v13  ;;  %v2277_v50 = vld [vmem:[#allocation2 + $0x28] sm:$0xff] }
 0x439   : > { %v3103_v48 = vpop.f32.mrf.mxu1 }
 0x43a   : > { %v3196_v35 = vadd.f32 %v3102_v49, %v2266_v10  ;;  %v2278_v48 = vld [vmem:[#allocation2 + $0xa0] sm:$0xff] }
 0x43b   : > { %v3106_v38 = vpop.f32.mrf.mxu1 }
 0x43c   : > { %3228 = vst [vmem:[#allocation2 + $0x38] sm:$0xff] %v3196_v35  ;;  %v3107_v21 = vadd.f32 %v3106_v38, %v6034_v22 }
 0x43d   : > { %v3108_v33 = vpop.f32.mrf.mxu1 }
 0x43e   : > { %v3197_v2 = vadd.f32 %v3107_v21, %v2267_v3  ;;  %v2279_v21 = vld [vmem:[#allocation2 + $0xf8] sm:$0xff] }
 0x43f   : > { %v3111_v7 = vpop.f32.mrf.mxu1 }
 0x440   : > { %3229 = vst [vmem:[#allocation2 + $0x58] sm:$0xff] %v3197_v2  ;;  %v3112_v28 = vadd.f32 %v3111_v7, %v6036_v17  ;;  %v2280_v7 = vld [vmem:[#allocation2 + $0x20] sm:$0xff] }
 0x441   : > { %v3113_v34 = vpop.f32.mrf.mxu1 }
 0x442   : > { %v3198_v5 = vadd.f32 %v3112_v28, %v2268_v11 }
 0x443   : > { %v3116_v63 = vpop.f32.mrf.mxu1 }
 0x444   : > { %3230 = vst [vmem:[#allocation2 + $0x40] sm:$0xff] %v3198_v5  ;;  %v3117_v13 = vadd.f32 %v3116_v63, %v6038_v24 }
 0x445   : > { %v3118_v36 = vpop.f32.mrf.mxu1 }
 0x446   : > { %v3199_v42 = vadd.f32 %v3117_v13, %v2269_v59  ;;  %v2281_v59 = vld [vmem:[#allocation2 + $0x98] sm:$0xff] }
 0x447   : > { %v3121_v29 = vpop.f32.mrf.mxu1 }
 0x448   : > { %3231 = vst [vmem:[#allocation2 + $0xc8] sm:$0xff] %v3199_v42  ;;  %v3122_v22 = vadd.f32 %v3121_v29, %v6040_v6 }
 0x449   : > { %v3123_v43 = vpop.f32.mrf.mxu1 }
 0x44a   : > { %v3200_v23 = vadd.f32 %v3122_v22, %v2270_v41 }
 0x44b   : > { %v3126_v53 = vpop.f32.mrf.mxu1 }
 0x44c   : > { %3232 = vst [vmem:[#allocation2 + $0xe0] sm:$0xff] %v3200_v23  ;;  %v3127_v17 = vadd.f32 %v3126_v53, %v6042_v46 }
 0x44d   : > { %v3128_v31 = vpop.f32.mrf.mxu1 }
 0x44e   : > { %v3201_v15 = vadd.f32 %v3127_v17, %v2271_v27 }
 0x44f   : > { %v3131_v4 = vpop.f32.mrf.mxu1 }
 0x450   : > { %3233 = vst [vmem:[#allocation2 + $0x90] sm:$0xff] %v3201_v15  ;;  %v3132_v24 = vadd.f32 %v3131_v4, %v6044_v18 }
 0x451   : > { %v3133_v30 = vpop.f32.mrf.mxu1 }
 0x452   : > { %v3202_v37 = vadd.f32 %v3132_v24, %v2272_v0 }
 0x453   : > { %v3136_v45 = vpop.f32.mrf.mxu1 }
 0x454   : > { %3234 = vst [vmem:[#allocation2 + $0x70] sm:$0xff] %v3202_v37  ;;  %v3137_v6 = vadd.f32 %v3136_v45, %v6046_v40 }
 0x455   : > { %v3138_v8 = vpop.f32.mrf.mxu1 }
 0x456   : > { %v3203_v14 = vadd.f32 %v3137_v6, %v2273_v39 }
 0x457   : > { %v3141_v57 = vpop.f32.mrf.mxu1 }
 0x458   : > { %3235 = vst [vmem:[#allocation2 + $0xc0] sm:$0xff] %v3203_v14  ;;  %v3142_v46 = vadd.f32 %v3141_v57, %v6048_v58 }
 0x459   : > { %v3143_v1 = vpop.f32.mrf.mxu1 }
 0x45a   : > { %v3204_v61 = vadd.f32 %v3142_v46, %v2274_v44 }
 0x45b   : > { %v3146_v54 = vpop.f32.mrf.mxu1 }
 0x45c   : > { %3236 = vst [vmem:[#allocation2 + $0xa8] sm:$0xff] %v3204_v61  ;;  %v3147_v18 = vadd.f32 %v3146_v54, %v6050_v51 }
 0x45d   : > { %v3148_v26 = vpop.f32.mrf.mxu1 }
 0x45e   : > { %v3205_v19 = vadd.f32 %v3147_v18, %v2275_v16 }
 0x45f   : > { %v3151_v32 = vpop.f32.mrf.mxu1 }
 0x460   : > { %3237 = vst [vmem:[#allocation2 + $0xd0] sm:$0xff] %v3205_v19  ;;  %v3152_v40 = vadd.f32 %v3151_v32, %v6052_v20 }
 0x461   : > { %v3153_v25 = vpop.f32.mrf.mxu1 }
 0x462   : > { %v3206_v62 = vadd.f32 %v3152_v40, %v2276_v47 }
 0x463   : > { %v3156_v10 = vpop.f32.mrf.mxu1 }
 0x464   : > { %3238 = vst [vmem:[#allocation2 + $0x10] sm:$0xff] %v3206_v62  ;;  %v3157_v58 = vadd.f32 %v3156_v10, %v6054_v52 }
 0x465   : > { %v3158_v55 = vpop.f32.mrf.mxu1 }
 0x466   : > { %v3207_v49 = vadd.f32 %v3157_v58, %v2277_v50 }
 0x467   : > { %v3161_v35 = vpop.f32.mrf.mxu1 }
 0x468   : > { %3239 = vst [vmem:[#allocation2 + $0x28] sm:$0xff] %v3207_v49  ;;  %v3162_v51 = vadd.f32 %v3161_v35, %v6056_v60 }
 0x469   : > { %v3163_v3 = vpop.f32.mrf.mxu1 }
 0x46a   : > { %v3208_v38 = vadd.f32 %v3162_v51, %v2278_v48 }
 0x46b   : > { %v3166_v33 = vpop.f32.mrf.mxu1 }
 0x46c   : > { %3240 = vst [vmem:[#allocation2 + $0xa0] sm:$0xff] %v3208_v38  ;;  %v3167_v20 = vadd.f32 %v3166_v33, %v6058_v56 }
 0x46d   : > { %v3168_v2 = vpop.f32.mrf.mxu1 }
 0x46e   : > { %v3209_v11 = vadd.f32 %v3167_v20, %v2279_v21 }
 0x46f   : > { %v3171_v28 = vpop.f32.mrf.mxu1 }
 0x470   : > { %3241 = vst [vmem:[#allocation2 + $0xf8] sm:$0xff] %v3209_v11  ;;  %v3172_v52 = vadd.f32 %v3171_v28, %v6060_v12 }
 0x471   : > { %v3173_v34 = vpop.f32.mrf.mxu1 }
 0x472   : > { %v3210_v5 = vadd.f32 %v3172_v52, %v2280_v7 }
 0x473   : > { %v3176_v63 = vpop.f32.mrf.mxu1 }
 0x474   : > { %3242 = vst [vmem:[#allocation2 + $0x20] sm:$0xff] %v3210_v5  ;;  %v3177_v60 = vadd.f32 %v3176_v63, %v6062_v9  ;;  %3247 = sbr.rel (%p3459_p6) target bundleno = 1164 (0x48c), region = 60 }
 0x475   : > { %v3178_v13 = vpop.f32.mrf.mxu1 }
 0x476   : > { %v3211_v36 = vadd.f32 %v3177_v60, %v2281_v59 }
 0x478   : > { %3243 = vst [vmem:[#allocation2 + $0x98] sm:$0xff] %v3211_v36 }
 0x479   : > { %v3248_v56 = vld [vmem:[#allocation2 + $0xb0] sm:$0xff]  ;;  %v6100_v42 = vld [vmem:[%s6246_s7] ss:$0 sm:$0xff]  ;;  %v3250_v22 = vld [vmem:[#allocation2 + $0xd8] sm:$0xff] }
 0x47a   : > { %v3249_v12 = vld [vmem:[#allocation2] sm:$0xff]  ;;  %v3287_v41 = vadd.f32 %v6100_v42, %v3248_v56  ;;  %v3251_v43 = vld [vmem:[#allocation2 + $0x18] sm:$0xff]  ;;  %v3252_v9 = vld [vmem:[#allocation2 + $0x50] sm:$0xff]  ;;  %v3289_v23 = vadd.f32 %v6100_v42, %v3250_v22 }
 0x47b   : > { %v3288_v29 = vadd.f32 %v6100_v42, %v3249_v12  ;;  %v3290_v27 = vadd.f32 %v6100_v42, %v3251_v43  ;;  %v3291_v53 = vadd.f32 %v6100_v42, %v3252_v9  ;;  %v3253_v17 = vld [vmem:[#allocation2 + $0x68] sm:$0xff]  ;;  %v3254_v31 = vld [vmem:[#allocation2 + $0x30] sm:$0xff]  ;;  %v3256_v30 = vld [vmem:[#allocation2 + $0x80] sm:$0xff] }
 0x47c   : > { %v3255_v15 = vld [vmem:[#allocation2 + $0x48] sm:$0xff]  ;;  %3319 = vst [vmem:[%s6247_s8] sm:$0xff] %v3287_v41  ;;  %v3292_v0 = vadd.f32 %v6100_v42, %v3253_v17  ;;  %v3293_v4 = vadd.f32 %v6100_v42, %v3254_v31  ;;  %3321 = vst [vmem:[%s6247_s8 + $0x10] sm:$0xff] %v3289_v23  ;;  %v3295_v45 = vadd.f32 %v6100_v42, %v3256_v30  ;;  %v3259_v14 = vld [vmem:[#allocation2 + $0xb8] sm:$0xff] }
 0x47d   : > { %3320 = vst [vmem:[%s6247_s8 + $0x8] sm:$0xff] %v3288_v29  ;;  %v3294_v24 = vadd.f32 %v6100_v42, %v3255_v15  ;;  %v3257_v37 = vld [vmem:[#allocation2 + $0x88] sm:$0xff]  ;;  %3322 = vst [vmem:[%s6247_s8 + $0x18] sm:$0xff] %v3290_v27  ;;  %v3260_v44 = vld [vmem:[#allocation2 + $0x60] sm:$0xff]  ;;  %v3298_v46 = vadd.f32 %v6100_v42, %v3259_v14 }
 0x47e   : > { %v3258_v39 = vld [vmem:[#allocation2 + $0xe8] sm:$0xff]  ;;  %3323 = vst [vmem:[%s6247_s8 + $0x20] sm:$0xff] %v3291_v53  ;;  %v3296_v6 = vadd.f32 %v6100_v42, %v3257_v37  ;;  %v3261_v57 = vld [vmem:[#allocation2 + $0xf0] sm:$0xff]  ;;  %3324 = vst [vmem:[%s6247_s8 + $0x28] sm:$0xff] %v3292_v0  ;;  %v3299_v1 = vadd.f32 %v6100_v42, %v3260_v44 }
 0x47f   : > { %v3297_v8 = vadd.f32 %v6100_v42, %v3258_v39  ;;  %3325 = vst [vmem:[%s6247_s8 + $0x30] sm:$0xff] %v3293_v4  ;;  %3326 = vst [vmem:[%s6247_s8 + $0x38] sm:$0xff] %v3294_v24  ;;  %v3300_v61 = vadd.f32 %v6100_v42, %v3261_v57  ;;  %v3262_v16 = vld [vmem:[#allocation2 + $0x8] sm:$0xff]  ;;  %v3263_v54 = vld [vmem:[#allocation2 + $0x78] sm:$0xff] }
 0x480   : > { %v3264_v18 = vld [vmem:[#allocation2 + $0x38] sm:$0xff]  ;;  %3327 = vst [vmem:[%s6247_s8 + $0x40] sm:$0xff] %v3295_v45  ;;  %3328 = vst [vmem:[%s6247_s8 + $0x48] sm:$0xff] %v3296_v6  ;;  %v3301_v26 = vadd.f32 %v6100_v42, %v3262_v16  ;;  %v3302_v19 = vadd.f32 %v6100_v42, %v3263_v54  ;;  %v3266_v40 = vld [vmem:[#allocation2 + $0x40] sm:$0xff] }
 0x481   : > { %3329 = vst [vmem:[%s6247_s8 + $0x50] sm:$0xff] %v3297_v8  ;;  %v3303_v47 = vadd.f32 %v6100_v42, %v3264_v18  ;;  %v3265_v32 = vld [vmem:[#allocation2 + $0x58] sm:$0xff]  ;;  %v3267_v25 = vld [vmem:[#allocation2 + $0xc8] sm:$0xff]  ;;  %3330 = vst [vmem:[%s6247_s8 + $0x58] sm:$0xff] %v3298_v46  ;;  %v3305_v50 = vadd.f32 %v6100_v42, %v3266_v40 }
 0x482   : > { %3331 = vst [vmem:[%s6247_s8 + $0x60] sm:$0xff] %v3299_v1  ;;  %3332 = vst [vmem:[%s6247_s8 + $0x68] sm:$0xff] %v3300_v61  ;;  %v3304_v62 = vadd.f32 %v6100_v42, %v3265_v32  ;;  %v3306_v10 = vadd.f32 %v6100_v42, %v3267_v25  ;;  %v3268_v58 = vld [vmem:[#allocation2 + $0xe0] sm:$0xff]  ;;  %v3269_v55 = vld [vmem:[#allocation2 + $0x90] sm:$0xff] }
 0x483   : > { %v3270_v49 = vld [vmem:[#allocation2 + $0x70] sm:$0xff]  ;;  %3333 = vst [vmem:[%s6247_s8 + $0x70] sm:$0xff] %v3301_v26  ;;  %3334 = vst [vmem:[%s6247_s8 + $0x78] sm:$0xff] %v3302_v19  ;;  %v3307_v48 = vadd.f32 %v6100_v42, %v3268_v58  ;;  %v3308_v35 = vadd.f32 %v6100_v42, %v3269_v55  ;;  %v3271_v3 = vld [vmem:[#allocation2 + $0xc0] sm:$0xff] }
 0x484   : > { %3335 = vst [vmem:[%s6247_s8 + $0x80] sm:$0xff] %v3303_v47  ;;  %v3309_v51 = vadd.f32 %v6100_v42, %v3270_v49  ;;  %v3272_v38 = vld [vmem:[#allocation2 + $0xa8] sm:$0xff]  ;;  %v3273_v21 = vld [vmem:[#allocation2 + $0xd0] sm:$0xff]  ;;  %3336 = vst [vmem:[%s6247_s8 + $0x88] sm:$0xff] %v3304_v62  ;;  %v3310_v33 = vadd.f32 %v6100_v42, %v3271_v3 }
 0x485   : > { %3337 = vst [vmem:[%s6247_s8 + $0x90] sm:$0xff] %v3305_v50  ;;  %3338 = vst [vmem:[%s6247_s8 + $0x98] sm:$0xff] %v3306_v10  ;;  %v3311_v20 = vadd.f32 %v6100_v42, %v3272_v38  ;;  %v3312_v2 = vadd.f32 %v6100_v42, %v3273_v21  ;;  %v3274_v11 = vld [vmem:[#allocation2 + $0x10] sm:$0xff]  ;;  %v3275_v7 = vld [vmem:[#allocation2 + $0x28] sm:$0xff] }
 0x486   : > { %v3276_v28 = vld [vmem:[#allocation2 + $0xa0] sm:$0xff]  ;;  %3339 = vst [vmem:[%s6247_s8 + $0xa0] sm:$0xff] %v3307_v48  ;;  %3340 = vst [vmem:[%s6247_s8 + $0xa8] sm:$0xff] %v3308_v35  ;;  %v3313_v52 = vadd.f32 %v6100_v42, %v3274_v11  ;;  %v3314_v34 = vadd.f32 %v6100_v42, %v3275_v7  ;;  %v3277_v59 = vld [vmem:[#allocation2 + $0xf8] sm:$0xff] }
 0x487   : > { %3341 = vst [vmem:[%s6247_s8 + $0xb0] sm:$0xff] %v3309_v51  ;;  %v3315_v5 = vadd.f32 %v6100_v42, %v3276_v28  ;;  %v3278_v63 = vld [vmem:[#allocation2 + $0x20] sm:$0xff]  ;;  %v3279_v60 = vld [vmem:[#allocation2 + $0x98] sm:$0xff]  ;;  %3342 = vst [vmem:[%s6247_s8 + $0xb8] sm:$0xff] %v3310_v33  ;;  %v3316_v13 = vadd.f32 %v6100_v42, %v3277_v59 }
 0x488   : > { %3343 = vst [vmem:[%s6247_s8 + $0xc0] sm:$0xff] %v3311_v20  ;;  %3344 = vst [vmem:[%s6247_s8 + $0xc8] sm:$0xff] %v3312_v2  ;;  %v3317_v36 = vadd.f32 %v6100_v42, %v3278_v63  ;;  %v3318_v56 = vadd.f32 %v6100_v42, %v3279_v60 }
 0x489   : > { %3345 = vst [vmem:[%s6247_s8 + $0xd0] sm:$0xff] %v3313_v52  ;;  %3346 = vst [vmem:[%s6247_s8 + $0xd8] sm:$0xff] %v3314_v34 }
 0x48a   : > { %3347 = vst [vmem:[%s6247_s8 + $0xe0] sm:$0xff] %v3315_v5  ;;  %3348 = vst [vmem:[%s6247_s8 + $0xe8] sm:$0xff] %v3316_v13 }
 0x48b   : > { %3349 = vst [vmem:[%s6247_s8 + $0xf0] sm:$0xff] %v3317_v36  ;;  %3350 = vst [vmem:[%s6247_s8 + $0xf8] sm:$0xff] %v3318_v56 }
 0x48c PF: > { %s18_s29 = sadd.s32 1, %s4154_s29   ;;  %s6487_s27 = smov %s4150_s28 }
 0x48d   : > { %p15_p7 = scmp.ge.s32.totalorder %s18_s29, 6   ;;  %s6488_s28 = smov %s6490_s30 }
 0x48f   :  { %17 = sbr.rel (!%p15_p7) target bundleno = 2 (0x2), region = 96 }

// kernel: grid_gnn_with_angles.2
= control target key start
LH: loop header
LB: loop body
LE: loop exit
PB: predicated region body
PF: predicated region fallthrough
CT: control target
= control target key end

     0   :  { %s4427_s27 = smov 0   ;;  %s4429_s28 = smov 0   ;;  %s6593_s0 = inlined_call_operand.vmem [shape: f32[256,128], index: 0, kind: input, shape index: {}]   ;;  %s6594_s1 = inlined_call_operand.vmem [shape: bf16[2048,256], index: 1, kind: input, shape index: {}]   ;;  %s6595_s2 = inlined_call_operand.vmem [shape: bf16[2048,256], index: 2, kind: input, shape index: {}]   ;;  %s6596_s3 = inlined_call_operand.vmem [shape: f32[2048,2], index: 3, kind: input, shape index: {}]   ;;  %s6597_s4 = inlined_call_operand.vmem [shape: f32[128,128], index: 4, kind: input, shape index: {}]   ;;  %s6598_s5 = inlined_call_operand.vmem [shape: f32[2,128], index: 5, kind: input, shape index: {}]   ;;  %s6599_s6 = inlined_call_operand.vmem [shape: f32[1,128], index: 6, kind: input, shape index: {}]   ;;  %s6600_s7 = inlined_call_operand.vmem [shape: f32[1,128], index: 7, kind: input, shape index: {}]   ;;  %s6601_s8 = inlined_call_operand.vmem [shape: f32[256,128], index: 8, kind: output, shape index: {}]  }
   0x1   :  { %s4431_s29 = smov 0  }
   0x2 LB: > { %s27_s30 = sadd.s32 1, %s4372_s28  ;;  %p3542_p0 = scmp.ge.s32.totalorder %s4376_s29, 1  ;;  %s4376_s29 = sphi %s4431_s29, %s18_s29   ;;  %s4372_s28 = sphi %s4429_s28, %s6823_s28   ;;  %s4368_s27 = sphi %s4427_s27, %s6822_s27  }
   0x3   : > { %p28_p1 = scmp.ge.s32.totalorder %s27_s30, 4  ;;  %p306_p2 = scmp.lt.s32.totalorder %s4376_s29, 5 }
   0x5   : > { %s6825_s30 = smov (%p28_p1, %s27_s30), 0  ;;  %p307_p3 = pnand %p3542_p0, %p306_p2 }
   0x7   : > { %310 = sbr.rel (%p307_p3) target bundleno = 1180 (0x49c), region = 52 }
   0xc   : > { %s3543_s9 = sshll.u32 %s4368_s27, 6  ;;  %p3551_p5 = scmp.ne.s32.totalorder %s4368_s27, 0 }
   0xd   : > { %p357_p4 = scmp.lt.s32.totalorder %s3543_s9, 255 }
   0xe   : > { %390 = sbr.rel (%p3551_p5) target bundleno = 277 (0x115), region = 56 }
   0xf   : > { %s6827_s9 = smov (!%p357_p4, %s3543_s9), 255 }
  0x10   : > { %s3561_s10 = sshll.u32 %s6827_s9, 3 }
  0x11   : > { %s4451_s13 = scalar_lea.vmem %s6594_s1, %s3561_s10  ;;  %s4456_s16 = scalar_lea.vmem %s6595_s2, %s3561_s10 }
  0x12   : > { %s4461_s19 = scalar_lea.vmem %s6596_s3, %s3561_s10 }
  0x13   : > { %v470_v0 = vld [vmem:[%s6597_s4 + $0x78] sm:$0xff]  ;;  %v469_v1 = vld [vmem:[%s6597_s4 + $0x70] sm:$0xff]  ;;  %v4378_v2 = vmov 0.0   ;;  %v468_v3 = vld [vmem:[%s6597_s4 + $0x68] sm:$0xff] }
  0x14   : > { %391 = vst [vmem:[#allocation2 + $0xb0] sm:$0xff] %v4378_v2  ;;  %392 = vst [vmem:[#allocation2] sm:$0xff] %v4378_v2  ;;  %3611 = vmatprep.subr.mxu0 %v470_v0  ;;  %3691 = vmatprep.subr.mxu1 %v470_v0  ;;  %v467_v4 = vld [vmem:[%s6597_s4 + $0x60] sm:$0xff]  ;;  %v466_v5 = vld [vmem:[%s6597_s4 + $0x58] sm:$0xff] }
  0x15   : > { %393 = vst [vmem:[#allocation2 + $0xd8] sm:$0xff] %v4378_v2  ;;  %394 = vst [vmem:[#allocation2 + $0x18] sm:$0xff] %v4378_v2  ;;  %3612 = vmatpush3.msra.mxu0 %v470_v0  ;;  %3707 = vmatpush3.msra.mxu1 %v470_v0  ;;  %v465_v6 = vld [vmem:[%s6597_s4 + $0x50] sm:$0xff]  ;;  %v464_v7 = vld [vmem:[%s6597_s4 + $0x48] sm:$0xff] }
  0x16   : > { %395 = vst [vmem:[#allocation2 + $0x50] sm:$0xff] %v4378_v2  ;;  %396 = vst [vmem:[#allocation2 + $0x68] sm:$0xff] %v4378_v2  ;;  %3613 = vmatprep.subr.mxu0 %v469_v1  ;;  %3692 = vmatprep.subr.mxu1 %v469_v1  ;;  %v463_v8 = vld [vmem:[%s6597_s4 + $0x40] sm:$0xff]  ;;  %v462_v9 = vld [vmem:[%s6597_s4 + $0x38] sm:$0xff] }
  0x17   : > { %397 = vst [vmem:[#allocation2 + $0x30] sm:$0xff] %v4378_v2  ;;  %398 = vst [vmem:[#allocation2 + $0x48] sm:$0xff] %v4378_v2  ;;  %3614 = vmatpush3.msra.mxu0 %v469_v1  ;;  %3708 = vmatpush3.msra.mxu1 %v469_v1  ;;  %v461_v10 = vld [vmem:[%s6597_s4 + $0x30] sm:$0xff]  ;;  %v460_v11 = vld [vmem:[%s6597_s4 + $0x28] sm:$0xff] }
  0x18   : > { %399 = vst [vmem:[#allocation2 + $0x80] sm:$0xff] %v4378_v2  ;;  %400 = vst [vmem:[#allocation2 + $0x88] sm:$0xff] %v4378_v2  ;;  %3615 = vmatprep.subr.mxu0 %v468_v3  ;;  %3693 = vmatprep.subr.mxu1 %v468_v3  ;;  %v459_v12 = vld [vmem:[%s6597_s4 + $0x20] sm:$0xff]  ;;  %v458_v13 = vld [vmem:[%s6597_s4 + $0x18] sm:$0xff] }
  0x19   : > { %401 = vst [vmem:[#allocation2 + $0xe8] sm:$0xff] %v4378_v2  ;;  %402 = vst [vmem:[#allocation2 + $0xb8] sm:$0xff] %v4378_v2  ;;  %3616 = vmatpush3.msra.mxu0 %v468_v3  ;;  %3709 = vmatpush3.msra.mxu1 %v468_v3  ;;  %v457_v14 = vld [vmem:[%s6597_s4 + $0x10] sm:$0xff]  ;;  %v456_v15 = vld [vmem:[%s6597_s4 + $0x8] sm:$0xff] }
  0x1a   : > { %403 = vst [vmem:[#allocation2 + $0x60] sm:$0xff] %v4378_v2  ;;  %404 = vst [vmem:[#allocation2 + $0xf0] sm:$0xff] %v4378_v2  ;;  %3617 = vmatprep.subr.mxu0 %v467_v4  ;;  %3694 = vmatprep.subr.mxu1 %v467_v4  ;;  %v455_v16 = vld [vmem:[%s6597_s4] sm:$0xff]  ;;  %v424_v19 = vld [vmem:[%s6593_s0 + $0x8] sm:$0xff] }
  0x1b   : > { %405 = vst [vmem:[#allocation2 + $0x8] sm:$0xff] %v4378_v2  ;;  %406 = vst [vmem:[#allocation2 + $0x78] sm:$0xff] %v4378_v2  ;;  %3618 = vmatpush3.msra.mxu0 %v467_v4  ;;  %3710 = vmatpush3.msra.mxu1 %v467_v4  ;;  %v423_v17 = vld [vmem:[%s6593_s0] sm:$0xff]  ;;  %v440_v20 = vld [vmem:[%s6593_s0 + $0x88] sm:$0xff] }
  0x1c   : > { %407 = vst [vmem:[#allocation2 + $0x38] sm:$0xff] %v4378_v2  ;;  %408 = vst [vmem:[#allocation2 + $0x58] sm:$0xff] %v4378_v2  ;;  %3619 = vmatprep.subr.mxu0 %v466_v5  ;;  %3695 = vmatprep.subr.mxu1 %v466_v5  ;;  %v439_v18 = vld [vmem:[%s6593_s0 + $0x80] sm:$0xff]  ;;  %v425_v21 = vld [vmem:[%s6593_s0 + $0x10] sm:$0xff] }
  0x1d   : > { %409 = vst [vmem:[#allocation2 + $0x40] sm:$0xff] %v4378_v2  ;;  %410 = vst [vmem:[#allocation2 + $0xc8] sm:$0xff] %v4378_v2  ;;  %3620 = vmatpush3.msra.mxu0 %v466_v5  ;;  %3711 = vmatpush3.msra.mxu1 %v466_v5  ;;  %v441_v22 = vld [vmem:[%s6593_s0 + $0x90] sm:$0xff]  ;;  %v426_v23 = vld [vmem:[%s6593_s0 + $0x18] sm:$0xff] }
  0x1e   : > { %411 = vst [vmem:[#allocation2 + $0xe0] sm:$0xff] %v4378_v2  ;;  %412 = vst [vmem:[#allocation2 + $0x90] sm:$0xff] %v4378_v2  ;;  %3621 = vmatprep.subr.mxu0 %v465_v6  ;;  %3696 = vmatprep.subr.mxu1 %v465_v6  ;;  %v442_v24 = vld [vmem:[%s6593_s0 + $0x98] sm:$0xff]  ;;  %v427_v25 = vld [vmem:[%s6593_s0 + $0x20] sm:$0xff] }
  0x1f   : > { %413 = vst [vmem:[#allocation2 + $0x70] sm:$0xff] %v4378_v2  ;;  %414 = vst [vmem:[#allocation2 + $0xc0] sm:$0xff] %v4378_v2  ;;  %3622 = vmatpush3.msra.mxu0 %v465_v6  ;;  %3712 = vmatpush3.msra.mxu1 %v465_v6  ;;  %v443_v26 = vld [vmem:[%s6593_s0 + $0xa0] sm:$0xff]  ;;  %v428_v27 = vld [vmem:[%s6593_s0 + $0x28] sm:$0xff] }
  0x20   : > { %415 = vst [vmem:[#allocation2 + $0xa8] sm:$0xff] %v4378_v2  ;;  %416 = vst [vmem:[#allocation2 + $0xd0] sm:$0xff] %v4378_v2  ;;  %3623 = vmatprep.subr.mxu0 %v464_v7  ;;  %3697 = vmatprep.subr.mxu1 %v464_v7  ;;  %v444_v28 = vld [vmem:[%s6593_s0 + $0xa8] sm:$0xff]  ;;  %v429_v29 = vld [vmem:[%s6593_s0 + $0x30] sm:$0xff] }
  0x21   : > { %417 = vst [vmem:[#allocation2 + $0x10] sm:$0xff] %v4378_v2  ;;  %418 = vst [vmem:[#allocation2 + $0x28] sm:$0xff] %v4378_v2  ;;  %3624 = vmatpush3.msra.mxu0 %v464_v7  ;;  %3713 = vmatpush3.msra.mxu1 %v464_v7  ;;  %v445_v30 = vld [vmem:[%s6593_s0 + $0xb0] sm:$0xff]  ;;  %v430_v31 = vld [vmem:[%s6593_s0 + $0x38] sm:$0xff] }
  0x22   : > { %419 = vst [vmem:[#allocation2 + $0xa0] sm:$0xff] %v4378_v2  ;;  %420 = vst [vmem:[#allocation2 + $0xf8] sm:$0xff] %v4378_v2  ;;  %3625 = vmatprep.subr.mxu0 %v463_v8  ;;  %3698 = vmatprep.subr.mxu1 %v463_v8  ;;  %v446_v32 = vld [vmem:[%s6593_s0 + $0xb8] sm:$0xff]  ;;  %v431_v33 = vld [vmem:[%s6593_s0 + $0x40] sm:$0xff] }
  0x23   : > { %421 = vst [vmem:[#allocation2 + $0x20] sm:$0xff] %v4378_v2  ;;  %422 = vst [vmem:[#allocation2 + $0x98] sm:$0xff] %v4378_v2  ;;  %3626 = vmatpush3.msra.mxu0 %v463_v8  ;;  %3714 = vmatpush3.msra.mxu1 %v463_v8  ;;  %v447_v34 = vld [vmem:[%s6593_s0 + $0xc0] sm:$0xff]  ;;  %v432_v35 = vld [vmem:[%s6593_s0 + $0x48] sm:$0xff] }
  0x24   : > { %3627 = vmatprep.subr.mxu0 %v462_v9  ;;  %3699 = vmatprep.subr.mxu1 %v462_v9  ;;  %v448_v36 = vld [vmem:[%s6593_s0 + $0xc8] sm:$0xff]  ;;  %v433_v37 = vld [vmem:[%s6593_s0 + $0x50] sm:$0xff]  ;;  %v434_v39 = vld [vmem:[%s6593_s0 + $0x58] sm:$0xff] }
  0x25   : > { %3628 = vmatpush3.msra.mxu0 %v462_v9  ;;  %3715 = vmatpush3.msra.mxu1 %v462_v9  ;;  %v449_v38 = vld [vmem:[%s6593_s0 + $0xd0] sm:$0xff]  ;;  %v450_v40 = vld [vmem:[%s6593_s0 + $0xd8] sm:$0xff]  ;;  %v435_v41 = vld [vmem:[%s6593_s0 + $0x60] sm:$0xff] }
  0x26   : > { %3629 = vmatprep.subr.mxu0 %v461_v10  ;;  %3700 = vmatprep.subr.mxu1 %v461_v10  ;;  %v451_v42 = vld [vmem:[%s6593_s0 + $0xe0] sm:$0xff]  ;;  %v436_v43 = vld [vmem:[%s6593_s0 + $0x68] sm:$0xff]  ;;  %v437_v45 = vld [vmem:[%s6593_s0 + $0x70] sm:$0xff] }
  0x27   : > { %3630 = vmatpush3.msra.mxu0 %v461_v10  ;;  %3716 = vmatpush3.msra.mxu1 %v461_v10  ;;  %v452_v44 = vld [vmem:[%s6593_s0 + $0xe8] sm:$0xff]  ;;  %v453_v46 = vld [vmem:[%s6593_s0 + $0xf0] sm:$0xff]  ;;  %v438_v47 = vld [vmem:[%s6593_s0 + $0x78] sm:$0xff] }
  0x28   : > { %3631 = vmatprep.subr.mxu0 %v460_v11  ;;  %3701 = vmatprep.subr.mxu1 %v460_v11  ;;  %v454_v48 = vld [vmem:[%s6593_s0 + $0xf8] sm:$0xff] }
  0x29   : > { %3632 = vmatpush3.msra.mxu0 %v460_v11  ;;  %3717 = vmatpush3.msra.mxu1 %v460_v11 }
  0x2a   : > { %3633 = vmatprep.subr.mxu0 %v459_v12  ;;  %3702 = vmatprep.subr.mxu1 %v459_v12 }
  0x2b   : > { %3634 = vmatpush3.msra.mxu0 %v459_v12  ;;  %3718 = vmatpush3.msra.mxu1 %v459_v12 }
  0x2c   : > { %3635 = vmatprep.subr.mxu0 %v458_v13  ;;  %3703 = vmatprep.subr.mxu1 %v458_v13 }
  0x2d   : > { %3636 = vmatpush3.msra.mxu0 %v458_v13  ;;  %3719 = vmatpush3.msra.mxu1 %v458_v13 }
  0x2e   : > { %3637 = vmatprep.subr.mxu0 %v457_v14  ;;  %3704 = vmatprep.subr.mxu1 %v457_v14 }
  0x2f   : > { %3638 = vmatpush3.msra.mxu0 %v457_v14  ;;  %3720 = vmatpush3.msra.mxu1 %v457_v14 }
  0x30   : > { %3639 = vmatprep.subr.mxu0 %v456_v15  ;;  %3705 = vmatprep.subr.mxu1 %v456_v15 }
  0x31   : > { %3640 = vmatpush3.msra.mxu0 %v456_v15  ;;  %3721 = vmatpush3.msra.mxu1 %v456_v15 }
  0x32   : > { %3641 = vmatprep.subr.mxu0 %v455_v16  ;;  %3706 = vmatprep.subr.mxu1 %v455_v16 }
  0x33   : > { %3642 = vmatpush3.msra.mxu0 %v455_v16  ;;  %3722 = vmatpush3.msra.mxu1 %v455_v16 }
  0x34   : > { %3643 = vmatprep.mubr.f32.mxu0 %v423_v17  ;;  %3667 = vmatprep.mubr.f32.mxu1 %v439_v18 }
  0x35   : > { %3644 = vmatmul.mubr.f32.vlgmr.msra.gmra.mxu0 %v424_v19  ;;  %3668 = vmatmul.mubr.f32.vlgmr.msra.gmra.mxu1 %v440_v20 }
  0x36   : > { %3646 = vmatprep.mubr.f32.mxu0 %v425_v21  ;;  %3670 = vmatprep.mubr.f32.mxu1 %v441_v22 }
  0x39   : > { %3647 = vmatmul.mubr.f32.gmra.mxu0 %v426_v23  ;;  %3671 = vmatmul.mubr.f32.gmra.mxu1 %v442_v24 }
  0x3a   : > { %3649 = vmatprep.mubr.f32.mxu0 %v427_v25  ;;  %3673 = vmatprep.mubr.f32.mxu1 %v443_v26 }
  0x3d   : > { %3650 = vmatmul.mubr.f32.gmra.mxu0 %v428_v27  ;;  %3674 = vmatmul.mubr.f32.gmra.mxu1 %v444_v28 }
  0x3e   : > { %3652 = vmatprep.mubr.f32.mxu0 %v429_v29  ;;  %3676 = vmatprep.mubr.f32.mxu1 %v445_v30 }
  0x41   : > { %3653 = vmatmul.mubr.f32.gmra.mxu0 %v430_v31  ;;  %3677 = vmatmul.mubr.f32.gmra.mxu1 %v446_v32 }
  0x42   : > { %3655 = vmatprep.mubr.f32.mxu0 %v431_v33  ;;  %3679 = vmatprep.mubr.f32.mxu1 %v447_v34 }
  0x45   : > { %3656 = vmatmul.mubr.f32.gmra.mxu0 %v432_v35  ;;  %3680 = vmatmul.mubr.f32.gmra.mxu1 %v448_v36 }
  0x46   : > { %3658 = vmatprep.mubr.f32.mxu0 %v433_v37  ;;  %3682 = vmatprep.mubr.f32.mxu1 %v449_v38 }
  0x49   : > { %3659 = vmatmul.mubr.f32.gmra.mxu0 %v434_v39  ;;  %3683 = vmatmul.mubr.f32.gmra.mxu1 %v450_v40 }
  0x4a   : > { %3661 = vmatprep.mubr.f32.mxu0 %v435_v41  ;;  %3685 = vmatprep.mubr.f32.mxu1 %v451_v42 }
  0x4d   : > { %3662 = vmatmul.mubr.f32.gmra.mxu0 %v436_v43  ;;  %3686 = vmatmul.mubr.f32.gmra.mxu1 %v452_v44 }
  0x4e   : > { %3664 = vmatprep.mubr.f32.mxu0 %v437_v45  ;;  %3688 = vmatprep.mubr.f32.mxu1 %v453_v46 }
  0x51   : > { %3665 = vmatmul.mubr.f32.gmra.mxu0 %v438_v47  ;;  %3689 = vmatmul.mubr.f32.gmra.mxu1 %v454_v48 }
  0xf5   : > { %v3645_v49 = vpop.f32.mrf.mxu0  ;;  %v3669_v50 = vpop.f32.mrf.mxu1 }
  0xf6   : > { %697 = vst [vmem:[#allocation3 + $0xc8] sm:$0xff] %v3645_v49  ;;  %713 = vst [vmem:[#allocation3 + $0x70] sm:$0xff] %v3669_v50 }
  0xf7   : > { %v537_v51 = vpop.f32.mrf.mxu0  ;;  %v617_v52 = vpop.f32.mrf.mxu1 }
  0xf8   : > { %696 = vst [vmem:[#allocation3 + $0x80] sm:$0xff] %v537_v51  ;;  %712 = vst [vmem:[#allocation3 + $0x10] sm:$0xff] %v617_v52 }
  0xf9   : > { %v3648_v53 = vpop.f32.mrf.mxu0  ;;  %v3672_v54 = vpop.f32.mrf.mxu1 }
  0xfa   : > { %699 = vst [vmem:[#allocation3 + $0x78] sm:$0xff] %v3648_v53  ;;  %715 = vst [vmem:[#allocation3 + $0xa0] sm:$0xff] %v3672_v54 }
  0xfb   : > { %v547_v55 = vpop.f32.mrf.mxu0  ;;  %v627_v56 = vpop.f32.mrf.mxu1 }
  0xfc   : > { %698 = vst [vmem:[#allocation3 + $0xe8] sm:$0xff] %v547_v55  ;;  %714 = vst [vmem:[#allocation3 + $0x50] sm:$0xff] %v627_v56 }
  0xfd   : > { %v3651_v57 = vpop.f32.mrf.mxu0  ;;  %v3675_v58 = vpop.f32.mrf.mxu1 }
  0xfe   : > { %701 = vst [vmem:[#allocation3 + $0x90] sm:$0xff] %v3651_v57  ;;  %717 = vst [vmem:[#allocation3 + $0x30] sm:$0xff] %v3675_v58 }
  0xff   : > { %v557_v59 = vpop.f32.mrf.mxu0  ;;  %v637_v60 = vpop.f32.mrf.mxu1 }
 0x100   : > { %700 = vst [vmem:[#allocation3 + $0x8] sm:$0xff] %v557_v59  ;;  %716 = vst [vmem:[#allocation3 + $0xd8] sm:$0xff] %v637_v60 }
 0x101   : > { %v3654_v61 = vpop.f32.mrf.mxu0  ;;  %v3678_v62 = vpop.f32.mrf.mxu1 }
 0x102   : > { %703 = vst [vmem:[#allocation3 + $0xa8] sm:$0xff] %v3654_v61  ;;  %719 = vst [vmem:[#allocation3 + $0xf0] sm:$0xff] %v3678_v62 }
 0x103   : > { %v567_v63 = vpop.f32.mrf.mxu0  ;;  %v647_v0 = vpop.f32.mrf.mxu1 }
 0x104   : > { %702 = vst [vmem:[#allocation3 + $0x58] sm:$0xff] %v567_v63  ;;  %718 = vst [vmem:[#allocation3 + $0x20] sm:$0xff] %v647_v0 }
 0x105   : > { %v3657_v1 = vpop.f32.mrf.mxu0  ;;  %v3681_v2 = vpop.f32.mrf.mxu1 }
 0x106   : > { %705 = vst [vmem:[#allocation3 + $0xb0] sm:$0xff] %v3657_v1  ;;  %721 = vst [vmem:[#allocation3 + $0x48] sm:$0xff] %v3681_v2 }
 0x107   : > { %v577_v3 = vpop.f32.mrf.mxu0  ;;  %v657_v4 = vpop.f32.mrf.mxu1 }
 0x108   : > { %704 = vst [vmem:[#allocation3 + $0xd0] sm:$0xff] %v577_v3  ;;  %720 = vst [vmem:[#allocation3 + $0x88] sm:$0xff] %v657_v4 }
 0x109   : > { %v3660_v5 = vpop.f32.mrf.mxu0  ;;  %v3684_v6 = vpop.f32.mrf.mxu1 }
 0x10a   : > { %707 = vst [vmem:[#allocation3 + $0x40] sm:$0xff] %v3660_v5  ;;  %723 = vst [vmem:[#allocation3 + $0xc0] sm:$0xff] %v3684_v6 }
 0x10b   : > { %v587_v7 = vpop.f32.mrf.mxu0  ;;  %v667_v8 = vpop.f32.mrf.mxu1 }
 0x10c   : > { %706 = vst [vmem:[#allocation3 + $0x38] sm:$0xff] %v587_v7  ;;  %722 = vst [vmem:[#allocation3 + $0xf8] sm:$0xff] %v667_v8 }
 0x10d   : > { %v3663_v9 = vpop.f32.mrf.mxu0  ;;  %v3687_v10 = vpop.f32.mrf.mxu1 }
 0x10e   : > { %709 = vst [vmem:[#allocation3 + $0x60] sm:$0xff] %v3663_v9  ;;  %725 = vst [vmem:[#allocation3] sm:$0xff] %v3687_v10 }
 0x10f   : > { %v597_v11 = vpop.f32.mrf.mxu0  ;;  %v677_v12 = vpop.f32.mrf.mxu1 }
 0x110   : > { %708 = vst [vmem:[#allocation3 + $0xe0] sm:$0xff] %v597_v11  ;;  %724 = vst [vmem:[#allocation3 + $0xb8] sm:$0xff] %v677_v12 }
 0x111   : > { %v3666_v13 = vpop.f32.mrf.mxu0  ;;  %v3690_v14 = vpop.f32.mrf.mxu1 }
 0x112   : > { %711 = vst [vmem:[#allocation3 + $0x68] sm:$0xff] %v3666_v13  ;;  %727 = vst [vmem:[#allocation3 + $0x98] sm:$0xff] %v3690_v14 }
 0x113   : > { %v607_v15 = vpop.f32.mrf.mxu0  ;;  %v687_v16 = vpop.f32.mrf.mxu1 }
 0x114   : > { %710 = vst [vmem:[#allocation3 + $0x18] sm:$0xff] %v607_v15  ;;  %726 = vst [vmem:[#allocation3 + $0x28] sm:$0xff] %v687_v16 }
 0x115 PF: > { %v4609_v17 = vld [vmem:[%s4461_s19 + $0x10] sm:$0xff]  ;;  %v4612_v18 = vld [vmem:[%s4461_s19] sm:$0xff]  ;;  %v6602_v20 = vmov 0.0   ;;  %v6604_v21 = vmov 0   ;;  %v4620_v23 = vld [vmem:[%s4461_s19 + $0x18] sm:$0xff]  ;;  %p3555_p6 = scmp.ne.s32.totalorder %s4368_s27, 3 }
 0x116   : > { %1865 = vmatprep.subr.mxu0 %v6602_v20  ;;  %3752 = vset.pattern.permute.xlu1 %v6604_v21  ;;  %v4624_v24 = vld [vmem:[%s4461_s19 + $0x8] sm:$0xff]  ;;  %v933_v25 = vld [vmem:[#allocation3 + $0x60] sm:$0xff]  ;;  %v930_v30 = vld [vmem:[#allocation3 + $0x38] sm:$0xff] }
 0x117   : > { %3751 = vset.pattern.permute.xlu0 %v6604_v21  ;;  %1029 = vperm.xlu1 %3752, %v4609_v17   ;;  %v932_v26 = vld [vmem:[#allocation3 + $0xe0] sm:$0xff]  ;;  %v4631_v27 = vld [vmem:[%s4461_s19 + $0x28] sm:$0xff]  ;;  %v4641_v31 = vld [vmem:[%s4461_s19 + $0x38] sm:$0xff] }
 0x118   : > { %1019 = vperm.xlu0 %3751, %v4612_v18   ;;  %2794 = vmatprep.subr.mxu1 %v6602_v20  ;;  %v4635_v28 = vld [vmem:[%s4461_s19 + $0x20] sm:$0xff]  ;;  %v4645_v32 = vld [vmem:[%s4461_s19 + $0x30] sm:$0xff]  ;;  %v4651_v35 = vld [vmem:[%s4461_s19 + $0x48] sm:$0xff] }
 0x119   : > { %v935_v19 = vld [vmem:[#allocation3 + $0x68] sm:$0xff]  ;;  %v931_v29 = vld [vmem:[#allocation3 + $0x40] sm:$0xff]  ;;  %v929_v33 = vld [vmem:[#allocation3 + $0xb0] sm:$0xff] }
 0x11a   : > { %1866 = vmatpush1.msra.mxu0 %v935_v19  ;;  %v928_v34 = vld [vmem:[#allocation3 + $0xd0] sm:$0xff]  ;;  %v4655_v36 = vld [vmem:[%s4461_s19 + $0x40] sm:$0xff]  ;;  %v927_v37 = vld [vmem:[#allocation3 + $0xa8] sm:$0xff] }
 0x11b   : > { %v934_v22 = vld [vmem:[#allocation3 + $0x18] sm:$0xff]  ;;  %1867 = vmatprep.subr.mxu0 %v6602_v20  ;;  %1034 = vperm.xlu1 %3752, %v4620_v23   ;;  %v4665_v40 = vld [vmem:[%s4461_s19 + $0x50] sm:$0xff]  ;;  %v4668_v42 = vld [vmem:[%s4451_s13] sm:$0xff] }
 0x11c   : > { %1868 = vmatpush1.msra.mxu0 %v934_v22  ;;  %1024 = vperm.xlu0 %3751, %v4624_v24   ;;  %v926_v38 = vld [vmem:[#allocation3 + $0x58] sm:$0xff]  ;;  %v925_v41 = vld [vmem:[#allocation3 + $0x90] sm:$0xff]  ;;  %v924_v43 = vld [vmem:[#allocation3 + $0x8] sm:$0xff]  ;;  %v793_v44 = vunpack.c.h.bf16 %v4668_v42 }
 0x11d   : > { %1869 = vmatprep.subr.mxu0 %v6602_v20  ;;  %v4661_v39 = vld [vmem:[%s4461_s19 + $0x58] sm:$0xff]  ;;  %v4675_v45 = vld [vmem:[%s4461_s19 + $0x68] sm:$0xff]  ;;  %v4679_v46 = vld [vmem:[%s4461_s19 + $0x60] sm:$0xff] }
 0x11e   : > { %1870 = vmatpush1.msra.mxu0 %v933_v25  ;;  %v923_v47 = vld [vmem:[#allocation3 + $0x78] sm:$0xff]  ;;  %1929 = vmatprep.mubr.f32.mxu0 %v793_v44  ;;  %v922_v48 = vld [vmem:[#allocation3 + $0xe8] sm:$0xff]  ;;  %v4689_v50 = vld [vmem:[%s4461_s19 + $0x70] sm:$0xff] }
 0x11f   : > { %1871 = vmatprep.subr.mxu0 %v6602_v20  ;;  %1044 = vperm.xlu1 %3752, %v4631_v27   ;;  %v4685_v49 = vld [vmem:[%s4461_s19 + $0x78] sm:$0xff]  ;;  %v921_v51 = vld [vmem:[#allocation3 + $0xc8] sm:$0xff]  ;;  %v920_v52 = vld [vmem:[#allocation3 + $0x80] sm:$0xff] }
 0x120   : > { %1872 = vmatpush1.msra.mxu0 %v932_v26  ;;  %1039 = vperm.xlu0 %3751, %v4635_v28   ;;  %v4695_v53 = vld [vmem:[%s4461_s19 + $0x88] sm:$0xff]  ;;  %v4699_v54 = vld [vmem:[%s4461_s19 + $0x80] sm:$0xff]  ;;  %v951_v55 = vld [vmem:[#allocation3 + $0x98] sm:$0xff] }
 0x121   : > { %1873 = vmatprep.subr.mxu0 %v6602_v20  ;;  %v950_v56 = vld [vmem:[#allocation3 + $0x28] sm:$0xff]  ;;  %v4705_v57 = vld [vmem:[%s4461_s19 + $0x98] sm:$0xff]  ;;  %v4709_v58 = vld [vmem:[%s4461_s19 + $0x90] sm:$0xff] }
 0x122   : > { %1874 = vmatpush1.msra.mxu0 %v931_v29  ;;  %v949_v59 = vld [vmem:[#allocation3] sm:$0xff]  ;;  %v948_v60 = vld [vmem:[#allocation3 + $0xb8] sm:$0xff]  ;;  %v4715_v61 = vld [vmem:[%s4461_s19 + $0xa8] sm:$0xff] }
 0x123   : > { %1875 = vmatprep.subr.mxu0 %v6602_v20  ;;  %1054 = vperm.xlu1 %3752, %v4641_v31   ;;  %v4719_v62 = vld [vmem:[%s4461_s19 + $0xa0] sm:$0xff]  ;;  %v946_v0 = vld [vmem:[#allocation3 + $0xf8] sm:$0xff]  ;;  %v4729_v2 = vld [vmem:[%s4461_s19 + $0xb0] sm:$0xff] }
 0x124   : > { %1876 = vmatpush1.msra.mxu0 %v930_v30  ;;  %1049 = vperm.xlu0 %3751, %v4645_v32   ;;  %v947_v63 = vld [vmem:[#allocation3 + $0xc0] sm:$0xff]  ;;  %v4725_v1 = vld [vmem:[%s4461_s19 + $0xb8] sm:$0xff]  ;;  %v945_v3 = vld [vmem:[#allocation3 + $0x48] sm:$0xff]  ;;  %v792_v30 = vunpack.c.l.bf16 %v4668_v42 }
 0x125   : > { %1877 = vmatprep.subr.mxu0 %v6602_v20  ;;  %v944_v4 = vld [vmem:[#allocation3 + $0x88] sm:$0xff]  ;;  %v4739_v6 = vld [vmem:[%s4461_s19 + $0xc0] sm:$0xff]  ;;  %v943_v7 = vld [vmem:[#allocation3 + $0xf0] sm:$0xff] }
 0x126   : > { %1878 = vmatpush1.msra.mxu0 %v929_v33  ;;  %v4735_v5 = vld [vmem:[%s4461_s19 + $0xc8] sm:$0xff]  ;;  %v942_v8 = vld [vmem:[#allocation3 + $0x20] sm:$0xff]  ;;  %v4745_v9 = vld [vmem:[%s4461_s19 + $0xd8] sm:$0xff] }
 0x127   : > { %1879 = vmatprep.subr.mxu0 %v6602_v20  ;;  %1064 = vperm.xlu1 %3752, %v4651_v35   ;;  %v4749_v10 = vld [vmem:[%s4461_s19 + $0xd0] sm:$0xff]  ;;  %v940_v12 = vld [vmem:[#allocation3 + $0xd8] sm:$0xff]  ;;  %v4755_v13 = vld [vmem:[%s4461_s19 + $0xe8] sm:$0xff] }
 0x128   : > { %1880 = vmatpush1.msra.mxu0 %v928_v34  ;;  %1059 = vperm.xlu0 %3751, %v4655_v36   ;;  %v941_v11 = vld [vmem:[#allocation3 + $0x30] sm:$0xff]  ;;  %v4759_v14 = vld [vmem:[%s4461_s19 + $0xe0] sm:$0xff]  ;;  %v4765_v19 = vld [vmem:[%s4461_s19 + $0xf8] sm:$0xff] }
 0x129   : > { %1881 = vmatprep.subr.mxu0 %v6602_v20  ;;  %v939_v15 = vld [vmem:[#allocation3 + $0xa0] sm:$0xff]  ;;  %v938_v16 = vld [vmem:[#allocation3 + $0x50] sm:$0xff]  ;;  %v729_v26 = vld [vmem:[%s4451_s13 + $0x8] sm:$0xff] }
 0x12a   : > { %1882 = vmatpush1.msra.mxu0 %v927_v37  ;;  %v4769_v22 = vld [vmem:[%s4461_s19 + $0xf0] sm:$0xff]  ;;  %v985_v33 = vld [vmem:[%s4461_s19 + $0x108] sm:$0xff]  ;;  %v795_v34 = vunpack.c.h.bf16 %v729_v26  ;;  %v984_v37 = vld [vmem:[%s4461_s19 + $0x100] sm:$0xff] }
 0x12b   : > { %1883 = vmatprep.subr.mxu0 %v6602_v20  ;;  %1074 = vperm.xlu1 %3752, %v4661_v39   ;;  %v937_v25 = vld [vmem:[#allocation3 + $0x70] sm:$0xff]  ;;  %v4781_v42 = vld [vmem:[%s4461_s19 + $0x118] sm:$0xff] }
 0x12c   : > { %1884 = vmatpush1.msra.mxu0 %v926_v38  ;;  %1069 = vperm.xlu0 %3751, %v4665_v40   ;;  %v936_v29 = vld [vmem:[#allocation3 + $0x10] sm:$0xff] }
 0x12d   : > { %1885 = vmatprep.subr.mxu0 %v6602_v20  ;;  %v730_v38 = vld [vmem:[%s4451_s13 + $0x10] sm:$0xff] }
 0x12e   : > { %1886 = vmatpush1.msra.mxu0 %v925_v41  ;;  %v794_v41 = vunpack.c.l.bf16 %v729_v26  ;;  %v986_v44 = vld [vmem:[%s4461_s19 + $0x110] sm:$0xff] }
 0x12f   : > { %1887 = vmatprep.subr.mxu0 %v6602_v20  ;;  %1084 = vperm.xlu1 %3752, %v4675_v45   ;;  %v4817_v26 = vld [vmem:[%s4461_s19 + $0x150] sm:$0xff] }
 0x130   : > { %1888 = vmatpush1.msra.mxu0 %v924_v43  ;;  %1079 = vperm.xlu0 %3751, %v4679_v46   ;;  %v797_v43 = vunpack.c.h.bf16 %v730_v38 }
 0x131   : > { %1889 = vmatprep.subr.mxu0 %v6602_v20 }
 0x132   : > { %1890 = vmatpush1.msra.mxu0 %v923_v47  ;;  %v731_v47 = vld [vmem:[%s4451_s13 + $0x18] sm:$0xff] }
 0x133   : > { %1891 = vmatprep.subr.mxu0 %v6602_v20  ;;  %1094 = vperm.xlu1 %3752, %v4685_v49  }
 0x134   : > { %1892 = vmatpush1.msra.mxu0 %v922_v48  ;;  %1089 = vperm.xlu0 %3751, %v4689_v50   ;;  %v796_v48 = vunpack.c.l.bf16 %v730_v38  ;;  %v736_v38 = vld [vmem:[%s4451_s13 + $0x40] sm:$0xff] }
 0x135   : > { %1893 = vmatprep.subr.mxu0 %v6602_v20 }
 0x136   : > { %1894 = vmatpush1.msra.mxu0 %v921_v51  ;;  %v4787_v51 = vld [vmem:[%s4461_s19 + $0x128] sm:$0xff] }
 0x137   : > { %1895 = vmatprep.subr.mxu0 %v6602_v20  ;;  %1104 = vperm.xlu1 %3752, %v4695_v53  }
 0x138   : > { %1896 = vmatpush1.msra.mxu0 %v920_v52  ;;  %1099 = vperm.xlu0 %3751, %v4699_v54   ;;  %v799_v52 = vunpack.c.h.bf16 %v731_v47 }
 0x139   : > { %1897 = vmatprep.subr.mxu0 %v6602_v20 }
 0x13a   : > { %1898 = vmatpush2.msra.mxu0 %v951_v55  ;;  %v4790_v55 = vld [vmem:[%s4461_s19 + $0x120] sm:$0xff] }
 0x13b   : > { %1899 = vmatprep.subr.mxu0 %v6602_v20  ;;  %1114 = vperm.xlu1 %3752, %v4705_v57  }
 0x13c   : > { %1900 = vmatpush2.msra.mxu0 %v950_v56  ;;  %1109 = vperm.xlu0 %3751, %v4709_v58   ;;  %v732_v56 = vld [vmem:[%s4451_s13 + $0x20] sm:$0xff] }
 0x13d   : > { %1901 = vmatprep.subr.mxu0 %v6602_v20 }
 0x13e   : > { %1902 = vmatpush2.msra.mxu0 %v949_v59  ;;  %v798_v59 = vunpack.c.l.bf16 %v731_v47  ;;  %v737_v47 = vld [vmem:[%s4451_s13 + $0x48] sm:$0xff] }
 0x13f   : > { %1903 = vmatprep.subr.mxu0 %v6602_v20  ;;  %1124 = vperm.xlu1 %3752, %v4715_v61  }
 0x140   : > { %1904 = vmatpush2.msra.mxu0 %v948_v60  ;;  %1119 = vperm.xlu0 %3751, %v4719_v62   ;;  %v4796_v60 = vld [vmem:[%s4461_s19 + $0x138] sm:$0xff] }
 0x141   : > { %1905 = vmatprep.subr.mxu0 %v6602_v20 }
 0x142   : > { %1906 = vmatpush2.msra.mxu0 %v947_v63  ;;  %v801_v63 = vunpack.c.h.bf16 %v732_v56 }
 0x143   : > { %1907 = vmatprep.subr.mxu0 %v6602_v20  ;;  %1134 = vperm.xlu1 %3752, %v4725_v1  }
 0x144   : > { %1908 = vmatpush2.msra.mxu0 %v946_v0  ;;  %1129 = vperm.xlu0 %3751, %v4729_v2   ;;  %v4799_v0 = vld [vmem:[%s4461_s19 + $0x130] sm:$0xff] }
 0x145   : > { %1909 = vmatprep.subr.mxu0 %v6602_v20 }
 0x146   : > { %1910 = vmatpush2.msra.mxu0 %v945_v3  ;;  %v733_v3 = vld [vmem:[%s4451_s13 + $0x28] sm:$0xff] }
 0x147   : > { %1911 = vmatprep.subr.mxu0 %v6602_v20  ;;  %1144 = vperm.xlu1 %3752, %v4735_v5  }
 0x148   : > { %1912 = vmatpush2.msra.mxu0 %v944_v4  ;;  %1139 = vperm.xlu0 %3751, %v4739_v6   ;;  %v800_v4 = vunpack.c.l.bf16 %v732_v56  ;;  %v4839_v56 = vld [vmem:[%s4461_s19 + $0x170] sm:$0xff] }
 0x149   : > { %1913 = vmatprep.subr.mxu0 %v6602_v20 }
 0x14a   : > { %1914 = vmatpush2.msra.mxu0 %v943_v7  ;;  %v4805_v7 = vld [vmem:[%s4461_s19 + $0x148] sm:$0xff] }
 0x14b   : > { %1915 = vmatprep.subr.mxu0 %v6602_v20  ;;  %1154 = vperm.xlu1 %3752, %v4745_v9  }
 0x14c   : > { %1916 = vmatpush2.msra.mxu0 %v942_v8  ;;  %1149 = vperm.xlu0 %3751, %v4749_v10   ;;  %v803_v8 = vunpack.c.h.bf16 %v733_v3 }
 0x14d   : > { %1917 = vmatprep.subr.mxu0 %v6602_v20 }
 0x14e   : > { %1918 = vmatpush2.msra.mxu0 %v941_v11  ;;  %v4808_v11 = vld [vmem:[%s4461_s19 + $0x140] sm:$0xff] }
 0x14f   : > { %1919 = vmatprep.subr.mxu0 %v6602_v20  ;;  %1164 = vperm.xlu1 %3752, %v4755_v13  }
 0x150   : > { %1920 = vmatpush2.msra.mxu0 %v940_v12  ;;  %1159 = vperm.xlu0 %3751, %v4759_v14   ;;  %v734_v12 = vld [vmem:[%s4451_s13 + $0x30] sm:$0xff] }
 0x151   : > { %1921 = vmatprep.subr.mxu0 %v6602_v20 }
 0x152   : > { %1922 = vmatpush2.msra.mxu0 %v939_v15  ;;  %v802_v15 = vunpack.c.l.bf16 %v733_v3  ;;  %v810_v3 = vunpack.c.l.bf16 %v737_v47 }
 0x153   : > { %1923 = vmatprep.subr.mxu0 %v6602_v20  ;;  %1174 = vperm.xlu1 %3752, %v4765_v19  }
 0x154   : > { %1924 = vmatpush2.msra.mxu0 %v938_v16  ;;  %1169 = vperm.xlu0 %3751, %v4769_v22   ;;  %v4814_v16 = vld [vmem:[%s4461_s19 + $0x158] sm:$0xff] }
 0x155   : > { %1925 = vmatprep.subr.mxu0 %v6602_v20 }
 0x156   : > { %1926 = vmatpush2.msra.mxu0 %v937_v25  ;;  %v805_v25 = vunpack.c.h.bf16 %v734_v12 }
 0x157   : > { %1927 = vmatprep.subr.mxu0 %v6602_v20  ;;  %1184 = vperm.xlu1 %3752, %v985_v33   ;;  %v4823_v33 = vld [vmem:[%s4461_s19 + $0x168] sm:$0xff] }
 0x158   : > { %1928 = vmatpush2.msra.mxu0 %v936_v29  ;;  %1179 = vperm.xlu0 %3751, %v984_v37   ;;  %v735_v29 = vld [vmem:[%s4451_s13 + $0x38] sm:$0xff]  ;;  %v4826_v37 = vld [vmem:[%s4461_s19 + $0x160] sm:$0xff] }
 0x159   : > { %1930 = vmatmul.mubr.f32.vlgmr.msra.gmra.mxu0 %v792_v30  ;;  %v804_v30 = vunpack.c.l.bf16 %v734_v12  ;;  %v739_v12 = vld [vmem:[%s4451_s13 + $0x58] sm:$0xff] }
 0x15a   : > { %1934 = vmatprep.mubr.f32.mxu0 %v795_v34  ;;  %v807_v34 = vunpack.c.h.bf16 %v735_v29 }
 0x15b   : > { %1194 = vperm.xlu1 %3752, %v4781_v42  }
 0x15c   : > { %1189 = vperm.xlu0 %3751, %v986_v44   ;;  %v809_v44 = vunpack.c.h.bf16 %v736_v38 }
 0x15d   : > { %1935 = vmatmul.mubr.f32.gmra.mxu0 %v794_v41  ;;  %v806_v41 = vunpack.c.l.bf16 %v735_v29  ;;  %v740_v29 = vld [vmem:[%s4451_s13 + $0x60] sm:$0xff] }
 0x15e   : > { %1939 = vmatprep.mubr.f32.mxu0 %v797_v43  ;;  %v4832_v43 = vld [vmem:[%s4461_s19 + $0x178] sm:$0xff] }
 0x15f   : > { %1204 = vperm.xlu1 %3752, %v4787_v51  }
 0x160   : > { %1199 = vperm.xlu0 %3751, %v4790_v55  }
 0x161   : > { %1940 = vmatmul.mubr.f32.gmra.mxu0 %v796_v48  ;;  %v6605_v48 = vmov 1  }
 0x162   : > { %1944 = vmatprep.mubr.f32.mxu0 %v799_v52  ;;  %v808_v52 = vunpack.c.l.bf16 %v736_v38  ;;  %v741_v38 = vld [vmem:[%s4451_s13 + $0x68] sm:$0xff] }
 0x163   : > { %1214 = vperm.xlu1 %3752, %v4796_v60  }
 0x164   : > { %1209 = vperm.xlu0 %3751, %v4799_v0  }
 0x165   : > { %1945 = vmatmul.mubr.f32.gmra.mxu0 %v798_v59  ;;  %v811_v59 = vunpack.c.h.bf16 %v737_v47  ;;  %v742_v47 = vld [vmem:[%s4451_s13 + $0x70] sm:$0xff] }
 0x166   : > { %1949 = vmatprep.mubr.f32.mxu0 %v801_v63  ;;  %v738_v63 = vld [vmem:[%s4451_s13 + $0x50] sm:$0xff] }
 0x167   : > { %1224 = vperm.xlu1 %3752, %v4805_v7  }
 0x168   : > { %1219 = vperm.xlu0 %3751, %v4808_v11  }
 0x169   : > { %1950 = vmatmul.mubr.f32.gmra.mxu0 %v800_v4  ;;  %v1015_v4 = vld [vmem:[%s4461_s19 + $0x1f8] sm:$0xff] }
 0x16a   : > { %1954 = vmatprep.mubr.f32.mxu0 %v803_v8  ;;  %v813_v8 = vunpack.c.h.bf16 %v738_v63 }
 0x16b   : > { %1234 = vperm.xlu1 %3752, %v4814_v16  }
 0x16c   : > { %1229 = vperm.xlu0 %3751, %v4817_v26  }
 0x16d   : > { %1955 = vmatmul.mubr.f32.gmra.mxu0 %v802_v15  ;;  %v1013_v15 = vld [vmem:[%s4461_s19 + $0x1e8] sm:$0xff] }
 0x16e   : > { %1959 = vmatprep.mubr.f32.mxu0 %v805_v25  ;;  %v815_v25 = vunpack.c.h.bf16 %v739_v12 }
 0x16f   : > { %1244 = vperm.xlu1 %3752, %v4823_v33  }
 0x170   : > { %1239 = vperm.xlu0 %3751, %v4826_v37  }
 0x171   : > { %1960 = vmatmul.mubr.f32.gmra.mxu0 %v804_v30  ;;  %v814_v30 = vunpack.c.l.bf16 %v739_v12  ;;  %v1004_v12 = vld [vmem:[%s4461_s19 + $0x1a0] sm:$0xff] }
 0x172   : > { %1964 = vmatprep.mubr.f32.mxu0 %v807_v34  ;;  %v817_v34 = vunpack.c.h.bf16 %v740_v29 }
 0x173   : > { %3753 = vset.pattern.permute.xlu1 %v6605_v48 }
 0x174   : > { %1254 = vperm.xlu0 %3751, %v4832_v43   ;;  %1463 = vperm.xlu1 %3753, %v4689_v50   ;;  %v812_v50 = vunpack.c.l.bf16 %v738_v63  ;;  %v743_v63 = vld [vmem:[%s4451_s13 + $0x78] sm:$0xff] }
 0x175   : > { %1965 = vmatmul.mubr.f32.gmra.mxu0 %v806_v41  ;;  %v4857_v41 = vld [vmem:[%s4461_s19 + $0x1c8] sm:$0xff] }
 0x176   : > { %1969 = vmatprep.mubr.f32.mxu0 %v809_v44  ;;  %v819_v44 = vunpack.c.h.bf16 %v741_v38 }
 0x178   : > { %1249 = vperm.xlu0 %3751, %v4839_v56   ;;  %1459 = vperm.xlu1 %3753, %v4675_v45   ;;  %v4851_v45 = vld [vmem:[%s4461_s19 + $0x1e0] sm:$0xff] }
 0x179   : > { %1970 = vmatmul.mubr.f32.gmra.mxu0 %v808_v52  ;;  %v4863_v52 = vld [vmem:[%s4461_s19 + $0x1b0] sm:$0xff] }
 0x17a   : > { %1974 = vmatprep.mubr.f32.mxu0 %v811_v59  ;;  %v821_v59 = vunpack.c.h.bf16 %v742_v47 }
 0x17c   : > { %1334 = vperm.xlu0 %3751, %v1015_v4   ;;  %1451 = vperm.xlu1 %3753, %v4661_v39   ;;  %v816_v39 = vunpack.c.l.bf16 %v740_v29  ;;  %v823_v4 = vunpack.c.h.bf16 %v743_v63 }
 0x17d   : > { %1975 = vmatmul.mubr.f32.gmra.mxu0 %v810_v3  ;;  %v1005_v3 = vld [vmem:[%s4461_s19 + $0x1a8] sm:$0xff] }
 0x17e   : > { %1979 = vmatprep.mubr.f32.mxu0 %v813_v8  ;;  %v744_v8 = vld [vmem:[%s4451_s13 + $0x80] sm:$0xff] }
 0x180   : > { %1324 = vperm.xlu0 %3751, %v1013_v15   ;;  %1443 = vperm.xlu1 %3753, %v4651_v35   ;;  %v818_v35 = vunpack.c.l.bf16 %v741_v38 }
 0x181   : > { %1980 = vmatmul.mubr.f32.gmra.mxu0 %v812_v50  ;;  %v825_v50 = vunpack.c.h.bf16 %v744_v8 }
 0x182   : > { %1984 = vmatprep.mubr.f32.mxu0 %v815_v25  ;;  %v745_v25 = vld [vmem:[%s4451_s13 + $0x88] sm:$0xff] }
 0x184   : > { %1319 = vperm.xlu0 %3751, %v4851_v45   ;;  %1435 = vperm.xlu1 %3753, %v4641_v31   ;;  %v820_v31 = vunpack.c.l.bf16 %v742_v47  ;;  %v1002_v47 = vld [vmem:[%s4461_s19 + $0x190] sm:$0xff] }
 0x185   : > { %1985 = vmatmul.mubr.f32.gmra.mxu0 %v814_v30  ;;  %v1003_v30 = vld [vmem:[%s4461_s19 + $0x198] sm:$0xff] }
 0x186   : > { %1989 = vmatprep.mubr.f32.mxu0 %v817_v34  ;;  %v827_v34 = vunpack.c.h.bf16 %v745_v25 }
 0x188   : > { %1304 = vperm.xlu0 %3751, %v4857_v41   ;;  %1427 = vperm.xlu1 %3753, %v4631_v27   ;;  %v822_v27 = vunpack.c.l.bf16 %v743_v63 }
 0x189   : > { %1990 = vmatmul.mubr.f32.gmra.mxu0 %v816_v39 }
 0x18a   : > { %1994 = vmatprep.mubr.f32.mxu0 %v819_v44  ;;  %v826_v44 = vunpack.c.l.bf16 %v745_v25 }
 0x18c   : > { %1289 = vperm.xlu0 %3751, %v4863_v52   ;;  %1419 = vperm.xlu1 %3753, %v4620_v23   ;;  %v824_v23 = vunpack.c.l.bf16 %v744_v8 }
 0x18d   : > { %1995 = vmatmul.mubr.f32.gmra.mxu0 %v818_v35 }
 0x18e   : > { %1999 = vmatprep.mubr.f32.mxu0 %v821_v59 }
 0x190   : > { %1284 = vperm.xlu0 %3751, %v1005_v3   ;;  %1411 = vperm.xlu1 %3753, %v4624_v24   ;;  %v746_v24 = vld [vmem:[%s4451_s13 + $0x90] sm:$0xff]  ;;  %v1001_v3 = vld [vmem:[%s4461_s19 + $0x188] sm:$0xff] }
 0x191   : > { %2000 = vmatmul.mubr.f32.gmra.mxu0 %v820_v31  ;;  %v829_v35 = vunpack.c.h.bf16 %v746_v24  ;;  %v828_v31 = vunpack.c.l.bf16 %v746_v24 }
 0x192   : > { %2004 = vmatprep.mubr.f32.mxu0 %v823_v4  ;;  %v4872_v15 = vpop.permute.xlu1 %1029 }
 0x193   : > { %v4875_v29 = vpop.permute.xlu0 %1019 }
 0x194   : > { %6619 = vst [vmem:[#allocation4_spill] sm:$0xff] %v4875_v29  ;;  %1279 = vperm.xlu0 %3751, %v1004_v12   ;;  %1531 = vperm.xlu1 %3753, %v4765_v19   ;;  %v747_v19 = vld [vmem:[%s4451_s13 + $0x98] sm:$0xff] }
 0x195   : > { %2005 = vmatmul.mubr.f32.gmra.mxu0 %v822_v27  ;;  %v831_v4 = vunpack.c.h.bf16 %v747_v19  ;;  %v830_v12 = vunpack.c.l.bf16 %v747_v19 }
 0x196   : > { %2009 = vmatprep.mubr.f32.mxu0 %v825_v50  ;;  %v4879_v38 = vpop.permute.xlu1 %1034  ;;  %v1000_v50 = vld [vmem:[%s4461_s19 + $0x180] sm:$0xff] }
 0x197   : > { %v4882_v39 = vpop.permute.xlu0 %1024 }
 0x198   : > { %6620 = vst [vmem:[#allocation5_spill] sm:$0xff] %v4882_v39  ;;  %1274 = vperm.xlu0 %3751, %v1003_v30   ;;  %1523 = vperm.xlu1 %3753, %v4755_v13   ;;  %v748_v13 = vld [vmem:[%s4451_s13 + $0xa0] sm:$0xff] }
 0x199   : > { %2010 = vmatmul.mubr.f32.gmra.mxu0 %v824_v23  ;;  %v833_v25 = vunpack.c.h.bf16 %v748_v13 }
 0x19a   : > { %2014 = vmatprep.mubr.f32.mxu0 %v827_v34  ;;  %v4886_v59 = vpop.permute.xlu1 %1044  ;;  %v832_v34 = vunpack.c.l.bf16 %v748_v13 }
 0x19b   : > { %v4889_v63 = vpop.permute.xlu0 %1039 }
 0x19c   : > { %1269 = vperm.xlu0 %3751, %v1002_v47   ;;  %1515 = vperm.xlu1 %3753, %v4745_v9   ;;  %v749_v9 = vld [vmem:[%s4451_s13 + $0xa8] sm:$0xff] }
 0x19d   : > { %2015 = vmatmul.mubr.f32.gmra.mxu0 %v826_v44  ;;  %v835_v24 = vunpack.c.h.bf16 %v749_v9  ;;  %v750_v44 = vld [vmem:[%s4451_s13 + $0xb0] sm:$0xff] }
 0x19e   : > { %2019 = vmatprep.mubr.f32.mxu0 %v829_v35  ;;  %v4893_v8 = vpop.permute.xlu1 %1054  ;;  %v834_v35 = vunpack.c.l.bf16 %v749_v9  ;;  %v837_v19 = vunpack.c.h.bf16 %v750_v44  ;;  %v753_v9 = vld [vmem:[%s4451_s13 + $0xc8] sm:$0xff] }
 0x19f   : > { %v4896_v27 = vpop.permute.xlu0 %1049 }
 0x1a0   : > { %1264 = vperm.xlu0 %3751, %v1001_v3   ;;  %1507 = vperm.xlu1 %3753, %v4735_v5  }
 0x1a1   : > { %2020 = vmatmul.mubr.f32.gmra.mxu0 %v828_v31  ;;  %v751_v31 = vld [vmem:[%s4451_s13 + $0xb8] sm:$0xff] }
 0x1a2   : > { %2024 = vmatprep.mubr.f32.mxu0 %v831_v4  ;;  %v4900_v23 = vpop.permute.xlu1 %1064  ;;  %v836_v4 = vunpack.c.l.bf16 %v750_v44  ;;  %v839_v13 = vunpack.c.h.bf16 %v751_v31  ;;  %v843_v44 = vunpack.c.h.bf16 %v753_v9 }
 0x1a3   : > { %v4903_v30 = vpop.permute.xlu0 %1059 }
 0x1a4   : > { %1259 = vperm.xlu0 %3751, %v1000_v50   ;;  %1499 = vperm.xlu1 %3753, %v4725_v1   ;;  %v838_v50 = vunpack.c.l.bf16 %v751_v31 }
 0x1a5   : > { %2025 = vmatmul.mubr.f32.gmra.mxu0 %v830_v12 }
 0x1a6   : > { %2029 = vmatprep.mubr.f32.mxu0 %v833_v25  ;;  %v4907_v47 = vpop.permute.xlu1 %1074 }
 0x1a7   : > { %v4909_v5 = vpop.permute.xlu0 %1069 }
 0x1a8   : > { %3984 = vset.pattern.permute.xlu0 %v6605_v48  ;;  %1491 = vperm.xlu1 %3753, %v4715_v61   ;;  %v752_v61 = vld [vmem:[%s4451_s13 + $0xc0] sm:$0xff] }
 0x1a9   : > { %2030 = vmatmul.mubr.f32.gmra.mxu0 %v832_v34  ;;  %1467 = vperm.xlu0 %3984, %v4685_v49   ;;  %v841_v25 = vunpack.c.h.bf16 %v752_v61  ;;  %v4932_v34 = vld [vmem:[%s4461_s19 + $0x1f0] sm:$0xff] }
 0x1aa   : > { %2034 = vmatprep.mubr.f32.mxu0 %v835_v24  ;;  %v4915_v1 = vpop.permute.xlu1 %1084  ;;  %v840_v24 = vunpack.c.l.bf16 %v752_v61 }
 0x1ab   : > { %v4917_v3 = vpop.permute.xlu0 %1079 }
 0x1ac   : > { %1483 = vperm.xlu1 %3753, %v4705_v57  }
 0x1ad   : > { %2035 = vmatmul.mubr.f32.gmra.mxu0 %v834_v35  ;;  %1455 = vperm.xlu0 %3984, %v4679_v46  }
 0x1ae   : > { %2039 = vmatprep.mubr.f32.mxu0 %v837_v19  ;;  %v4922_v12 = vpop.permute.xlu1 %1094  ;;  %v842_v19 = vunpack.c.l.bf16 %v753_v9 }
 0x1af   : > { %v4924_v49 = vpop.permute.xlu0 %1089 }
 0x1b0   : > { %1475 = vperm.xlu1 %3753, %v4695_v53   ;;  %v754_v53 = vld [vmem:[%s4451_s13 + $0xd0] sm:$0xff] }
 0x1b1   : > { %2040 = vmatmul.mubr.f32.gmra.mxu0 %v836_v4  ;;  %1447 = vperm.xlu0 %3984, %v4665_v40   ;;  %v845_v31 = vunpack.c.h.bf16 %v754_v53  ;;  %v755_v4 = vld [vmem:[%s4451_s13 + $0xd8] sm:$0xff]  ;;  %v844_v61 = vunpack.c.l.bf16 %v754_v53 }
 0x1b2   : > { %2044 = vmatprep.mubr.f32.mxu0 %v839_v13  ;;  %v4929_v57 = vpop.permute.xlu1 %1104 }
 0x1b3   : > { %v4934_v46 = vpop.permute.xlu0 %1099 }
 0x1b4   : > { %6621 = vst [vmem:[#allocation6_spill] sm:$0xff] %v4934_v46  ;;  %3754 = vset.pattern.permute.xlu1 %v6604_v21 }
 0x1b5   : > { %2045 = vmatmul.mubr.f32.gmra.mxu0 %v838_v50  ;;  %1439 = vperm.xlu0 %3984, %v4655_v36   ;;  %v4953_v50 = vld [vmem:[%s4461_s19 + $0x1d8] sm:$0xff] }
 0x1b6   : > { %2049 = vmatprep.mubr.f32.mxu0 %v841_v25  ;;  %1329 = vperm.xlu1 %3754, %v4932_v34   ;;  %v4940_v40 = vpop.permute.xlu1 %1114  ;;  %v847_v25 = vunpack.c.h.bf16 %v755_v4 }
 0x1b7   : > { %v4942_v35 = vpop.permute.xlu0 %1109 }
 0x1b8   : > { %6622 = vst [vmem:[#allocation7_spill] sm:$0xff] %v4942_v35  ;;  %v2364_v35 = vld [vmem:[%s4456_s16 + $0x90] sm:$0xff] }
 0x1b9   : > { %2050 = vmatmul.mubr.f32.gmra.mxu0 %v840_v24  ;;  %1431 = vperm.xlu0 %3984, %v4645_v32   ;;  %v756_v32 = vld [vmem:[%s4451_s13 + $0xe0] sm:$0xff]  ;;  %v846_v24 = vunpack.c.l.bf16 %v755_v4 }
 0x1ba   : > { %2054 = vmatprep.mubr.f32.mxu0 %v843_v44  ;;  %3755 = vset.pattern.permute.xlu1 %v6605_v48  ;;  %v4948_v36 = vpop.permute.xlu1 %1124  ;;  %v1010_v44 = vld [vmem:[%s4461_s19 + $0x1d0] sm:$0xff]  ;;  %v849_v53 = vunpack.c.h.bf16 %v756_v32  ;;  %v848_v20 = vunpack.c.l.bf16 %v756_v32  ;;  %v759_v32 = vld [vmem:[%s4451_s13 + $0xf8] sm:$0xff] }
 0x1bb   : > { %1647 = vperm.xlu1 %3755, %v4851_v45   ;;  %v4950_v13 = vpop.permute.xlu0 %1119 }
 0x1bc   : > { %6623 = vst [vmem:[#allocation8_spill] sm:$0xff] %v4950_v13 }
 0x1bd   : > { %2055 = vmatmul.mubr.f32.gmra.mxu0 %v842_v19  ;;  %1423 = vperm.xlu0 %3984, %v4635_v28   ;;  %v757_v19 = vld [vmem:[%s4451_s13 + $0xe8] sm:$0xff] }
 0x1be   : > { %2059 = vmatprep.mubr.f32.mxu0 %v845_v31  ;;  %v4958_v9 = vpop.permute.xlu1 %1134 }
 0x1bf   : > { %3756 = vset.pattern.permute.xlu1 %v6604_v21  ;;  %v4960_v45 = vpop.permute.xlu0 %1129  ;;  %v758_v21 = vld [vmem:[%s4451_s13 + $0xf0] sm:$0xff] }
 0x1c0   : > { %6624 = vst [vmem:[#allocation9_spill] sm:$0xff] %v4960_v45  ;;  %1314 = vperm.xlu1 %3756, %v4953_v50  }
 0x1c1   : > { %2060 = vmatmul.mubr.f32.gmra.mxu0 %v844_v61  ;;  %1415 = vperm.xlu0 %3984, %v4609_v17   ;;  %v851_v61 = vunpack.c.h.bf16 %v757_v19  ;;  %v850_v17 = vunpack.c.l.bf16 %v757_v19 }
 0x1c2   : > { %2064 = vmatprep.mubr.f32.mxu0 %v847_v25  ;;  %v4966_v31 = vpop.permute.xlu1 %1144 }
 0x1c3   : > { %v4968_v28 = vpop.permute.xlu0 %1139 }
 0x1c4   : > { %6625 = vst [vmem:[#allocation10_spill] sm:$0xff] %v4968_v28  ;;  %1309 = vperm.xlu1 %3756, %v1010_v44   ;;  %v852_v28 = vunpack.c.l.bf16 %v758_v21 }
 0x1c5   : > { %2065 = vmatmul.mubr.f32.gmra.mxu0 %v846_v24  ;;  %1407 = vperm.xlu0 %3984, %v4612_v18   ;;  %v853_v24 = vunpack.c.h.bf16 %v758_v21 }
 0x1c6   : > { %2069 = vmatprep.mubr.f32.mxu0 %v849_v53  ;;  %v4972_v4 = vpop.permute.xlu1 %1154 }
 0x1c7   : > { %v4974_v25 = vpop.permute.xlu0 %1149 }
 0x1c8   : > { %6626 = vst [vmem:[#allocation11_spill] sm:$0xff] %v4974_v25  ;;  %3757 = vset.pattern.permute.xlu1 %v6605_v48  ;;  %v854_v48 = vunpack.c.l.bf16 %v759_v32 }
 0x1c9   : > { %2070 = vmatmul.mubr.f32.gmra.mxu0 %v848_v20  ;;  %1639 = vperm.xlu1 %3757, %v1010_v44   ;;  %v855_v20 = vunpack.c.h.bf16 %v759_v32  ;;  %v760_v44 = vld [vmem:[%s4451_s13 + $0x100] sm:$0xff]  ;;  %v762_v32 = vld [vmem:[%s4451_s13 + $0x110] sm:$0xff] }
 0x1ca   : > { %2074 = vmatprep.mubr.f32.mxu0 %v851_v61  ;;  %1527 = vperm.xlu0 %3984, %v4769_v22   ;;  %v4979_v53 = vpop.permute.xlu1 %1164  ;;  %v4989_v61 = vld [vmem:[%s4461_s19 + $0x1c0] sm:$0xff]  ;;  %v857_v21 = vunpack.c.h.bf16 %v760_v44 }
 0x1cb   : > { %v4981_v18 = vpop.permute.xlu0 %1159 }
 0x1cc   : > { %6627 = vst [vmem:[#allocation12_spill] sm:$0xff] %v4981_v18  ;;  %v6629_v18 = vmov 0  }
 0x1cd   : > { %2075 = vmatmul.mubr.f32.gmra.mxu0 %v850_v17  ;;  %1635 = vperm.xlu1 %3757, %v4857_v41   ;;  %v761_v41 = vld [vmem:[%s4451_s13 + $0x108] sm:$0xff]  ;;  %v1007_v17 = vld [vmem:[%s4461_s19 + $0x1b8] sm:$0xff] }
 0x1ce   : > { %2079 = vmatprep.mubr.f32.mxu0 %v853_v24  ;;  %1519 = vperm.xlu0 %3984, %v4759_v14   ;;  %v4986_v19 = vpop.permute.xlu1 %1174 }
 0x1cf   : > { %v4991_v22 = vpop.permute.xlu0 %1169 }
 0x1d0   : > { %6628 = vst [vmem:[#allocation13_spill] sm:$0xff] %v4991_v22  ;;  %v856_v22 = vunpack.c.l.bf16 %v760_v44 }
 0x1d1   : > { %2080 = vmatmul.mubr.f32.gmra.mxu0 %v852_v28  ;;  %3758 = vset.pattern.permute.xlu1 %v6629_v18  ;;  %v859_v28 = vunpack.c.h.bf16 %v761_v41 }
 0x1d2   : > { %2084 = vmatprep.mubr.f32.mxu0 %v855_v20  ;;  %1511 = vperm.xlu0 %3984, %v4749_v10   ;;  %v4997_v14 = vpop.permute.xlu1 %1184  ;;  %v858_v20 = vunpack.c.l.bf16 %v761_v41 }
 0x1d3   : > { %1299 = vperm.xlu1 %3758, %v4989_v61   ;;  %6630 = vst [vmem:[#allocation14_spill] sm:$0xff] %v4997_v14  ;;  %v5000_v24 = vpop.permute.xlu0 %1179  ;;  %v861_v14 = vunpack.c.h.bf16 %v762_v32 }
 0x1d4   : > { %6631 = vst [vmem:[#allocation15_spill] sm:$0xff] %v5000_v24  ;;  %v6634_v24 = vmov 1  }
 0x1d5   : > { %2085 = vmatmul.mubr.f32.gmra.mxu0 %v854_v48  ;;  %v763_v48 = vld [vmem:[%s4451_s13 + $0x118] sm:$0xff] }
 0x1d6   : > { %2089 = vmatprep.mubr.f32.mxu0 %v857_v21  ;;  %1503 = vperm.xlu0 %3984, %v4739_v6   ;;  %v5004_v18 = vpop.permute.xlu1 %1194  ;;  %v860_v21 = vunpack.c.l.bf16 %v762_v32 }
 0x1d7   : > { %1294 = vperm.xlu1 %3758, %v1007_v17   ;;  %6632 = vst [vmem:[#allocation16_spill] sm:$0xff] %v5004_v18  ;;  %v5006_v10 = vpop.permute.xlu0 %1189 }
 0x1d8   : > { %6633 = vst [vmem:[#allocation17_spill] sm:$0xff] %v5006_v10  ;;  %v863_v10 = vunpack.c.h.bf16 %v763_v48 }
 0x1d9   : > { %2090 = vmatmul.mubr.f32.gmra.mxu0 %v856_v22  ;;  %v764_v22 = vld [vmem:[%s4451_s13 + $0x120] sm:$0xff] }
 0x1da   : > { %2094 = vmatprep.mubr.f32.mxu0 %v859_v28  ;;  %1495 = vperm.xlu0 %3984, %v4729_v2   ;;  %v5011_v44 = vpop.permute.xlu1 %1204  ;;  %v765_v28 = vld [vmem:[%s4451_s13 + $0x128] sm:$0xff] }
 0x1db   : > { %3759 = vset.pattern.permute.xlu1 %v6634_v24  ;;  %6635 = vst [vmem:[#allocation18_spill] sm:$0xff] %v5011_v44  ;;  %v5013_v6 = vpop.permute.xlu0 %1199  ;;  %v865_v24 = vunpack.c.h.bf16 %v764_v22  ;;  %v2362_v44 = vld [vmem:[%s4456_s16 + $0x80] sm:$0xff] }
 0x1dc   : > { %1627 = vperm.xlu1 %3759, %v1007_v17   ;;  %6636 = vst [vmem:[#allocation19_spill] sm:$0xff] %v5013_v6  ;;  %v862_v17 = vunpack.c.l.bf16 %v763_v48 }
 0x1dd   : > { %2095 = vmatmul.mubr.f32.gmra.mxu0 %v858_v20  ;;  %v766_v20 = vld [vmem:[%s4451_s13 + $0x130] sm:$0xff] }
 0x1de   : > { %2099 = vmatprep.mubr.f32.mxu0 %v861_v14  ;;  %1487 = vperm.xlu0 %3984, %v4719_v62   ;;  %v5018_v2 = vpop.permute.xlu1 %1214  ;;  %v864_v62 = vunpack.c.l.bf16 %v764_v22  ;;  %v869_v48 = vunpack.c.h.bf16 %v766_v20 }
 0x1df   : > { %6637 = vst [vmem:[#allocation20_spill] sm:$0xff] %v5018_v2  ;;  %v5020_v41 = vpop.permute.xlu0 %1209  ;;  %v767_v2 = vld [vmem:[%s4451_s13 + $0x138] sm:$0xff] }
 0x1e0   : > { %1623 = vperm.xlu1 %3759, %v4863_v52   ;;  %6638 = vst [vmem:[#allocation21_spill] sm:$0xff] %v5020_v41  ;;  %v867_v52 = vunpack.c.h.bf16 %v765_v28 }
 0x1e1   : > { %2100 = vmatmul.mubr.f32.gmra.mxu0 %v860_v21 }
 0x1e2   : > { %2104 = vmatprep.mubr.f32.mxu0 %v863_v10  ;;  %1479 = vperm.xlu0 %3984, %v4709_v58   ;;  %v5024_v14 = vpop.permute.xlu1 %1224  ;;  %v866_v58 = vunpack.c.l.bf16 %v765_v28 }
 0x1e3   : > { %6639 = vst [vmem:[#allocation22_spill] sm:$0xff] %v5024_v14  ;;  %v5026_v32 = vpop.permute.xlu0 %1219  ;;  %v2447_v14 = vunpack.c.h.bf16 %v2364_v35 }
 0x1e4   : > { %6640 = vst [vmem:[#allocation23_spill] sm:$0xff] %v5026_v32  ;;  %v768_v32 = vld [vmem:[%s4451_s13 + $0x140] sm:$0xff] }
 0x1e5   : > { %2105 = vmatmul.mubr.f32.gmra.mxu0 %v862_v17 }
 0x1e6   : > { %2109 = vmatprep.mubr.f32.mxu0 %v865_v24  ;;  %1471 = vperm.xlu0 %3984, %v4699_v54   ;;  %v5030_v21 = vpop.permute.xlu1 %1234  ;;  %v868_v54 = vunpack.c.l.bf16 %v766_v20  ;;  %v871_v24 = vunpack.c.h.bf16 %v767_v2 }
 0x1e7   : > { %6641 = vst [vmem:[#allocation24_spill] sm:$0xff] %v5030_v21  ;;  %v5032_v10 = vpop.permute.xlu0 %1229  ;;  %v2351_v21 = vld [vmem:[%s4456_s16 + $0x28] sm:$0xff] }
 0x1e8   : > { %6642 = vst [vmem:[#allocation25_spill] sm:$0xff] %v5032_v10  ;;  %v769_v10 = vld [vmem:[%s4451_s13 + $0x148] sm:$0xff] }
 0x1e9   : > { %2110 = vmatmul.mubr.f32.gmra.mxu0 %v864_v62 }
 0x1ea   : > { %2114 = vmatprep.mubr.f32.mxu0 %v867_v52  ;;  %1595 = vperm.xlu0 %3984, %v4832_v43   ;;  %v5036_v17 = vpop.permute.xlu1 %1244  ;;  %v870_v43 = vunpack.c.l.bf16 %v767_v2  ;;  %v873_v52 = vunpack.c.h.bf16 %v768_v32 }
 0x1eb   : > { %6643 = vst [vmem:[#allocation26_spill] sm:$0xff] %v5036_v17  ;;  %v5038_v22 = vpop.permute.xlu0 %1239 }
 0x1ec   : > { %6644 = vst [vmem:[#allocation27_spill] sm:$0xff] %v5038_v22  ;;  %v2347_v22 = vld [vmem:[%s4456_s16 + $0x8] sm:$0xff] }
 0x1ed   : > { %2115 = vmatmul.mubr.f32.gmra.mxu0 %v866_v58 }
 0x1ee   : > { %2119 = vmatprep.mubr.f32.mxu0 %v869_v48  ;;  %1591 = vperm.xlu0 %3984, %v4839_v56   ;;  %v872_v56 = vunpack.c.l.bf16 %v768_v32  ;;  %v875_v48 = vunpack.c.h.bf16 %v769_v10 }
 0x1ef   : > { %v5042_v62 = vpop.permute.xlu0 %1254  ;;  %v5044_v28 = vpop.permute.xlu1 %1463 }
 0x1f0   : > { %6645 = vst [vmem:[#allocation28_spill] sm:$0xff] %v5042_v62 }
 0x1f1   : > { %2120 = vmatmul.mubr.f32.gmra.mxu0 %v868_v54  ;;  %v770_v54 = vld [vmem:[%s4451_s13 + $0x150] sm:$0xff] }
 0x1f2   : > { %2124 = vmatprep.mubr.f32.mxu0 %v871_v24  ;;  %1587 = vperm.xlu0 %3984, %v4823_v33   ;;  %v874_v24 = vunpack.c.l.bf16 %v769_v10  ;;  %v877_v41 = vunpack.c.h.bf16 %v770_v54  ;;  %v772_v10 = vld [vmem:[%s4451_s13 + $0x160] sm:$0xff] }
 0x1f3   : > { %v5048_v58 = vpop.permute.xlu0 %1249  ;;  %v5050_v20 = vpop.permute.xlu1 %1459  ;;  %v880_v45 = vunpack.c.l.bf16 %v772_v10 }
 0x1f4   : > { %6646 = vst [vmem:[#allocation29_spill] sm:$0xff] %v5048_v58  ;;  %v2363_v58 = vld [vmem:[%s4456_s16 + $0x88] sm:$0xff] }
 0x1f5   : > { %2125 = vmatmul.mubr.f32.gmra.mxu0 %v870_v43  ;;  %v771_v43 = vld [vmem:[%s4451_s13 + $0x158] sm:$0xff] }
 0x1f6   : > { %2129 = vmatprep.mubr.f32.mxu0 %v873_v52  ;;  %1583 = vperm.xlu0 %3984, %v4826_v37   ;;  %v876_v52 = vunpack.c.l.bf16 %v770_v54  ;;  %v2443_v54 = vunpack.c.h.bf16 %v2362_v44 }
 0x1f7   : > { %v5054_v2 = vpop.permute.xlu0 %1334  ;;  %v5056_v33 = vpop.permute.xlu1 %1451 }
 0x1f8   : > { %6647 = vst [vmem:[#allocation30_spill] sm:$0xff] %v5054_v2  ;;  %v879_v2 = vunpack.c.h.bf16 %v771_v43 }
 0x1f9   : > { %2130 = vmatmul.mubr.f32.gmra.mxu0 %v872_v56  ;;  %v2346_v56 = vld [vmem:[%s4456_s16] sm:$0xff] }
 0x1fa   : > { %2134 = vmatprep.mubr.f32.mxu0 %v875_v48  ;;  %1579 = vperm.xlu0 %3984, %v4814_v16   ;;  %v878_v48 = vunpack.c.l.bf16 %v771_v43  ;;  %v2411_v62 = vunpack.c.h.bf16 %v2346_v56 }
 0x1fb   : > { %v5060_v32 = vpop.permute.xlu0 %1324  ;;  %v5062_v37 = vpop.permute.xlu1 %1443 }
 0x1fc   : > { %6648 = vst [vmem:[#allocation31_spill] sm:$0xff] %v5060_v32  ;;  %v2410_v32 = vunpack.c.l.bf16 %v2346_v56  ;;  %v5076_v43 = vpack.i.bf16 %v2411_v62, %v2443_v54  ;;  %v774_v62 = vld [vmem:[%s4451_s13 + $0x170] sm:$0xff] }
 0x1fd   : > { %2135 = vmatmul.mubr.f32.gmra.mxu0 %v874_v24  ;;  %v2442_v24 = vunpack.c.l.bf16 %v2362_v44  ;;  %v2413_v44 = vunpack.c.h.bf16 %v2347_v22 }
 0x1fe   : > { %2139 = vmatprep.mubr.f32.mxu0 %v877_v41  ;;  %1575 = vperm.xlu0 %3984, %v4817_v26   ;;  %v881_v41 = vunpack.c.h.bf16 %v772_v10  ;;  %v773_v26 = vld [vmem:[%s4451_s13 + $0x168] sm:$0xff]  ;;  %v2349_v10 = vld [vmem:[%s4456_s16 + $0x18] sm:$0xff] }
 0x1ff   : > { %v5068_v6 = vpop.permute.xlu0 %1319  ;;  %v5070_v16 = vpop.permute.xlu1 %1435  ;;  %v3760_v56 = vpack.i.bf16 %v2410_v32, %v2442_v24  ;;  %v883_v13 = vunpack.c.h.bf16 %v773_v26  ;;  %v2365_v24 = vld [vmem:[%s4456_s16 + $0x98] sm:$0xff] }
 0x200   : > { %6649 = vst [vmem:[#allocation32_spill] sm:$0xff] %v5068_v6  ;;  %v2412_v6 = vunpack.c.l.bf16 %v2347_v22 }
 0x201   : > { %2140 = vmatmul.mubr.f32.gmra.mxu0 %v876_v52  ;;  %v2444_v52 = vunpack.c.l.bf16 %v2363_v58 }
 0x202   : > { %2144 = vmatprep.mubr.f32.mxu0 %v879_v2  ;;  %1571 = vperm.xlu0 %3984, %v4805_v7   ;;  %v2445_v2 = vunpack.c.h.bf16 %v2363_v58  ;;  %v2348_v7 = vld [vmem:[%s4456_s16 + $0x10] sm:$0xff]  ;;  %v2446_v58 = vunpack.c.l.bf16 %v2364_v35 }
 0x203   : > { %v5078_v18 = vpop.permute.xlu0 %1304  ;;  %v5080_v25 = vpop.permute.xlu1 %1427  ;;  %v2414_v22 = vunpack.c.l.bf16 %v2348_v7 }
 0x204   : > { %6650 = vst [vmem:[#allocation33_spill] sm:$0xff] %v5078_v18  ;;  %v5086_v54 = vpack.i.bf16 %v2413_v44, %v2445_v2  ;;  %v882_v18 = vunpack.c.l.bf16 %v773_v26  ;;  %v775_v26 = vld [vmem:[%s4451_s13 + $0x178] sm:$0xff]  ;;  %v884_v2 = vunpack.c.l.bf16 %v774_v62 }
 0x205   : > { %2145 = vmatmul.mubr.f32.gmra.mxu0 %v878_v48  ;;  %v3762_v48 = vpack.i.bf16 %v2412_v6, %v2444_v52  ;;  %v2416_v52 = vunpack.c.l.bf16 %v2349_v10  ;;  %v3764_v35 = vpack.i.bf16 %v2414_v22, %v2446_v58  ;;  %v5116_v22 = vld [vmem:[%s6598_s5 + $0x1] ss:$0 sm:$0xff] }
 0x206   : > { %2149 = vmatprep.mubr.f32.mxu0 %v881_v41  ;;  %1567 = vperm.xlu0 %3984, %v4808_v11   ;;  %v2415_v41 = vunpack.c.h.bf16 %v2348_v7  ;;  %v885_v11 = vunpack.c.h.bf16 %v774_v62  ;;  %v2449_v7 = vunpack.c.h.bf16 %v2365_v24  ;;  %v886_v62 = vunpack.c.l.bf16 %v775_v26 }
 0x207   : > { %v5088_v46 = vpop.permute.xlu0 %1289  ;;  %v5090_v32 = vpop.permute.xlu1 %1419 }
 0x208   : > { %6651 = vst [vmem:[#allocation34_spill] sm:$0xff] %v5088_v46  ;;  %v5096_v6 = vpack.i.bf16 %v2415_v41, %v2447_v14  ;;  %v887_v46 = vunpack.c.h.bf16 %v775_v26  ;;  %v2366_v14 = vld [vmem:[%s4456_s16 + $0xa0] sm:$0xff] }
 0x209   : > { %2150 = vmatmul.mubr.f32.gmra.mxu0 %v880_v45  ;;  %3761 = vxpose.xlu1.b32.start [1/16] %v3760_v56, 128  ;;  %v2448_v45 = vunpack.c.l.bf16 %v2365_v24  ;;  %v5107_v41 = vld [vmem:[%s6598_s5] ss:$0 sm:$0xff] }
 0x20a   : > { %2154 = vmatprep.mubr.f32.mxu0 %v883_v13  ;;  %1563 = vperm.xlu0 %3984, %v4796_v60   ;;  %v2417_v13 = vunpack.c.h.bf16 %v2349_v10  ;;  %v2350_v60 = vld [vmem:[%s4456_s16 + $0x20] sm:$0xff]  ;;  %v1372_v26 = vmul.f32 %v5107_v41, %v4986_v19 }
 0x20b   : > { %v5098_v44 = vpop.permute.xlu0 %1284  ;;  %v5100_v56 = vpop.permute.xlu1 %1411  ;;  %v2418_v24 = vunpack.c.l.bf16 %v2350_v60  ;;  %v2419_v17 = vunpack.c.h.bf16 %v2350_v60 }
 0x20c   : > { %6652 = vst [vmem:[#allocation35_spill] sm:$0xff] %v5098_v44  ;;  %6653 = vst [vmem:[#allocation36_spill] sm:$0xff] %v5100_v56  ;;  %v5111_v44 = vpack.i.bf16 %v2417_v13, %v2449_v7  ;;  %v2451_v13 = vunpack.c.h.bf16 %v2366_v14  ;;  %v777_v7 = vld [vmem:[%s4451_s13 + $0x188] sm:$0xff] }
 0x20d   : > { %2155 = vmatmul.mubr.f32.gmra.mxu0 %v882_v18  ;;  %3763 = vxpose.xlu1.b32.cont [2/16] %v3762_v48, 128  ;;  %v776_v18 = vld [vmem:[%s4451_s13 + $0x180] sm:$0xff]  ;;  %v3766_v48 = vpack.i.bf16 %v2416_v52, %v2448_v45 }
 0x20e   : > { %2159 = vmatprep.mubr.f32.mxu0 %v885_v11  ;;  %1559 = vperm.xlu0 %3984, %v4799_v0   ;;  %v2450_v11 = vunpack.c.l.bf16 %v2366_v14  ;;  %v2367_v0 = vld [vmem:[%s4456_s16 + $0xa8] sm:$0xff]  ;;  %v889_v45 = vunpack.c.h.bf16 %v776_v18  ;;  %v888_v14 = vunpack.c.l.bf16 %v776_v18 }
 0x20f   : > { %v5118_v58 = vpop.permute.xlu0 %1279  ;;  %v1532_v10 = vpop.permute.xlu1 %1531  ;;  %v2452_v29 = vunpack.c.l.bf16 %v2367_v0  ;;  %v2453_v39 = vunpack.c.h.bf16 %v2367_v0 }
 0x210   : > { %6654 = vst [vmem:[#allocation37_spill] sm:$0xff] %v5118_v58  ;;  %v1697_v52 = vmul.f32 %v5116_v22, %v1532_v10  ;;  %v5127_v58 = vpack.i.bf16 %v2419_v17, %v2451_v13  ;;  %v2421_v10 = vunpack.c.h.bf16 %v2351_v21  ;;  %v891_v13 = vunpack.c.h.bf16 %v777_v7 }
 0x211   : > { %2160 = vmatmul.mubr.f32.gmra.mxu0 %v884_v2  ;;  %3765 = vxpose.xlu1.b32.cont [3/16] %v3764_v35, 128  ;;  %v2420_v35 = vunpack.c.l.bf16 %v2351_v21  ;;  %v890_v21 = vunpack.c.l.bf16 %v777_v7  ;;  %v1368_v7 = vmul.f32 %v5107_v41, %v4972_v4 }
 0x212   : > { %2164 = vmatprep.mubr.f32.mxu0 %v887_v46  ;;  %1555 = vperm.xlu0 %3984, %v4787_v51   ;;  %v5129_v2 = vadd.f32 %v1697_v52, %v1372_v26  ;;  %v3768_v46 = vpack.i.bf16 %v2418_v24, %v2450_v11  ;;  %v1370_v51 = vmul.f32 %v5107_v41, %v4979_v53  ;;  %v2352_v26 = vld [vmem:[%s4456_s16 + $0x30] sm:$0xff] }
 0x213   : > { %v5131_v60 = vpop.permute.xlu0 %1274  ;;  %v1524_v19 = vpop.permute.xlu1 %1523  ;;  %v2368_v52 = vld [vmem:[%s4456_s16 + $0xb0] sm:$0xff]  ;;  %v2422_v11 = vunpack.c.l.bf16 %v2352_v26 }
 0x214   : > { %6655 = vst [vmem:[#allocation38_spill] sm:$0xff] %v5129_v2  ;;  %6656 = vst [vmem:[#allocation39_spill] sm:$0xff] %v5131_v60  ;;  %v1695_v17 = vmul.f32 %v5116_v22, %v1524_v19  ;;  %v5140_v60 = vpack.i.bf16 %v2421_v10, %v2453_v39  ;;  %v2454_v0 = vunpack.c.l.bf16 %v2368_v52  ;;  %v2369_v19 = vld [vmem:[%s4456_s16 + $0xb8] sm:$0xff]  ;;  %v2423_v2 = vunpack.c.h.bf16 %v2352_v26 }
 0x215   : > { %2165 = vmatmul.mubr.f32.gmra.mxu0 %v886_v62  ;;  %3767 = vxpose.xlu1.b32.cont [4/16] %v3766_v48, 128  ;;  %v778_v62 = vld [vmem:[%s4451_s13 + $0x190] sm:$0xff]  ;;  %v3770_v48 = vpack.i.bf16 %v2420_v35, %v2452_v29  ;;  %v1669_v10 = vmul.f32 %v5116_v22, %v5090_v32  ;;  %v1344_v32 = vmul.f32 %v5107_v41, %v4879_v38 }
 0x216   : > { %2169 = vmatprep.mubr.f32.mxu0 %v889_v45  ;;  %1551 = vperm.xlu0 %3984, %v4790_v55   ;;  %v5142_v18 = vadd.f32 %v1695_v17, %v1370_v51  ;;  %v2353_v45 = vld [vmem:[%s4456_s16 + $0x38] sm:$0xff]  ;;  %v2455_v55 = vunpack.c.h.bf16 %v2368_v52  ;;  %v893_v39 = vunpack.c.h.bf16 %v778_v62  ;;  %v892_v51 = vunpack.c.l.bf16 %v778_v62 }
 0x217   : > { %v5144_v24 = vpop.permute.xlu0 %1269  ;;  %v1516_v56 = vpop.permute.xlu1 %1515  ;;  %v2424_v17 = vunpack.c.l.bf16 %v2353_v45 }
 0x218   : > { %6657 = vst [vmem:[#allocation40_spill] sm:$0xff] %v5142_v18  ;;  %6658 = vst [vmem:[#allocation41_spill] sm:$0xff] %v5144_v24  ;;  %v1693_v29 = vmul.f32 %v5116_v22, %v1516_v56  ;;  %v2354_v56 = vld [vmem:[%s4456_s16 + $0x40] sm:$0xff] }
 0x219   : > { %v5146_v53 = vpop.f32.mrf.mxu0  ;;  %2170 = vmatmul.mubr.f32.gmra.mxu0 %v888_v14  ;;  %3769 = vxpose.xlu1.b32.cont [5/16] %v3768_v46, 128  ;;  %v779_v14 = vld [vmem:[%s4451_s13 + $0x198] sm:$0xff]  ;;  %v5155_v46 = vpack.i.bf16 %v2423_v2, %v2455_v55  ;;  %v2425_v2 = vunpack.c.h.bf16 %v2353_v45  ;;  %v2457_v55 = vunpack.c.h.bf16 %v2369_v19  ;;  %v1733_v45 = vadd.f32 %v1669_v10, %v1344_v32 }
 0x21a   : > { %6659 = vst [vmem:[#allocation42_spill] sm:$0xff] %v5146_v53  ;;  %2174 = vmatprep.mubr.f32.mxu0 %v891_v13  ;;  %1547 = vperm.xlu0 %3984, %v4781_v42   ;;  %v2456_v13 = vunpack.c.l.bf16 %v2369_v19  ;;  %v5159_v26 = vadd.f32 %v1693_v29, %v1368_v7  ;;  %v3772_v42 = vpack.i.bf16 %v2422_v11, %v2454_v0  ;;  %v2370_v7 = vld [vmem:[%s4456_s16 + $0xc0] sm:$0xff]  ;;  %v894_v19 = vunpack.c.l.bf16 %v779_v14 }
 0x21b   : > { %v1933_v35 = vpop.f32.mrf.mxu0  ;;  %v5161_v4 = vpop.permute.xlu0 %1264  ;;  %v1366_v29 = vmul.f32 %v5107_v41, %v4966_v31  ;;  %v780_v11 = vld [vmem:[%s4451_s13 + $0x1a0] sm:$0xff]  ;;  %v5174_v0 = vpack.i.bf16 %v2425_v2, %v2457_v55  ;;  %v2426_v24 = vunpack.c.l.bf16 %v2354_v56  ;;  %v2427_v18 = vunpack.c.h.bf16 %v2354_v56 }
 0x21c   : > { %6660 = vst [vmem:[#allocation43_spill] sm:$0xff] %v5159_v26  ;;  %6661 = vst [vmem:[#allocation44_spill] sm:$0xff] %v5161_v4  ;;  %v1508_v62 = vpop.permute.xlu1 %1507  ;;  %v895_v35 = vunpack.c.h.bf16 %v779_v14  ;;  %v3774_v38 = vpack.i.bf16 %v2424_v17, %v2456_v13  ;;  %v2459_v2 = vunpack.c.h.bf16 %v2370_v7  ;;  %v897_v14 = vunpack.c.h.bf16 %v780_v11  ;;  %v5189_v17 = vld [vmem:[%s6599_s6] ss:$0 sm:$0xff]  ;;  %v4338_v13 = vld [vmem:[%s4461_s19 + $0x108] sm:$0xff] }
 0x21d   : > { %v5163_v52 = vpop.f32.mrf.mxu0  ;;  %2175 = vmatmul.mubr.f32.gmra.mxu0 %v890_v21  ;;  %3771 = vxpose.xlu1.b32.cont [6/16] %v3770_v48, 128  ;;  %v1691_v4 = vmul.f32 %v5116_v22, %v1508_v62  ;;  %v4337_v21 = vld [vmem:[%s4461_s19 + $0x110] sm:$0xff]  ;;  %v2458_v62 = vunpack.c.l.bf16 %v2370_v7  ;;  %v1364_v10 = vmul.f32 %v5107_v41, %v4958_v9  ;;  %v1804_v32 = vadd.f32 %v5189_v17, %v1733_v45 }
 0x21e   : > { %6662 = vst [vmem:[#allocation45_spill] sm:$0xff] %v5163_v52  ;;  %2179 = vmatprep.mubr.f32.mxu0 %v893_v39  ;;  %1543 = vperm.xlu0 %3984, %v4337_v21   ;;  %v2355_v21 = vld [vmem:[%s4456_s16 + $0x48] sm:$0xff]  ;;  %v5194_v56 = vpack.i.bf16 %v2427_v18, %v2459_v2  ;;  %v2372_v45 = vld [vmem:[%s4456_s16 + $0xd0] sm:$0xff] }
 0x21f   : > { %v1938_v48 = vpop.f32.mrf.mxu0  ;;  %v5176_v39 = vadd.f32 %v1691_v4, %v1366_v29  ;;  %v5178_v26 = vpop.permute.xlu0 %1259  ;;  %v2428_v7 = vunpack.c.l.bf16 %v2355_v21 }
 0x220   : > { %6664 = vst [vmem:[#allocation47_spill] sm:$0xff] %v5178_v26  ;;  %v2371_v48 = vld [vmem:[%s4456_s16 + $0xc8] sm:$0xff]  ;;  %v1500_v55 = vpop.permute.xlu1 %1499  ;;  %6665 = vst [vmem:[#allocation48_spill] sm:$0xff] %v5194_v56  ;;  %v2374_v56 = vld [vmem:[%s4456_s16 + $0xe0] sm:$0xff] }
 0x221   : > { %6663 = vst [vmem:[#allocation46_spill] sm:$0xff] %v5176_v39  ;;  %v5180_v31 = vpop.f32.mrf.mxu0  ;;  %2180 = vmatmul.mubr.f32.gmra.mxu0 %v892_v51  ;;  %3773 = vxpose.xlu1.b32.cont [7/16] %v3772_v42, 128  ;;  %v1689_v51 = vmul.f32 %v5116_v22, %v1500_v55  ;;  %v781_v42 = vld [vmem:[%s4451_s13 + $0x1a8] sm:$0xff]  ;;  %v2460_v9 = vunpack.c.l.bf16 %v2371_v48  ;;  %v3776_v55 = vpack.i.bf16 %v2426_v24, %v2458_v62  ;;  %v2356_v39 = vld [vmem:[%s4456_s16 + $0x50] sm:$0xff] }
 0x222   : > { %2184 = vmatprep.mubr.f32.mxu0 %v895_v35  ;;  %1539 = vperm.xlu0 %3984, %v4338_v13   ;;  %v896_v35 = vunpack.c.l.bf16 %v780_v11  ;;  %v2429_v13 = vunpack.c.h.bf16 %v2355_v21  ;;  %v899_v11 = vunpack.c.h.bf16 %v781_v42  ;;  %v782_v62 = vld [vmem:[%s4451_s13 + $0x1b0] sm:$0xff] }
 0x223   : > { %v1943_v4 = vpop.f32.mrf.mxu0  ;;  %v5197_v29 = vadd.f32 %v1689_v51, %v1364_v10  ;;  %v1362_v10 = vmul.f32 %v5107_v41, %v4948_v36  ;;  %v2430_v51 = vunpack.c.l.bf16 %v2356_v39  ;;  %v2462_v36 = vunpack.c.l.bf16 %v2372_v45 }
 0x224   : > { %v2461_v4 = vunpack.c.h.bf16 %v2371_v48  ;;  %v1492_v18 = vpop.permute.xlu1 %1491  ;;  %v5202_v2 = vpop.permute.xlu0 %1467  ;;  %v3778_v48 = vpack.i.bf16 %v2428_v7, %v2460_v9  ;;  %v1360_v7 = vmul.f32 %v5107_v41, %v4940_v40 }
 0x225   : > { %6666 = vst [vmem:[#allocation49_spill] sm:$0xff] %v5197_v29  ;;  %v1946_v26 = vpop.f32.mrf.mxu0  ;;  %2185 = vmatmul.mubr.f32.gmra.mxu0 %v894_v19  ;;  %3775 = vxpose.xlu1.b32.cont [8/16] %v3774_v38, 128  ;;  %v1687_v19 = vmul.f32 %v5116_v22, %v1492_v18  ;;  %v4339_v38 = vld [vmem:[%s4461_s19 + $0x100] sm:$0xff]  ;;  %v2357_v29 = vld [vmem:[%s4456_s16 + $0x58] sm:$0xff]  ;;  %v3780_v40 = vpack.i.bf16 %v2430_v51, %v2462_v36 }
 0x226   : > { %v5200_v53 = vadd.f32 %v1946_v26, %v1804_v32  ;;  %2189 = vmatprep.mubr.f32.mxu0 %v897_v14  ;;  %1535 = vperm.xlu0 %3984, %v4339_v38   ;;  %v5210_v21 = vpack.i.bf16 %v2429_v13, %v2461_v4  ;;  %v898_v26 = vunpack.c.l.bf16 %v781_v42  ;;  %v2373_v18 = vld [vmem:[%s4456_s16 + $0xd8] sm:$0xff]  ;;  %v2463_v38 = vunpack.c.h.bf16 %v2372_v45 }
 0x227   : > { %v1948_v24 = vpop.f32.mrf.mxu0  ;;  %v5212_v14 = vadd.f32 %v1687_v19, %v1362_v10  ;;  %v901_v42 = vunpack.c.h.bf16 %v782_v62  ;;  %v4340_v13 = vld [vmem:[%s4461_s19 + $0x1f8] sm:$0xff]  ;;  %v900_v4 = vunpack.c.l.bf16 %v782_v62  ;;  %v2432_v10 = vunpack.c.l.bf16 %v2357_v29 }
 0x228   : > { %6667 = vst [vmem:[#allocation50_spill] sm:$0xff] %v5200_v53  ;;  %6668 = vst [vmem:[#allocation51_spill] sm:$0xff] %v5210_v21  ;;  %v2431_v53 = vunpack.c.h.bf16 %v2356_v39  ;;  %v1484_v24 = vpop.permute.xlu1 %1483  ;;  %v5218_v52 = vpop.permute.xlu0 %1455  ;;  %v2464_v39 = vunpack.c.l.bf16 %v2373_v18  ;;  %v2465_v21 = vunpack.c.h.bf16 %v2373_v18 }
 0x229   : > { %6669 = vst [vmem:[#allocation52_spill] sm:$0xff] %v5212_v14  ;;  %v5214_v32 = vpop.f32.mrf.mxu0  ;;  %2190 = vmatmul.mubr.f32.gmra.mxu0 %v896_v35  ;;  %3777 = vxpose.xlu1.b32.cont [9/16] %v3776_v55, 128  ;;  %v1685_v9 = vmul.f32 %v5116_v22, %v1484_v24  ;;  %v783_v55 = vld [vmem:[%s4451_s13 + $0x1b8] sm:$0xff]  ;;  %v2358_v14 = vld [vmem:[%s4456_s16 + $0x60] sm:$0xff]  ;;  %v2433_v24 = vunpack.c.h.bf16 %v2357_v29 }
 0x22a   : > { %6670 = vst [vmem:[#allocation53_spill] sm:$0xff] %v5214_v32  ;;  %2194 = vmatprep.mubr.f32.mxu0 %v899_v11  ;;  %1659 = vperm.xlu0 %3984, %v4340_v13   ;;  %v5225_v45 = vpack.i.bf16 %v2431_v53, %v2463_v38  ;;  %v903_v62 = vunpack.c.h.bf16 %v783_v55  ;;  %v1358_v53 = vmul.f32 %v5107_v41, %v4929_v57  ;;  %v902_v51 = vunpack.c.l.bf16 %v783_v55  ;;  %v2376_v32 = vld [vmem:[%s4456_s16 + $0xf0] sm:$0xff] }
 0x22b   : > { %v1953_v35 = vpop.f32.mrf.mxu0  ;;  %v5227_v19 = vadd.f32 %v1685_v9, %v1360_v7  ;;  %v3782_v29 = vpack.i.bf16 %v2432_v10, %v2464_v39  ;;  %v2434_v36 = vunpack.c.l.bf16 %v2358_v14  ;;  %v5240_v18 = vpack.i.bf16 %v2433_v24, %v2465_v21  ;;  %v2359_v9 = vld [vmem:[%s4456_s16 + $0x68] sm:$0xff] }
 0x22c   : > { %6671 = vst [vmem:[#allocation54_spill] sm:$0xff] %v5225_v45  ;;  %v1476_v13 = vpop.permute.xlu1 %1475  ;;  %v5232_v35 = vpop.permute.xlu0 %1447  ;;  %v2466_v57 = vunpack.c.l.bf16 %v2374_v56  ;;  %v2435_v45 = vunpack.c.h.bf16 %v2358_v14  ;;  %v4341_v21 = vld [vmem:[%s4461_s19 + $0x1e8] sm:$0xff] }
 0x22d   : > { %v5229_v11 = vpop.f32.mrf.mxu0  ;;  %2195 = vmatmul.mubr.f32.gmra.mxu0 %v898_v26  ;;  %3779 = vxpose.xlu1.b32.cont [10/16] %v3778_v48, 128  ;;  %v1683_v38 = vmul.f32 %v5116_v22, %v1476_v13  ;;  %v784_v48 = vld [vmem:[%s4451_s13 + $0x1c0] sm:$0xff]  ;;  %6673 = vst [vmem:[#allocation56_spill] sm:$0xff] %v5240_v18  ;;  %v2375_v13 = vld [vmem:[%s4456_s16 + $0xe8] sm:$0xff] }
 0x22e   : > { %6672 = vst [vmem:[#allocation55_spill] sm:$0xff] %v5229_v11  ;;  %2199 = vmatprep.mubr.f32.mxu0 %v901_v42  ;;  %1655 = vperm.xlu0 %3984, %v4932_v34   ;;  %v2467_v34 = vunpack.c.h.bf16 %v2374_v56  ;;  %v905_v10 = vunpack.c.h.bf16 %v784_v48  ;;  %v785_v24 = vld [vmem:[%s4451_s13 + $0x1c8] sm:$0xff]  ;;  %v904_v56 = vunpack.c.l.bf16 %v784_v48  ;;  %v3784_v14 = vpack.i.bf16 %v2434_v36, %v2466_v57 }
 0x22f   : > { %v1958_v26 = vpop.f32.mrf.mxu0  ;;  %v5242_v42 = vadd.f32 %v1683_v38, %v1358_v53  ;;  %v2436_v53 = vunpack.c.l.bf16 %v2359_v9  ;;  %v906_v48 = vunpack.c.l.bf16 %v785_v24 }
 0x230   : > { %v5248_v26 = vpop.permute.xlu0 %1439 }
 0x231   : > { %v5244_v7 = vpop.f32.mrf.mxu0  ;;  %2200 = vmatmul.mubr.f32.gmra.mxu0 %v900_v4  ;;  %3781 = vxpose.xlu1.b32.cont [11/16] %v3780_v40, 128  ;;  %v5250_v55 = vpop.permute.xlu1 %1329  ;;  %v2468_v4 = vunpack.c.l.bf16 %v2375_v13  ;;  %v5254_v40 = vpack.i.bf16 %v2435_v45, %v2467_v34  ;;  %v786_v45 = vld [vmem:[%s4451_s13 + $0x1d0] sm:$0xff] }
 0x232   : > { %6674 = vst [vmem:[#allocation57_spill] sm:$0xff] %v5250_v55  ;;  %2204 = vmatprep.mubr.f32.mxu0 %v903_v62  ;;  %1651 = vperm.xlu0 %3984, %v4341_v21   ;;  %v2437_v55 = vunpack.c.h.bf16 %v2359_v9  ;;  %v2469_v62 = vunpack.c.h.bf16 %v2375_v13  ;;  %v907_v21 = vunpack.c.h.bf16 %v785_v24  ;;  %v2470_v9 = vunpack.c.l.bf16 %v2376_v32  ;;  %v787_v24 = vld [vmem:[%s4451_s13 + $0x1d8] sm:$0xff] }
 0x233   : > { %v1963_v39 = vpop.f32.mrf.mxu0  ;;  %6675 = vst [vmem:[#allocation58_spill] sm:$0xff] %v5254_v40  ;;  %v2361_v40 = vld [vmem:[%s4456_s16 + $0x78] sm:$0xff] }
 0x234   : > { %v5258_v18 = vpop.permute.xlu0 %1431  ;;  %v2360_v39 = vld [vmem:[%s4456_s16 + $0x70] sm:$0xff]  ;;  %v5264_v34 = vpack.i.bf16 %v2437_v55, %v2469_v62  ;;  %v2377_v55 = vld [vmem:[%s4456_s16 + $0xf8] sm:$0xff] }
 0x235   : > { %v5256_v38 = vpop.f32.mrf.mxu0  ;;  %2205 = vmatmul.mubr.f32.gmra.mxu0 %v902_v51  ;;  %3783 = vxpose.xlu1.b32.cont [12/16] %v3782_v29, 128  ;;  %v3786_v29 = vpack.i.bf16 %v2436_v53, %v2468_v4  ;;  %v2438_v57 = vunpack.c.l.bf16 %v2360_v39  ;;  %v2439_v13 = vunpack.c.h.bf16 %v2360_v39  ;;  %v908_v4 = vunpack.c.l.bf16 %v786_v45 }
 0x236   : > { %2209 = vmatprep.mubr.f32.mxu0 %v905_v10  ;;  %1643 = vperm.xlu0 %3984, %v4953_v50   ;;  %6676 = vst [vmem:[#allocation59_spill] sm:$0xff] %v5264_v34  ;;  %v5266_v51 = vpop.permute.xlu1 %1647  ;;  %v2471_v10 = vunpack.c.h.bf16 %v2376_v32  ;;  %v2441_v39 = vunpack.c.h.bf16 %v2361_v40 }
 0x237   : > { %v1968_v11 = vpop.f32.mrf.mxu0  ;;  %6677 = vst [vmem:[#allocation60_spill] sm:$0xff] %v5266_v51  ;;  %v3788_v32 = vpack.i.bf16 %v2438_v57, %v2470_v9  ;;  %v910_v9 = vunpack.c.l.bf16 %v787_v24 }
 0x238   : > { %v5270_v50 = vpop.permute.xlu0 %1423  ;;  %v909_v11 = vunpack.c.h.bf16 %v786_v45  ;;  %v5276_v51 = vpack.i.bf16 %v2439_v13, %v2471_v10  ;;  %v1343_v13 = vmul.f32 %v5107_v41, %v4872_v15 }
 0x239   : > { %v5268_v36 = vpop.f32.mrf.mxu0  ;;  %2210 = vmatmul.mubr.f32.gmra.mxu0 %v904_v56  ;;  %3785 = vxpose.xlu1.b32.cont [13/16] %v3784_v14, 128  ;;  %v2440_v14 = vunpack.c.l.bf16 %v2361_v40 }
 0x23a   : > { %2214 = vmatprep.mubr.f32.mxu0 %v907_v21  ;;  %1631 = vperm.xlu0 %3984, %v4989_v61   ;;  %6678 = vst [vmem:[#allocation61_spill] sm:$0xff] %v5276_v51  ;;  %v2472_v21 = vunpack.c.l.bf16 %v2377_v55  ;;  %v911_v61 = vunpack.c.h.bf16 %v787_v24  ;;  %v788_v51 = vld [vmem:[%s4451_s13 + $0x1e0] sm:$0xff] }
 0x23b   : > { %v1973_v62 = vpop.f32.mrf.mxu0  ;;  %v5278_v53 = vpop.permute.xlu1 %1314  ;;  %v913_v15 = vunpack.c.h.bf16 %v788_v51 }
 0x23c   : > { %6679 = vst [vmem:[#allocation62_spill] sm:$0xff] %v5278_v53  ;;  %v1416_v34 = vpop.permute.xlu0 %1415  ;;  %v2473_v62 = vunpack.c.h.bf16 %v2377_v55  ;;  %v4342_v53 = vld [vmem:[%s4461_s19 + $0x1a8] sm:$0xff] }
 0x23d   : > { %v5280_v56 = vpop.f32.mrf.mxu0  ;;  %2215 = vmatmul.mubr.f32.gmra.mxu0 %v906_v48  ;;  %3787 = vxpose.xlu1.b32.cont [14/16] %v3786_v29, 128  ;;  %v1668_v10 = vmul.f32 %v5116_v22, %v1416_v34 }
 0x23e   : > { %2219 = vmatprep.mubr.f32.mxu0 %v909_v11  ;;  %1619 = vperm.xlu0 %3984, %v4342_v53   ;;  %v5287_v29 = vpack.i.bf16 %v2441_v39, %v2473_v62  ;;  %v3790_v11 = vpack.i.bf16 %v2440_v14, %v2472_v21  ;;  %v4343_v53 = vld [vmem:[%s4461_s19 + $0x1a0] sm:$0xff]  ;;  %v789_v39 = vld [vmem:[%s4451_s13 + $0x1e8] sm:$0xff] }
 0x23f   : > { %v1978_v45 = vpop.f32.mrf.mxu0  ;;  %v1310_v48 = vpop.permute.xlu1 %1309  ;;  %v1732_v57 = vadd.f32 %v1668_v10, %v1343_v13  ;;  %v4344_v10 = vld [vmem:[%s4461_s19 + $0x198] sm:$0xff] }
 0x240   : > { %v5291_v55 = vpop.permute.xlu0 %1407  ;;  %v1399_v62 = vmul.f32 %v5107_v41, %v1310_v48 }
 0x241   : > { %v5289_v40 = vpop.f32.mrf.mxu0  ;;  %2220 = vmatmul.mubr.f32.gmra.mxu0 %v908_v4  ;;  %3789 = vxpose.xlu1.b32.cont [15/16] %v3788_v32, 128  ;;  %v1803_v34 = vadd.f32 %v5189_v17, %v1732_v57  ;;  %v912_v32 = vunpack.c.l.bf16 %v788_v51  ;;  %v790_v57 = vld [vmem:[%s4451_s13 + $0x1f0] sm:$0xff] }
 0x242   : > { %2224 = vmatprep.mubr.f32.mxu0 %v911_v61  ;;  %1615 = vperm.xlu0 %3984, %v4343_v53   ;;  %v915_v61 = vunpack.c.h.bf16 %v789_v39  ;;  %v4345_v53 = vld [vmem:[%s4461_s19 + $0x190] sm:$0xff] }
 0x243   : > { %v1983_v45 = vpop.f32.mrf.mxu0  ;;  %v5298_v13 = vadd.f32 %v5180_v31, %v1803_v34 }
 0x244   : > { %v1640_v4 = vpop.permute.xlu1 %1639 }
 0x245   : > { %v5300_v24 = vpop.f32.mrf.mxu0  ;;  %2225 = vmatmul.mubr.f32.gmra.mxu0 %v910_v9  ;;  %3791 = vxpose.xlu1.b32.end [16/16] %v3790_v11, 128  ;;  %v1724_v14 = vmul.f32 %v5116_v22, %v1640_v4  ;;  %v5303_v21 = vpop.permute.xlu0 %1527  ;;  %v914_v9 = vunpack.c.l.bf16 %v789_v39  ;;  %v791_v4 = vld [vmem:[%s4451_s13 + $0x1f8] sm:$0xff] }
 0x246   : > { %2229 = vmatprep.mubr.f32.mxu0 %v913_v15  ;;  %1611 = vperm.xlu0 %3984, %v4344_v10   ;;  %v917_v15 = vunpack.c.h.bf16 %v790_v57  ;;  %v1679_v10 = vmul.f32 %v5116_v22, %v5050_v20  ;;  %v1353_v20 = vmul.f32 %v5107_v41, %v4917_v3 }
 0x247   : > { %v1988_v48 = vpop.f32.mrf.mxu0  ;;  %v5307_v31 = vadd.f32 %v1724_v14, %v1399_v62  ;;  %v1680_v62 = vmul.f32 %v5116_v22, %v5044_v28  ;;  %v1355_v14 = vmul.f32 %v5107_v41, %v4924_v49  ;;  %v1354_v49 = vmul.f32 %v5107_v41, %v4915_v1 }
 0x248   : > { %v5312_v51 = vpop.permute.xlu1 %1635  ;;  %v1352_v1 = vmul.f32 %v5107_v41, %v4907_v47  ;;  %v1351_v47 = vmul.f32 %v5107_v41, %v4909_v5 }
 0x249   : > { %6680 = vst [vmem:[#allocation63_spill] sm:$0xff] %v5307_v31  ;;  %v5309_v34 = vpop.f32.mrf.mxu0  ;;  %2230 = vmatmul.mubr.f32.gmra.mxu0 %v912_v32  ;;  %3873 = vxpose.xlu1.b32.start [1/16] %v5076_v43, 128  ;;  %6681 = vst [vmem:[#allocation64_spill] sm:$0xff] %v5312_v51  ;;  %v5314_v11 = vpop.permute.xlu0 %1519  ;;  %v1681_v32 = vmul.f32 %v5116_v22, %v5202_v2  ;;  %v916_v43 = vunpack.c.l.bf16 %v790_v57  ;;  %v919_v2 = vunpack.c.h.bf16 %v791_v4  ;;  %v918_v31 = vunpack.c.l.bf16 %v791_v4  ;;  %v6722_v51 = vld [vmem:[#allocation7_spill] sm:$0xff] }
 0x24a   : > { %2234 = vmatprep.mubr.f32.mxu0 %v915_v61  ;;  %1607 = vperm.xlu0 %3984, %v4345_v53   ;;  %v1356_v61 = vmul.f32 %v5107_v41, %v4922_v12  ;;  %v1678_v57 = vmul.f32 %v5116_v22, %v5218_v52  ;;  %v1744_v12 = vadd.f32 %v1680_v62, %v1355_v14 }
 0x24b   : > { %v1993_v45 = vpop.f32.mrf.mxu0  ;;  %v1743_v52 = vadd.f32 %v1679_v10, %v1354_v49  ;;  %v1675_v62 = vmul.f32 %v5116_v22, %v5062_v37  ;;  %v1350_v4 = vmul.f32 %v5107_v41, %v4900_v23  ;;  %v1674_v37 = vmul.f32 %v5116_v22, %v5248_v26 }
 0x24c   : > { %v1745_v53 = vadd.f32 %v1681_v32, %v1356_v61  ;;  %v1677_v45 = vmul.f32 %v5116_v22, %v5056_v33  ;;  %v1742_v3 = vadd.f32 %v1678_v57, %v1353_v20  ;;  %v4347_v32 = vld [vmem:[%s4461_s19 + $0x180] sm:$0xff] }
 0x24d   : > { %v1996_v39 = vpop.f32.mrf.mxu0  ;;  %2235 = vmatmul.mubr.f32.gmra.mxu0 %v914_v9  ;;  %3875 = vxpose.xlu1.b32.cont [2/16] %v5086_v54, 128  ;;  %v5329_v48 = vpop.permute.xlu0 %1511  ;;  %v4346_v9 = vld [vmem:[%s4461_s19 + $0x188] sm:$0xff]  ;;  %v1814_v23 = vadd.f32 %v5189_v17, %v1743_v52  ;;  %v1739_v5 = vadd.f32 %v1675_v62, %v1350_v4 }
 0x24e   : > { %v5331_v28 = vpop.permute.xlu1 %1299  ;;  %2239 = vmatprep.mubr.f32.mxu0 %v917_v15  ;;  %1603 = vperm.xlu0 %3984, %v4346_v9   ;;  %v1816_v14 = vadd.f32 %v5189_v17, %v1745_v53  ;;  %v1741_v61 = vadd.f32 %v1677_v45, %v1352_v1  ;;  %v1813_v53 = vadd.f32 %v5189_v17, %v1742_v3 }
 0x24f   : > { %6682 = vst [vmem:[#allocation65_spill] sm:$0xff] %v5331_v28  ;;  %v1998_v54 = vpop.f32.mrf.mxu0 }
 0x250   : > { %v1992_v62 = vadd.f32 %v5309_v34, %v1813_v53  ;;  %v1818_v34 = vadd.f32 %v5189_v17, %v5242_v42  ;;  %v1345_v42 = vmul.f32 %v5107_v41, %v4889_v63  ;;  %v6687_v53 = vld [vmem:[#allocation36_spill] sm:$0xff] }
 0x251   : > { %v2001_v15 = vpop.f32.mrf.mxu0  ;;  %2240 = vmatmul.mubr.f32.gmra.mxu0 %v916_v43  ;;  %3877 = vxpose.xlu1.b32.cont [3/16] %v5096_v6, 128  ;;  %v5343_v9 = vpop.permute.xlu0 %1503  ;;  %v1676_v6 = vmul.f32 %v5116_v22, %v5232_v35  ;;  %v1815_v43 = vadd.f32 %v5189_v17, %v1744_v12  ;;  %v1349_v12 = vmul.f32 %v5107_v41, %v4903_v30 }
 0x252   : > { %v1295_v54 = vpop.permute.xlu1 %1294  ;;  %2244 = vmatprep.mubr.f32.mxu0 %v919_v2  ;;  %1599 = vperm.xlu0 %3984, %v4347_v32   ;;  %v1672_v30 = vmul.f32 %v5116_v22, %v5258_v18  ;;  %v1348_v32 = vmul.f32 %v5107_v41, %v4893_v8  ;;  %v1670_v8 = vmul.f32 %v5116_v22, %v5270_v50 }
 0x253   : > { %v2003_v33 = vpop.f32.mrf.mxu0  ;;  %v2002_v2 = vadd.f32 %v2001_v15, %v1815_v43  ;;  %v1396_v35 = vmul.f32 %v5107_v41, %v1295_v54  ;;  %v1740_v45 = vadd.f32 %v1676_v6, %v1351_v47  ;;  %v1673_v15 = vmul.f32 %v5116_v22, %v5070_v16 }
 0x254   : > { %v1738_v52 = vadd.f32 %v1674_v37, %v1349_v12  ;;  %v1812_v54 = vadd.f32 %v5189_v17, %v1741_v61  ;;  %v1347_v16 = vmul.f32 %v5107_v41, %v4896_v27  ;;  %v1810_v33 = vadd.f32 %v5189_v17, %v1739_v5 }
 0x255   : > { %v2006_v10 = vpop.f32.mrf.mxu0  ;;  %2245 = vmatmul.mubr.f32.gmra.mxu0 %v918_v31  ;;  %3879 = vxpose.xlu1.b32.cont [4/16] %v5111_v44, 128  ;;  %v5363_v49 = vpop.permute.xlu0 %1495  ;;  %v1997_v31 = vadd.f32 %v1996_v39, %v1814_v23  ;;  %v1737_v6 = vadd.f32 %v1673_v15, %v1348_v32  ;;  %v1671_v43 = vmul.f32 %v5116_v22, %v5080_v25  ;;  %v6690_v15 = vld [vmem:[#allocation5_spill] sm:$0xff] }
 0x256   : > { %v2007_v57 = vadd.f32 %v2006_v10, %v1816_v14  ;;  %v1987_v18 = vadd.f32 %v5300_v24, %v1812_v54  ;;  %v1809_v27 = vadd.f32 %v5189_v17, %v1738_v52  ;;  %v1736_v47 = vadd.f32 %v1672_v30, %v1347_v16 }
 0x257   : > { %v2008_v20 = vpop.f32.mrf.mxu0  ;;  %v1628_v26 = vpop.permute.xlu1 %1627  ;;  %v1346_v25 = vmul.f32 %v5107_v41, %v4886_v59  ;;  %v1977_v50 = vadd.f32 %v5280_v56, %v1810_v33  ;;  %v1820_v56 = vadd.f32 %v5189_v17, %v5227_v19  ;;  %v1342_v52 = vmul.f32 %v5107_v41, %v6690_v15 }
 0x258   : > { %4209 = vtanh.f32 %v2007_v57  ;;  %v1721_v44 = vmul.f32 %v5116_v22, %v1628_v26  ;;  %v1972_v57 = vadd.f32 %v5268_v36, %v1809_v27  ;;  %v6691_v30 = vmov 0.0  }
 0x259   : > { %v5372_v1 = vpop.f32.mrf.mxu0  ;;  %3881 = vxpose.xlu1.b32.cont [5/16] %v5127_v58, 128  ;;  %4211 = vtanh.f32 %v2002_v2  ;;  %v5380_v3 = vpop.permute.xlu0 %1487  ;;  %v1811_v58 = vadd.f32 %v5189_v17, %v1740_v45  ;;  %v1735_v23 = vadd.f32 %v1671_v43, %v1346_v25  ;;  %v5456_v25 = vld [vmem:[%s4456_s16 + $0x188] sm:$0xff] }
 0x25a   : > { %6683 = vst [vmem:[#allocation66_spill] sm:$0xff] %v5372_v1  ;;  %v5378_v39 = vadd.f32 %v1721_v44, %v1396_v35  ;;  %4213 = vtanh.f32 %v1997_v31  ;;  %v1807_v35 = vadd.f32 %v5189_v17, %v1736_v47 }
 0x25b   : > { %v2013_v4 = vpop.f32.mrf.mxu0  ;;  %v1982_v61 = vadd.f32 %v5289_v40, %v1811_v58  ;;  %4215 = vtanh.f32 %v1992_v62  ;;  %v1808_v40 = vadd.f32 %v5189_v17, %v1737_v6  ;;  %v1806_v20 = vadd.f32 %v5189_v17, %v1735_v23  ;;  %v5434_v62 = vld [vmem:[%s4456_s16 + $0x100] sm:$0xff]  ;;  %v6694_v58 = vld [vmem:[#allocation53_spill] sm:$0xff] }
 0x25c   : > { %6684 = vst [vmem:[#allocation67_spill] sm:$0xff] %v5378_v39  ;;  %4217 = vtanh.f32 %v1987_v18  ;;  %v1962_v45 = vadd.f32 %v5244_v7, %v1807_v35  ;;  %v6692_v7 = vld [vmem:[#allocation4_spill] sm:$0xff] }
 0x25d   : > { %v2016_v14 = vpop.f32.mrf.mxu0  ;;  %3883 = vxpose.xlu1.b32.cont [6/16] %v5140_v60, 128  ;;  %v5400_v37 = vpop.permute.xlu0 %1479  ;;  %v1734_v60 = vadd.f32 %v1670_v8, %v1345_v42  ;;  %4219 = vtanh.f32 %v1982_v61  ;;  %v1967_v12 = vadd.f32 %v5256_v38, %v1808_v40  ;;  %v1666_v38 = vmul.f32 %v5116_v22, %v5291_v55  ;;  %v6693_v55 = vld [vmem:[#allocation55_spill] sm:$0xff]  ;;  %v6696_v6 = vld [vmem:[#allocation48_spill] sm:$0xff]  ;;  %v5453_v42 = vld [vmem:[%s4456_s16 + $0x108] sm:$0xff] }
 0x25e   : > { %v5398_v24 = vadd.f32 %v2016_v14, %v1818_v34  ;;  %4221 = vtanh.f32 %v1977_v50  ;;  %v1341_v16 = vmul.f32 %v5107_v41, %v6692_v7  ;;  %v1957_v32 = vadd.f32 %v6693_v55, %v1806_v20  ;;  %v6704_v7 = vld [vmem:[#allocation54_spill] sm:$0xff] }
 0x25f   : > { %v2018_v10 = vpop.f32.mrf.mxu0  ;;  %v1805_v36 = vadd.f32 %v5189_v17, %v1734_v60  ;;  %4223 = vtanh.f32 %v1972_v57  ;;  %v2474_v8 = vunpack.c.l.bf16 %v5434_v62  ;;  %v6699_v60 = vld [vmem:[#allocation51_spill] sm:$0xff] }
 0x260   : > { %6685 = vst [vmem:[#allocation68_spill] sm:$0xff] %v5398_v24  ;;  %4225 = vtanh.f32 %v1967_v12  ;;  %v1730_v43 = vadd.f32 %v1666_v38, %v1341_v16  ;;  %v2508_v12 = vunpack.c.l.bf16 %v5456_v25  ;;  %v6705_v16 = vld [vmem:[#allocation42_spill] sm:$0xff] }
 0x261   : > { %v5407_v2 = vpop.f32.mrf.mxu0  ;;  %3885 = vxpose.xlu1.b32.cont [7/16] %v5155_v46, 128  ;;  %v5413_v63 = vpop.permute.xlu0 %1471  ;;  %v1667_v46 = vmul.f32 %v5116_v22, %v6687_v53  ;;  %v1952_v18 = vadd.f32 %v6694_v58, %v1805_v36  ;;  %4227 = vtanh.f32 %v1962_v45  ;;  %v5471_v36 = vld [vmem:[%s4456_s16 + $0x110] sm:$0xff]  ;;  %v6701_v45 = vld [vmem:[#allocation45_spill] sm:$0xff] }
 0x262   : > { %6686 = vst [vmem:[#allocation69_spill] sm:$0xff] %v5407_v2  ;;  %4229 = vtanh.f32 %v1957_v32  ;;  %v1801_v40 = vadd.f32 %v5189_v17, %v1730_v43  ;;  %v5495_v43 = vld [vmem:[%s4456_s16 + $0x198] sm:$0xff]  ;;  %v5661_v24 = vld [vmem:[%s4456_s16 + $0x150] sm:$0xff]  ;;  %v6742_v2 = vld [vmem:[#allocation49_spill] sm:$0xff] }
 0x263   : > { %v2023_v59 = vpop.f32.mrf.mxu0  ;;  %v1731_v4 = vadd.f32 %v1667_v46, %v1342_v52  ;;  %4231 = vtanh.f32 %v1952_v18 }
 0x264   : > { %v2476_v59 = vunpack.c.l.bf16 %v5453_v42  ;;  %v1932_v55 = vadd.f32 %v6705_v16, %v1801_v40  ;;  %v5525_v16 = vld [vmem:[%s4456_s16 + $0x128] sm:$0xff] }
 0x265   : > { %v4210_v5 = vpop.eup %4209  ;;  %v2026_v26 = vpop.f32.mrf.mxu0  ;;  %3887 = vxpose.xlu1.b32.cont [8/16] %v5174_v0, 128  ;;  %v5437_v0 = vld [vmem:[%s4456_s16 + $0x180] sm:$0xff]  ;;  %v1802_v50 = vadd.f32 %v5189_v17, %v1731_v4  ;;  %v2478_v4 = vunpack.c.l.bf16 %v5471_v36 }
 0x266   : > { %v5426_v19 = vadd.f32 %v2026_v26, %v1820_v56  ;;  %v5428_v31 = vpop.permute.xlu0 %1595  ;;  %2795 = vmatpush1.msra.mxu1 %v4210_v5  ;;  %v4212_v44 = vpop.eup %4211  ;;  %v2506_v14 = vunpack.c.l.bf16 %v5437_v0  ;;  %v6700_v5 = vld [vmem:[#allocation26_spill] sm:$0xff] }
 0x267   : > { %6689 = vst [vmem:[#allocation70_spill] sm:$0xff] %v5428_v31  ;;  %v2028_v54 = vpop.f32.mrf.mxu0  ;;  %2796 = vmatprep.subr.mxu1 %v6691_v30  ;;  %v4214_v33 = vpop.eup %4213  ;;  %v1386_v53 = vmul.f32 %v5107_v41, %v6700_v5  ;;  %v5474_v26 = vld [vmem:[%s4456_s16 + $0x190] sm:$0xff]  ;;  %v1937_v38 = vadd.f32 %v6701_v45, %v1802_v50  ;;  %v5511_v5 = vld [vmem:[%s4456_s16 + $0x1a0] sm:$0xff] }
 0x268   : > { %6688 = vst [vmem:[#allocation36_spill] sm:$0xff] %v5426_v19  ;;  %2797 = vmatpush1.msra.mxu1 %v4212_v44  ;;  %v4216_v47 = vpop.eup %4215  ;;  %v3985_v57 = vpack.i.bf16 %v2474_v8, %v2506_v14  ;;  %v6702_v44 = vld [vmem:[#allocation50_spill] sm:$0xff]  ;;  %v2513_v19 = vunpack.c.h.bf16 %v5495_v43 }
 0x269   : > { %v5443_v34 = vpop.f32.mrf.mxu0  ;;  %2798 = vmatprep.subr.mxu1 %v6691_v30  ;;  %3889 = vxpose.xlu1.b32.cont [9/16] %v6696_v6, 128  ;;  %v4218_v10 = vpop.eup %4217  ;;  %4233 = vtanh.f32 %v6702_v44  ;;  %v5492_v6 = vld [vmem:[%s4456_s16 + $0x118] sm:$0xff] }
 0x26a   : > { %6695 = vst [vmem:[#allocation5_spill] sm:$0xff] %v5443_v34  ;;  %v5447_v27 = vpop.permute.xlu0 %1591  ;;  %2799 = vmatpush1.msra.mxu1 %v4214_v33  ;;  %v4220_v56 = vpop.eup %4219  ;;  %4235 = vtanh.f32 %v5298_v13  ;;  %v3987_v33 = vpack.i.bf16 %v2476_v59, %v2508_v12  ;;  %v2510_v13 = vunpack.c.l.bf16 %v5474_v26  ;;  %v2480_v50 = vunpack.c.l.bf16 %v5492_v6  ;;  %v6744_v34 = vld [vmem:[#allocation52_spill] sm:$0xff] }
 0x26b   : > { %6697 = vst [vmem:[#allocation4_spill] sm:$0xff] %v5447_v27  ;;  %v2033_v61 = vpop.f32.mrf.mxu0  ;;  %2800 = vmatprep.subr.mxu1 %v6691_v30  ;;  %v4222_v15 = vpop.eup %4221  ;;  %4237 = vtanh.f32 %v1937_v38  ;;  %v6729_v27 = vld [vmem:[#allocation12_spill] sm:$0xff] }
 0x26c   : > { %2801 = vmatpush1.msra.mxu1 %v4216_v47  ;;  %v4224_v58 = vpop.eup %4223  ;;  %v6707_v47 = vld [vmem:[#allocation56_spill] sm:$0xff]  ;;  %4239 = vtanh.f32 %v1932_v55  ;;  %v5528_v55 = vld [vmem:[%s4456_s16 + $0x1a8] sm:$0xff] }
 0x26d   : > { %v5459_v23 = vpop.f32.mrf.mxu0  ;;  %2802 = vmatprep.subr.mxu1 %v6691_v30  ;;  %3891 = vxpose.xlu1.b32.cont [10/16] %v6699_v60, 128  ;;  %v4226_v8 = vpop.eup %4225  ;;  %v2512_v60 = vunpack.c.l.bf16 %v5495_v43 }
 0x26e   : > { %6698 = vst [vmem:[#allocation55_spill] sm:$0xff] %v5459_v23  ;;  %v1588_v35 = vpop.permute.xlu0 %1587  ;;  %2803 = vmatpush1.msra.mxu1 %v4218_v10  ;;  %v3989_v10 = vpack.i.bf16 %v2478_v4, %v2510_v13  ;;  %v4228_v40 = vpop.eup %4227  ;;  %v6712_v13 = vld [vmem:[#allocation59_spill] sm:$0xff] }
 0x26f   : > { %v1711_v46 = vmul.f32 %v5116_v22, %v1588_v35  ;;  %v2038_v20 = vpop.f32.mrf.mxu0  ;;  %2804 = vmatprep.subr.mxu1 %v6691_v30  ;;  %v6708_v35 = vld [vmem:[#allocation24_spill] sm:$0xff]  ;;  %v3991_v38 = vpack.i.bf16 %v2480_v50, %v2512_v60  ;;  %v2516_v50 = vunpack.c.l.bf16 %v5528_v55 }
 0x270   : > { %2805 = vmatpush1.msra.mxu1 %v4220_v56  ;;  %3986 = vxpose.xlu0.b32.start [1/16] %v3985_v57, 128  ;;  %v1384_v57 = vmul.f32 %v5107_v41, %v6708_v35  ;;  %v5508_v56 = vld [vmem:[%s4456_s16 + $0x120] sm:$0xff]  ;;  %v6710_v41 = vld [vmem:[#allocation58_spill] sm:$0xff] }
 0x271   : > { %v5479_v52 = vadd.f32 %v1711_v46, %v1386_v53  ;;  %v5481_v54 = vpop.f32.mrf.mxu0  ;;  %2806 = vmatprep.subr.mxu1 %v6691_v30  ;;  %3893 = vxpose.xlu1.b32.cont [11/16] %v6704_v7, 128  ;;  %v4230_v53 = vpop.eup %4229  ;;  %v2482_v44 = vunpack.c.l.bf16 %v5508_v56  ;;  %v5545_v60 = vld [vmem:[%s6598_s5] ss:$0 sm:$0xff] }
 0x272   : > { %v5486_v32 = vpop.permute.xlu0 %1583  ;;  %2807 = vmatpush1.msra.mxu1 %v4222_v15  ;;  %v2514_v15 = vunpack.c.l.bf16 %v5511_v5  ;;  %6713 = vst [vmem:[#allocation45_spill] sm:$0xff] %v5545_v60  ;;  %v1369_v31 = vmul.f32 %v5545_v60, %v6729_v27 }
 0x273   : > { %6703 = vst [vmem:[#allocation53_spill] sm:$0xff] %v5479_v52  ;;  %6706 = vst [vmem:[#allocation48_spill] sm:$0xff] %v5486_v32  ;;  %v2043_v18 = vpop.f32.mrf.mxu0  ;;  %2808 = vmatprep.subr.mxu1 %v6691_v30  ;;  %v2511_v52 = vunpack.c.h.bf16 %v5474_v26 }
 0x274   : > { %2809 = vmatpush1.msra.mxu1 %v4224_v58  ;;  %3988 = vxpose.xlu0.b32.cont [2/16] %v3987_v33, 128  ;;  %v5535_v58 = vld [vmem:[%s4456_s16 + $0x130] sm:$0xff] }
 0x275   : > { %v5497_v14 = vpop.f32.mrf.mxu0  ;;  %2810 = vmatprep.subr.mxu1 %v6691_v30  ;;  %3895 = vxpose.xlu1.b32.cont [12/16] %v6707_v47, 128  ;;  %v5538_v18 = vld [vmem:[%s4456_s16 + $0x1b0] sm:$0xff] }
 0x276   : > { %v1580_v61 = vpop.permute.xlu0 %1579  ;;  %2811 = vmatpush1.msra.mxu1 %v4226_v8 }
 0x277   : > { %v1709_v59 = vmul.f32 %v5116_v22, %v1580_v61  ;;  %v2048_v12 = vpop.f32.mrf.mxu0  ;;  %2812 = vmatprep.subr.mxu1 %v6691_v30  ;;  %v4232_v22 = vpop.eup %4231  ;;  %v3993_v61 = vpack.i.bf16 %v2482_v44, %v2514_v15 }
 0x278   : > { %2813 = vmatpush1.msra.mxu1 %v4228_v40  ;;  %3990 = vxpose.xlu0.b32.cont [3/16] %v3989_v10, 128  ;;  %v4234_v33 = vpop.eup %4233  ;;  %v2484_v10 = vunpack.c.l.bf16 %v5525_v16  ;;  %v6714_v40 = vld [vmem:[#allocation22_spill] sm:$0xff] }
 0x279   : > { %v5513_v46 = vadd.f32 %v1709_v59, %v1384_v57  ;;  %v5515_v20 = vpop.f32.mrf.mxu0  ;;  %2814 = vmatprep.subr.mxu1 %v6691_v30  ;;  %3897 = vxpose.xlu1.b32.cont [13/16] %v6710_v41, 128  ;;  %v4236_v8 = vpop.eup %4235  ;;  %v1382_v35 = vmul.f32 %v5545_v60, %v6714_v40  ;;  %v5552_v57 = vld [vmem:[%s6598_s5 + $0x1] ss:$0 sm:$0xff]  ;;  %v2518_v41 = vunpack.c.l.bf16 %v5538_v18  ;;  %v5571_v40 = vld [vmem:[%s4456_s16 + $0x138] sm:$0xff] }
 0x27a   : > { %v5519_v45 = vpop.permute.xlu0 %1575  ;;  %2815 = vmatpush1.msra.mxu1 %v4230_v53  ;;  %v2486_v53 = vunpack.c.l.bf16 %v5535_v58  ;;  %v1694_v26 = vmul.f32 %v5552_v57, %v5314_v11 }
 0x27b   : > { %6709 = vst [vmem:[#allocation51_spill] sm:$0xff] %v5513_v46  ;;  %6711 = vst [vmem:[#allocation26_spill] sm:$0xff] %v5519_v45  ;;  %v2053_v7 = vpop.f32.mrf.mxu0  ;;  %2816 = vmatprep.subr.mxu1 %v6691_v30  ;;  %v6727_v45 = vld [vmem:[#allocation11_spill] sm:$0xff] }
 0x27c   : > { %2817 = vmatpush1.msra.mxu1 %v4232_v22  ;;  %3992 = vxpose.xlu0.b32.cont [4/16] %v3991_v38, 128  ;;  %v4238_v22 = vpop.eup %4237  ;;  %v5558_v38 = vpop.permute.xlu1 %1623  ;;  %v6717_v7 = vld [vmem:[#allocation61_spill] sm:$0xff] }
 0x27d   : > { %v5530_v4 = vpop.f32.mrf.mxu0  ;;  %2818 = vmatprep.subr.mxu1 %v6691_v30  ;;  %3899 = vxpose.xlu1.b32.cont [14/16] %v6712_v13, 128  ;;  %6715 = vst [vmem:[#allocation50_spill] sm:$0xff] %v5558_v38  ;;  %v2507_v13 = vunpack.c.h.bf16 %v5437_v0  ;;  %6736 = vst [vmem:[#allocation61_spill] sm:$0xff] %v5661_v24 }
 0x27e   : > { %v1572_v47 = vpop.permute.xlu0 %1571  ;;  %2819 = vmatpush1.msra.mxu1 %v4234_v33  ;;  %v2475_v33 = vunpack.c.h.bf16 %v5434_v62 }
 0x27f   : > { %v1707_v59 = vmul.f32 %v5552_v57, %v1572_v47  ;;  %v2058_v12 = vpop.f32.mrf.mxu0  ;;  %2820 = vmatprep.subr.mxu1 %v6691_v30  ;;  %v3995_v47 = vpack.i.bf16 %v2484_v10, %v2516_v50  ;;  %v5585_v10 = vld [vmem:[%s4456_s16 + $0x140] sm:$0xff] }
 0x280   : > { %2821 = vmatpush1.msra.mxu1 %v4236_v8  ;;  %3994 = vxpose.xlu0.b32.cont [5/16] %v3993_v61, 128  ;;  %v5575_v12 = vld [vmem:[%s4456_s16 + $0x1b8] sm:$0xff]  ;;  %v2488_v61 = vunpack.c.l.bf16 %v5571_v40  ;;  %v4097_v50 = vpack.i.bf16 %v2475_v33, %v2507_v13  ;;  %v5602_v33 = vmul.f32 %v5545_v60, %v6722_v51  ;;  %v6723_v13 = vld [vmem:[#allocation8_spill] sm:$0xff] }
 0x281   : > { %v5560_v44 = vadd.f32 %v1707_v59, %v1382_v35  ;;  %v5562_v15 = vpop.f32.mrf.mxu0  ;;  %2822 = vmatprep.subr.mxu1 %v6691_v30  ;;  %3901 = vxpose.xlu1.b32.cont [15/16] %v6717_v7, 128  ;;  %v4240_v35 = vpop.eup %4239  ;;  %v3997_v7 = vpack.i.bf16 %v2486_v53, %v2518_v41  ;;  %v2520_v41 = vunpack.c.l.bf16 %v5575_v12 }
 0x282   : > { %v5568_v8 = vpop.permute.xlu0 %1567  ;;  %2823 = vmatpush1.msra.mxu1 %v4238_v22  ;;  %v2477_v22 = vunpack.c.h.bf16 %v5453_v42 }
 0x283   : > { %6716 = vst [vmem:[#allocation54_spill] sm:$0xff] %v5560_v44  ;;  %6718 = vst [vmem:[#allocation42_spill] sm:$0xff] %v5568_v8  ;;  %v2063_v59 = vpop.f32.mrf.mxu0  ;;  %2824 = vmatprep.subr.mxu1 %v6691_v30  ;;  %v6724_v44 = vld [vmem:[#allocation9_spill] sm:$0xff]  ;;  %v3999_v32 = vpack.i.bf16 %v2488_v61, %v2520_v41  ;;  %v6732_v41 = vld [vmem:[#allocation16_spill] sm:$0xff] }
 0x284   : > { %2825 = vmatpush1.msra.mxu1 %v4240_v35  ;;  %v2509_v59 = vunpack.c.h.bf16 %v5456_v25  ;;  %3996 = vxpose.xlu0.b32.cont [6/16] %v3995_v47, 128  ;;  %v5594_v35 = vld [vmem:[%s4456_s16 + $0x1c0] sm:$0xff]  ;;  %v5606_v25 = vmul.f32 %v5545_v60, %v6723_v13  ;;  %v5610_v47 = vmul.f32 %v5545_v60, %v6724_v44  ;;  %v2479_v44 = vunpack.c.h.bf16 %v5471_v36 }
 0x285   : > { %v5577_v62 = vpop.f32.mrf.mxu0  ;;  %2826 = vmatprep.subr.mxu1 %v6691_v30  ;;  %3903 = vxpose.xlu1.b32.end [16/16] %v5287_v29, 128  ;;  %v5581_v0 = vpop.trf.xlu1  ;;  %v6721_v29 = vld [vmem:[#allocation6_spill] sm:$0xff]  ;;  %v1696_v36 = vmul.f32 %v5552_v57, %v5303_v21  ;;  %v5648_v27 = vmul.f32 %v5545_v60, %v6732_v41  ;;  %v2481_v41 = vunpack.c.h.bf16 %v5492_v6  ;;  %v6739_v6 = vld [vmem:[#allocation43_spill] sm:$0xff] }
 0x286   : > { %6719 = vst [vmem:[#allocation56_spill] sm:$0xff] %v5581_v0  ;;  %v5589_v39 = vpop.permute.xlu0 %1563  ;;  %v3793_v53 = vunpack.i.l.bf16 %v5581_v0  ;;  %v5598_v38 = vmul.f32 %v5545_v60, %v6721_v29  ;;  %v2490_v29 = vunpack.c.l.bf16 %v5585_v10  ;;  %v4099_v13 = vpack.i.bf16 %v2477_v22, %v2509_v59  ;;  %v5640_v59 = vld [vmem:[%s4456_s16 + $0x1c8] sm:$0xff]  ;;  %v6734_v21 = vld [vmem:[#allocation38_spill] sm:$0xff] }
 0x287   : > { %6720 = vst [vmem:[#allocation24_spill] sm:$0xff] %v5589_v39  ;;  %v2068_v42 = vpop.f32.mrf.mxu0  ;;  %v6725_v39 = vld [vmem:[#allocation10_spill] sm:$0xff]  ;;  %v1832_v11 = vadd.f32 %v5189_v17, %v6734_v21  ;;  %v4101_v1 = vpack.i.bf16 %v2479_v44, %v2511_v52  ;;  %v2524_v21 = vunpack.c.l.bf16 %v5640_v59  ;;  %v5677_v52 = vld [vmem:[%s6599_s6] ss:$0 sm:$0xff]  ;;  %v2494_v44 = vunpack.c.l.bf16 %v5661_v24  ;;  %v5707_v24 = vld [vmem:[%s4456_s16 + $0x1d8] sm:$0xff] }
 0x288   : > { %v5614_v46 = vmul.f32 %v5545_v60, %v6725_v39  ;;  %2858 = vmatprep.mubr.f32.mxu1 %v3793_v53  ;;  %v2522_v42 = vunpack.c.l.bf16 %v5594_v35  ;;  %v1367_v39 = vmul.f32 %v5545_v60, %v6727_v45  ;;  %3998 = vxpose.xlu0.b32.cont [7/16] %v3997_v7, 128  ;;  %v5637_v45 = vld [vmem:[%s4456_s16 + $0x148] sm:$0xff]  ;;  %v6731_v7 = vld [vmem:[#allocation14_spill] sm:$0xff]  ;;  %v5681_v43 = vadd.f32 %v5677_v52, %v6739_v6  ;;  %v5696_v6 = vld [vmem:[%s4456_s16 + $0x158] sm:$0xff] }
 0x289   : > { %v5617_v8 = vpop.f32.mrf.mxu0  ;;  %v5619_v51 = vpop.trf.xlu1  ;;  %4098 = vxpose.xlu1.b32.start [1/16] %v4097_v50, 128  ;;  %v5644_v61 = vmul.f32 %v5545_v60, %v6731_v7  ;;  %v5664_v7 = vld [vmem:[%s4456_s16 + $0x1d0] sm:$0xff] }
 0x28a   : > { %6726 = vst [vmem:[#allocation58_spill] sm:$0xff] %v5619_v51  ;;  %v5626_v53 = vpop.permute.xlu0 %1559  ;;  %v6730_v51 = vld [vmem:[#allocation13_spill] sm:$0xff]  ;;  %v4001_v28 = vpack.i.bf16 %v2490_v29, %v2522_v42  ;;  %6737 = vst [vmem:[#allocation6_spill] sm:$0xff] %v5664_v7  ;;  %v1758_v29 = vadd.f32 %v1694_v26, %v1369_v31  ;;  %v1692_v42 = vmul.f32 %v5552_v57, %v5329_v48  ;;  %v2526_v48 = vunpack.c.l.bf16 %v5664_v7 }
 0x28b   : > { %6728 = vst [vmem:[#allocation59_spill] sm:$0xff] %v5626_v53  ;;  %v1371_v50 = vmul.f32 %v5545_v60, %v6730_v51  ;;  %v2073_v22 = vpop.f32.mrf.mxu0  ;;  %v6733_v51 = vld [vmem:[#allocation40_spill] sm:$0xff]  ;;  %v1688_v31 = vmul.f32 %v5552_v57, %v5363_v49  ;;  %v2515_v49 = vunpack.c.h.bf16 %v5511_v5  ;;  %v5702_v60 = vadd.f32 %v5677_v52, %v6742_v2 }
 0x28c   : > { %v5652_v53 = vadd.f32 %v5189_v17, %v6733_v51  ;;  %4000 = vxpose.xlu0.b32.cont [8/16] %v3999_v32, 128  ;;  %v2492_v17 = vunpack.c.l.bf16 %v5637_v45  ;;  %v4005_v23 = vpack.i.bf16 %v2494_v44, %v2526_v48  ;;  %v1686_v44 = vmul.f32 %v5552_v57, %v5380_v3 }
 0x28d   : > { %v5656_v22 = vpop.f32.mrf.mxu0  ;;  %v5658_v0 = vpop.trf.xlu1  ;;  %4100 = vxpose.xlu1.b32.cont [2/16] %v4099_v13, 128  ;;  %v1690_v13 = vmul.f32 %v5552_v57, %v5343_v9  ;;  %v2483_v9 = vunpack.c.h.bf16 %v5508_v56  ;;  %v1752_v2 = vadd.f32 %v1688_v31, %v5610_v47  ;;  %v1684_v48 = vmul.f32 %v5552_v57, %v5400_v37  ;;  %v5744_v37 = vld [vmem:[%s4456_s16 + $0x168] sm:$0xff] }
 0x28e   : > { %6735 = vst [vmem:[#allocation22_spill] sm:$0xff] %v5658_v0  ;;  %v5668_v51 = vpop.permute.xlu0 %1555  ;;  %v1760_v0 = vadd.f32 %v1696_v36, %v1371_v50  ;;  %v6740_v50 = vld [vmem:[#allocation46_spill] sm:$0xff] }
 0x28f   : > { %6738 = vst [vmem:[#allocation7_spill] sm:$0xff] %v5668_v51  ;;  %v2078_v32 = vpop.f32.mrf.mxu0  ;;  %v5691_v36 = vadd.f32 %v5677_v52, %v6740_v50  ;;  %v4003_v50 = vpack.i.bf16 %v2492_v17, %v2524_v21  ;;  %v5719_v17 = vld [vmem:[%s4456_s16 + $0x160] sm:$0xff] }
 0x290   : > { %v4103_v32 = vpack.i.bf16 %v2481_v41, %v2513_v19  ;;  %4002 = vxpose.xlu0.b32.cont [9/16] %v4001_v28, 128  ;;  %v1829_v19 = vadd.f32 %v5677_v52, %v1758_v29  ;;  %v1831_v56 = vadd.f32 %v5677_v52, %v1760_v0  ;;  %v1754_v41 = vadd.f32 %v1690_v13, %v5614_v46  ;;  %v5722_v21 = vld [vmem:[%s4456_s16 + $0x1e0] sm:$0xff] }
 0x291   : > { %v2081_v26 = vpop.f32.mrf.mxu0  ;;  %v5693_v51 = vpop.trf.xlu1  ;;  %4102 = vxpose.xlu1.b32.cont [3/16] %v4101_v1, 128  ;;  %v5711_v1 = vadd.f32 %v5677_v52, %v6744_v34  ;;  %v2496_v28 = vunpack.c.l.bf16 %v5696_v6  ;;  %v2528_v34 = vunpack.c.l.bf16 %v5707_v24  ;;  %v4105_v29 = vpack.i.bf16 %v2483_v9, %v2515_v49 }
 0x292   : > { %6741 = vst [vmem:[#allocation8_spill] sm:$0xff] %v5693_v51  ;;  %v5704_v7 = vpop.permute.xlu0 %1551  ;;  %v1756_v51 = vadd.f32 %v1692_v42, %v1367_v39  ;;  %v2485_v0 = vunpack.c.h.bf16 %v5525_v16  ;;  %v2517_v46 = vunpack.c.h.bf16 %v5528_v55  ;;  %v2082_v13 = vadd.f32 %v2081_v26, %v1831_v56 }
 0x293   : > { %6743 = vst [vmem:[#allocation9_spill] sm:$0xff] %v5704_v7  ;;  %v2083_v5 = vpop.f32.mrf.mxu0  ;;  %v2498_v7 = vunpack.c.l.bf16 %v5719_v17  ;;  %v1825_v16 = vadd.f32 %v5677_v52, %v1754_v41  ;;  %v4007_v9 = vpack.i.bf16 %v2496_v28, %v2528_v34  ;;  %v2519_v56 = vunpack.c.h.bf16 %v5538_v18 }
 0x294   : > { %4004 = vxpose.xlu0.b32.cont [10/16] %v4003_v50, 128  ;;  %v1827_v55 = vadd.f32 %v5677_v52, %v1756_v51  ;;  %v4107_v49 = vpack.i.bf16 %v2485_v0, %v2517_v46  ;;  %v2487_v50 = vunpack.c.h.bf16 %v5535_v58  ;;  %v2072_v51 = vadd.f32 %v5617_v8, %v1829_v19  ;;  %v5766_v19 = vld [vmem:[%s4456_s16 + $0x170] sm:$0xff] }
 0x295   : > { %v2086_v39 = vpop.f32.mrf.mxu0  ;;  %v5724_v42 = vpop.trf.xlu1  ;;  %4104 = vxpose.xlu1.b32.cont [4/16] %v4103_v32, 128  ;;  %v2530_v32 = vunpack.c.l.bf16 %v5722_v21  ;;  %v5758_v28 = vadd.f32 %v1684_v48, %v5602_v33  ;;  %v1823_v58 = vadd.f32 %v5677_v52, %v1752_v2  ;;  %v2067_v18 = vadd.f32 %v5577_v62, %v5681_v43  ;;  %v5772_v0 = vld [vmem:[%s4456_s16 + $0x1f0] sm:$0xff] }
 0x296   : > { %v2087_v47 = vadd.f32 %v2086_v39, %v1832_v11  ;;  %v1548_v31 = vpop.permute.xlu0 %1547  ;;  %v2077_v11 = vadd.f32 %v5656_v22, %v5652_v53  ;;  %v5752_v53 = vld [vmem:[%s4456_s16 + $0x1e8] sm:$0xff]  ;;  %v5755_v22 = vadd.f32 %v1686_v44, %v5606_v25  ;;  %v4109_v2 = vpack.i.bf16 %v2487_v50, %v2519_v56  ;;  %v5803_v50 = vld [vmem:[%s4456_s16 + $0x1f8] sm:$0xff] }
 0x297   : > { %v2088_v5 = vpop.f32.mrf.mxu0  ;;  %v4009_v34 = vpack.i.bf16 %v2498_v7, %v2530_v32  ;;  %v1701_v8 = vmul.f32 %v5552_v57, %v1548_v31  ;;  %v2532_v33 = vunpack.c.l.bf16 %v5752_v53  ;;  %v2489_v7 = vunpack.c.h.bf16 %v5571_v40 }
 0x298   : > { %4241 = vtanh.f32 %v2087_v47  ;;  %4006 = vxpose.xlu0.b32.cont [11/16] %v4005_v23, 128  ;;  %v2500_v23 = vunpack.c.l.bf16 %v5744_v37  ;;  %v2521_v62 = vunpack.c.h.bf16 %v5575_v12  ;;  %v2062_v43 = vadd.f32 %v5562_v15, %v1827_v55 }
 0x299   : > { %v5739_v26 = vpop.f32.mrf.mxu0  ;;  %v5741_v3 = vpop.trf.xlu1  ;;  %4106 = vxpose.xlu1.b32.cont [5/16] %v4105_v29, 128  ;;  %4243 = vtanh.f32 %v2082_v13  ;;  %v1682_v13 = vmul.f32 %v5552_v57, %v5413_v63  ;;  %v2052_v47 = vadd.f32 %v5515_v20, %v1825_v16  ;;  %v2502_v48 = vunpack.c.l.bf16 %v5766_v19  ;;  %v5792_v20 = vld [vmem:[%s4456_s16 + $0x178] sm:$0xff] }
 0x29a   : > { %v5749_v41 = vpop.permute.xlu0 %1543  ;;  %4245 = vtanh.f32 %v2077_v11  ;;  %v2057_v40 = vadd.f32 %v5530_v4, %v5691_v36  ;;  %v1765_v15 = vadd.f32 %v1701_v8, %v5648_v27  ;;  %v2534_v12 = vunpack.c.l.bf16 %v5772_v0 }
 0x29b   : > { %v2093_v39 = vpop.f32.mrf.mxu0  ;;  %4247 = vtanh.f32 %v2072_v51  ;;  %v4111_v16 = vpack.i.bf16 %v2489_v7, %v2521_v62  ;;  %v2491_v55 = vunpack.c.h.bf16 %v5585_v10  ;;  %v2523_v4 = vunpack.c.h.bf16 %v5594_v35  ;;  %v6746_v7 = vld [vmem:[#allocation55_spill] sm:$0xff] }
 0x29c   : > { %4008 = vxpose.xlu0.b32.cont [12/16] %v4007_v9, 128  ;;  %4249 = vtanh.f32 %v2067_v18  ;;  %v4011_v27 = vpack.i.bf16 %v2500_v23, %v2532_v33  ;;  %v2047_v11 = vadd.f32 %v5497_v14, %v5702_v60  ;;  %v1836_v10 = vadd.f32 %v5677_v52, %v1765_v15 }
 0x29d   : > { %v2096_v29 = vpop.f32.mrf.mxu0  ;;  %v5768_v25 = vpop.trf.xlu1  ;;  %4108 = vxpose.xlu1.b32.cont [6/16] %v4107_v49, 128  ;;  %4251 = vtanh.f32 %v2062_v43  ;;  %v4013_v35 = vpack.i.bf16 %v2502_v48, %v2534_v12  ;;  %v2504_v56 = vunpack.c.l.bf16 %v5792_v20  ;;  %v4113_v14 = vpack.i.bf16 %v2491_v55, %v2523_v4  ;;  %v6748_v48 = vld [vmem:[#allocation61_spill] sm:$0xff] }
 0x29e   : > { %v1540_v46 = vpop.permute.xlu0 %1539  ;;  %4253 = vtanh.f32 %v2052_v47  ;;  %v2493_v60 = vunpack.c.h.bf16 %v5637_v45  ;;  %v2536_v23 = vunpack.c.l.bf16 %v5803_v50  ;;  %v1819_v45 = vadd.f32 %v5677_v52, %v5758_v28  ;;  %v6750_v12 = vld [vmem:[#allocation57_spill] sm:$0xff] }
 0x29f   : > { %v1699_v31 = vmul.f32 %v5552_v57, %v1540_v46  ;;  %v2098_v44 = vpop.f32.mrf.mxu0  ;;  %4255 = vtanh.f32 %v2057_v40  ;;  %v2037_v62 = vadd.f32 %v6746_v7, %v5711_v1  ;;  %v6747_v46 = vld [vmem:[#allocation5_spill] sm:$0xff]  ;;  %v2495_v28 = vunpack.c.h.bf16 %v6748_v48  ;;  %v6749_v40 = vld [vmem:[#allocation6_spill] sm:$0xff] }
 0x2a0   : > { %4010 = vxpose.xlu0.b32.cont [13/16] %v4009_v34, 128  ;;  %4257 = vtanh.f32 %v2047_v11  ;;  %v4015_v1 = vpack.i.bf16 %v2504_v56, %v2536_v23  ;;  %v2497_v56 = vunpack.c.h.bf16 %v5696_v6  ;;  %v6756_v7 = vld [vmem:[#allocation66_spill] sm:$0xff] }
 0x2a1   : > { %v1763_v5 = vadd.f32 %v1699_v31, %v5644_v61  ;;  %v5787_v32 = vpop.f32.mrf.mxu0  ;;  %v5789_v63 = vpop.trf.xlu1  ;;  %4110 = vxpose.xlu1.b32.cont [7/16] %v4109_v2, 128  ;;  %v2042_v61 = vadd.f32 %v5481_v54, %v1823_v58  ;;  %v2525_v58 = vunpack.c.h.bf16 %v5640_v59  ;;  %v1746_v59 = vadd.f32 %v1682_v13, %v5598_v38 }
 0x2a2   : > { %v5796_v36 = vpop.permute.xlu0 %1535  ;;  %v2527_v38 = vunpack.c.h.bf16 %v6749_v40 }
 0x2a3   : > { %v1834_v9 = vadd.f32 %v5677_v52, %v1763_v5  ;;  %v2103_v49 = vpop.f32.mrf.mxu0  ;;  %v4115_v44 = vpack.i.bf16 %v2493_v60, %v2525_v58  ;;  %4259 = vtanh.f32 %v2042_v61  ;;  %v6751_v5 = vld [vmem:[#allocation45_spill] sm:$0xff] }
 0x2a4   : > { %4012 = vxpose.xlu0.b32.cont [14/16] %v4011_v27, 128  ;;  %v6752_v27 = vld [vmem:[#allocation69_spill] sm:$0xff]  ;;  %4261 = vtanh.f32 %v2037_v62 }
 0x2a5   : > { %v4242_v51 = vpop.eup %4241  ;;  %v5807_v39 = vadd.f32 %v2096_v29, %v1834_v9  ;;  %v2106_v34 = vpop.f32.mrf.mxu0  ;;  %4112 = vxpose.xlu1.b32.cont [8/16] %v4111_v16, 128  ;;  %v1821_v29 = vadd.f32 %v5677_v52, %v5755_v22  ;;  %v1403_v16 = vmul.f32 %v6751_v5, %v6750_v12  ;;  %v2022_v11 = vadd.f32 %v6752_v27, %v1819_v45 }
 0x2a6   : > { %v5809_v54 = vpop.trf.xlu1  ;;  %v5813_v18 = vadd.f32 %v2106_v34, %v1836_v10  ;;  %v5815_v8 = vpop.permute.xlu0 %1659  ;;  %2827 = vmatpush2.msra.mxu1 %v4242_v51  ;;  %v2529_v51 = vunpack.c.h.bf16 %v5707_v24  ;;  %v1817_v34 = vadd.f32 %v5677_v52, %v1746_v59  ;;  %v2499_v45 = vunpack.c.h.bf16 %v5719_v17 }
 0x2a7   : > { %6745 = vst [vmem:[#allocation10_spill] sm:$0xff] %v5815_v8  ;;  %v4244_v33 = vpop.eup %4243  ;;  %v2108_v2 = vpop.f32.mrf.mxu0  ;;  %2828 = vmatprep.subr.mxu1 %v6691_v30  ;;  %v2032_v47 = vadd.f32 %v6747_v46, %v1821_v29  ;;  %v2531_v59 = vunpack.c.h.bf16 %v5722_v21  ;;  %v6757_v46 = vld [vmem:[#allocation62_spill] sm:$0xff]  ;;  %v6790_v8 = vld [vmem:[#allocation53_spill] sm:$0xff] }
 0x2a8   : > { %2829 = vmatpush2.msra.mxu1 %v4244_v33  ;;  %v4246_v43 = vpop.eup %4245  ;;  %4014 = vxpose.xlu0.b32.cont [15/16] %v4013_v35, 128  ;;  %v4117_v35 = vpack.i.bf16 %v2495_v28, %v2527_v38  ;;  %v6755_v33 = vld [vmem:[#allocation36_spill] sm:$0xff]  ;;  %v4119_v6 = vpack.i.bf16 %v2497_v56, %v2529_v51  ;;  %v2012_v62 = vadd.f32 %v6756_v7, %v1817_v34  ;;  %v2503_v51 = vunpack.c.h.bf16 %v5766_v19 }
 0x2a9   : > { %v5827_v31 = vpop.f32.mrf.mxu0  ;;  %2830 = vmatprep.subr.mxu1 %v6691_v30  ;;  %4114 = vxpose.xlu1.b32.cont [9/16] %v4113_v14, 128  ;;  %v4248_v15 = vpop.eup %4247  ;;  %4263 = vtanh.f32 %v2032_v47  ;;  %v1400_v47 = vmul.f32 %v6751_v5, %v6757_v46  ;;  %v6758_v28 = vld [vmem:[#allocation68_spill] sm:$0xff]  ;;  %v2535_v34 = vunpack.c.h.bf16 %v5772_v0  ;;  %v2537_v46 = vunpack.c.h.bf16 %v5803_v50 }
 0x2aa   : > { %v5830_v22 = vpop.trf.xlu1  ;;  %v1656_v13 = vpop.permute.xlu0 %1655  ;;  %2831 = vmatpush2.msra.mxu1 %v4246_v43  ;;  %4265 = vtanh.f32 %v6755_v33 }
 0x2ab   : > { %v1728_v55 = vmul.f32 %v5552_v57, %v1656_v13  ;;  %v2113_v4 = vpop.f32.mrf.mxu0  ;;  %2832 = vmatprep.subr.mxu1 %v6691_v30  ;;  %v4250_v9 = vpop.eup %4249  ;;  %4267 = vtanh.f32 %v2022_v11  ;;  %v4121_v13 = vpack.i.bf16 %v2499_v45, %v2531_v59  ;;  %v4125_v0 = vpack.i.bf16 %v2503_v51, %v2535_v34 }
 0x2ac   : > { %2833 = vmatpush2.msra.mxu1 %v4248_v15  ;;  %4016 = vxpose.xlu0.b32.end [16/16] %v4015_v1, 128  ;;  %v4252_v60 = vpop.eup %4251  ;;  %4269 = vtanh.f32 %v6758_v28  ;;  %v2501_v1 = vunpack.c.h.bf16 %v5744_v37  ;;  %v2533_v15 = vunpack.c.h.bf16 %v5752_v53 }
 0x2ad   : > { %v5839_v49 = vadd.f32 %v1728_v55, %v1403_v16  ;;  %v5841_v61 = vpop.f32.mrf.mxu0  ;;  %2834 = vmatprep.subr.mxu1 %v6691_v30  ;;  %4116 = vxpose.xlu1.b32.cont [10/16] %v4115_v44, 128  ;;  %v4254_v23 = vpop.eup %4253  ;;  %4271 = vtanh.f32 %v2012_v62  ;;  %v6760_v55 = vld [vmem:[#allocation65_spill] sm:$0xff] }
 0x2ae   : > { %v5844_v10 = vpop.trf.xlu1  ;;  %v5849_v14 = vpop.permute.xlu0 %1651  ;;  %2835 = vmatpush2.msra.mxu1 %v4250_v9  ;;  %v1397_v4 = vmul.f32 %v6751_v5, %v6760_v55  ;;  %v4123_v53 = vpack.i.bf16 %v2501_v1, %v2533_v15  ;;  %v6766_v55 = vld [vmem:[#allocation58_spill] sm:$0xff] }
 0x2af   : > { %6753 = vst [vmem:[#allocation11_spill] sm:$0xff] %v5839_v49  ;;  %6754 = vst [vmem:[#allocation12_spill] sm:$0xff] %v5849_v14  ;;  %v2118_v58 = vpop.f32.mrf.mxu0  ;;  %2836 = vmatprep.subr.mxu1 %v6691_v30  ;;  %v4256_v29 = vpop.eup %4255 }
 0x2b0   : > { %2837 = vmatpush2.msra.mxu1 %v4252_v60  ;;  %v4258_v40 = vpop.eup %4257 }
 0x2b1   : > { %v5853_v2 = vpop.f32.mrf.mxu0  ;;  %2838 = vmatprep.subr.mxu1 %v6691_v30  ;;  %4118 = vxpose.xlu1.b32.cont [11/16] %v4117_v35, 128  ;;  %v4260_v16 = vpop.eup %4259 }
 0x2b2   : > { %v5856_v24 = vpop.trf.xlu1  ;;  %v1644_v43 = vpop.permute.xlu0 %1643  ;;  %2839 = vmatpush2.msra.mxu1 %v4256_v29 }
 0x2b3   : > { %v1725_v44 = vmul.f32 %v5552_v57, %v1644_v43  ;;  %v2123_v48 = vpop.f32.mrf.mxu0  ;;  %2840 = vmatprep.subr.mxu1 %v6691_v30  ;;  %v4262_v9 = vpop.eup %4261  ;;  %v2505_v43 = vunpack.c.h.bf16 %v5792_v20  ;;  %v6765_v20 = vld [vmem:[#allocation56_spill] sm:$0xff] }
 0x2b4   : > { %2841 = vmatpush2.msra.mxu1 %v4254_v23  ;;  %v6762_v23 = vld [vmem:[#allocation35_spill] sm:$0xff] }
 0x2b5   : > { %v5866_v17 = vadd.f32 %v1725_v44, %v1400_v47  ;;  %v5868_v21 = vpop.f32.mrf.mxu0  ;;  %2842 = vmatprep.subr.mxu1 %v6691_v30  ;;  %4120 = vxpose.xlu1.b32.cont [12/16] %v4119_v6, 128  ;;  %v1394_v33 = vmul.f32 %v6751_v5, %v6762_v23  ;;  %v6764_v44 = vld [vmem:[#allocation37_spill] sm:$0xff]  ;;  %v3801_v23 = vunpack.i.h.bf16 %v6766_v55 }
 0x2b6   : > { %v5871_v38 = vpop.trf.xlu1  ;;  %v1632_v12 = vpop.permute.xlu0 %1631  ;;  %2843 = vmatpush2.msra.mxu1 %v4258_v40  ;;  %v1393_v48 = vmul.f32 %v6751_v5, %v6764_v44 }
 0x2b7   : > { %6759 = vst [vmem:[#allocation13_spill] sm:$0xff] %v5866_v17  ;;  %v1722_v27 = vmul.f32 %v5552_v57, %v1632_v12  ;;  %v2128_v11 = vpop.f32.mrf.mxu0  ;;  %2844 = vmatprep.subr.mxu1 %v6691_v30  ;;  %v4264_v58 = vpop.eup %4263  ;;  %v3796_v12 = vunpack.i.h.bf16 %v6765_v20  ;;  %v6783_v17 = vld [vmem:[#allocation17_spill] sm:$0xff] }
 0x2b8   : > { %2845 = vmatpush2.msra.mxu1 %v4260_v16  ;;  %v4266_v45 = vpop.eup %4265 }
 0x2b9   : > { %v5879_v35 = vadd.f32 %v1722_v27, %v1397_v4  ;;  %v5881_v56 = vpop.f32.mrf.mxu0  ;;  %2846 = vmatprep.subr.mxu1 %v6691_v30  ;;  %4122 = vxpose.xlu1.b32.cont [13/16] %v4121_v13, 128  ;;  %v4268_v47 = vpop.eup %4267  ;;  %v3798_v4 = vunpack.i.l.bf16 %v6766_v55  ;;  %v4127_v27 = vpack.i.bf16 %v2505_v43, %v2537_v46 }
 0x2ba   : > { %v5884_v37 = vpop.trf.xlu1  ;;  %v1620_v60 = vpop.permute.xlu0 %1619  ;;  %2847 = vmatpush2.msra.mxu1 %v4262_v9  ;;  %v6767_v9 = vld [vmem:[#allocation39_spill] sm:$0xff] }
 0x2bb   : > { %6761 = vst [vmem:[#allocation14_spill] sm:$0xff] %v5879_v35  ;;  %v1719_v29 = vmul.f32 %v5552_v57, %v1620_v60  ;;  %v2133_v6 = vpop.f32.mrf.mxu0  ;;  %2848 = vmatprep.subr.mxu1 %v6691_v30  ;;  %v4270_v13 = vpop.eup %4269 }
 0x2bc   : > { %2849 = vmatpush2.msra.mxu1 %v4264_v58  ;;  %v4272_v11 = vpop.eup %4271  ;;  %v6769_v6 = vld [vmem:[#allocation22_spill] sm:$0xff] }
 0x2bd   : > { %v5892_v59 = vadd.f32 %v1719_v29, %v1394_v33  ;;  %v5894_v7 = vpop.f32.mrf.mxu0  ;;  %2850 = vmatprep.subr.mxu1 %v6691_v30  ;;  %4124 = vxpose.xlu1.b32.cont [14/16] %v4123_v53, 128  ;;  %v1392_v53 = vmul.f32 %v6751_v5, %v6767_v9  ;;  %v6775_v9 = vld [vmem:[#allocation4_spill] sm:$0xff] }
 0x2be   : > { %v5897_v19 = vpop.trf.xlu1  ;;  %v1616_v62 = vpop.permute.xlu0 %1615  ;;  %2851 = vmatpush2.msra.mxu1 %v4266_v45  ;;  %v3803_v45 = vunpack.i.l.bf16 %v6769_v6 }
 0x2bf   : > { %6763 = vst [vmem:[#allocation16_spill] sm:$0xff] %v5892_v59  ;;  %v1718_v28 = vmul.f32 %v5552_v57, %v1616_v62  ;;  %v2138_v40 = vpop.f32.mrf.mxu0  ;;  %2852 = vmatprep.subr.mxu1 %v6691_v30 }
 0x2c0   : > { %2853 = vmatpush2.msra.mxu1 %v4268_v47 }
 0x2c1   : > { %v5905_v1 = vadd.f32 %v1718_v28, %v1393_v48  ;;  %v5907_v15 = vpop.f32.mrf.mxu0  ;;  %2854 = vmatprep.subr.mxu1 %v6691_v30  ;;  %4126 = vxpose.xlu1.b32.cont [15/16] %v4125_v0, 128  ;;  %v6770_v0 = vld [vmem:[#allocation41_spill] sm:$0xff]  ;;  %v3806_v48 = vunpack.i.h.bf16 %v6769_v6 }
 0x2c2   : > { %v5911_v50 = vpop.trf.xlu1  ;;  %v1612_v16 = vpop.permute.xlu0 %1611  ;;  %2855 = vmatpush2.msra.mxu1 %v4270_v13  ;;  %v1391_v62 = vmul.f32 %v6751_v5, %v6770_v0  ;;  %v6772_v13 = vld [vmem:[#allocation8_spill] sm:$0xff]  ;;  %v6778_v0 = vld [vmem:[#allocation29_spill] sm:$0xff] }
 0x2c3   : > { %v1717_v51 = vmul.f32 %v5552_v57, %v1612_v16  ;;  %v2143_v34 = vpop.f32.mrf.mxu0  ;;  %2856 = vmatprep.subr.mxu1 %v6691_v30  ;;  %v3808_v20 = vunpack.i.l.bf16 %v6772_v13  ;;  %v3811_v6 = vunpack.i.h.bf16 %v6772_v13 }
 0x2c4   : > { %2857 = vmatpush2.msra.mxu1 %v4272_v11 }
 0x2c5   : > { %v5918_v60 = vadd.f32 %v1717_v51, %v1392_v53  ;;  %v5920_v58 = vpop.f32.mrf.mxu0  ;;  %2859 = vmatmul.mubr.f32.vlgmr.msra.gmra.mxu1 %v3796_v12  ;;  %3019 = vmatprep.subr.mxu1 %v6691_v30  ;;  %v6773_v12 = vld [vmem:[#allocation44_spill] sm:$0xff]  ;;  %v1712_v53 = vmul.f32 %v5552_v57, %v6775_v9  ;;  %v6781_v9 = vld [vmem:[#allocation27_spill] sm:$0xff] }
 0x2c6   : > { %v5924_v33 = vpop.trf.xlu1  ;;  %v1608_v29 = vpop.permute.xlu0 %1607  ;;  %2863 = vmatprep.mubr.f32.mxu1 %v3798_v4  ;;  %4128 = vxpose.xlu1.b32.end [16/16] %v4127_v27, 128  ;;  %v1390_v16 = vmul.f32 %v6751_v5, %v6773_v12  ;;  %v6774_v27 = vld [vmem:[#allocation70_spill] sm:$0xff]  ;;  %v6776_v51 = vld [vmem:[#allocation28_spill] sm:$0xff] }
 0x2c7   : > { %6768 = vst [vmem:[#allocation40_spill] sm:$0xff] %v5924_v33  ;;  %v1716_v43 = vmul.f32 %v5552_v57, %v1608_v29  ;;  %v2148_v46 = vpop.f32.mrf.mxu0  ;;  %v1713_v11 = vmul.f32 %v5552_v57, %v6774_v27  ;;  %v1388_v34 = vmul.f32 %v6751_v5, %v6776_v51  ;;  %v1385_v51 = vmul.f32 %v6751_v5, %v6781_v9 }
 0x2c8   : > { %v3813_v46 = vunpack.i.l.bf16 %v5724_v42 }
 0x2c9   : > { %v5930_v47 = vadd.f32 %v1716_v43, %v1391_v62  ;;  %v5932_v44 = vpop.f32.mrf.mxu0  ;;  %2864 = vmatmul.mubr.f32.gmra.mxu1 %v3801_v23  ;;  %v1387_v62 = vmul.f32 %v6751_v5, %v6778_v0  ;;  %v1777_v27 = vadd.f32 %v1713_v11, %v1388_v34 }
 0x2ca   : > { %v5935_v28 = vpop.trf.xlu1  ;;  %v1604_v40 = vpop.permute.xlu0 %1603  ;;  %2868 = vmatprep.mubr.f32.mxu1 %v3803_v45 }
 0x2cb   : > { %6771 = vst [vmem:[#allocation38_spill] sm:$0xff] %v5935_v28  ;;  %v1715_v55 = vmul.f32 %v5552_v57, %v1604_v40  ;;  %v2153_v4 = vpop.f32.mrf.mxu0  ;;  %v6779_v40 = vld [vmem:[#allocation47_spill] sm:$0xff]  ;;  %v1776_v13 = vadd.f32 %v1712_v53, %v1387_v62  ;;  %v6785_v53 = vld [vmem:[#allocation18_spill] sm:$0xff]  ;;  %v1848_v49 = vadd.f32 %v5677_v52, %v1777_v27 }
 0x2cc   : > { %v1389_v12 = vmul.f32 %v6751_v5, %v6779_v40  ;;  %v6780_v4 = vld [vmem:[#allocation48_spill] sm:$0xff]  ;;  %v5967_v40 = vmul.f32 %v6751_v5, %v6783_v17  ;;  %v1378_v34 = vmul.f32 %v6751_v5, %v6785_v53  ;;  %v3821_v53 = vunpack.i.h.bf16 %v5741_v3 }
 0x2cd   : > { %v5947_v23 = vadd.f32 %v1715_v55, %v1390_v16  ;;  %v2156_v29 = vpop.f32.mrf.mxu0  ;;  %2869 = vmatmul.mubr.f32.gmra.mxu1 %v3806_v48  ;;  %v1710_v16 = vmul.f32 %v5552_v57, %v6780_v4  ;;  %v6784_v4 = vld [vmem:[#allocation19_spill] sm:$0xff]  ;;  %v6788_v17 = vld [vmem:[#allocation20_spill] sm:$0xff]  ;;  %v1847_v9 = vadd.f32 %v5677_v52, %v1776_v13 }
 0x2ce   : > { %v5950_v45 = vpop.trf.xlu1  ;;  %v1600_v43 = vpop.permute.xlu0 %1599  ;;  %2873 = vmatprep.mubr.f32.mxu1 %v3808_v20  ;;  %v3816_v20 = vunpack.i.h.bf16 %v5724_v42  ;;  %v5972_v11 = vmul.f32 %v6751_v5, %v6784_v4  ;;  %v6789_v4 = vld [vmem:[#allocation25_spill] sm:$0xff]  ;;  %v6792_v13 = vld [vmem:[#allocation23_spill] sm:$0xff] }
 0x2cf   : > { %6777 = vst [vmem:[#allocation43_spill] sm:$0xff] %v5950_v45  ;;  %v1714_v55 = vmul.f32 %v5552_v57, %v1600_v43  ;;  %v2158_v48 = vpop.f32.mrf.mxu0  ;;  %v3818_v43 = vunpack.i.l.bf16 %v5741_v3  ;;  %v1774_v62 = vadd.f32 %v1710_v16, %v1385_v51  ;;  %v1383_v14 = vmul.f32 %v6751_v5, %v6789_v4  ;;  %v6793_v45 = vld [vmem:[#allocation42_spill] sm:$0xff] }
 0x2d0   : > { %v1846_v16 = vadd.f32 %v5677_v52, %v6790_v8  ;;  %v1381_v27 = vmul.f32 %v6751_v5, %v6792_v13  ;;  %v1706_v4 = vmul.f32 %v5552_v57, %v6793_v45  ;;  %v3828_v45 = vunpack.i.l.bf16 %v5789_v63 }
 0x2d1   : > { %v1778_v59 = vadd.f32 %v1714_v55, %v1389_v12  ;;  %v2161_v0 = vpop.f32.mrf.mxu0  ;;  %2874 = vmatmul.mubr.f32.gmra.mxu1 %v3811_v6  ;;  %v6786_v6 = vld [vmem:[#allocation26_spill] sm:$0xff]  ;;  %v6787_v55 = vld [vmem:[#allocation21_spill] sm:$0xff]  ;;  %v1845_v8 = vadd.f32 %v5677_v52, %v1774_v62 }
 0x2d2   : > { %v5963_v35 = vpop.trf.xlu1  ;;  %2878 = vmatprep.mubr.f32.mxu1 %v3813_v46  ;;  %v1708_v42 = vmul.f32 %v5552_v57, %v6786_v6  ;;  %v1379_v48 = vmul.f32 %v6751_v5, %v6787_v55  ;;  %v1380_v46 = vmul.f32 %v6751_v5, %v6788_v17  ;;  %v3823_v6 = vunpack.i.l.bf16 %v5768_v25 }
 0x2d3   : > { %6782 = vst [vmem:[#allocation46_spill] sm:$0xff] %v5963_v35  ;;  %v2163_v12 = vpop.f32.mrf.mxu0  ;;  %v2162_v55 = vadd.f32 %v2161_v0, %v1847_v9  ;;  %v2157_v33 = vadd.f32 %v2156_v29, %v1846_v16  ;;  %v6795_v0 = vld [vmem:[#allocation24_spill] sm:$0xff]  ;;  %v1770_v29 = vadd.f32 %v1706_v4, %v1381_v27  ;;  %v6797_v9 = vld [vmem:[#allocation7_spill] sm:$0xff]  ;;  %v3831_v27 = vunpack.i.h.bf16 %v5789_v63 }
 0x2d4   : > { %v1772_v35 = vadd.f32 %v1708_v42, %v1383_v14  ;;  %v3826_v14 = vunpack.i.h.bf16 %v5768_v25  ;;  %v6796_v42 = vld [vmem:[#allocation59_spill] sm:$0xff]  ;;  %v1703_v16 = vmul.f32 %v5552_v57, %v6797_v9  ;;  %v3833_v4 = vunpack.i.l.bf16 %v5809_v54 }
 0x2d5   : > { %v2166_v51 = vpop.f32.mrf.mxu0  ;;  %2879 = vmatmul.mubr.f32.gmra.mxu1 %v3816_v20  ;;  %v6794_v20 = vld [vmem:[#allocation51_spill] sm:$0xff] }
 0x2d6   : > { %v5990_v12 = vpop.trf.xlu1  ;;  %v2167_v17 = vadd.f32 %v2166_v51, %v1848_v49  ;;  %2883 = vmatprep.mubr.f32.mxu1 %v3818_v43  ;;  %v1844_v3 = vadd.f32 %v5677_v52, %v6794_v20  ;;  %v1705_v49 = vmul.f32 %v5552_v57, %v6795_v0  ;;  %v2152_v43 = vadd.f32 %v5932_v44, %v1845_v8  ;;  %v6799_v20 = vld [vmem:[#allocation9_spill] sm:$0xff] }
 0x2d7   : > { %6791 = vst [vmem:[#allocation49_spill] sm:$0xff] %v5990_v12  ;;  %v2168_v28 = vpop.f32.mrf.mxu0  ;;  %v1849_v12 = vadd.f32 %v5677_v52, %v1778_v59  ;;  %v1704_v59 = vmul.f32 %v5552_v57, %v6796_v42  ;;  %v1843_v44 = vadd.f32 %v5677_v52, %v1772_v35  ;;  %v1851_v0 = vadd.f32 %v5677_v52, %v5930_v47 }
 0x2d8   : > { %4273 = vtanh.f32 %v2167_v17  ;;  %v2147_v17 = vadd.f32 %v5920_v58, %v1844_v3  ;;  %v1700_v3 = vmul.f32 %v5552_v57, %v5749_v41 }
 0x2d9   : > { %v2171_v5 = vpop.f32.mrf.mxu0  ;;  %2884 = vmatmul.mubr.f32.gmra.mxu1 %v3821_v53  ;;  %4275 = vtanh.f32 %v2162_v55  ;;  %v6798_v53 = vld [vmem:[#allocation54_spill] sm:$0xff]  ;;  %v2142_v55 = vadd.f32 %v5907_v15, %v1843_v44  ;;  %v1768_v58 = vadd.f32 %v1704_v59, %v1379_v48  ;;  %v6052_v59 = vld [vmem:[%s6598_s5 + $0x1] ss:$0 sm:$0xff] }
 0x2da   : > { %v6005_v62 = vpop.trf.xlu1  ;;  %v6007_v28 = vadd.f32 %v2171_v5, %v1849_v12  ;;  %2888 = vmatprep.mubr.f32.mxu1 %v3823_v6  ;;  %v1842_v25 = vadd.f32 %v5677_v52, %v6798_v53  ;;  %4277 = vtanh.f32 %v2157_v33  ;;  %v1850_v12 = vadd.f32 %v5677_v52, %v5947_v23 }
 0x2db   : > { %v2173_v51 = vpop.f32.mrf.mxu0  ;;  %v1769_v6 = vadd.f32 %v1705_v49, %v1380_v46  ;;  %4279 = vtanh.f32 %v2152_v43  ;;  %v1767_v33 = vadd.f32 %v1703_v16, %v1378_v34  ;;  %v1702_v23 = vmul.f32 %v5552_v57, %v6799_v20 }
 0x2dc   : > { %v1841_v46 = vadd.f32 %v5677_v52, %v1770_v29  ;;  %v2137_v63 = vadd.f32 %v5894_v7, %v1842_v25  ;;  %4281 = vtanh.f32 %v2147_v17  ;;  %v3836_v43 = vunpack.i.h.bf16 %v5809_v54 }
 0x2dd   : > { %v2176_v13 = vpop.f32.mrf.mxu0  ;;  %2889 = vmatmul.mubr.f32.gmra.mxu1 %v3826_v14  ;;  %v1840_v49 = vadd.f32 %v5677_v52, %v1769_v6  ;;  %v3838_v5 = vunpack.i.l.bf16 %v5830_v22  ;;  %4283 = vtanh.f32 %v2142_v55  ;;  %v1766_v41 = vadd.f32 %v1702_v23, %v5972_v11 }
 0x2de   : > { %v6022_v35 = vpop.trf.xlu1  ;;  %v6024_v8 = vadd.f32 %v2176_v13, %v1850_v12  ;;  %2893 = vmatprep.mubr.f32.mxu1 %v3828_v45  ;;  %v2132_v48 = vadd.f32 %v5881_v56, %v1841_v46  ;;  %v1838_v7 = vadd.f32 %v5677_v52, %v1767_v33  ;;  %v1839_v47 = vadd.f32 %v5677_v52, %v1768_v58 }
 0x2df   : > { %v2178_v15 = vpop.f32.mrf.mxu0  ;;  %v1764_v56 = vadd.f32 %v1700_v3, %v5967_v40  ;;  %v2127_v29 = vadd.f32 %v5868_v21, %v1840_v49  ;;  %4285 = vtanh.f32 %v2137_v63  ;;  %v1852_v54 = vadd.f32 %v5677_v52, %v5918_v60 }
 0x2e0   : > { %v1698_v11 = vmul.f32 %v6052_v59, %v5796_v36  ;;  %v2122_v9 = vadd.f32 %v5853_v2, %v1839_v47  ;;  %v3841_v40 = vunpack.i.h.bf16 %v5830_v22  ;;  %v3843_v21 = vunpack.i.l.bf16 %v5844_v10  ;;  %v6066_v36 = vld [vmem:[%s6598_s5] ss:$0 sm:$0xff]  ;;  %v6800_v2 = vld [vmem:[#allocation15_spill] sm:$0xff] }
 0x2e1   : > { %v2181_v34 = vpop.f32.mrf.mxu0  ;;  %2894 = vmatmul.mubr.f32.gmra.mxu1 %v3831_v27  ;;  %4287 = vtanh.f32 %v2132_v48  ;;  %v1373_v53 = vmul.f32 %v6066_v36, %v6800_v2  ;;  %v1837_v22 = vadd.f32 %v5677_v52, %v1766_v41  ;;  %v1835_v17 = vadd.f32 %v5677_v52, %v1764_v56 }
 0x2e2   : > { %v6038_v14 = vpop.trf.xlu1  ;;  %v6040_v57 = vadd.f32 %v2181_v34, %v1851_v0  ;;  %2898 = vmatprep.mubr.f32.mxu1 %v3833_v4  ;;  %v2117_v12 = vadd.f32 %v5841_v61, %v1838_v7  ;;  %4289 = vtanh.f32 %v2127_v29  ;;  %v1853_v6 = vadd.f32 %v5677_v52, %v5905_v1 }
 0x2e3   : > { %v2183_v45 = vpop.f32.mrf.mxu0  ;;  %v1762_v13 = vadd.f32 %v1698_v11, %v1373_v53  ;;  %v2112_v27 = vadd.f32 %v5827_v31, %v1837_v22  ;;  %v3846_v58 = vunpack.i.h.bf16 %v5844_v10  ;;  %v3848_v33 = vunpack.i.l.bf16 %v5856_v24 }
 0x2e4   : > { %4291 = vtanh.f32 %v2122_v9  ;;  %v2102_v46 = vadd.f32 %v5787_v32, %v1835_v17  ;;  %v3851_v3 = vunpack.i.h.bf16 %v5856_v24  ;;  %v3853_v0 = vunpack.i.l.bf16 %v5871_v38 }
 0x2e5   : > { %v4274_v42 = vpop.eup %4273  ;;  %v2186_v16 = vpop.f32.mrf.mxu0  ;;  %2899 = vmatmul.mubr.f32.gmra.mxu1 %v3836_v43  ;;  %4293 = vtanh.f32 %v2117_v12  ;;  %v1833_v10 = vadd.f32 %v5677_v52, %v1762_v13  ;;  %v3856_v24 = vunpack.i.h.bf16 %v5871_v38  ;;  %v3858_v41 = vunpack.i.l.bf16 %v5884_v37  ;;  %v6801_v12 = vld [vmem:[#allocation40_spill] sm:$0xff] }
 0x2e6   : > { %v6059_v44 = vpop.trf.xlu1  ;;  %v6061_v60 = vadd.f32 %v2186_v16, %v1852_v54  ;;  %3020 = vmatpush1.msra.mxu1 %v4274_v42  ;;  %2903 = vmatprep.mubr.f32.mxu1 %v3838_v5  ;;  %v4276_v51 = vpop.eup %4275  ;;  %4295 = vtanh.f32 %v2112_v27  ;;  %v3863_v29 = vunpack.i.l.bf16 %v5897_v19 }
 0x2e7   : > { %v2188_v25 = vpop.f32.mrf.mxu0  ;;  %3021 = vmatprep.subr.mxu1 %v6691_v30  ;;  %v4278_v55 = vpop.eup %4277  ;;  %4297 = vtanh.f32 %v5813_v18  ;;  %v2092_v5 = vadd.f32 %v5739_v26, %v1833_v10  ;;  %v3861_v26 = vunpack.i.h.bf16 %v5884_v37  ;;  %v3866_v37 = vunpack.i.h.bf16 %v5897_v19 }
 0x2e8   : > { %3022 = vmatpush1.msra.mxu1 %v4276_v51  ;;  %v4280_v1 = vpop.eup %4279  ;;  %4299 = vtanh.f32 %v2102_v46  ;;  %v3871_v19 = vunpack.i.h.bf16 %v5911_v50 }
 0x2e9   : > { %v2191_v4 = vpop.f32.mrf.mxu0  ;;  %2904 = vmatmul.mubr.f32.gmra.mxu1 %v3841_v40  ;;  %3023 = vmatprep.subr.mxu1 %v6691_v30  ;;  %v4282_v31 = vpop.eup %4281  ;;  %4301 = vtanh.f32 %v5807_v39  ;;  %v3868_v40 = vunpack.i.l.bf16 %v5911_v50  ;;  %v3908_v50 = vunpack.i.h.bf16 %v6801_v12 }
 0x2ea   : > { %v6080_v20 = vpop.trf.xlu1  ;;  %v6082_v61 = vadd.f32 %v2191_v4, %v1853_v6  ;;  %3024 = vmatpush1.msra.mxu1 %v4278_v55  ;;  %2908 = vmatprep.mubr.f32.mxu1 %v3843_v21  ;;  %v4284_v48 = vpop.eup %4283  ;;  %4303 = vtanh.f32 %v2092_v5  ;;  %v3905_v6 = vunpack.i.l.bf16 %v6801_v12 }
 0x2eb   : > { %v2193_v23 = vpop.f32.mrf.mxu0  ;;  %3025 = vmatprep.subr.mxu1 %v6691_v30 }
 0x2ec   : > { %3026 = vmatpush1.msra.mxu1 %v4280_v1  ;;  %v6094_v49 = vpop.trf.xlu0  ;;  %v4286_v52 = vpop.eup %4285 }
 0x2ed   : > { %v6087_v15 = vpop.f32.mrf.mxu0  ;;  %2909 = vmatmul.mubr.f32.gmra.mxu1 %v3846_v58  ;;  %3027 = vmatprep.subr.mxu1 %v6691_v30 }
 0x2ee   : > { %v6091_v63 = vpop.trf.xlu1  ;;  %3028 = vmatpush1.msra.mxu1 %v4282_v31  ;;  %2913 = vmatprep.mubr.f32.mxu1 %v3848_v33  ;;  %v4288_v18 = vpop.eup %4287  ;;  %v6802_v33 = vld [vmem:[#allocation38_spill] sm:$0xff] }
 0x2ef   : > { %v2198_v32 = vpop.f32.mrf.mxu0  ;;  %3029 = vmatprep.subr.mxu1 %v6691_v30  ;;  %v4290_v45 = vpop.eup %4289  ;;  %v3910_v1 = vunpack.i.l.bf16 %v6802_v33 }
 0x2f0   : > { %3030 = vmatpush1.msra.mxu1 %v4284_v48  ;;  %v6106_v7 = vpop.trf.xlu0 }
 0x2f1   : > { %v6098_v34 = vpop.f32.mrf.mxu0  ;;  %2914 = vmatmul.mubr.f32.gmra.mxu1 %v3851_v3  ;;  %3031 = vmatprep.subr.mxu1 %v6691_v30  ;;  %v4292_v42 = vpop.eup %4291  ;;  %v3913_v3 = vunpack.i.h.bf16 %v6802_v33  ;;  %v6810_v33 = vld [vmem:[#allocation31_spill] sm:$0xff] }
 0x2f2   : > { %v6102_v43 = vpop.trf.xlu1  ;;  %3032 = vmatpush1.msra.mxu1 %v4286_v52  ;;  %2918 = vmatprep.mubr.f32.mxu1 %v3853_v0  ;;  %v4294_v11 = vpop.eup %4293  ;;  %v6803_v0 = vld [vmem:[#allocation43_spill] sm:$0xff] }
 0x2f3   : > { %v2203_v47 = vpop.f32.mrf.mxu0  ;;  %3033 = vmatprep.subr.mxu1 %v6691_v30  ;;  %v4296_v51 = vpop.eup %4295  ;;  %v3915_v48 = vunpack.i.l.bf16 %v6803_v0 }
 0x2f4   : > { %3034 = vmatpush1.msra.mxu1 %v4288_v18  ;;  %v6117_v54 = vpop.trf.xlu0  ;;  %v4298_v53 = vpop.eup %4297  ;;  %v6804_v18 = vld [vmem:[#allocation46_spill] sm:$0xff] }
 0x2f5   : > { %v6110_v56 = vpop.f32.mrf.mxu0  ;;  %2919 = vmatmul.mubr.f32.gmra.mxu1 %v3856_v24  ;;  %3035 = vmatprep.subr.mxu1 %v6691_v30  ;;  %v4300_v17 = vpop.eup %4299  ;;  %v3920_v47 = vunpack.i.l.bf16 %v6804_v18 }
 0x2f6   : > { %v6114_v38 = vpop.trf.xlu1  ;;  %3036 = vmatpush1.msra.mxu1 %v4290_v45  ;;  %2923 = vmatprep.mubr.f32.mxu1 %v3858_v41  ;;  %v4302_v27 = vpop.eup %4301  ;;  %v3918_v41 = vunpack.i.h.bf16 %v6803_v0 }
 0x2f7   : > { %v2208_v39 = vpop.f32.mrf.mxu0  ;;  %3037 = vmatprep.subr.mxu1 %v6691_v30  ;;  %v4304_v31 = vpop.eup %4303 }
 0x2f8   : > { %3038 = vmatpush1.msra.mxu1 %v4292_v42  ;;  %v6127_v21 = vpop.trf.xlu0  ;;  %v6805_v42 = vld [vmem:[#allocation10_spill] sm:$0xff] }
 0x2f9   : > { %v6120_v9 = vpop.f32.mrf.mxu0  ;;  %2924 = vmatmul.mubr.f32.gmra.mxu1 %v3861_v26  ;;  %3039 = vmatprep.subr.mxu1 %v6691_v30  ;;  %v1729_v39 = vmul.f32 %v6052_v59, %v6805_v42 }
 0x2fa   : > { %v6124_v16 = vpop.trf.xlu1  ;;  %3040 = vmatpush1.msra.mxu1 %v4294_v11  ;;  %2928 = vmatprep.mubr.f32.mxu1 %v3863_v29 }
 0x2fb   : > { %v2213_v2 = vpop.f32.mrf.mxu0  ;;  %3041 = vmatprep.subr.mxu1 %v6691_v30 }
 0x2fc   : > { %3042 = vmatpush1.msra.mxu1 %v4296_v51  ;;  %v6137_v55 = vpop.trf.xlu0  ;;  %v6807_v2 = vld [vmem:[#allocation12_spill] sm:$0xff] }
 0x2fd   : > { %v6130_v22 = vpop.f32.mrf.mxu0  ;;  %2929 = vmatmul.mubr.f32.gmra.mxu1 %v3866_v37  ;;  %3043 = vmatprep.subr.mxu1 %v6691_v30  ;;  %v3923_v37 = vunpack.i.h.bf16 %v6804_v18 }
 0x2fe   : > { %v6134_v25 = vpop.trf.xlu1  ;;  %3044 = vmatpush1.msra.mxu1 %v4298_v53  ;;  %2933 = vmatprep.mubr.f32.mxu1 %v3868_v40  ;;  %v6806_v40 = vld [vmem:[#allocation30_spill] sm:$0xff]  ;;  %v1727_v53 = vmul.f32 %v6052_v59, %v6807_v2 }
 0x2ff   : > { %v2218_v13 = vpop.f32.mrf.mxu0  ;;  %3045 = vmatprep.subr.mxu1 %v6691_v30  ;;  %v1404_v51 = vmul.f32 %v6066_v36, %v6806_v40  ;;  %v6812_v40 = vld [vmem:[#allocation11_spill] sm:$0xff] }
 0x300   : > { %3046 = vmatpush1.msra.mxu1 %v4300_v17  ;;  %v6147_v23 = vpop.trf.xlu0  ;;  %v6809_v13 = vld [vmem:[#allocation60_spill] sm:$0xff] }
 0x301   : > { %v6140_v4 = vpop.f32.mrf.mxu0  ;;  %2934 = vmatmul.mubr.f32.gmra.mxu1 %v3871_v19  ;;  %3047 = vmatprep.subr.mxu1 %v6691_v30  ;;  %v6808_v19 = vld [vmem:[#allocation49_spill] sm:$0xff] }
 0x302   : > { %v6144_v58 = vpop.trf.xlu1  ;;  %3048 = vmatpush1.msra.mxu1 %v4302_v27  ;;  %2938 = vmatprep.mubr.f32.mxu1 %v3905_v6  ;;  %v3925_v17 = vunpack.i.l.bf16 %v6808_v19  ;;  %v1726_v27 = vmul.f32 %v6052_v59, %v6809_v13 }
 0x303   : > { %v2223_v46 = vpop.f32.mrf.mxu0  ;;  %3049 = vmatprep.subr.mxu1 %v6691_v30 }
 0x304   : > { %3050 = vmatpush1.msra.mxu1 %v4304_v31  ;;  %v6155_v32 = vpop.trf.xlu0  ;;  %v1793_v31 = vadd.f32 %v1729_v39, %v1404_v51  ;;  %v6811_v46 = vld [vmem:[#allocation32_spill] sm:$0xff] }
 0x305   : > { %v6150_v10 = vpop.f32.mrf.mxu0  ;;  %2939 = vmatmul.mubr.f32.gmra.mxu1 %v3908_v50  ;;  %3051 = vmatprep.subr.mxu1 %v6691_v30  ;;  %v4353_v39 = vld [vmem:[%s6599_s6] ss:$0 sm:$0xff] }
 0x306   : > { %2943 = vmatprep.mubr.f32.mxu1 %v3910_v1  ;;  %v6157_v52 = vpop.trf.xlu1  ;;  %v1402_v1 = vmul.f32 %v6066_v36, %v6810_v33  ;;  %v1863_v51 = vadd.f32 %v4353_v39, %v6812_v40  ;;  %v1864_v2 = vadd.f32 %v4353_v39, %v1793_v31 }
 0x307   : > { %v2228_v24 = vpop.f32.mrf.mxu0 }
 0x308   : > { %v6161_v45 = vpop.trf.xlu0  ;;  %v1791_v24 = vadd.f32 %v1727_v53, %v1402_v1 }
 0x309   : > { %v2231_v5 = vpop.f32.mrf.mxu0  ;;  %2944 = vmatmul.mubr.f32.gmra.mxu1 %v3913_v3  ;;  %v1401_v3 = vmul.f32 %v6066_v36, %v6811_v46 }
 0x30a   : > { %2948 = vmatprep.mubr.f32.mxu1 %v3915_v48  ;;  %v6163_v26 = vpop.trf.xlu1  ;;  %v3928_v48 = vunpack.i.h.bf16 %v6808_v19  ;;  %v1862_v13 = vadd.f32 %v4353_v39, %v1791_v24 }
 0x30b   : > { %v2233_v29 = vpop.f32.mrf.mxu0 }
 0x30c   : > { %v6173_v12 = vpop.trf.xlu0  ;;  %v1790_v29 = vadd.f32 %v1726_v27, %v1401_v3  ;;  %v3935_v27 = vunpack.i.l.bf16 %v6022_v35  ;;  %v6814_v3 = vld [vmem:[#allocation33_spill] sm:$0xff] }
 0x30d   : > { %v2236_v11 = vpop.f32.mrf.mxu0  ;;  %2949 = vmatmul.mubr.f32.gmra.mxu1 %v3918_v41  ;;  %v3930_v41 = vunpack.i.l.bf16 %v6005_v62  ;;  %v1398_v31 = vmul.f32 %v6066_v36, %v6814_v3  ;;  %v6816_v3 = vld [vmem:[#allocation50_spill] sm:$0xff] }
 0x30e   : > { %2953 = vmatprep.mubr.f32.mxu1 %v3920_v47  ;;  %v6175_v6 = vpop.trf.xlu1 }
 0x30f   : > { %v2238_v50 = vpop.f32.mrf.mxu0 }
 0x310   : > { %v6185_v18 = vpop.trf.xlu0 }
 0x311   : > { %v2241_v0 = vpop.f32.mrf.mxu0  ;;  %2954 = vmatmul.mubr.f32.gmra.mxu1 %v3923_v37  ;;  %v6813_v37 = vld [vmem:[#allocation64_spill] sm:$0xff] }
 0x312   : > { %2958 = vmatprep.mubr.f32.mxu1 %v3925_v17  ;;  %v6187_v47 = vpop.trf.xlu1  ;;  %v1723_v19 = vmul.f32 %v6052_v59, %v6813_v37  ;;  %v3933_v17 = vunpack.i.h.bf16 %v6005_v62  ;;  %v2242_v50 = vadd.f32 %v2241_v0, %v1863_v51  ;;  %v2237_v37 = vadd.f32 %v2236_v11, %v1862_v13  ;;  %v6815_v0 = vld [vmem:[#allocation13_spill] sm:$0xff]  ;;  %v6817_v11 = vld [vmem:[#allocation63_spill] sm:$0xff] }
 0x313   : > { %v2243_v42 = vpop.f32.mrf.mxu0  ;;  %v3938_v62 = vunpack.i.h.bf16 %v6022_v35  ;;  %v1860_v24 = vadd.f32 %v4353_v39, %v6815_v0  ;;  %v3940_v51 = vunpack.i.l.bf16 %v6038_v14  ;;  %v1859_v13 = vadd.f32 %v4353_v39, %v6817_v11  ;;  %v6818_v35 = vld [vmem:[#allocation34_spill] sm:$0xff] }
 0x314   : > { %v6197_v1 = vpop.trf.xlu0  ;;  %v1861_v42 = vadd.f32 %v4353_v39, %v1790_v29  ;;  %v1720_v29 = vmul.f32 %v6052_v59, %v6816_v3  ;;  %v6821_v3 = vld [vmem:[#allocation16_spill] sm:$0xff]  ;;  %v3955_v11 = vunpack.i.l.bf16 %v6091_v63 }
 0x315   : > { %v2246_v53 = vpop.f32.mrf.mxu0  ;;  %2959 = vmatmul.mubr.f32.gmra.mxu1 %v3928_v48  ;;  %v1787_v48 = vadd.f32 %v1723_v19, %v1398_v31  ;;  %v2227_v19 = vadd.f32 %v6150_v10, %v1860_v24  ;;  %v6819_v10 = vld [vmem:[#allocation14_spill] sm:$0xff] }
 0x316   : > { %v2247_v33 = vadd.f32 %v2246_v53, %v1864_v2  ;;  %2963 = vmatprep.mubr.f32.mxu1 %v3930_v41  ;;  %v6199_v46 = vpop.trf.xlu1  ;;  %v2232_v41 = vadd.f32 %v2231_v5, %v1861_v42  ;;  %v3943_v5 = vunpack.i.h.bf16 %v6038_v14  ;;  %v3948_v14 = vunpack.i.h.bf16 %v6059_v44 }
 0x317   : > { %v2248_v40 = vpop.f32.mrf.mxu0 }
 0x318   : > { %4305 = vtanh.f32 %v2247_v33  ;;  %v6206_v2 = vpop.trf.xlu0  ;;  %v2222_v33 = vadd.f32 %v6140_v4, %v1859_v13  ;;  %v1857_v40 = vadd.f32 %v4353_v39, %v6819_v10 }
 0x319   : > { %2964 = vmatmul.mubr.f32.gmra.mxu1 %v3933_v17  ;;  %4307 = vtanh.f32 %v2242_v50  ;;  %v1395_v17 = vmul.f32 %v6066_v36, %v6818_v35  ;;  %v1858_v50 = vadd.f32 %v4353_v39, %v1787_v48  ;;  %v6820_v36 = vld [vmem:[#allocation67_spill] sm:$0xff] }
 0x31a   : > { %2968 = vmatprep.mubr.f32.mxu1 %v3935_v27  ;;  %v6208_v53 = vpop.trf.xlu1  ;;  %4309 = vtanh.f32 %v2237_v37  ;;  %v3945_v27 = vunpack.i.l.bf16 %v6059_v44  ;;  %v1856_v48 = vadd.f32 %v4353_v39, %v6820_v36  ;;  %v2212_v4 = vadd.f32 %v6120_v9, %v1857_v40 }
 0x31b   : > { %4311 = vtanh.f32 %v2232_v41  ;;  %v1784_v42 = vadd.f32 %v1720_v29, %v1395_v17  ;;  %v2217_v37 = vadd.f32 %v6130_v22, %v1858_v50  ;;  %v3953_v44 = vunpack.i.h.bf16 %v6080_v20 }
 0x31c   : > { %v6219_v31 = vpop.trf.xlu0  ;;  %4313 = vtanh.f32 %v2227_v19  ;;  %v1854_v29 = vadd.f32 %v4353_v39, %v6821_v3  ;;  %v4021_v3 = vunpack.i.h.bf16 %v6094_v49 }
 0x31d   : > { %2969 = vmatmul.mubr.f32.gmra.mxu1 %v3938_v62  ;;  %4315 = vtanh.f32 %v2222_v33  ;;  %v3950_v62 = vunpack.i.l.bf16 %v6080_v20  ;;  %v1855_v41 = vadd.f32 %v4353_v39, %v1784_v42  ;;  %v3960_v39 = vunpack.i.l.bf16 %v6102_v43 }
 0x31e   : > { %2973 = vmatprep.mubr.f32.mxu1 %v3940_v51  ;;  %v6221_v59 = vpop.trf.xlu1  ;;  %v2207_v51 = vadd.f32 %v6110_v56, %v1856_v48  ;;  %4317 = vtanh.f32 %v2217_v37  ;;  %v2197_v56 = vadd.f32 %v6087_v15, %v1854_v29  ;;  %v3965_v33 = vunpack.i.l.bf16 %v6114_v38 }
 0x31f   : > { %v2202_v9 = vadd.f32 %v6098_v34, %v1855_v41  ;;  %4319 = vtanh.f32 %v2212_v4  ;;  %v3958_v34 = vunpack.i.h.bf16 %v6091_v63  ;;  %v3963_v63 = vunpack.i.h.bf16 %v6102_v43 }
 0x320   : > { %v6229_v0 = vpop.trf.xlu0  ;;  %4321 = vtanh.f32 %v2207_v51  ;;  %v3968_v43 = vunpack.i.h.bf16 %v6114_v38  ;;  %v3973_v38 = vunpack.i.h.bf16 %v6124_v16  ;;  %v3978_v48 = vunpack.i.h.bf16 %v6134_v25 }
 0x321   : > { %2974 = vmatmul.mubr.f32.gmra.mxu1 %v3943_v5  ;;  %4323 = vtanh.f32 %v2202_v9  ;;  %v3983_v41 = vunpack.i.h.bf16 %v6144_v58 }
 0x322   : > { %2978 = vmatprep.mubr.f32.mxu1 %v3945_v27  ;;  %v6231_v24 = vpop.trf.xlu1  ;;  %4325 = vtanh.f32 %v2197_v56  ;;  %v4033_v56 = vunpack.i.l.bf16 %v6127_v21 }
 0x323   : > { %4327 = vtanh.f32 %v6082_v61  ;;  %v3970_v61 = vunpack.i.l.bf16 %v6124_v16 }
 0x324   : > { %v6238_v13 = vpop.trf.xlu0  ;;  %4329 = vtanh.f32 %v6061_v60 }
 0x325   : > { %v4306_v22 = vpop.eup %4305  ;;  %2979 = vmatmul.mubr.f32.gmra.mxu1 %v3948_v14  ;;  %4331 = vtanh.f32 %v6040_v57  ;;  %v3975_v57 = vunpack.i.l.bf16 %v6134_v25  ;;  %v4018_v25 = vunpack.i.l.bf16 %v6094_v49  ;;  %v4031_v49 = vunpack.i.h.bf16 %v6117_v54 }
 0x326   : > { %3052 = vmatpush2.msra.mxu1 %v4306_v22  ;;  %2983 = vmatprep.mubr.f32.mxu1 %v3950_v62  ;;  %v6240_v19 = vpop.trf.xlu1  ;;  %v4308_v35 = vpop.eup %4307  ;;  %4333 = vtanh.f32 %v6024_v8 }
 0x327   : > { %3053 = vmatprep.subr.mxu1 %v6691_v30  ;;  %v4310_v20 = vpop.eup %4309  ;;  %4335 = vtanh.f32 %v6007_v28  ;;  %v3980_v28 = vunpack.i.l.bf16 %v6144_v58  ;;  %v4023_v58 = vunpack.i.l.bf16 %v6106_v7 }
 0x328   : > { %3054 = vmatpush2.msra.mxu1 %v4308_v35  ;;  %v6247_v17 = vpop.trf.xlu0  ;;  %v4312_v50 = vpop.eup %4311  ;;  %v4028_v35 = vunpack.i.l.bf16 %v6117_v54  ;;  %v4048_v54 = vunpack.i.l.bf16 %v6155_v32 }
 0x329   : > { %2984 = vmatmul.mubr.f32.gmra.mxu1 %v3953_v44  ;;  %3055 = vmatprep.subr.mxu1 %v6691_v30  ;;  %v4314_v15 = vpop.eup %4313 }
 0x32a   : > { %3056 = vmatpush2.msra.mxu1 %v4310_v20  ;;  %2988 = vmatprep.mubr.f32.mxu1 %v3955_v11  ;;  %v6249_v5 = vpop.trf.xlu1  ;;  %v4316_v42 = vpop.eup %4315  ;;  %v4026_v11 = vunpack.i.h.bf16 %v6106_v7  ;;  %v4036_v20 = vunpack.i.h.bf16 %v6127_v21  ;;  %v4043_v7 = vunpack.i.l.bf16 %v6147_v23  ;;  %v4053_v21 = vunpack.i.l.bf16 %v6161_v45 }
 0x32b   : > { %3057 = vmatprep.subr.mxu1 %v6691_v30  ;;  %v4318_v10 = vpop.eup %4317 }
 0x32c   : > { %3058 = vmatpush2.msra.mxu1 %v4312_v50  ;;  %v4320_v37 = vpop.eup %4319  ;;  %v4051_v50 = vunpack.i.h.bf16 %v6155_v32  ;;  %v4068_v32 = vunpack.i.l.bf16 %v6197_v1 }
 0x32d   : > { %2989 = vmatmul.mubr.f32.gmra.mxu1 %v3958_v34  ;;  %3059 = vmatprep.subr.mxu1 %v6691_v30  ;;  %v4322_v60 = vpop.eup %4321  ;;  %v4038_v34 = vunpack.i.l.bf16 %v6137_v55 }
 0x32e   : > { %3060 = vmatpush2.msra.mxu1 %v4314_v15  ;;  %2993 = vmatprep.mubr.f32.mxu1 %v3960_v39  ;;  %v6256_v27 = vpop.trf.xlu1  ;;  %v4324_v36 = vpop.eup %4323  ;;  %v4046_v39 = vunpack.i.h.bf16 %v6147_v23  ;;  %v4056_v15 = vunpack.i.h.bf16 %v6161_v45  ;;  %v4063_v23 = vunpack.i.l.bf16 %v6185_v18  ;;  %v4073_v45 = vunpack.i.l.bf16 %v6206_v2 }
 0x32f   : > { %3061 = vmatprep.subr.mxu1 %v6691_v30  ;;  %v4326_v8 = vpop.eup %4325 }
 0x330   : > { %3062 = vmatpush2.msra.mxu1 %v4316_v42  ;;  %v4328_v4 = vpop.eup %4327  ;;  %v4071_v42 = vunpack.i.h.bf16 %v6197_v1  ;;  %v4088_v1 = vunpack.i.l.bf16 %v6238_v13 }
 0x331   : > { %2994 = vmatmul.mubr.f32.gmra.mxu1 %v3963_v63  ;;  %3063 = vmatprep.subr.mxu1 %v6691_v30  ;;  %v4330_v62 = vpop.eup %4329  ;;  %v4061_v63 = vunpack.i.h.bf16 %v6173_v12 }
 0x332   : > { %3064 = vmatpush2.msra.mxu1 %v4318_v10  ;;  %2998 = vmatprep.mubr.f32.mxu1 %v3965_v33  ;;  %v6264_v40 = vpop.trf.xlu1  ;;  %v4332_v22 = vpop.eup %4331  ;;  %v4066_v33 = vunpack.i.h.bf16 %v6185_v18  ;;  %v4076_v10 = vunpack.i.h.bf16 %v6206_v2  ;;  %v4083_v18 = vunpack.i.l.bf16 %v6229_v0  ;;  %v4093_v2 = vunpack.i.l.bf16 %v6247_v17 }
 0x333   : > { %3065 = vmatprep.subr.mxu1 %v6691_v30  ;;  %v4334_v44 = vpop.eup %4333 }
 0x334   : > { %3066 = vmatpush2.msra.mxu1 %v4320_v37  ;;  %v4336_v9 = vpop.eup %4335  ;;  %v4091_v37 = vunpack.i.h.bf16 %v6238_v13  ;;  %v4138_v13 = vunpack.i.h.bf16 %v6163_v26 }
 0x335   : > { %2999 = vmatmul.mubr.f32.gmra.mxu1 %v3968_v43  ;;  %3067 = vmatprep.subr.mxu1 %v6691_v30  ;;  %v4081_v43 = vunpack.i.h.bf16 %v6219_v31 }
 0x336   : > { %3068 = vmatpush2.msra.mxu1 %v4322_v60  ;;  %3003 = vmatprep.mubr.f32.mxu1 %v3970_v61  ;;  %v6272_v14 = vpop.trf.xlu1  ;;  %v4086_v61 = vunpack.i.h.bf16 %v6229_v0  ;;  %v4096_v60 = vunpack.i.h.bf16 %v6247_v17  ;;  %v4135_v0 = vunpack.i.l.bf16 %v6163_v26  ;;  %v4150_v26 = vunpack.i.l.bf16 %v6199_v46 }
 0x337   : > { %3069 = vmatprep.subr.mxu1 %v6691_v30 }
 0x338   : > { %3070 = vmatpush2.msra.mxu1 %v4324_v36  ;;  %v4140_v36 = vunpack.i.l.bf16 %v6175_v6 }
 0x339   : > { %3004 = vmatmul.mubr.f32.gmra.mxu1 %v3973_v38  ;;  %3071 = vmatprep.subr.mxu1 %v6691_v30  ;;  %v4133_v38 = vunpack.i.h.bf16 %v6157_v52 }
 0x33a   : > { %3072 = vmatpush2.msra.mxu1 %v4326_v8  ;;  %3008 = vmatprep.mubr.f32.mxu1 %v3975_v57  ;;  %v6278_v16 = vpop.trf.xlu1 }
 0x33b   : > { %3073 = vmatprep.subr.mxu1 %v6691_v30 }
 0x33c   : > { %3074 = vmatpush2.msra.mxu1 %v4328_v4 }
 0x33d   : > { %3009 = vmatmul.mubr.f32.gmra.mxu1 %v3978_v48  ;;  %3075 = vmatprep.subr.mxu1 %v6691_v30  ;;  %v4143_v48 = vunpack.i.h.bf16 %v6175_v6  ;;  %v4155_v6 = vunpack.i.l.bf16 %v6208_v53 }
 0x33e   : > { %3076 = vmatpush2.msra.mxu1 %v4330_v62  ;;  %3013 = vmatprep.mubr.f32.mxu1 %v3980_v28  ;;  %v6284_v51 = vpop.trf.xlu1  ;;  %v4148_v62 = vunpack.i.h.bf16 %v6187_v47 }
 0x33f   : > { %3077 = vmatprep.subr.mxu1 %v6691_v30 }
 0x340   : > { %3078 = vmatpush2.msra.mxu1 %v4332_v22  ;;  %v4153_v22 = vunpack.i.h.bf16 %v6199_v46  ;;  %v4165_v46 = vunpack.i.l.bf16 %v6231_v24 }
 0x341   : > { %3014 = vmatmul.mubr.f32.gmra.mxu1 %v3983_v41  ;;  %3079 = vmatprep.subr.mxu1 %v6691_v30 }
 0x342   : > { %3080 = vmatpush2.msra.mxu1 %v4334_v44  ;;  %3083 = vmatprep.mubr.f32.mxu1 %v4018_v25  ;;  %v6290_v29 = vpop.trf.xlu1 }
 0x343   : > { %3081 = vmatprep.subr.mxu1 %v6691_v30  ;;  %v4041_v30 = vunpack.i.h.bf16 %v6137_v55  ;;  %v4058_v55 = vunpack.i.l.bf16 %v6173_v12  ;;  %v4078_v12 = vunpack.i.l.bf16 %v6219_v31  ;;  %v4130_v31 = vunpack.i.l.bf16 %v6157_v52 }
 0x344   : > { %3082 = vmatpush2.msra.mxu1 %v4336_v9  ;;  %v4145_v52 = vunpack.i.l.bf16 %v6187_v47  ;;  %v4160_v47 = vunpack.i.l.bf16 %v6221_v59 }
 0x345   : > { %3084 = vmatmul.mubr.f32.vlgmr.msra.gmra.mxu1 %v4021_v3 }
 0x346   : > { %3088 = vmatprep.mubr.f32.mxu1 %v4023_v58  ;;  %v4158_v58 = vunpack.i.h.bf16 %v6208_v53  ;;  %v4170_v53 = vunpack.i.l.bf16 %v6240_v19 }
 0x349   : > { %3089 = vmatmul.mubr.f32.gmra.mxu1 %v4026_v11 }
 0x34a   : > { %3093 = vmatprep.mubr.f32.mxu1 %v4028_v35  ;;  %v4163_v35 = vunpack.i.h.bf16 %v6221_v59  ;;  %v4175_v59 = vunpack.i.l.bf16 %v6249_v5 }
 0x34d   : > { %3094 = vmatmul.mubr.f32.gmra.mxu1 %v4031_v49 }
 0x34e   : > { %3098 = vmatprep.mubr.f32.mxu1 %v4033_v56 }
 0x351   : > { %3099 = vmatmul.mubr.f32.gmra.mxu1 %v4036_v20  ;;  %v4168_v20 = vunpack.i.h.bf16 %v6231_v24  ;;  %v4180_v24 = vunpack.i.l.bf16 %v6256_v27 }
 0x352   : > { %3103 = vmatprep.mubr.f32.mxu1 %v4038_v34 }
 0x355   : > { %3104 = vmatmul.mubr.f32.gmra.mxu1 %v4041_v30  ;;  %v4173_v30 = vunpack.i.h.bf16 %v6240_v19  ;;  %v4185_v19 = vunpack.i.l.bf16 %v6264_v40 }
 0x356   : > { %3108 = vmatprep.mubr.f32.mxu1 %v4043_v7 }
 0x359   : > { %3109 = vmatmul.mubr.f32.gmra.mxu1 %v4046_v39 }
 0x35a   : > { %3113 = vmatprep.mubr.f32.mxu1 %v4048_v54  ;;  %v4178_v54 = vunpack.i.h.bf16 %v6249_v5  ;;  %v4190_v5 = vunpack.i.l.bf16 %v6272_v14 }
 0x35d   : > { %3114 = vmatmul.mubr.f32.gmra.mxu1 %v4051_v50 }
 0x35e   : > { %3118 = vmatprep.mubr.f32.mxu1 %v4053_v21 }
 0x361   : > { %3119 = vmatmul.mubr.f32.gmra.mxu1 %v4056_v15  ;;  %v4183_v15 = vunpack.i.h.bf16 %v6256_v27  ;;  %v4195_v27 = vunpack.i.l.bf16 %v6278_v16 }
 0x362   : > { %3123 = vmatprep.mubr.f32.mxu1 %v4058_v55 }
 0x365   : > { %3124 = vmatmul.mubr.f32.gmra.mxu1 %v4061_v63 }
 0x366   : > { %3128 = vmatprep.mubr.f32.mxu1 %v4063_v23  ;;  %v4188_v23 = vunpack.i.h.bf16 %v6264_v40  ;;  %v4200_v40 = vunpack.i.l.bf16 %v6284_v51 }
 0x369   : > { %3129 = vmatmul.mubr.f32.gmra.mxu1 %v4066_v33 }
 0x36a   : > { %3133 = vmatprep.mubr.f32.mxu1 %v4068_v32 }
 0x36d   : > { %3134 = vmatmul.mubr.f32.gmra.mxu1 %v4071_v42  ;;  %v4193_v42 = vunpack.i.h.bf16 %v6272_v14  ;;  %v4205_v14 = vunpack.i.l.bf16 %v6290_v29 }
 0x36e   : > { %3138 = vmatprep.mubr.f32.mxu1 %v4073_v45 }
 0x371   : > { %3139 = vmatmul.mubr.f32.gmra.mxu1 %v4076_v10 }
 0x372   : > { %3143 = vmatprep.mubr.f32.mxu1 %v4078_v12  ;;  %v4198_v12 = vunpack.i.h.bf16 %v6278_v16 }
 0x375   : > { %3144 = vmatmul.mubr.f32.gmra.mxu1 %v4081_v43 }
 0x376   : > { %3148 = vmatprep.mubr.f32.mxu1 %v4083_v18 }
 0x379   : > { %3149 = vmatmul.mubr.f32.gmra.mxu1 %v4086_v61  ;;  %v4203_v61 = vunpack.i.h.bf16 %v6284_v51 }
 0x37a   : > { %3153 = vmatprep.mubr.f32.mxu1 %v4088_v1 }
 0x37d   : > { %3154 = vmatmul.mubr.f32.gmra.mxu1 %v4091_v37 }
 0x37e   : > { %3158 = vmatprep.mubr.f32.mxu1 %v4093_v2  ;;  %v4208_v2 = vunpack.i.h.bf16 %v6290_v29 }
 0x381   : > { %3159 = vmatmul.mubr.f32.gmra.mxu1 %v4096_v60 }
 0x382   : > { %3163 = vmatprep.mubr.f32.mxu1 %v4130_v31 }
 0x385   : > { %v6325_v57 = vpop.f32.mrf.mxu1  ;;  %3164 = vmatmul.mubr.f32.gmra.mxu1 %v4133_v38 }
 0x386   : > { %3168 = vmatprep.mubr.f32.mxu1 %v4135_v0 }
 0x387   : > { %v2862_v8 = vpop.f32.mrf.mxu1 }
 0x389   : > { %v6329_v17 = vpop.f32.mrf.mxu1  ;;  %3169 = vmatmul.mubr.f32.gmra.mxu1 %v4138_v13 }
 0x38a   : > { %3173 = vmatprep.mubr.f32.mxu1 %v4140_v36 }
 0x38b   : > { %v2867_v28 = vpop.f32.mrf.mxu1 }
 0x38d   : > { %v6333_v4 = vpop.f32.mrf.mxu1  ;;  %3174 = vmatmul.mubr.f32.gmra.mxu1 %v4143_v48 }
 0x38e   : > { %3178 = vmatprep.mubr.f32.mxu1 %v4145_v52 }
 0x38f   : > { %v2872_v41 = vpop.f32.mrf.mxu1 }
 0x391   : > { %v6337_v25 = vpop.f32.mrf.mxu1  ;;  %3179 = vmatmul.mubr.f32.gmra.mxu1 %v4148_v62 }
 0x392   : > { %3183 = vmatprep.mubr.f32.mxu1 %v4150_v26 }
 0x393   : > { %v2877_v44 = vpop.f32.mrf.mxu1 }
 0x395   : > { %v6341_v3 = vpop.f32.mrf.mxu1  ;;  %3184 = vmatmul.mubr.f32.gmra.mxu1 %v4153_v22 }
 0x396   : > { %3188 = vmatprep.mubr.f32.mxu1 %v4155_v6 }
 0x397   : > { %v2882_v9 = vpop.f32.mrf.mxu1 }
 0x399   : > { %v6345_v11 = vpop.f32.mrf.mxu1  ;;  %3189 = vmatmul.mubr.f32.gmra.mxu1 %v4158_v58 }
 0x39a   : > { %3193 = vmatprep.mubr.f32.mxu1 %v4160_v47 }
 0x39b   : > { %v2887_v49 = vpop.f32.mrf.mxu1 }
 0x39d   : > { %v6349_v56 = vpop.f32.mrf.mxu1  ;;  %3194 = vmatmul.mubr.f32.gmra.mxu1 %v4163_v35 }
 0x39e   : > { %3198 = vmatprep.mubr.f32.mxu1 %v4165_v46 }
 0x39f   : > { %v2892_v34 = vpop.f32.mrf.mxu1 }
 0x3a1   : > { %v6354_v7 = vpop.f32.mrf.mxu1  ;;  %3199 = vmatmul.mubr.f32.gmra.mxu1 %v4168_v20 }
 0x3a2   : > { %3203 = vmatprep.mubr.f32.mxu1 %v4170_v53 }
 0x3a3   : > { %v2897_v39 = vpop.f32.mrf.mxu1 }
 0x3a5   : > { %v6358_v50 = vpop.f32.mrf.mxu1  ;;  %3204 = vmatmul.mubr.f32.gmra.mxu1 %v4173_v30 }
 0x3a6   : > { %3208 = vmatprep.mubr.f32.mxu1 %v4175_v59 }
 0x3a7   : > { %v2902_v21 = vpop.f32.mrf.mxu1 }
 0x3a9   : > { %v6362_v55 = vpop.f32.mrf.mxu1  ;;  %3209 = vmatmul.mubr.f32.gmra.mxu1 %v4178_v54 }
 0x3aa   : > { %3213 = vmatprep.mubr.f32.mxu1 %v4180_v24 }
 0x3ab   : > { %v2907_v63 = vpop.f32.mrf.mxu1 }
 0x3ac   : > { %v2314_v63 = vld [vmem:[#allocation2 + $0xb0] sm:$0xff] }
 0x3ad   : > { %v6366_v33 = vpop.f32.mrf.mxu1  ;;  %3214 = vmatmul.mubr.f32.gmra.mxu1 %v4183_v15 }
 0x3ae   : > { %3218 = vmatprep.mubr.f32.mxu1 %v4185_v19 }
 0x3af   : > { %v2912_v32 = vpop.f32.mrf.mxu1 }
 0x3b1   : > { %v6370_v45 = vpop.f32.mrf.mxu1  ;;  %3219 = vmatmul.mubr.f32.gmra.mxu1 %v4188_v23 }
 0x3b2   : > { %3223 = vmatprep.mubr.f32.mxu1 %v4190_v5 }
 0x3b3   : > { %v2917_v10 = vpop.f32.mrf.mxu1 }
 0x3b5   : > { %v6374_v43 = vpop.f32.mrf.mxu1  ;;  %3224 = vmatmul.mubr.f32.gmra.mxu1 %v4193_v42 }
 0x3b6   : > { %3228 = vmatprep.mubr.f32.mxu1 %v4195_v27  ;;  %v2315_v27 = vld [vmem:[#allocation2] sm:$0xff] }
 0x3b7   : > { %v2922_v18 = vpop.f32.mrf.mxu1 }
 0x3b9   : > { %v6378_v1 = vpop.f32.mrf.mxu1  ;;  %3229 = vmatmul.mubr.f32.gmra.mxu1 %v4198_v12 }
 0x3ba   : > { %3233 = vmatprep.mubr.f32.mxu1 %v4200_v40 }
 0x3bb   : > { %v2927_v37 = vpop.f32.mrf.mxu1 }
 0x3bd   : > { %v6382_v60 = vpop.f32.mrf.mxu1  ;;  %3234 = vmatmul.mubr.f32.gmra.mxu1 %v4203_v61  ;;  %v2316_v61 = vld [vmem:[#allocation2 + $0xd8] sm:$0xff] }
 0x3be   : > { %3238 = vmatprep.mubr.f32.mxu1 %v4205_v14 }
 0x3bf   : > { %v2932_v16 = vpop.f32.mrf.mxu1 }
 0x3c1   : > { %v6384_v31 = vpop.f32.mrf.mxu1  ;;  %3239 = vmatmul.mubr.f32.gmra.mxu1 %v4208_v2 }
 0x3c3   : > { %v2937_v38 = vpop.f32.mrf.mxu1 }
 0x3c4   : > { %v2317_v38 = vld [vmem:[#allocation2 + $0x18] sm:$0xff] }
 0x3c5   : > { %v6386_v0 = vpop.f32.mrf.mxu1 }
 0x3c7   : > { %v2942_v51 = vpop.f32.mrf.mxu1 }
 0x3c9   : > { %v6388_v13 = vpop.f32.mrf.mxu1 }
 0x3cb   : > { %v2947_v36 = vpop.f32.mrf.mxu1 }
 0x3cd   : > { %v6390_v8 = vpop.f32.mrf.mxu1 }
 0x3cf   : > { %v2952_v48 = vpop.f32.mrf.mxu1 }
 0x3d1   : > { %v6392_v52 = vpop.f32.mrf.mxu1 }
 0x3d3   : > { %v2957_v29 = vpop.f32.mrf.mxu1 }
 0x3d4   : > { %v2318_v29 = vld [vmem:[#allocation2 + $0x50] sm:$0xff] }
 0x3d5   : > { %v6394_v28 = vpop.f32.mrf.mxu1 }
 0x3d7   : > { %v2962_v62 = vpop.f32.mrf.mxu1 }
 0x3d9   : > { %v6396_v26 = vpop.f32.mrf.mxu1 }
 0x3db   : > { %v2967_v41 = vpop.f32.mrf.mxu1 }
 0x3dd   : > { %v6398_v22 = vpop.f32.mrf.mxu1 }
 0x3df   : > { %v2972_v6 = vpop.f32.mrf.mxu1 }
 0x3e1   : > { %v6400_v44 = vpop.f32.mrf.mxu1 }
 0x3e3   : > { %v2977_v58 = vpop.f32.mrf.mxu1 }
 0x3e4   : > { %v2319_v58 = vld [vmem:[#allocation2 + $0x68] sm:$0xff] }
 0x3e5   : > { %v6402_v47 = vpop.f32.mrf.mxu1 }
 0x3e7   : > { %v2982_v9 = vpop.f32.mrf.mxu1 }
 0x3e9   : > { %v6404_v35 = vpop.f32.mrf.mxu1 }
 0x3eb   : > { %v2987_v46 = vpop.f32.mrf.mxu1 }
 0x3ed   : > { %v6406_v49 = vpop.f32.mrf.mxu1 }
 0x3ef   : > { %v2992_v20 = vpop.f32.mrf.mxu1 }
 0x3f1   : > { %v6408_v53 = vpop.f32.mrf.mxu1 }
 0x3f3   : > { %v2997_v34 = vpop.f32.mrf.mxu1 }
 0x3f4   : > { %v2320_v34 = vld [vmem:[#allocation2 + $0x30] sm:$0xff] }
 0x3f5   : > { %v6410_v30 = vpop.f32.mrf.mxu1 }
 0x3f7   : > { %v3002_v59 = vpop.f32.mrf.mxu1 }
 0x3f9   : > { %v6412_v39 = vpop.f32.mrf.mxu1 }
 0x3fb   : > { %v3007_v54 = vpop.f32.mrf.mxu1 }
 0x3fd   : > { %v6414_v24 = vpop.f32.mrf.mxu1 }
 0x3ff   : > { %v3012_v21 = vpop.f32.mrf.mxu1 }
 0x401   : > { %v6416_v15 = vpop.f32.mrf.mxu1 }
 0x403   : > { %v3017_v19 = vpop.f32.mrf.mxu1 }
 0x404   : > { %v2321_v19 = vld [vmem:[#allocation2 + $0x48] sm:$0xff] }
 0x405   : > { %v3085_v23 = vpop.f32.mrf.mxu1 }
 0x406   : > { %v3086_v5 = vadd.f32 %v3085_v23, %v6325_v57 }
 0x407   : > { %v3087_v32 = vpop.f32.mrf.mxu1 }
 0x408   : > { %v3244_v42 = vadd.f32 %v3086_v5, %v2314_v63  ;;  %v2322_v32 = vld [vmem:[#allocation2 + $0x80] sm:$0xff] }
 0x409   : > { %v3090_v10 = vpop.f32.mrf.mxu1 }
 0x40a   : > { %3276 = vst [vmem:[#allocation2 + $0xb0] sm:$0xff] %v3244_v42  ;;  %v3091_v12 = vadd.f32 %v3090_v10, %v6329_v17 }
 0x40b   : > { %v3092_v40 = vpop.f32.mrf.mxu1 }
 0x40c   : > { %v3245_v18 = vadd.f32 %v3091_v12, %v2315_v27  ;;  %v2323_v12 = vld [vmem:[#allocation2 + $0x88] sm:$0xff] }
 0x40d   : > { %v3095_v14 = vpop.f32.mrf.mxu1 }
 0x40e   : > { %3277 = vst [vmem:[#allocation2] sm:$0xff] %v3245_v18  ;;  %v3096_v37 = vadd.f32 %v3095_v14, %v6333_v4  ;;  %v2324_v14 = vld [vmem:[#allocation2 + $0xe8] sm:$0xff] }
 0x40f   : > { %v3097_v2 = vpop.f32.mrf.mxu1 }
 0x410   : > { %v3246_v16 = vadd.f32 %v3096_v37, %v2316_v61 }
 0x411   : > { %v3100_v51 = vpop.f32.mrf.mxu1 }
 0x412   : > { %3278 = vst [vmem:[#allocation2 + $0xd8] sm:$0xff] %v3246_v16  ;;  %v3101_v57 = vadd.f32 %v3100_v51, %v6337_v25 }
 0x413   : > { %v3102_v36 = vpop.f32.mrf.mxu1 }
 0x414   : > { %v3247_v48 = vadd.f32 %v3101_v57, %v2317_v38  ;;  %v2325_v38 = vld [vmem:[#allocation2 + $0xb8] sm:$0xff] }
 0x415   : > { %v3105_v62 = vpop.f32.mrf.mxu1 }
 0x416   : > { %3279 = vst [vmem:[#allocation2 + $0x18] sm:$0xff] %v3247_v48  ;;  %v3106_v17 = vadd.f32 %v3105_v62, %v6341_v3  ;;  %v2326_v48 = vld [vmem:[#allocation2 + $0x60] sm:$0xff] }
 0x417   : > { %v3107_v41 = vpop.f32.mrf.mxu1 }
 0x418   : > { %v3248_v6 = vadd.f32 %v3106_v17, %v2318_v29  ;;  %v2327_v41 = vld [vmem:[#allocation2 + $0xf0] sm:$0xff] }
 0x419   : > { %v3110_v9 = vpop.f32.mrf.mxu1 }
 0x41a   : > { %3280 = vst [vmem:[#allocation2 + $0x50] sm:$0xff] %v3248_v6  ;;  %v3111_v4 = vadd.f32 %v3110_v9, %v6345_v11 }
 0x41b   : > { %v3112_v46 = vpop.f32.mrf.mxu1 }
 0x41c   : > { %v3249_v20 = vadd.f32 %v3111_v4, %v2319_v58  ;;  %v2328_v4 = vld [vmem:[#allocation2 + $0x8] sm:$0xff] }
 0x41d   : > { %v3115_v59 = vpop.f32.mrf.mxu1 }
 0x41e   : > { %3281 = vst [vmem:[#allocation2 + $0x68] sm:$0xff] %v3249_v20  ;;  %v3116_v25 = vadd.f32 %v3115_v59, %v6349_v56  ;;  %v2329_v59 = vld [vmem:[#allocation2 + $0x78] sm:$0xff] }
 0x41f   : > { %v3117_v54 = vpop.f32.mrf.mxu1 }
 0x420   : > { %v3250_v21 = vadd.f32 %v3116_v25, %v2320_v34 }
 0x421   : > { %v3120_v63 = vpop.f32.mrf.mxu1 }
 0x422   : > { %3282 = vst [vmem:[#allocation2 + $0x30] sm:$0xff] %v3250_v21  ;;  %v3121_v3 = vadd.f32 %v3120_v63, %v6354_v7 }
 0x423   : > { %v3122_v23 = vpop.f32.mrf.mxu1 }
 0x424   : > { %v3251_v5 = vadd.f32 %v3121_v3, %v2321_v19  ;;  %v2330_v19 = vld [vmem:[#allocation2 + $0x38] sm:$0xff] }
 0x425   : > { %v3125_v42 = vpop.f32.mrf.mxu1 }
 0x426   : > { %3283 = vst [vmem:[#allocation2 + $0x48] sm:$0xff] %v3251_v5  ;;  %v3126_v11 = vadd.f32 %v3125_v42, %v6358_v50  ;;  %v2331_v5 = vld [vmem:[#allocation2 + $0x58] sm:$0xff] }
 0x427   : > { %v3127_v27 = vpop.f32.mrf.mxu1 }
 0x428   : > { %v3252_v10 = vadd.f32 %v3126_v11, %v2322_v32  ;;  %v2332_v27 = vld [vmem:[#allocation2 + $0x40] sm:$0xff] }
 0x429   : > { %v3130_v40 = vpop.f32.mrf.mxu1 }
 0x42a   : > { %3284 = vst [vmem:[#allocation2 + $0x80] sm:$0xff] %v3252_v10  ;;  %v3131_v56 = vadd.f32 %v3130_v40, %v6362_v55 }
 0x42b   : > { %v3132_v18 = vpop.f32.mrf.mxu1 }
 0x42c   : > { %v3253_v61 = vadd.f32 %v3131_v56, %v2323_v12  ;;  %v2333_v56 = vld [vmem:[#allocation2 + $0xc8] sm:$0xff] }
 0x42d   : > { %v3135_v37 = vpop.f32.mrf.mxu1 }
 0x42e   : > { %3285 = vst [vmem:[#allocation2 + $0x88] sm:$0xff] %v3253_v61  ;;  %v3136_v7 = vadd.f32 %v3135_v37, %v6366_v33  ;;  %v2334_v37 = vld [vmem:[#allocation2 + $0xe0] sm:$0xff] }
 0x42f   : > { %v3137_v2 = vpop.f32.mrf.mxu1 }
 0x430   : > { %v3254_v16 = vadd.f32 %v3136_v7, %v2324_v14 }
 0x431   : > { %v3140_v51 = vpop.f32.mrf.mxu1 }
 0x432   : > { %3286 = vst [vmem:[#allocation2 + $0xe8] sm:$0xff] %v3254_v16  ;;  %v3141_v50 = vadd.f32 %v3140_v51, %v6370_v45 }
 0x433   : > { %v3142_v57 = vpop.f32.mrf.mxu1 }
 0x434   : > { %v3255_v36 = vadd.f32 %v3141_v50, %v2325_v38  ;;  %v2335_v38 = vld [vmem:[#allocation2 + $0x90] sm:$0xff] }
 0x435   : > { %v3145_v29 = vpop.f32.mrf.mxu1 }
 0x436   : > { %3287 = vst [vmem:[#allocation2 + $0xb8] sm:$0xff] %v3255_v36  ;;  %v3146_v55 = vadd.f32 %v3145_v29, %v6374_v43  ;;  %v2336_v36 = vld [vmem:[#allocation2 + $0x70] sm:$0xff] }
 0x437   : > { %v3147_v62 = vpop.f32.mrf.mxu1 }
 0x438   : > { %v3256_v17 = vadd.f32 %v3146_v55, %v2326_v48  ;;  %v2337_v62 = vld [vmem:[#allocation2 + $0xc0] sm:$0xff] }
 0x439   : > { %v3150_v6 = vpop.f32.mrf.mxu1 }
 0x43a   : > { %3288 = vst [vmem:[#allocation2 + $0x60] sm:$0xff] %v3256_v17  ;;  %v3151_v33 = vadd.f32 %v3150_v6, %v6378_v1 }
 0x43b   : > { %v3152_v58 = vpop.f32.mrf.mxu1 }
 0x43c   : > { %v3257_v9 = vadd.f32 %v3151_v33, %v2327_v41  ;;  %v2338_v33 = vld [vmem:[#allocation2 + $0xa8] sm:$0xff] }
 0x43d   : > { %v3155_v46 = vpop.f32.mrf.mxu1 }
 0x43e   : > { %3289 = vst [vmem:[#allocation2 + $0xf0] sm:$0xff] %v3257_v9  ;;  %v3156_v45 = vadd.f32 %v3155_v46, %v6382_v60  ;;  %v2339_v46 = vld [vmem:[#allocation2 + $0xd0] sm:$0xff] }
 0x43f   : > { %v3157_v20 = vpop.f32.mrf.mxu1 }
 0x440   : > { %v3258_v34 = vadd.f32 %v3156_v45, %v2328_v4 }
 0x441   : > { %v3160_v25 = vpop.f32.mrf.mxu1 }
 0x442   : > { %3290 = vst [vmem:[#allocation2 + $0x8] sm:$0xff] %v3258_v34  ;;  %v3161_v43 = vadd.f32 %v3160_v25, %v6384_v31 }
 0x443   : > { %v3162_v54 = vpop.f32.mrf.mxu1 }
 0x444   : > { %v3259_v21 = vadd.f32 %v3161_v43, %v2329_v59  ;;  %v2340_v59 = vld [vmem:[#allocation2 + $0x10] sm:$0xff] }
 0x445   : > { %v3165_v63 = vpop.f32.mrf.mxu1 }
 0x446   : > { %3291 = vst [vmem:[#allocation2 + $0x78] sm:$0xff] %v3259_v21  ;;  %v3166_v1 = vadd.f32 %v3165_v63, %v6386_v0  ;;  %v2341_v21 = vld [vmem:[#allocation2 + $0x28] sm:$0xff] }
 0x447   : > { %v3167_v3 = vpop.f32.mrf.mxu1 }
 0x448   : > { %v3260_v23 = vadd.f32 %v3166_v1, %v2330_v19  ;;  %v2342_v3 = vld [vmem:[#allocation2 + $0xa0] sm:$0xff] }
 0x449   : > { %v3170_v32 = vpop.f32.mrf.mxu1 }
 0x44a   : > { %3292 = vst [vmem:[#allocation2 + $0x38] sm:$0xff] %v3260_v23  ;;  %v3171_v60 = vadd.f32 %v3170_v32, %v6388_v13 }
 0x44b   : > { %v3172_v42 = vpop.f32.mrf.mxu1 }
 0x44c   : > { %v3261_v11 = vadd.f32 %v3171_v60, %v2331_v5  ;;  %v2343_v60 = vld [vmem:[#allocation2 + $0xf8] sm:$0xff] }
 0x44d   : > { %v3175_v10 = vpop.f32.mrf.mxu1 }
 0x44e   : > { %3293 = vst [vmem:[#allocation2 + $0x58] sm:$0xff] %v3261_v11  ;;  %v3176_v31 = vadd.f32 %v3175_v10, %v6390_v8  ;;  %v2344_v10 = vld [vmem:[#allocation2 + $0x20] sm:$0xff] }
 0x44f   : > { %v3177_v12 = vpop.f32.mrf.mxu1 }
 0x450   : > { %v3262_v40 = vadd.f32 %v3176_v31, %v2332_v27 }
 0x451   : > { %v3180_v18 = vpop.f32.mrf.mxu1 }
 0x452   : > { %3294 = vst [vmem:[#allocation2 + $0x40] sm:$0xff] %v3262_v40  ;;  %v3181_v0 = vadd.f32 %v3180_v18, %v6392_v52 }
 0x453   : > { %v3182_v61 = vpop.f32.mrf.mxu1 }
 0x454   : > { %v3263_v14 = vadd.f32 %v3181_v0, %v2333_v56  ;;  %v2345_v56 = vld [vmem:[#allocation2 + $0x98] sm:$0xff] }
 0x455   : > { %v3185_v7 = vpop.f32.mrf.mxu1 }
 0x456   : > { %3295 = vst [vmem:[#allocation2 + $0xc8] sm:$0xff] %v3263_v14  ;;  %v3186_v13 = vadd.f32 %v3185_v7, %v6394_v28 }
 0x457   : > { %v3187_v2 = vpop.f32.mrf.mxu1 }
 0x458   : > { %v3264_v16 = vadd.f32 %v3186_v13, %v2334_v37 }
 0x459   : > { %v3190_v51 = vpop.f32.mrf.mxu1 }
 0x45a   : > { %3296 = vst [vmem:[#allocation2 + $0xe0] sm:$0xff] %v3264_v16  ;;  %v3191_v8 = vadd.f32 %v3190_v51, %v6396_v26 }
 0x45b   : > { %v3192_v50 = vpop.f32.mrf.mxu1 }
 0x45c   : > { %v3265_v57 = vadd.f32 %v3191_v8, %v2335_v38 }
 0x45d   : > { %v3195_v48 = vpop.f32.mrf.mxu1 }
 0x45e   : > { %3297 = vst [vmem:[#allocation2 + $0x90] sm:$0xff] %v3265_v57  ;;  %v3196_v52 = vadd.f32 %v3195_v48, %v6398_v22 }
 0x45f   : > { %v3197_v29 = vpop.f32.mrf.mxu1 }
 0x460   : > { %v3266_v55 = vadd.f32 %v3196_v52, %v2336_v36 }
 0x461   : > { %v3200_v17 = vpop.f32.mrf.mxu1 }
 0x462   : > { %3298 = vst [vmem:[#allocation2 + $0x70] sm:$0xff] %v3266_v55  ;;  %v3201_v28 = vadd.f32 %v3200_v17, %v6400_v44 }
 0x463   : > { %v3202_v41 = vpop.f32.mrf.mxu1 }
 0x464   : > { %v3267_v6 = vadd.f32 %v3201_v28, %v2337_v62 }
 0x465   : > { %v3205_v58 = vpop.f32.mrf.mxu1 }
 0x466   : > { %3299 = vst [vmem:[#allocation2 + $0xc0] sm:$0xff] %v3267_v6  ;;  %v3206_v26 = vadd.f32 %v3205_v58, %v6402_v47 }
 0x467   : > { %v3207_v9 = vpop.f32.mrf.mxu1 }
 0x468   : > { %v3268_v4 = vadd.f32 %v3206_v26, %v2338_v33 }
 0x469   : > { %v3210_v45 = vpop.f32.mrf.mxu1 }
 0x46a   : > { %3300 = vst [vmem:[#allocation2 + $0xa8] sm:$0xff] %v3268_v4  ;;  %v3211_v22 = vadd.f32 %v3210_v45, %v6404_v35 }
 0x46b   : > { %v3212_v20 = vpop.f32.mrf.mxu1 }
 0x46c   : > { %v3269_v34 = vadd.f32 %v3211_v22, %v2339_v46 }
 0x46d   : > { %v3215_v25 = vpop.f32.mrf.mxu1 }
 0x46e   : > { %3301 = vst [vmem:[#allocation2 + $0xd0] sm:$0xff] %v3269_v34  ;;  %v3216_v44 = vadd.f32 %v3215_v25, %v6406_v49 }
 0x46f   : > { %v3217_v43 = vpop.f32.mrf.mxu1 }
 0x470   : > { %v3270_v54 = vadd.f32 %v3216_v44, %v2340_v59 }
 0x471   : > { %v3220_v19 = vpop.f32.mrf.mxu1 }
 0x472   : > { %3302 = vst [vmem:[#allocation2 + $0x10] sm:$0xff] %v3270_v54  ;;  %v3221_v47 = vadd.f32 %v3220_v19, %v6408_v53 }
 0x473   : > { %v3222_v63 = vpop.f32.mrf.mxu1 }
 0x474   : > { %v3271_v1 = vadd.f32 %v3221_v47, %v2341_v21 }
 0x475   : > { %v3225_v23 = vpop.f32.mrf.mxu1 }
 0x476   : > { %3303 = vst [vmem:[#allocation2 + $0x28] sm:$0xff] %v3271_v1  ;;  %v3226_v35 = vadd.f32 %v3225_v23, %v6410_v30 }
 0x477   : > { %v3227_v5 = vpop.f32.mrf.mxu1 }
 0x478   : > { %v3272_v32 = vadd.f32 %v3226_v35, %v2342_v3 }
 0x479   : > { %v3230_v42 = vpop.f32.mrf.mxu1 }
 0x47a   : > { %3304 = vst [vmem:[#allocation2 + $0xa0] sm:$0xff] %v3272_v32  ;;  %v3231_v49 = vadd.f32 %v3230_v42, %v6412_v39 }
 0x47b   : > { %v3232_v11 = vpop.f32.mrf.mxu1 }
 0x47c   : > { %v3273_v27 = vadd.f32 %v3231_v49, %v2343_v60 }
 0x47d   : > { %v3235_v31 = vpop.f32.mrf.mxu1 }
 0x47e   : > { %3305 = vst [vmem:[#allocation2 + $0xf8] sm:$0xff] %v3273_v27  ;;  %v3236_v53 = vadd.f32 %v3235_v31, %v6414_v24 }
 0x47f   : > { %v3237_v12 = vpop.f32.mrf.mxu1 }
 0x480   : > { %v3274_v40 = vadd.f32 %v3236_v53, %v2344_v10 }
 0x481   : > { %v3240_v18 = vpop.f32.mrf.mxu1 }
 0x482   : > { %3306 = vst [vmem:[#allocation2 + $0x20] sm:$0xff] %v3274_v40  ;;  %v3241_v30 = vadd.f32 %v3240_v18, %v6416_v15  ;;  %3311 = sbr.rel (%p3555_p6) target bundleno = 1180 (0x49c), region = 60 }
 0x483   : > { %v3242_v0 = vpop.f32.mrf.mxu1 }
 0x484   : > { %v3275_v61 = vadd.f32 %v3241_v30, %v2345_v56 }
 0x486   : > { %3307 = vst [vmem:[#allocation2 + $0x98] sm:$0xff] %v3275_v61 }
 0x487   : > { %v3312_v39 = vld [vmem:[#allocation2 + $0xb0] sm:$0xff]  ;;  %v6454_v14 = vld [vmem:[%s6600_s7] ss:$0 sm:$0xff]  ;;  %v3314_v13 = vld [vmem:[#allocation2 + $0xd8] sm:$0xff] }
 0x488   : > { %v3313_v24 = vld [vmem:[#allocation2] sm:$0xff]  ;;  %v3351_v37 = vadd.f32 %v6454_v14, %v3312_v39  ;;  %v3315_v2 = vld [vmem:[#allocation2 + $0x18] sm:$0xff]  ;;  %v3316_v15 = vld [vmem:[#allocation2 + $0x50] sm:$0xff]  ;;  %v3353_v16 = vadd.f32 %v6454_v14, %v3314_v13 }
 0x489   : > { %v3352_v7 = vadd.f32 %v6454_v14, %v3313_v24  ;;  %v3354_v38 = vadd.f32 %v6454_v14, %v3315_v2  ;;  %v3355_v51 = vadd.f32 %v6454_v14, %v3316_v15  ;;  %v3317_v8 = vld [vmem:[#allocation2 + $0x68] sm:$0xff]  ;;  %v3318_v50 = vld [vmem:[#allocation2 + $0x30] sm:$0xff]  ;;  %v3320_v55 = vld [vmem:[#allocation2 + $0x80] sm:$0xff] }
 0x48a   : > { %v3319_v57 = vld [vmem:[#allocation2 + $0x48] sm:$0xff]  ;;  %v3383_v36 = vmax.f32 %v3351_v37, 0.0  ;;  %v3356_v52 = vadd.f32 %v6454_v14, %v3317_v8  ;;  %v3357_v29 = vadd.f32 %v6454_v14, %v3318_v50  ;;  %v3385_v28 = vmax.f32 %v3353_v16, 0.0  ;;  %v3323_v58 = vld [vmem:[#allocation2 + $0xb8] sm:$0xff]  ;;  %v3324_v26 = vld [vmem:[#allocation2 + $0x60] sm:$0xff] }
 0x48b   : > { %v3384_v48 = vmax.f32 %v3352_v7, 0.0  ;;  %v3321_v62 = vld [vmem:[#allocation2 + $0x88] sm:$0xff]  ;;  %v3386_v41 = vmax.f32 %v3354_v38, 0.0  ;;  %v3387_v6 = vmax.f32 %v3355_v51, 0.0  ;;  %v3358_v33 = vadd.f32 %v6454_v14, %v3319_v57  ;;  %v3325_v9 = vld [vmem:[#allocation2 + $0xf0] sm:$0xff]  ;;  %v3327_v34 = vld [vmem:[#allocation2 + $0x78] sm:$0xff] }
 0x48c   : > { %v3322_v17 = vld [vmem:[#allocation2 + $0xe8] sm:$0xff]  ;;  %3415 = vst [vmem:[%s6601_s8] sm:$0xff] %v3383_v36  ;;  %v3388_v4 = vmax.f32 %v3356_v52, 0.0  ;;  %v3389_v46 = vmax.f32 %v3357_v29, 0.0  ;;  %v3359_v45 = vadd.f32 %v6454_v14, %v3320_v55  ;;  %v3360_v22 = vadd.f32 %v6454_v14, %v3321_v62  ;;  %3417 = vst [vmem:[%s6601_s8 + $0x10] sm:$0xff] %v3385_v28  ;;  %v3328_v54 = vld [vmem:[#allocation2 + $0x38] sm:$0xff] }
 0x48d   : > { %3416 = vst [vmem:[%s6601_s8 + $0x8] sm:$0xff] %v3384_v48  ;;  %v3326_v20 = vld [vmem:[#allocation2 + $0x8] sm:$0xff]  ;;  %3418 = vst [vmem:[%s6601_s8 + $0x18] sm:$0xff] %v3386_v41  ;;  %v3390_v59 = vmax.f32 %v3358_v33, 0.0  ;;  %v3361_v25 = vadd.f32 %v6454_v14, %v3322_v17  ;;  %v3362_v44 = vadd.f32 %v6454_v14, %v3323_v58  ;;  %v3363_v43 = vadd.f32 %v6454_v14, %v3324_v26  ;;  %v3329_v21 = vld [vmem:[#allocation2 + $0x58] sm:$0xff] }
 0x48e   : > { %3419 = vst [vmem:[%s6601_s8 + $0x20] sm:$0xff] %v3387_v6  ;;  %3420 = vst [vmem:[%s6601_s8 + $0x28] sm:$0xff] %v3388_v4  ;;  %v3391_v19 = vmax.f32 %v3359_v45, 0.0  ;;  %v3392_v47 = vmax.f32 %v3360_v22, 0.0  ;;  %v3364_v63 = vadd.f32 %v6454_v14, %v3325_v9  ;;  %v3365_v1 = vadd.f32 %v6454_v14, %v3326_v20  ;;  %v3330_v3 = vld [vmem:[#allocation2 + $0x40] sm:$0xff]  ;;  %v3331_v23 = vld [vmem:[#allocation2 + $0xc8] sm:$0xff] }
 0x48f   : > { %3421 = vst [vmem:[%s6601_s8 + $0x30] sm:$0xff] %v3389_v46  ;;  %v3332_v35 = vld [vmem:[#allocation2 + $0xe0] sm:$0xff]  ;;  %3422 = vst [vmem:[%s6601_s8 + $0x38] sm:$0xff] %v3390_v59  ;;  %v3393_v5 = vmax.f32 %v3361_v25, 0.0  ;;  %v3394_v32 = vmax.f32 %v3362_v44, 0.0  ;;  %v3395_v60 = vmax.f32 %v3363_v43, 0.0  ;;  %v3366_v42 = vadd.f32 %v6454_v14, %v3327_v34 }
 0x490   : > { %v3333_v49 = vld [vmem:[#allocation2 + $0x90] sm:$0xff]  ;;  %3423 = vst [vmem:[%s6601_s8 + $0x40] sm:$0xff] %v3391_v19  ;;  %3424 = vst [vmem:[%s6601_s8 + $0x48] sm:$0xff] %v3392_v47  ;;  %v3396_v27 = vmax.f32 %v3364_v63, 0.0  ;;  %v3397_v10 = vmax.f32 %v3365_v1, 0.0  ;;  %v3367_v31 = vadd.f32 %v6454_v14, %v3328_v54  ;;  %v3368_v53 = vadd.f32 %v6454_v14, %v3329_v21  ;;  %v3335_v12 = vld [vmem:[#allocation2 + $0xc0] sm:$0xff] }
 0x491   : > { %v3334_v11 = vld [vmem:[#allocation2 + $0x70] sm:$0xff]  ;;  %3425 = vst [vmem:[%s6601_s8 + $0x50] sm:$0xff] %v3393_v5  ;;  %3426 = vst [vmem:[%s6601_s8 + $0x58] sm:$0xff] %v3394_v32  ;;  %v3398_v40 = vmax.f32 %v3366_v42, 0.0  ;;  %v3369_v56 = vadd.f32 %v6454_v14, %v3330_v3  ;;  %v3370_v18 = vadd.f32 %v6454_v14, %v3331_v23  ;;  %v3371_v30 = vadd.f32 %v6454_v14, %v3332_v35  ;;  %v3336_v0 = vld [vmem:[#allocation2 + $0xa8] sm:$0xff] }
 0x492   : > { %3427 = vst [vmem:[%s6601_s8 + $0x60] sm:$0xff] %v3395_v60  ;;  %v3337_v61 = vld [vmem:[#allocation2 + $0xd0] sm:$0xff]  ;;  %3428 = vst [vmem:[%s6601_s8 + $0x68] sm:$0xff] %v3396_v27  ;;  %v3399_v39 = vmax.f32 %v3367_v31, 0.0  ;;  %v3400_v24 = vmax.f32 %v3368_v53, 0.0  ;;  %v3372_v37 = vadd.f32 %v6454_v14, %v3333_v49  ;;  %v3373_v7 = vadd.f32 %v6454_v14, %v3334_v11  ;;  %v3339_v2 = vld [vmem:[#allocation2 + $0x28] sm:$0xff] }
 0x493   : > { %3429 = vst [vmem:[%s6601_s8 + $0x70] sm:$0xff] %v3397_v10  ;;  %v3338_v13 = vld [vmem:[#allocation2 + $0x10] sm:$0xff]  ;;  %v3340_v15 = vld [vmem:[#allocation2 + $0xa0] sm:$0xff]  ;;  %3430 = vst [vmem:[%s6601_s8 + $0x78] sm:$0xff] %v3398_v40  ;;  %v3401_v16 = vmax.f32 %v3369_v56, 0.0  ;;  %v3402_v38 = vmax.f32 %v3370_v18, 0.0  ;;  %v3374_v8 = vadd.f32 %v6454_v14, %v3335_v12  ;;  %v3375_v52 = vadd.f32 %v6454_v14, %v3336_v0 }
 0x494   : > { %v3403_v51 = vmax.f32 %v3371_v30, 0.0  ;;  %v3341_v50 = vld [vmem:[#allocation2 + $0xf8] sm:$0xff]  ;;  %v3342_v57 = vld [vmem:[#allocation2 + $0x20] sm:$0xff]  ;;  %3431 = vst [vmem:[%s6601_s8 + $0x80] sm:$0xff] %v3399_v39  ;;  %3432 = vst [vmem:[%s6601_s8 + $0x88] sm:$0xff] %v3400_v24  ;;  %v3404_v36 = vmax.f32 %v3372_v37, 0.0  ;;  %v3376_v29 = vadd.f32 %v6454_v14, %v3337_v61  ;;  %v3377_v17 = vadd.f32 %v6454_v14, %v3338_v13 }
 0x495   : > { %v3405_v48 = vmax.f32 %v3373_v7, 0.0  ;;  %v3343_v55 = vld [vmem:[#allocation2 + $0x98] sm:$0xff]  ;;  %3433 = vst [vmem:[%s6601_s8 + $0x90] sm:$0xff] %v3401_v16  ;;  %3434 = vst [vmem:[%s6601_s8 + $0x98] sm:$0xff] %v3402_v38  ;;  %v3406_v62 = vmax.f32 %v3374_v8, 0.0  ;;  %v3378_v28 = vadd.f32 %v6454_v14, %v3339_v2  ;;  %v3379_v41 = vadd.f32 %v6454_v14, %v3340_v15 }
 0x496   : > { %3435 = vst [vmem:[%s6601_s8 + $0xa0] sm:$0xff] %v3403_v51  ;;  %3436 = vst [vmem:[%s6601_s8 + $0xa8] sm:$0xff] %v3404_v36  ;;  %v3407_v6 = vmax.f32 %v3375_v52, 0.0  ;;  %v3408_v33 = vmax.f32 %v3376_v29, 0.0  ;;  %v3380_v58 = vadd.f32 %v6454_v14, %v3341_v50  ;;  %v3381_v26 = vadd.f32 %v6454_v14, %v3342_v57 }
 0x497   : > { %3437 = vst [vmem:[%s6601_s8 + $0xb0] sm:$0xff] %v3405_v48  ;;  %3438 = vst [vmem:[%s6601_s8 + $0xb8] sm:$0xff] %v3406_v62  ;;  %v3409_v9 = vmax.f32 %v3377_v17, 0.0  ;;  %v3410_v4 = vmax.f32 %v3378_v28, 0.0  ;;  %v3411_v46 = vmax.f32 %v3379_v41, 0.0  ;;  %v3382_v45 = vadd.f32 %v6454_v14, %v3343_v55 }
 0x498   : > { %3439 = vst [vmem:[%s6601_s8 + $0xc0] sm:$0xff] %v3407_v6  ;;  %3440 = vst [vmem:[%s6601_s8 + $0xc8] sm:$0xff] %v3408_v33  ;;  %v3412_v22 = vmax.f32 %v3380_v58, 0.0  ;;  %v3413_v20 = vmax.f32 %v3381_v26, 0.0 }
 0x499   : > { %3441 = vst [vmem:[%s6601_s8 + $0xd0] sm:$0xff] %v3409_v9  ;;  %3442 = vst [vmem:[%s6601_s8 + $0xd8] sm:$0xff] %v3410_v4  ;;  %v3414_v14 = vmax.f32 %v3382_v45, 0.0 }
 0x49a   : > { %3443 = vst [vmem:[%s6601_s8 + $0xe0] sm:$0xff] %v3411_v46  ;;  %3444 = vst [vmem:[%s6601_s8 + $0xe8] sm:$0xff] %v3412_v22 }
 0x49b   : > { %3445 = vst [vmem:[%s6601_s8 + $0xf0] sm:$0xff] %v3413_v20  ;;  %3446 = vst [vmem:[%s6601_s8 + $0xf8] sm:$0xff] %v3414_v14 }
 0x49c PF: > { %s18_s29 = sadd.s32 1, %s4376_s29   ;;  %s6822_s27 = smov %s4372_s28 }
 0x49d   : > { %p15_p7 = scmp.ge.s32.totalorder %s18_s29, 6   ;;  %s6823_s28 = smov %s6825_s30 }
 0x49f   :  { %17 = sbr.rel (!%p15_p7) target bundleno = 2 (0x2), region = 96 }

</bundles_post_ra>
